<compile_context>
chip_gen: v7x
topology: tpu7x:2x2x1
jax: 0.10.0
libtpu: 0.0.40
codegen_flags: <defaults>
</compile_context>

<pallas_src>
import math

import numpy as np
import jax
import jax.numpy as jnp
from jax.experimental import pallas as pl
from jax.experimental.pallas import tpu as pltpu

# ---- model sizes (small, consistent with the module) ----
B = 8           # graphs per batch (batched pallas_call)
N = 16          # nodes per graph
NN = N * N      # edges in the dense graph representation
F_IN = 16       # args.n_input_feats
C = 32          # args.channels (= EGNNConv hidden size)
NOUT = 8        # decoder output size
OUT_PAD = 128   # lane-dense padded output width
ENC_LAYERS = 1  # encoder GraphConv num_layers
DEC_LAYERS = 2  # decoder EquivalentTransformer num_layers
L = ENC_LAYERS + DEC_LAYERS
LN_EPS = 1e-5


def _erf(x):
    # Float32-accurate rational approximation (A&S 7.1.26, |err| <= 1.5e-7).
    # Uses only abs/exp/mul/add/div so it lowers cleanly on the VPU/EUP.
    p = 0.3275911
    a1, a2, a3, a4, a5 = (0.254829592, -0.284496736, 1.421413741,
                          -1.453152027, 1.061405429)
    ax = jnp.abs(x)
    t = 1.0 / (1.0 + p * ax)
    poly = ((((a5 * t + a4) * t + a3) * t + a2) * t + a1) * t
    y = 1.0 - poly * jnp.exp(-(ax * ax))
    return jnp.where(x < 0.0, -y, y)


def _gelu(x):  # exact (erf-based) GELU, matching nn.GELU() default
    return 0.5 * x * (1.0 + _erf(x * 0.7071067811865476))


def _silu(x):
    return x * (1.0 / (1.0 + jnp.exp(-x)))


def _layernorm(x, g, b):
    mu = jnp.mean(x, axis=-1, keepdims=True)
    xc = x - mu
    var = jnp.mean(xc * xc, axis=-1, keepdims=True)
    return xc / jnp.sqrt(var + LN_EPS) * g + b


def model_kernel(attr_ref, xyz_ref, adj_ref, ssrc_ref, sdst_ref, ddst_ref,
                 w0_ref, b0_ref, g0_ref, be0_ref,
                 w1_ref, b1_ref, g1_ref, be1_ref,
                 We1s_ref, We1d_ref, Wer_ref, Be1_ref, We2_ref, Be2_ref,
                 Wc1_ref, Bc1_ref, Wc2r_ref,
                 Wn1h_ref, Wn1n_ref, Bn1_ref, Wn2_ref, Bn2_ref,
                 gd_ref, bd_ref, wout_ref, bout_ref,
                 out_ref):
    attr = attr_ref[0]      # (N, F_IN)
    x0 = xyz_ref[0]         # (N, 3)
    A = adj_ref[0]          # (N, N), A[src, dst]

    # Constant edge-index selectors (edge e = src*N + dst):
    #   S_src[e, j] = 1 if src(e) == j ; S_dst[e, j] = 1 if dst(e) == j ; D_dst = S_dst^T
    S_src = ssrc_ref[...]   # (NN, N)
    S_dst = sdst_ref[...]   # (NN, N)
    D_dst = ddst_ref[...]   # (N, NN)
    S_diff = S_src - S_dst

    # Adjacency in edge layout: A_flat[e] = A[src(e), dst(e)]  (MXU "gather", no reshape)
    A_flat = jnp.sum(jnp.dot(S_src, A, preferred_element_type=jnp.float32) * S_dst,
                     axis=-1, keepdims=True)                                   # (NN, 1)
    deg = jnp.maximum(jnp.dot(D_dst, A_flat, preferred_element_type=jnp.float32), 1.0)
    D_mean = D_dst / deg                                                        # (N, NN)

    # ---- encoder.initial_node_embedding: (Linear -> LN -> GELU -> Dropout[off]) x2 ----
    h = _gelu(_layernorm(
        jnp.dot(attr, w0_ref[...], preferred_element_type=jnp.float32) + b0_ref[...],
        g0_ref[...], be0_ref[...]))
    h = _gelu(_layernorm(
        jnp.dot(h, w1_ref[...], preferred_element_type=jnp.float32) + b1_ref[...],
        g1_ref[...], be1_ref[...]))

    def egnn(l, h, x):
        # edge geometry: x_diff[e] = x[src(e)] - x[dst(e)]  (single selector matmul)
        x_diff = jnp.dot(S_diff, x, preferred_element_type=jnp.float32)        # (NN, 3)
        radial = jnp.sum(x_diff * x_diff, axis=-1, keepdims=True)              # (NN, 1)
        x_dn = x_diff / (jnp.sqrt(radial) + 1e-30)                             # normalized

        # edge_mlp lin1 over [h_src | h_dst | radial]
        hs = jnp.dot(h, We1s_ref[l], preferred_element_type=jnp.float32)       # (N, C)
        hd = jnp.dot(h, We1d_ref[l], preferred_element_type=jnp.float32)       # (N, C)
        pre = (jnp.dot(S_src, hs, preferred_element_type=jnp.float32)
               + jnp.dot(S_dst, hd, preferred_element_type=jnp.float32)
               + radial * Wer_ref[l] + Be1_ref[l])                             # (NN, C)
        m = _silu(pre)
        m = _silu(jnp.dot(m, We2_ref[l], preferred_element_type=jnp.float32)
                  + Be2_ref[l])                                                # msg_h

        # coord_mlp: final 1-wide Linear done as VPU multiply + lane reduction
        cmid = _silu(jnp.dot(m, Wc1_ref[l], preferred_element_type=jnp.float32)
                     + Bc1_ref[l])
        s = jnp.sum(cmid * Wc2r_ref[l], axis=-1, keepdims=True)                # (NN, 1)

        # aggregation at dst nodes: mask once, then MXU matmuls (sum for h, mean for x)
        h_neigh = jnp.dot(D_dst, A_flat * m, preferred_element_type=jnp.float32)        # (N, C)
        x_neigh = jnp.dot(D_mean, (A_flat * s) * x_dn, preferred_element_type=jnp.float32)  # (N, 3)

        # node_mlp on [h, h_neigh] (split weights -> no lane concat needed)
        n1 = _silu(jnp.dot(h, Wn1h_ref[l], preferred_element_type=jnp.float32)
                   + jnp.dot(h_neigh, Wn1n_ref[l], preferred_element_type=jnp.float32)
                   + Bn1_ref[l])
        h_new = jnp.dot(n1, Wn2_ref[l], preferred_element_type=jnp.float32) + Bn2_ref[l]
        return h_new, x + x_neigh

    # ---- encoder.graph_conv: coordinate updates discarded, coords stay xyz ----
    for l in range(ENC_LAYERS):
        h, _ = egnn(l, h, x0)

    # ---- decoder EquivalentTransformer: coords restart from xyz, GELU + shared LN ----
    xd = x0
    for l in range(ENC_LAYERS, L):
        h, xd = egnn(l, h, xd)
        h = _layernorm(_gelu(h), gd_ref[...], bd_ref[...])

    # ---- egnn_out_layer (lane-dense padded store; wrapper slices to NOUT) ----
    out_ref[0] = (jnp.dot(h, wout_ref[...], preferred_element_type=jnp.float32)
                  + bout_ref[...])


# ---------------- parameter init (deterministic, PyTorch-style uniform) ----------------
def _uniform(key, shape, fan_in):
    bound = 1.0 / math.sqrt(fan_in)
    return jax.random.uniform(key, shape, jnp.float32, -bound, bound)


def init_params(key):
    ks = iter(jax.random.split(key, 64))
    p = {}
    # initial_node_embedding
    p["w0"] = _uniform(next(ks), (F_IN, C), F_IN)
    p["b0"] = _uniform(next(ks), (1, C), F_IN)
    p["g0"] = jnp.ones((1, C), jnp.float32)
    p["be0"] = jnp.zeros((1, C), jnp.float32)
    p["w1"] = _uniform(next(ks), (C, C), C)
    p["b1"] = _uniform(next(ks), (1, C), C)
    p["g1"] = jnp.ones((1, C), jnp.float32)
    p["be1"] = jnp.zeros((1, C), jnp.float32)
    # stacked EGNNConv params (layer 0 = encoder GraphConv, layers 1..2 = decoder)
    fe = 2 * C + 1
    p["We1s"] = _uniform(next(ks), (L, C, C), fe)     # edge_mlp lin1, src rows
    p["We1d"] = _uniform(next(ks), (L, C, C), fe)     # edge_mlp lin1, dst rows
    p["Wer"] = _uniform(next(ks), (L, 1, C), fe)      # edge_mlp lin1, radial row
    p["Be1"] = _uniform(next(ks), (L, 1, C), fe)
    p["We2"] = _uniform(next(ks), (L, C, C), C)
    p["Be2"] = _uniform(next(ks), (L, 1, C), C)
    p["Wc1"] = _uniform(next(ks), (L, C, C), C)
    p["Bc1"] = _uniform(next(ks), (L, 1, C), C)
    p["Wc2r"] = _uniform(next(ks), (L, 1, C), C)      # coord_mlp final (no bias), row form
    p["Wn1h"] = _uniform(next(ks), (L, C, C), 2 * C)  # node_mlp lin1, h rows
    p["Wn1n"] = _uniform(next(ks), (L, C, C), 2 * C)  # node_mlp lin1, h_neigh rows
    p["Bn1"] = _uniform(next(ks), (L, 1, C), 2 * C)
    p["Wn2"] = _uniform(next(ks), (L, C, C), C)
    p["Bn2"] = _uniform(next(ks), (L, 1, C), C)
    # decoder shared LayerNorm + output head (zero-padded to lane-dense width)
    p["gd"] = jnp.ones((1, C), jnp.float32)
    p["bd"] = jnp.zeros((1, C), jnp.float32)
    wout = _uniform(next(ks), (C, NOUT), C)
    bout = _uniform(next(ks), (1, NOUT), C)
    p["wout_p"] = jnp.zeros((C, OUT_PAD), jnp.float32).at[:, :NOUT].set(wout)
    p["bout_p"] = jnp.zeros((1, OUT_PAD), jnp.float32).at[:, :NOUT].set(bout)
    return p


def _selectors():
    # Constant edge-index selectors for the dense N*N edge enumeration e = src*N + dst.
    e = np.arange(NN)
    src, dst = e // N, e % N
    s_src = (src[:, None] == np.arange(N)[None, :]).astype(np.float32)   # (NN, N)
    s_dst = (dst[:, None] == np.arange(N)[None, :]).astype(np.float32)   # (NN, N)
    d_dst = np.ascontiguousarray(s_dst.T)                                # (N, NN)
    return jnp.asarray(s_src), jnp.asarray(s_dst), jnp.asarray(d_dst)


def _wspec(shape):
    # full-array block, constant index_map -> stays VMEM-resident across the grid
    nd = len(shape)
    return pl.BlockSpec(shape, lambda b, _z=(0,) * nd: _z)


def my_model_forward(attr, xyz, adj, p):
    batch = attr.shape[0]
    s_src, s_dst, d_dst = _selectors()
    weights = (p["w0"], p["b0"], p["g0"], p["be0"],
               p["w1"], p["b1"], p["g1"], p["be1"],
               p["We1s"], p["We1d"], p["Wer"], p["Be1"], p["We2"], p["Be2"],
               p["Wc1"], p["Bc1"], p["Wc2r"],
               p["Wn1h"], p["Wn1n"], p["Bn1"], p["Wn2"], p["Bn2"],
               p["gd"], p["bd"], p["wout_p"], p["bout_p"])

    in_specs = [pl.BlockSpec((1, N, F_IN), lambda b: (b, 0, 0)),
                pl.BlockSpec((1, N, 3), lambda b: (b, 0, 0)),
                pl.BlockSpec((1, N, N), lambda b: (b, 0, 0)),
                _wspec(s_src.shape), _wspec(s_dst.shape), _wspec(d_dst.shape)]
    in_specs += [_wspec(w.shape) for w in weights]

    out = pl.pallas_call(
        model_kernel,
        out_shape=jax.ShapeDtypeStruct((batch, N, OUT_PAD), jnp.float32),
        grid=(batch,),
        in_specs=in_specs,
        out_specs=pl.BlockSpec((1, N, OUT_PAD), lambda b: (b, 0, 0)),
        compiler_params=pltpu.CompilerParams(dimension_semantics=("parallel",)),
    )(attr, xyz, adj, s_src, s_dst, d_dst, *weights)
    return out[:, :, :NOUT]


if __name__ == "__main__":
    key = jax.random.PRNGKey(0)
    k_attr, k_xyz, k_param = jax.random.split(key, 3)

    # Batch of graphs: G.ndata['attr'], G.ndata['xyz']; dense adjacency = fully connected,
    # no self loops (same topology for every batch element here).
    attr = jax.random.normal(k_attr, (B, N, F_IN), jnp.float32)
    xyz = jax.random.normal(k_xyz, (B, N, 3), jnp.float32)
    adj_one = jnp.ones((N, N), jnp.float32) - jnp.eye(N, dtype=jnp.float32)
    adj = jnp.tile(adj_one[None], (B, 1, 1))
    # TODO(synk): G.edata['attr'] (edge features) and the dropout branches are unused
    # because all EGNNConv layers use edge_feat_size=0 and do_dropout=False (inference).

    params = init_params(k_param)
    pred = my_model_forward(attr, xyz, adj, params)
    jax.block_until_ready(pred)
    assert pred.shape == (B, N, NOUT)
    print("KERNEL_OK")
</pallas_src>

<mosaic_0001>
module attributes {stable_mosaic.version = 11 : i64} {
  func.func @model_kernel(%arg0: i32, %arg1: memref<1x16x16xf32, #tpu.memory_space<vmem>>, %arg2: memref<1x16x3xf32, #tpu.memory_space<vmem>>, %arg3: memref<1x16x16xf32, #tpu.memory_space<vmem>>, %arg4: memref<256x16xf32, #tpu.memory_space<vmem>>, %arg5: memref<256x16xf32, #tpu.memory_space<vmem>>, %arg6: memref<16x256xf32, #tpu.memory_space<vmem>>, %arg7: memref<16x32xf32, #tpu.memory_space<vmem>>, %arg8: memref<1x32xf32, #tpu.memory_space<vmem>>, %arg9: memref<1x32xf32, #tpu.memory_space<vmem>>, %arg10: memref<1x32xf32, #tpu.memory_space<vmem>>, %arg11: memref<32x32xf32, #tpu.memory_space<vmem>>, %arg12: memref<1x32xf32, #tpu.memory_space<vmem>>, %arg13: memref<1x32xf32, #tpu.memory_space<vmem>>, %arg14: memref<1x32xf32, #tpu.memory_space<vmem>>, %arg15: memref<3x32x32xf32, #tpu.memory_space<vmem>>, %arg16: memref<3x32x32xf32, #tpu.memory_space<vmem>>, %arg17: memref<3x1x32xf32, #tpu.memory_space<vmem>>, %arg18: memref<3x1x32xf32, #tpu.memory_space<vmem>>, %arg19: memref<3x32x32xf32, #tpu.memory_space<vmem>>, %arg20: memref<3x1x32xf32, #tpu.memory_space<vmem>>, %arg21: memref<3x32x32xf32, #tpu.memory_space<vmem>>, %arg22: memref<3x1x32xf32, #tpu.memory_space<vmem>>, %arg23: memref<3x1x32xf32, #tpu.memory_space<vmem>>, %arg24: memref<3x32x32xf32, #tpu.memory_space<vmem>>, %arg25: memref<3x32x32xf32, #tpu.memory_space<vmem>>, %arg26: memref<3x1x32xf32, #tpu.memory_space<vmem>>, %arg27: memref<3x32x32xf32, #tpu.memory_space<vmem>>, %arg28: memref<3x1x32xf32, #tpu.memory_space<vmem>>, %arg29: memref<1x32xf32, #tpu.memory_space<vmem>>, %arg30: memref<1x32xf32, #tpu.memory_space<vmem>>, %arg31: memref<32x128xf32, #tpu.memory_space<vmem>>, %arg32: memref<1x128xf32, #tpu.memory_space<vmem>>, %arg33: memref<1x16x128xf32, #tpu.memory_space<vmem>>) attributes {dimension_semantics = [#tpu.dimension_semantics<parallel>], iteration_bounds = array<i64: 8>, scalar_prefetch = 0 : i64, scratch_operands = 0 : i64, tpu.core_type = #tpu.core_type<tc>, window_params = [{transform_indices = @transform_0, window_bounds = array<i64: 1, 16, 16>}, {transform_indices = @transform_1, window_bounds = array<i64: 1, 16, 3>}, {transform_indices = @transform_2, window_bounds = array<i64: 1, 16, 16>}, {pipeline_mode = #tpu.pipeline_mode<synchronous>, transform_indices = @transform_3, window_bounds = array<i64: 256, 16>}, {pipeline_mode = #tpu.pipeline_mode<synchronous>, transform_indices = @transform_4, window_bounds = array<i64: 256, 16>}, {pipeline_mode = #tpu.pipeline_mode<synchronous>, transform_indices = @transform_5, window_bounds = array<i64: 16, 256>}, {pipeline_mode = #tpu.pipeline_mode<synchronous>, transform_indices = @transform_6, window_bounds = array<i64: 16, 32>}, {pipeline_mode = #tpu.pipeline_mode<synchronous>, transform_indices = @transform_7, window_bounds = array<i64: 1, 32>}, {pipeline_mode = #tpu.pipeline_mode<synchronous>, transform_indices = @transform_8, window_bounds = array<i64: 1, 32>}, {pipeline_mode = #tpu.pipeline_mode<synchronous>, transform_indices = @transform_9, window_bounds = array<i64: 1, 32>}, {pipeline_mode = #tpu.pipeline_mode<synchronous>, transform_indices = @transform_10, window_bounds = array<i64: 32, 32>}, {pipeline_mode = #tpu.pipeline_mode<synchronous>, transform_indices = @transform_11, window_bounds = array<i64: 1, 32>}, {pipeline_mode = #tpu.pipeline_mode<synchronous>, transform_indices = @transform_12, window_bounds = array<i64: 1, 32>}, {pipeline_mode = #tpu.pipeline_mode<synchronous>, transform_indices = @transform_13, window_bounds = array<i64: 1, 32>}, {pipeline_mode = #tpu.pipeline_mode<synchronous>, transform_indices = @transform_14, window_bounds = array<i64: 3, 32, 32>}, {pipeline_mode = #tpu.pipeline_mode<synchronous>, transform_indices = @transform_15, window_bounds = array<i64: 3, 32, 32>}, {pipeline_mode = #tpu.pipeline_mode<synchronous>, transform_indices = @transform_16, window_bounds = array<i64: 3, 1, 32>}, {pipeline_mode = #tpu.pipeline_mode<synchronous>, transform_indices = @transform_17, window_bounds = array<i64: 3, 1, 32>}, {pipeline_mode = #tpu.pipeline_mode<synchronous>, transform_indices = @transform_18, window_bounds = array<i64: 3, 32, 32>}, {pipeline_mode = #tpu.pipeline_mode<synchronous>, transform_indices = @transform_19, window_bounds = array<i64: 3, 1, 32>}, {pipeline_mode = #tpu.pipeline_mode<synchronous>, transform_indices = @transform_20, window_bounds = array<i64: 3, 32, 32>}, {pipeline_mode = #tpu.pipeline_mode<synchronous>, transform_indices = @transform_21, window_bounds = array<i64: 3, 1, 32>}, {pipeline_mode = #tpu.pipeline_mode<synchronous>, transform_indices = @transform_22, window_bounds = array<i64: 3, 1, 32>}, {pipeline_mode = #tpu.pipeline_mode<synchronous>, transform_indices = @transform_23, window_bounds = array<i64: 3, 32, 32>}, {pipeline_mode = #tpu.pipeline_mode<synchronous>, transform_indices = @transform_24, window_bounds = array<i64: 3, 32, 32>}, {pipeline_mode = #tpu.pipeline_mode<synchronous>, transform_indices = @transform_25, window_bounds = array<i64: 3, 1, 32>}, {pipeline_mode = #tpu.pipeline_mode<synchronous>, transform_indices = @transform_26, window_bounds = array<i64: 3, 32, 32>}, {pipeline_mode = #tpu.pipeline_mode<synchronous>, transform_indices = @transform_27, window_bounds = array<i64: 3, 1, 32>}, {pipeline_mode = #tpu.pipeline_mode<synchronous>, transform_indices = @transform_28, window_bounds = array<i64: 1, 32>}, {pipeline_mode = #tpu.pipeline_mode<synchronous>, transform_indices = @transform_29, window_bounds = array<i64: 1, 32>}, {pipeline_mode = #tpu.pipeline_mode<synchronous>, transform_indices = @transform_30, window_bounds = array<i64: 32, 128>}, {pipeline_mode = #tpu.pipeline_mode<synchronous>, transform_indices = @transform_31, window_bounds = array<i64: 1, 128>}, {transform_indices = @transform_32, window_bounds = array<i64: 1, 16, 128>}]} {
    %c0 = arith.constant 0 : index
    %c0_0 = arith.constant 0 : index
    %c0_1 = arith.constant 0 : index
    %0 = vector.load %arg1[%c0, %c0_0, %c0_1] : memref<1x16x16xf32, #tpu.memory_space<vmem>>, vector<1x16x16xf32>
    %1 = vector.shape_cast %0 : vector<1x16x16xf32> to vector<16x16xf32>
    %c0_2 = arith.constant 0 : index
    %c0_3 = arith.constant 0 : index
    %c0_4 = arith.constant 0 : index
    %2 = vector.load %arg2[%c0_2, %c0_3, %c0_4] : memref<1x16x3xf32, #tpu.memory_space<vmem>>, vector<1x16x3xf32>
    %3 = vector.shape_cast %2 : vector<1x16x3xf32> to vector<16x3xf32>
    %c0_5 = arith.constant 0 : index
    %c0_6 = arith.constant 0 : index
    %c0_7 = arith.constant 0 : index
    %4 = vector.load %arg3[%c0_5, %c0_6, %c0_7] : memref<1x16x16xf32, #tpu.memory_space<vmem>>, vector<1x16x16xf32>
    %5 = vector.shape_cast %4 : vector<1x16x16xf32> to vector<16x16xf32>
    %c0_8 = arith.constant 0 : index
    %c0_9 = arith.constant 0 : index
    %6 = vector.load %arg4[%c0_8, %c0_9] : memref<256x16xf32, #tpu.memory_space<vmem>>, vector<256x16xf32>
    %c0_10 = arith.constant 0 : index
    %c0_11 = arith.constant 0 : index
    %7 = vector.load %arg5[%c0_10, %c0_11] : memref<256x16xf32, #tpu.memory_space<vmem>>, vector<256x16xf32>
    %c0_12 = arith.constant 0 : index
    %c0_13 = arith.constant 0 : index
    %8 = vector.load %arg6[%c0_12, %c0_13] : memref<16x256xf32, #tpu.memory_space<vmem>>, vector<16x256xf32>
    %9 = arith.subf %6, %7 : vector<256x16xf32>
    %cst = arith.constant dense<0.000000e+00> : vector<256x16xf32>
    %10 = tpu.matmul %6, %5, %cst {dimension_numbers = #tpu.dot_dimension_numbers<[1], [0], [0], [1], [0, 0, 1, 1], [], []>} : vector<256x16xf32>, vector<16x16xf32>, vector<256x16xf32> -> vector<256x16xf32>
    %11 = arith.mulf %10, %7 : vector<256x16xf32>
    %cst_14 = arith.constant dense<0.000000e+00> : vector<256xf32>
    %12 = vector.multi_reduction <add>, %11, %cst_14 [1] : vector<256x16xf32> to vector<256xf32>
    %13 = vector.shape_cast %12 : vector<256xf32> to vector<256x1xf32>
    %cst_15 = arith.constant dense<0.000000e+00> : vector<16x1xf32>
    %14 = tpu.matmul %8, %13, %cst_15 {dimension_numbers = #tpu.dot_dimension_numbers<[1], [0], [0], [1], [0, 0, 1, 1], [], []>} : vector<16x256xf32>, vector<256x1xf32>, vector<16x1xf32> -> vector<16x1xf32>
    %cst_16 = arith.constant 1.000000e+00 : f32
    %15 = vector.broadcast %cst_16 : f32 to vector<16x1xf32>
    %16 = arith.maximumf %14, %15 : vector<16x1xf32>
    %17 = vector.broadcast %16 : vector<16x1xf32> to vector<16x256xf32>
    %18 = arith.divf %8, %17 : vector<16x256xf32>
    %c0_17 = arith.constant 0 : index
    %c0_18 = arith.constant 0 : index
    %19 = vector.load %arg7[%c0_17, %c0_18] : memref<16x32xf32, #tpu.memory_space<vmem>>, vector<16x32xf32>
    %cst_19 = arith.constant dense<0.000000e+00> : vector<16x32xf32>
    %20 = tpu.matmul %1, %19, %cst_19 {dimension_numbers = #tpu.dot_dimension_numbers<[1], [0], [0], [1], [0, 0, 1, 1], [], []>} : vector<16x16xf32>, vector<16x32xf32>, vector<16x32xf32> -> vector<16x32xf32>
    %c0_20 = arith.constant 0 : index
    %c0_21 = arith.constant 0 : index
    %21 = vector.load %arg8[%c0_20, %c0_21] : memref<1x32xf32, #tpu.memory_space<vmem>>, vector<1x32xf32>
    %22 = vector.broadcast %21 : vector<1x32xf32> to vector<16x32xf32>
    %23 = arith.addf %20, %22 : vector<16x32xf32>
    %c0_22 = arith.constant 0 : index
    %c0_23 = arith.constant 0 : index
    %24 = vector.load %arg9[%c0_22, %c0_23] : memref<1x32xf32, #tpu.memory_space<vmem>>, vector<1x32xf32>
    %c0_24 = arith.constant 0 : index
    %c0_25 = arith.constant 0 : index
    %25 = vector.load %arg10[%c0_24, %c0_25] : memref<1x32xf32, #tpu.memory_space<vmem>>, vector<1x32xf32>
    %cst_26 = arith.constant dense<0.000000e+00> : vector<16xf32>
    %26 = vector.multi_reduction <add>, %23, %cst_26 [1] : vector<16x32xf32> to vector<16xf32>
    %27 = vector.shape_cast %26 : vector<16xf32> to vector<16x1xf32>
    %cst_27 = arith.constant 3.200000e+01 : f32
    %28 = vector.broadcast %cst_27 : f32 to vector<16x1xf32>
    %29 = arith.divf %27, %28 : vector<16x1xf32>
    %30 = vector.broadcast %29 : vector<16x1xf32> to vector<16x32xf32>
    %31 = arith.subf %23, %30 : vector<16x32xf32>
    %32 = arith.mulf %31, %31 : vector<16x32xf32>
    %cst_28 = arith.constant dense<0.000000e+00> : vector<16xf32>
    %33 = vector.multi_reduction <add>, %32, %cst_28 [1] : vector<16x32xf32> to vector<16xf32>
    %34 = vector.shape_cast %33 : vector<16xf32> to vector<16x1xf32>
    %cst_29 = arith.constant 3.200000e+01 : f32
    %35 = vector.broadcast %cst_29 : f32 to vector<16x1xf32>
    %36 = arith.divf %34, %35 : vector<16x1xf32>
    %cst_30 = arith.constant 9.99999974E-6 : f32
    %37 = vector.broadcast %cst_30 : f32 to vector<16x1xf32>
    %38 = arith.addf %36, %37 : vector<16x1xf32>
    %39 = math.sqrt %38 : vector<16x1xf32>
    %40 = vector.broadcast %39 : vector<16x1xf32> to vector<16x32xf32>
    %41 = arith.divf %31, %40 : vector<16x32xf32>
    %42 = vector.broadcast %24 : vector<1x32xf32> to vector<16x32xf32>
    %43 = arith.mulf %41, %42 : vector<16x32xf32>
    %44 = vector.broadcast %25 : vector<1x32xf32> to vector<16x32xf32>
    %45 = arith.addf %43, %44 : vector<16x32xf32>
    %cst_31 = arith.constant 5.000000e-01 : f32
    %46 = vector.broadcast %cst_31 : f32 to vector<16x32xf32>
    %47 = arith.mulf %46, %45 : vector<16x32xf32>
    %cst_32 = arith.constant 0.707106769 : f32
    %48 = vector.broadcast %cst_32 : f32 to vector<16x32xf32>
    %49 = arith.mulf %45, %48 : vector<16x32xf32>
    %50 = math.absf %49 : vector<16x32xf32>
    %cst_33 = arith.constant 0.327591091 : f32
    %51 = vector.broadcast %cst_33 : f32 to vector<16x32xf32>
    %52 = arith.mulf %51, %50 : vector<16x32xf32>
    %cst_34 = arith.constant 1.000000e+00 : f32
    %53 = vector.broadcast %cst_34 : f32 to vector<16x32xf32>
    %54 = arith.addf %53, %52 : vector<16x32xf32>
    %cst_35 = arith.constant 1.000000e+00 : f32
    %55 = vector.broadcast %cst_35 : f32 to vector<16x32xf32>
    %56 = arith.divf %55, %54 : vector<16x32xf32>
    %cst_36 = arith.constant 1.06140542 : f32
    %57 = vector.broadcast %cst_36 : f32 to vector<16x32xf32>
    %58 = arith.mulf %57, %56 : vector<16x32xf32>
    %cst_37 = arith.constant -1.45315206 : f32
    %59 = vector.broadcast %cst_37 : f32 to vector<16x32xf32>
    %60 = arith.addf %58, %59 : vector<16x32xf32>
    %61 = arith.mulf %60, %56 : vector<16x32xf32>
    %cst_38 = arith.constant 1.42141378 : f32
    %62 = vector.broadcast %cst_38 : f32 to vector<16x32xf32>
    %63 = arith.addf %61, %62 : vector<16x32xf32>
    %64 = arith.mulf %63, %56 : vector<16x32xf32>
    %cst_39 = arith.constant -0.284496725 : f32
    %65 = vector.broadcast %cst_39 : f32 to vector<16x32xf32>
    %66 = arith.addf %64, %65 : vector<16x32xf32>
    %67 = arith.mulf %66, %56 : vector<16x32xf32>
    %cst_40 = arith.constant 0.254829586 : f32
    %68 = vector.broadcast %cst_40 : f32 to vector<16x32xf32>
    %69 = arith.addf %67, %68 : vector<16x32xf32>
    %70 = arith.mulf %69, %56 : vector<16x32xf32>
    %71 = arith.mulf %50, %50 : vector<16x32xf32>
    %cst_41 = arith.constant 0.000000e+00 : f32
    %72 = vector.broadcast %cst_41 : f32 to vector<16x32xf32>
    %73 = arith.subf %72, %71 : vector<16x32xf32>
    %74 = math.exp %73 : vector<16x32xf32>
    %75 = arith.mulf %70, %74 : vector<16x32xf32>
    %cst_42 = arith.constant 1.000000e+00 : f32
    %76 = vector.broadcast %cst_42 : f32 to vector<16x32xf32>
    %77 = arith.subf %76, %75 : vector<16x32xf32>
    %cst_43 = arith.constant 0.000000e+00 : f32
    %78 = vector.broadcast %cst_43 : f32 to vector<16x32xf32>
    %79 = arith.cmpf olt, %49, %78 : vector<16x32xf32>
    %cst_44 = arith.constant 0.000000e+00 : f32
    %80 = vector.broadcast %cst_44 : f32 to vector<16x32xf32>
    %81 = arith.subf %80, %77 : vector<16x32xf32>
    %82 = arith.select %79, %81, %77 : vector<16x32xi1>, vector<16x32xf32>
    %cst_45 = arith.constant 1.000000e+00 : f32
    %83 = vector.broadcast %cst_45 : f32 to vector<16x32xf32>
    %84 = arith.addf %83, %82 : vector<16x32xf32>
    %85 = arith.mulf %47, %84 : vector<16x32xf32>
    %c0_46 = arith.constant 0 : index
    %c0_47 = arith.constant 0 : index
    %86 = vector.load %arg11[%c0_46, %c0_47] : memref<32x32xf32, #tpu.memory_space<vmem>>, vector<32x32xf32>
    %cst_48 = arith.constant dense<0.000000e+00> : vector<16x32xf32>
    %87 = tpu.matmul %85, %86, %cst_48 {dimension_numbers = #tpu.dot_dimension_numbers<[1], [0], [0], [1], [0, 0, 1, 1], [], []>} : vector<16x32xf32>, vector<32x32xf32>, vector<16x32xf32> -> vector<16x32xf32>
    %c0_49 = arith.constant 0 : index
    %c0_50 = arith.constant 0 : index
    %88 = vector.load %arg12[%c0_49, %c0_50] : memref<1x32xf32, #tpu.memory_space<vmem>>, vector<1x32xf32>
    %89 = vector.broadcast %88 : vector<1x32xf32> to vector<16x32xf32>
    %90 = arith.addf %87, %89 : vector<16x32xf32>
    %c0_51 = arith.constant 0 : index
    %c0_52 = arith.constant 0 : index
    %91 = vector.load %arg13[%c0_51, %c0_52] : memref<1x32xf32, #tpu.memory_space<vmem>>, vector<1x32xf32>
    %c0_53 = arith.constant 0 : index
    %c0_54 = arith.constant 0 : index
    %92 = vector.load %arg14[%c0_53, %c0_54] : memref<1x32xf32, #tpu.memory_space<vmem>>, vector<1x32xf32>
    %cst_55 = arith.constant dense<0.000000e+00> : vector<16xf32>
    %93 = vector.multi_reduction <add>, %90, %cst_55 [1] : vector<16x32xf32> to vector<16xf32>
    %94 = vector.shape_cast %93 : vector<16xf32> to vector<16x1xf32>
    %cst_56 = arith.constant 3.200000e+01 : f32
    %95 = vector.broadcast %cst_56 : f32 to vector<16x1xf32>
    %96 = arith.divf %94, %95 : vector<16x1xf32>
    %97 = vector.broadcast %96 : vector<16x1xf32> to vector<16x32xf32>
    %98 = arith.subf %90, %97 : vector<16x32xf32>
    %99 = arith.mulf %98, %98 : vector<16x32xf32>
    %cst_57 = arith.constant dense<0.000000e+00> : vector<16xf32>
    %100 = vector.multi_reduction <add>, %99, %cst_57 [1] : vector<16x32xf32> to vector<16xf32>
    %101 = vector.shape_cast %100 : vector<16xf32> to vector<16x1xf32>
    %cst_58 = arith.constant 3.200000e+01 : f32
    %102 = vector.broadcast %cst_58 : f32 to vector<16x1xf32>
    %103 = arith.divf %101, %102 : vector<16x1xf32>
    %cst_59 = arith.constant 9.99999974E-6 : f32
    %104 = vector.broadcast %cst_59 : f32 to vector<16x1xf32>
    %105 = arith.addf %103, %104 : vector<16x1xf32>
    %106 = math.sqrt %105 : vector<16x1xf32>
    %107 = vector.broadcast %106 : vector<16x1xf32> to vector<16x32xf32>
    %108 = arith.divf %98, %107 : vector<16x32xf32>
    %109 = vector.broadcast %91 : vector<1x32xf32> to vector<16x32xf32>
    %110 = arith.mulf %108, %109 : vector<16x32xf32>
    %111 = vector.broadcast %92 : vector<1x32xf32> to vector<16x32xf32>
    %112 = arith.addf %110, %111 : vector<16x32xf32>
    %cst_60 = arith.constant 5.000000e-01 : f32
    %113 = vector.broadcast %cst_60 : f32 to vector<16x32xf32>
    %114 = arith.mulf %113, %112 : vector<16x32xf32>
    %cst_61 = arith.constant 0.707106769 : f32
    %115 = vector.broadcast %cst_61 : f32 to vector<16x32xf32>
    %116 = arith.mulf %112, %115 : vector<16x32xf32>
    %117 = math.absf %116 : vector<16x32xf32>
    %cst_62 = arith.constant 0.327591091 : f32
    %118 = vector.broadcast %cst_62 : f32 to vector<16x32xf32>
    %119 = arith.mulf %118, %117 : vector<16x32xf32>
    %cst_63 = arith.constant 1.000000e+00 : f32
    %120 = vector.broadcast %cst_63 : f32 to vector<16x32xf32>
    %121 = arith.addf %120, %119 : vector<16x32xf32>
    %cst_64 = arith.constant 1.000000e+00 : f32
    %122 = vector.broadcast %cst_64 : f32 to vector<16x32xf32>
    %123 = arith.divf %122, %121 : vector<16x32xf32>
    %cst_65 = arith.constant 1.06140542 : f32
    %124 = vector.broadcast %cst_65 : f32 to vector<16x32xf32>
    %125 = arith.mulf %124, %123 : vector<16x32xf32>
    %cst_66 = arith.constant -1.45315206 : f32
    %126 = vector.broadcast %cst_66 : f32 to vector<16x32xf32>
    %127 = arith.addf %125, %126 : vector<16x32xf32>
    %128 = arith.mulf %127, %123 : vector<16x32xf32>
    %cst_67 = arith.constant 1.42141378 : f32
    %129 = vector.broadcast %cst_67 : f32 to vector<16x32xf32>
    %130 = arith.addf %128, %129 : vector<16x32xf32>
    %131 = arith.mulf %130, %123 : vector<16x32xf32>
    %cst_68 = arith.constant -0.284496725 : f32
    %132 = vector.broadcast %cst_68 : f32 to vector<16x32xf32>
    %133 = arith.addf %131, %132 : vector<16x32xf32>
    %134 = arith.mulf %133, %123 : vector<16x32xf32>
    %cst_69 = arith.constant 0.254829586 : f32
    %135 = vector.broadcast %cst_69 : f32 to vector<16x32xf32>
    %136 = arith.addf %134, %135 : vector<16x32xf32>
    %137 = arith.mulf %136, %123 : vector<16x32xf32>
    %138 = arith.mulf %117, %117 : vector<16x32xf32>
    %cst_70 = arith.constant 0.000000e+00 : f32
    %139 = vector.broadcast %cst_70 : f32 to vector<16x32xf32>
    %140 = arith.subf %139, %138 : vector<16x32xf32>
    %141 = math.exp %140 : vector<16x32xf32>
    %142 = arith.mulf %137, %141 : vector<16x32xf32>
    %cst_71 = arith.constant 1.000000e+00 : f32
    %143 = vector.broadcast %cst_71 : f32 to vector<16x32xf32>
    %144 = arith.subf %143, %142 : vector<16x32xf32>
    %cst_72 = arith.constant 0.000000e+00 : f32
    %145 = vector.broadcast %cst_72 : f32 to vector<16x32xf32>
    %146 = arith.cmpf olt, %116, %145 : vector<16x32xf32>
    %cst_73 = arith.constant 0.000000e+00 : f32
    %147 = vector.broadcast %cst_73 : f32 to vector<16x32xf32>
    %148 = arith.subf %147, %144 : vector<16x32xf32>
    %149 = arith.select %146, %148, %144 : vector<16x32xi1>, vector<16x32xf32>
    %cst_74 = arith.constant 1.000000e+00 : f32
    %150 = vector.broadcast %cst_74 : f32 to vector<16x32xf32>
    %151 = arith.addf %150, %149 : vector<16x32xf32>
    %152 = arith.mulf %114, %151 : vector<16x32xf32>
    %cst_75 = arith.constant dense<0.000000e+00> : vector<256x3xf32>
    %153 = tpu.matmul %9, %3, %cst_75 {dimension_numbers = #tpu.dot_dimension_numbers<[1], [0], [0], [1], [0, 0, 1, 1], [], []>} : vector<256x16xf32>, vector<16x3xf32>, vector<256x3xf32> -> vector<256x3xf32>
    %154 = arith.mulf %153, %153 : vector<256x3xf32>
    %cst_76 = arith.constant dense<0.000000e+00> : vector<256xf32>
    %155 = vector.multi_reduction <add>, %154, %cst_76 [1] : vector<256x3xf32> to vector<256xf32>
    %156 = vector.shape_cast %155 : vector<256xf32> to vector<256x1xf32>
    %c0_77 = arith.constant 0 : index
    %c0_78 = arith.constant 0 : index
    %c0_79 = arith.constant 0 : index
    %157 = vector.load %arg15[%c0_77, %c0_78, %c0_79] : memref<3x32x32xf32, #tpu.memory_space<vmem>>, vector<1x32x32xf32>
    %158 = vector.shape_cast %157 : vector<1x32x32xf32> to vector<32x32xf32>
    %cst_80 = arith.constant dense<0.000000e+00> : vector<16x32xf32>
    %159 = tpu.matmul %152, %158, %cst_80 {dimension_numbers = #tpu.dot_dimension_numbers<[1], [0], [0], [1], [0, 0, 1, 1], [], []>} : vector<16x32xf32>, vector<32x32xf32>, vector<16x32xf32> -> vector<16x32xf32>
    %c0_81 = arith.constant 0 : index
    %c0_82 = arith.constant 0 : index
    %c0_83 = arith.constant 0 : index
    %160 = vector.load %arg16[%c0_81, %c0_82, %c0_83] : memref<3x32x32xf32, #tpu.memory_space<vmem>>, vector<1x32x32xf32>
    %161 = vector.shape_cast %160 : vector<1x32x32xf32> to vector<32x32xf32>
    %cst_84 = arith.constant dense<0.000000e+00> : vector<16x32xf32>
    %162 = tpu.matmul %152, %161, %cst_84 {dimension_numbers = #tpu.dot_dimension_numbers<[1], [0], [0], [1], [0, 0, 1, 1], [], []>} : vector<16x32xf32>, vector<32x32xf32>, vector<16x32xf32> -> vector<16x32xf32>
    %cst_85 = arith.constant dense<0.000000e+00> : vector<256x32xf32>
    %163 = tpu.matmul %6, %159, %cst_85 {dimension_numbers = #tpu.dot_dimension_numbers<[1], [0], [0], [1], [0, 0, 1, 1], [], []>} : vector<256x16xf32>, vector<16x32xf32>, vector<256x32xf32> -> vector<256x32xf32>
    %cst_86 = arith.constant dense<0.000000e+00> : vector<256x32xf32>
    %164 = tpu.matmul %7, %162, %cst_86 {dimension_numbers = #tpu.dot_dimension_numbers<[1], [0], [0], [1], [0, 0, 1, 1], [], []>} : vector<256x16xf32>, vector<16x32xf32>, vector<256x32xf32> -> vector<256x32xf32>
    %165 = arith.addf %163, %164 : vector<256x32xf32>
    %c0_87 = arith.constant 0 : index
    %c0_88 = arith.constant 0 : index
    %c0_89 = arith.constant 0 : index
    %166 = vector.load %arg17[%c0_87, %c0_88, %c0_89] : memref<3x1x32xf32, #tpu.memory_space<vmem>>, vector<1x1x32xf32>
    %167 = vector.shape_cast %166 : vector<1x1x32xf32> to vector<1x32xf32>
    %168 = vector.broadcast %156 : vector<256x1xf32> to vector<256x32xf32>
    %169 = vector.broadcast %167 : vector<1x32xf32> to vector<256x32xf32>
    %170 = arith.mulf %168, %169 : vector<256x32xf32>
    %171 = arith.addf %165, %170 : vector<256x32xf32>
    %c0_90 = arith.constant 0 : index
    %c0_91 = arith.constant 0 : index
    %c0_92 = arith.constant 0 : index
    %172 = vector.load %arg18[%c0_90, %c0_91, %c0_92] : memref<3x1x32xf32, #tpu.memory_space<vmem>>, vector<1x1x32xf32>
    %173 = vector.shape_cast %172 : vector<1x1x32xf32> to vector<1x32xf32>
    %174 = vector.broadcast %173 : vector<1x32xf32> to vector<256x32xf32>
    %175 = arith.addf %171, %174 : vector<256x32xf32>
    %cst_93 = arith.constant 0.000000e+00 : f32
    %176 = vector.broadcast %cst_93 : f32 to vector<256x32xf32>
    %177 = arith.subf %176, %175 : vector<256x32xf32>
    %178 = math.exp %177 : vector<256x32xf32>
    %cst_94 = arith.constant 1.000000e+00 : f32
    %179 = vector.broadcast %cst_94 : f32 to vector<256x32xf32>
    %180 = arith.addf %179, %178 : vector<256x32xf32>
    %cst_95 = arith.constant 1.000000e+00 : f32
    %181 = vector.broadcast %cst_95 : f32 to vector<256x32xf32>
    %182 = arith.divf %181, %180 : vector<256x32xf32>
    %183 = arith.mulf %175, %182 : vector<256x32xf32>
    %c0_96 = arith.constant 0 : index
    %c0_97 = arith.constant 0 : index
    %c0_98 = arith.constant 0 : index
    %184 = vector.load %arg19[%c0_96, %c0_97, %c0_98] : memref<3x32x32xf32, #tpu.memory_space<vmem>>, vector<1x32x32xf32>
    %185 = vector.shape_cast %184 : vector<1x32x32xf32> to vector<32x32xf32>
    %cst_99 = arith.constant dense<0.000000e+00> : vector<256x32xf32>
    %186 = tpu.matmul %183, %185, %cst_99 {dimension_numbers = #tpu.dot_dimension_numbers<[1], [0], [0], [1], [0, 0, 1, 1], [], []>} : vector<256x32xf32>, vector<32x32xf32>, vector<256x32xf32> -> vector<256x32xf32>
    %c0_100 = arith.constant 0 : index
    %c0_101 = arith.constant 0 : index
    %c0_102 = arith.constant 0 : index
    %187 = vector.load %arg20[%c0_100, %c0_101, %c0_102] : memref<3x1x32xf32, #tpu.memory_space<vmem>>, vector<1x1x32xf32>
    %188 = vector.shape_cast %187 : vector<1x1x32xf32> to vector<1x32xf32>
    %189 = vector.broadcast %188 : vector<1x32xf32> to vector<256x32xf32>
    %190 = arith.addf %186, %189 : vector<256x32xf32>
    %cst_103 = arith.constant 0.000000e+00 : f32
    %191 = vector.broadcast %cst_103 : f32 to vector<256x32xf32>
    %192 = arith.subf %191, %190 : vector<256x32xf32>
    %193 = math.exp %192 : vector<256x32xf32>
    %cst_104 = arith.constant 1.000000e+00 : f32
    %194 = vector.broadcast %cst_104 : f32 to vector<256x32xf32>
    %195 = arith.addf %194, %193 : vector<256x32xf32>
    %cst_105 = arith.constant 1.000000e+00 : f32
    %196 = vector.broadcast %cst_105 : f32 to vector<256x32xf32>
    %197 = arith.divf %196, %195 : vector<256x32xf32>
    %198 = arith.mulf %190, %197 : vector<256x32xf32>
    %199 = vector.broadcast %13 : vector<256x1xf32> to vector<256x32xf32>
    %200 = arith.mulf %199, %198 : vector<256x32xf32>
    %cst_106 = arith.constant dense<0.000000e+00> : vector<16x32xf32>
    %201 = tpu.matmul %8, %200, %cst_106 {dimension_numbers = #tpu.dot_dimension_numbers<[1], [0], [0], [1], [0, 0, 1, 1], [], []>} : vector<16x256xf32>, vector<256x32xf32>, vector<16x32xf32> -> vector<16x32xf32>
    %c0_107 = arith.constant 0 : index
    %c0_108 = arith.constant 0 : index
    %c0_109 = arith.constant 0 : index
    %202 = vector.load %arg24[%c0_107, %c0_108, %c0_109] : memref<3x32x32xf32, #tpu.memory_space<vmem>>, vector<1x32x32xf32>
    %203 = vector.shape_cast %202 : vector<1x32x32xf32> to vector<32x32xf32>
    %cst_110 = arith.constant dense<0.000000e+00> : vector<16x32xf32>
    %204 = tpu.matmul %152, %203, %cst_110 {dimension_numbers = #tpu.dot_dimension_numbers<[1], [0], [0], [1], [0, 0, 1, 1], [], []>} : vector<16x32xf32>, vector<32x32xf32>, vector<16x32xf32> -> vector<16x32xf32>
    %c0_111 = arith.constant 0 : index
    %c0_112 = arith.constant 0 : index
    %c0_113 = arith.constant 0 : index
    %205 = vector.load %arg25[%c0_111, %c0_112, %c0_113] : memref<3x32x32xf32, #tpu.memory_space<vmem>>, vector<1x32x32xf32>
    %206 = vector.shape_cast %205 : vector<1x32x32xf32> to vector<32x32xf32>
    %cst_114 = arith.constant dense<0.000000e+00> : vector<16x32xf32>
    %207 = tpu.matmul %201, %206, %cst_114 {dimension_numbers = #tpu.dot_dimension_numbers<[1], [0], [0], [1], [0, 0, 1, 1], [], []>} : vector<16x32xf32>, vector<32x32xf32>, vector<16x32xf32> -> vector<16x32xf32>
    %208 = arith.addf %204, %207 : vector<16x32xf32>
    %c0_115 = arith.constant 0 : index
    %c0_116 = arith.constant 0 : index
    %c0_117 = arith.constant 0 : index
    %209 = vector.load %arg26[%c0_115, %c0_116, %c0_117] : memref<3x1x32xf32, #tpu.memory_space<vmem>>, vector<1x1x32xf32>
    %210 = vector.shape_cast %209 : vector<1x1x32xf32> to vector<1x32xf32>
    %211 = vector.broadcast %210 : vector<1x32xf32> to vector<16x32xf32>
    %212 = arith.addf %208, %211 : vector<16x32xf32>
    %cst_118 = arith.constant 0.000000e+00 : f32
    %213 = vector.broadcast %cst_118 : f32 to vector<16x32xf32>
    %214 = arith.subf %213, %212 : vector<16x32xf32>
    %215 = math.exp %214 : vector<16x32xf32>
    %cst_119 = arith.constant 1.000000e+00 : f32
    %216 = vector.broadcast %cst_119 : f32 to vector<16x32xf32>
    %217 = arith.addf %216, %215 : vector<16x32xf32>
    %cst_120 = arith.constant 1.000000e+00 : f32
    %218 = vector.broadcast %cst_120 : f32 to vector<16x32xf32>
    %219 = arith.divf %218, %217 : vector<16x32xf32>
    %220 = arith.mulf %212, %219 : vector<16x32xf32>
    %c0_121 = arith.constant 0 : index
    %c0_122 = arith.constant 0 : index
    %c0_123 = arith.constant 0 : index
    %221 = vector.load %arg27[%c0_121, %c0_122, %c0_123] : memref<3x32x32xf32, #tpu.memory_space<vmem>>, vector<1x32x32xf32>
    %222 = vector.shape_cast %221 : vector<1x32x32xf32> to vector<32x32xf32>
    %cst_124 = arith.constant dense<0.000000e+00> : vector<16x32xf32>
    %223 = tpu.matmul %220, %222, %cst_124 {dimension_numbers = #tpu.dot_dimension_numbers<[1], [0], [0], [1], [0, 0, 1, 1], [], []>} : vector<16x32xf32>, vector<32x32xf32>, vector<16x32xf32> -> vector<16x32xf32>
    %c0_125 = arith.constant 0 : index
    %c0_126 = arith.constant 0 : index
    %c0_127 = arith.constant 0 : index
    %224 = vector.load %arg28[%c0_125, %c0_126, %c0_127] : memref<3x1x32xf32, #tpu.memory_space<vmem>>, vector<1x1x32xf32>
    %225 = vector.shape_cast %224 : vector<1x1x32xf32> to vector<1x32xf32>
    %226 = vector.broadcast %225 : vector<1x32xf32> to vector<16x32xf32>
    %227 = arith.addf %223, %226 : vector<16x32xf32>
    %cst_128 = arith.constant dense<0.000000e+00> : vector<256x3xf32>
    %228 = tpu.matmul %9, %3, %cst_128 {dimension_numbers = #tpu.dot_dimension_numbers<[1], [0], [0], [1], [0, 0, 1, 1], [], []>} : vector<256x16xf32>, vector<16x3xf32>, vector<256x3xf32> -> vector<256x3xf32>
    %229 = arith.mulf %228, %228 : vector<256x3xf32>
    %cst_129 = arith.constant dense<0.000000e+00> : vector<256xf32>
    %230 = vector.multi_reduction <add>, %229, %cst_129 [1] : vector<256x3xf32> to vector<256xf32>
    %231 = vector.shape_cast %230 : vector<256xf32> to vector<256x1xf32>
    %232 = math.sqrt %231 : vector<256x1xf32>
    %cst_130 = arith.constant 1.000000e-30 : f32
    %233 = vector.broadcast %cst_130 : f32 to vector<256x1xf32>
    %234 = arith.addf %232, %233 : vector<256x1xf32>
    %235 = vector.broadcast %234 : vector<256x1xf32> to vector<256x3xf32>
    %236 = arith.divf %228, %235 : vector<256x3xf32>
    %c1 = arith.constant 1 : index
    %c0_131 = arith.constant 0 : index
    %c0_132 = arith.constant 0 : index
    %237 = vector.load %arg15[%c1, %c0_131, %c0_132] : memref<3x32x32xf32, #tpu.memory_space<vmem>>, vector<1x32x32xf32>
    %238 = vector.shape_cast %237 : vector<1x32x32xf32> to vector<32x32xf32>
    %cst_133 = arith.constant dense<0.000000e+00> : vector<16x32xf32>
    %239 = tpu.matmul %227, %238, %cst_133 {dimension_numbers = #tpu.dot_dimension_numbers<[1], [0], [0], [1], [0, 0, 1, 1], [], []>} : vector<16x32xf32>, vector<32x32xf32>, vector<16x32xf32> -> vector<16x32xf32>
    %c1_134 = arith.constant 1 : index
    %c0_135 = arith.constant 0 : index
    %c0_136 = arith.constant 0 : index
    %240 = vector.load %arg16[%c1_134, %c0_135, %c0_136] : memref<3x32x32xf32, #tpu.memory_space<vmem>>, vector<1x32x32xf32>
    %241 = vector.shape_cast %240 : vector<1x32x32xf32> to vector<32x32xf32>
    %cst_137 = arith.constant dense<0.000000e+00> : vector<16x32xf32>
    %242 = tpu.matmul %227, %241, %cst_137 {dimension_numbers = #tpu.dot_dimension_numbers<[1], [0], [0], [1], [0, 0, 1, 1], [], []>} : vector<16x32xf32>, vector<32x32xf32>, vector<16x32xf32> -> vector<16x32xf32>
    %cst_138 = arith.constant dense<0.000000e+00> : vector<256x32xf32>
    %243 = tpu.matmul %6, %239, %cst_138 {dimension_numbers = #tpu.dot_dimension_numbers<[1], [0], [0], [1], [0, 0, 1, 1], [], []>} : vector<256x16xf32>, vector<16x32xf32>, vector<256x32xf32> -> vector<256x32xf32>
    %cst_139 = arith.constant dense<0.000000e+00> : vector<256x32xf32>
    %244 = tpu.matmul %7, %242, %cst_139 {dimension_numbers = #tpu.dot_dimension_numbers<[1], [0], [0], [1], [0, 0, 1, 1], [], []>} : vector<256x16xf32>, vector<16x32xf32>, vector<256x32xf32> -> vector<256x32xf32>
    %245 = arith.addf %243, %244 : vector<256x32xf32>
    %c1_140 = arith.constant 1 : index
    %c0_141 = arith.constant 0 : index
    %c0_142 = arith.constant 0 : index
    %246 = vector.load %arg17[%c1_140, %c0_141, %c0_142] : memref<3x1x32xf32, #tpu.memory_space<vmem>>, vector<1x1x32xf32>
    %247 = vector.shape_cast %246 : vector<1x1x32xf32> to vector<1x32xf32>
    %248 = vector.broadcast %231 : vector<256x1xf32> to vector<256x32xf32>
    %249 = vector.broadcast %247 : vector<1x32xf32> to vector<256x32xf32>
    %250 = arith.mulf %248, %249 : vector<256x32xf32>
    %251 = arith.addf %245, %250 : vector<256x32xf32>
    %c1_143 = arith.constant 1 : index
    %c0_144 = arith.constant 0 : index
    %c0_145 = arith.constant 0 : index
    %252 = vector.load %arg18[%c1_143, %c0_144, %c0_145] : memref<3x1x32xf32, #tpu.memory_space<vmem>>, vector<1x1x32xf32>
    %253 = vector.shape_cast %252 : vector<1x1x32xf32> to vector<1x32xf32>
    %254 = vector.broadcast %253 : vector<1x32xf32> to vector<256x32xf32>
    %255 = arith.addf %251, %254 : vector<256x32xf32>
    %cst_146 = arith.constant 0.000000e+00 : f32
    %256 = vector.broadcast %cst_146 : f32 to vector<256x32xf32>
    %257 = arith.subf %256, %255 : vector<256x32xf32>
    %258 = math.exp %257 : vector<256x32xf32>
    %cst_147 = arith.constant 1.000000e+00 : f32
    %259 = vector.broadcast %cst_147 : f32 to vector<256x32xf32>
    %260 = arith.addf %259, %258 : vector<256x32xf32>
    %cst_148 = arith.constant 1.000000e+00 : f32
    %261 = vector.broadcast %cst_148 : f32 to vector<256x32xf32>
    %262 = arith.divf %261, %260 : vector<256x32xf32>
    %263 = arith.mulf %255, %262 : vector<256x32xf32>
    %c1_149 = arith.constant 1 : index
    %c0_150 = arith.constant 0 : index
    %c0_151 = arith.constant 0 : index
    %264 = vector.load %arg19[%c1_149, %c0_150, %c0_151] : memref<3x32x32xf32, #tpu.memory_space<vmem>>, vector<1x32x32xf32>
    %265 = vector.shape_cast %264 : vector<1x32x32xf32> to vector<32x32xf32>
    %cst_152 = arith.constant dense<0.000000e+00> : vector<256x32xf32>
    %266 = tpu.matmul %263, %265, %cst_152 {dimension_numbers = #tpu.dot_dimension_numbers<[1], [0], [0], [1], [0, 0, 1, 1], [], []>} : vector<256x32xf32>, vector<32x32xf32>, vector<256x32xf32> -> vector<256x32xf32>
    %c1_153 = arith.constant 1 : index
    %c0_154 = arith.constant 0 : index
    %c0_155 = arith.constant 0 : index
    %267 = vector.load %arg20[%c1_153, %c0_154, %c0_155] : memref<3x1x32xf32, #tpu.memory_space<vmem>>, vector<1x1x32xf32>
    %268 = vector.shape_cast %267 : vector<1x1x32xf32> to vector<1x32xf32>
    %269 = vector.broadcast %268 : vector<1x32xf32> to vector<256x32xf32>
    %270 = arith.addf %266, %269 : vector<256x32xf32>
    %cst_156 = arith.constant 0.000000e+00 : f32
    %271 = vector.broadcast %cst_156 : f32 to vector<256x32xf32>
    %272 = arith.subf %271, %270 : vector<256x32xf32>
    %273 = math.exp %272 : vector<256x32xf32>
    %cst_157 = arith.constant 1.000000e+00 : f32
    %274 = vector.broadcast %cst_157 : f32 to vector<256x32xf32>
    %275 = arith.addf %274, %273 : vector<256x32xf32>
    %cst_158 = arith.constant 1.000000e+00 : f32
    %276 = vector.broadcast %cst_158 : f32 to vector<256x32xf32>
    %277 = arith.divf %276, %275 : vector<256x32xf32>
    %278 = arith.mulf %270, %277 : vector<256x32xf32>
    %c1_159 = arith.constant 1 : index
    %c0_160 = arith.constant 0 : index
    %c0_161 = arith.constant 0 : index
    %279 = vector.load %arg21[%c1_159, %c0_160, %c0_161] : memref<3x32x32xf32, #tpu.memory_space<vmem>>, vector<1x32x32xf32>
    %280 = vector.shape_cast %279 : vector<1x32x32xf32> to vector<32x32xf32>
    %cst_162 = arith.constant dense<0.000000e+00> : vector<256x32xf32>
    %281 = tpu.matmul %278, %280, %cst_162 {dimension_numbers = #tpu.dot_dimension_numbers<[1], [0], [0], [1], [0, 0, 1, 1], [], []>} : vector<256x32xf32>, vector<32x32xf32>, vector<256x32xf32> -> vector<256x32xf32>
    %c1_163 = arith.constant 1 : index
    %c0_164 = arith.constant 0 : index
    %c0_165 = arith.constant 0 : index
    %282 = vector.load %arg22[%c1_163, %c0_164, %c0_165] : memref<3x1x32xf32, #tpu.memory_space<vmem>>, vector<1x1x32xf32>
    %283 = vector.shape_cast %282 : vector<1x1x32xf32> to vector<1x32xf32>
    %284 = vector.broadcast %283 : vector<1x32xf32> to vector<256x32xf32>
    %285 = arith.addf %281, %284 : vector<256x32xf32>
    %cst_166 = arith.constant 0.000000e+00 : f32
    %286 = vector.broadcast %cst_166 : f32 to vector<256x32xf32>
    %287 = arith.subf %286, %285 : vector<256x32xf32>
    %288 = math.exp %287 : vector<256x32xf32>
    %cst_167 = arith.constant 1.000000e+00 : f32
    %289 = vector.broadcast %cst_167 : f32 to vector<256x32xf32>
    %290 = arith.addf %289, %288 : vector<256x32xf32>
    %cst_168 = arith.constant 1.000000e+00 : f32
    %291 = vector.broadcast %cst_168 : f32 to vector<256x32xf32>
    %292 = arith.divf %291, %290 : vector<256x32xf32>
    %293 = arith.mulf %285, %292 : vector<256x32xf32>
    %c1_169 = arith.constant 1 : index
    %c0_170 = arith.constant 0 : index
    %c0_171 = arith.constant 0 : index
    %294 = vector.load %arg23[%c1_169, %c0_170, %c0_171] : memref<3x1x32xf32, #tpu.memory_space<vmem>>, vector<1x1x32xf32>
    %295 = vector.shape_cast %294 : vector<1x1x32xf32> to vector<1x32xf32>
    %296 = vector.broadcast %295 : vector<1x32xf32> to vector<256x32xf32>
    %297 = arith.mulf %293, %296 : vector<256x32xf32>
    %cst_172 = arith.constant dense<0.000000e+00> : vector<256xf32>
    %298 = vector.multi_reduction <add>, %297, %cst_172 [1] : vector<256x32xf32> to vector<256xf32>
    %299 = vector.shape_cast %298 : vector<256xf32> to vector<256x1xf32>
    %300 = vector.broadcast %13 : vector<256x1xf32> to vector<256x32xf32>
    %301 = arith.mulf %300, %278 : vector<256x32xf32>
    %cst_173 = arith.constant dense<0.000000e+00> : vector<16x32xf32>
    %302 = tpu.matmul %8, %301, %cst_173 {dimension_numbers = #tpu.dot_dimension_numbers<[1], [0], [0], [1], [0, 0, 1, 1], [], []>} : vector<16x256xf32>, vector<256x32xf32>, vector<16x32xf32> -> vector<16x32xf32>
    %303 = arith.mulf %13, %299 : vector<256x1xf32>
    %304 = vector.broadcast %303 : vector<256x1xf32> to vector<256x3xf32>
    %305 = arith.mulf %304, %236 : vector<256x3xf32>
    %cst_174 = arith.constant dense<0.000000e+00> : vector<16x3xf32>
    %306 = tpu.matmul %18, %305, %cst_174 {dimension_numbers = #tpu.dot_dimension_numbers<[1], [0], [0], [1], [0, 0, 1, 1], [], []>} : vector<16x256xf32>, vector<256x3xf32>, vector<16x3xf32> -> vector<16x3xf32>
    %c1_175 = arith.constant 1 : index
    %c0_176 = arith.constant 0 : index
    %c0_177 = arith.constant 0 : index
    %307 = vector.load %arg24[%c1_175, %c0_176, %c0_177] : memref<3x32x32xf32, #tpu.memory_space<vmem>>, vector<1x32x32xf32>
    %308 = vector.shape_cast %307 : vector<1x32x32xf32> to vector<32x32xf32>
    %cst_178 = arith.constant dense<0.000000e+00> : vector<16x32xf32>
    %309 = tpu.matmul %227, %308, %cst_178 {dimension_numbers = #tpu.dot_dimension_numbers<[1], [0], [0], [1], [0, 0, 1, 1], [], []>} : vector<16x32xf32>, vector<32x32xf32>, vector<16x32xf32> -> vector<16x32xf32>
    %c1_179 = arith.constant 1 : index
    %c0_180 = arith.constant 0 : index
    %c0_181 = arith.constant 0 : index
    %310 = vector.load %arg25[%c1_179, %c0_180, %c0_181] : memref<3x32x32xf32, #tpu.memory_space<vmem>>, vector<1x32x32xf32>
    %311 = vector.shape_cast %310 : vector<1x32x32xf32> to vector<32x32xf32>
    %cst_182 = arith.constant dense<0.000000e+00> : vector<16x32xf32>
    %312 = tpu.matmul %302, %311, %cst_182 {dimension_numbers = #tpu.dot_dimension_numbers<[1], [0], [0], [1], [0, 0, 1, 1], [], []>} : vector<16x32xf32>, vector<32x32xf32>, vector<16x32xf32> -> vector<16x32xf32>
    %313 = arith.addf %309, %312 : vector<16x32xf32>
    %c1_183 = arith.constant 1 : index
    %c0_184 = arith.constant 0 : index
    %c0_185 = arith.constant 0 : index
    %314 = vector.load %arg26[%c1_183, %c0_184, %c0_185] : memref<3x1x32xf32, #tpu.memory_space<vmem>>, vector<1x1x32xf32>
    %315 = vector.shape_cast %314 : vector<1x1x32xf32> to vector<1x32xf32>
    %316 = vector.broadcast %315 : vector<1x32xf32> to vector<16x32xf32>
    %317 = arith.addf %313, %316 : vector<16x32xf32>
    %cst_186 = arith.constant 0.000000e+00 : f32
    %318 = vector.broadcast %cst_186 : f32 to vector<16x32xf32>
    %319 = arith.subf %318, %317 : vector<16x32xf32>
    %320 = math.exp %319 : vector<16x32xf32>
    %cst_187 = arith.constant 1.000000e+00 : f32
    %321 = vector.broadcast %cst_187 : f32 to vector<16x32xf32>
    %322 = arith.addf %321, %320 : vector<16x32xf32>
    %cst_188 = arith.constant 1.000000e+00 : f32
    %323 = vector.broadcast %cst_188 : f32 to vector<16x32xf32>
    %324 = arith.divf %323, %322 : vector<16x32xf32>
    %325 = arith.mulf %317, %324 : vector<16x32xf32>
    %c1_189 = arith.constant 1 : index
    %c0_190 = arith.constant 0 : index
    %c0_191 = arith.constant 0 : index
    %326 = vector.load %arg27[%c1_189, %c0_190, %c0_191] : memref<3x32x32xf32, #tpu.memory_space<vmem>>, vector<1x32x32xf32>
    %327 = vector.shape_cast %326 : vector<1x32x32xf32> to vector<32x32xf32>
    %cst_192 = arith.constant dense<0.000000e+00> : vector<16x32xf32>
    %328 = tpu.matmul %325, %327, %cst_192 {dimension_numbers = #tpu.dot_dimension_numbers<[1], [0], [0], [1], [0, 0, 1, 1], [], []>} : vector<16x32xf32>, vector<32x32xf32>, vector<16x32xf32> -> vector<16x32xf32>
    %c1_193 = arith.constant 1 : index
    %c0_194 = arith.constant 0 : index
    %c0_195 = arith.constant 0 : index
    %329 = vector.load %arg28[%c1_193, %c0_194, %c0_195] : memref<3x1x32xf32, #tpu.memory_space<vmem>>, vector<1x1x32xf32>
    %330 = vector.shape_cast %329 : vector<1x1x32xf32> to vector<1x32xf32>
    %331 = vector.broadcast %330 : vector<1x32xf32> to vector<16x32xf32>
    %332 = arith.addf %328, %331 : vector<16x32xf32>
    %333 = arith.addf %3, %306 : vector<16x3xf32>
    %cst_196 = arith.constant 5.000000e-01 : f32
    %334 = vector.broadcast %cst_196 : f32 to vector<16x32xf32>
    %335 = arith.mulf %334, %332 : vector<16x32xf32>
    %cst_197 = arith.constant 0.707106769 : f32
    %336 = vector.broadcast %cst_197 : f32 to vector<16x32xf32>
    %337 = arith.mulf %332, %336 : vector<16x32xf32>
    %338 = math.absf %337 : vector<16x32xf32>
    %cst_198 = arith.constant 0.327591091 : f32
    %339 = vector.broadcast %cst_198 : f32 to vector<16x32xf32>
    %340 = arith.mulf %339, %338 : vector<16x32xf32>
    %cst_199 = arith.constant 1.000000e+00 : f32
    %341 = vector.broadcast %cst_199 : f32 to vector<16x32xf32>
    %342 = arith.addf %341, %340 : vector<16x32xf32>
    %cst_200 = arith.constant 1.000000e+00 : f32
    %343 = vector.broadcast %cst_200 : f32 to vector<16x32xf32>
    %344 = arith.divf %343, %342 : vector<16x32xf32>
    %cst_201 = arith.constant 1.06140542 : f32
    %345 = vector.broadcast %cst_201 : f32 to vector<16x32xf32>
    %346 = arith.mulf %345, %344 : vector<16x32xf32>
    %cst_202 = arith.constant -1.45315206 : f32
    %347 = vector.broadcast %cst_202 : f32 to vector<16x32xf32>
    %348 = arith.addf %346, %347 : vector<16x32xf32>
    %349 = arith.mulf %348, %344 : vector<16x32xf32>
    %cst_203 = arith.constant 1.42141378 : f32
    %350 = vector.broadcast %cst_203 : f32 to vector<16x32xf32>
    %351 = arith.addf %349, %350 : vector<16x32xf32>
    %352 = arith.mulf %351, %344 : vector<16x32xf32>
    %cst_204 = arith.constant -0.284496725 : f32
    %353 = vector.broadcast %cst_204 : f32 to vector<16x32xf32>
    %354 = arith.addf %352, %353 : vector<16x32xf32>
    %355 = arith.mulf %354, %344 : vector<16x32xf32>
    %cst_205 = arith.constant 0.254829586 : f32
    %356 = vector.broadcast %cst_205 : f32 to vector<16x32xf32>
    %357 = arith.addf %355, %356 : vector<16x32xf32>
    %358 = arith.mulf %357, %344 : vector<16x32xf32>
    %359 = arith.mulf %338, %338 : vector<16x32xf32>
    %cst_206 = arith.constant 0.000000e+00 : f32
    %360 = vector.broadcast %cst_206 : f32 to vector<16x32xf32>
    %361 = arith.subf %360, %359 : vector<16x32xf32>
    %362 = math.exp %361 : vector<16x32xf32>
    %363 = arith.mulf %358, %362 : vector<16x32xf32>
    %cst_207 = arith.constant 1.000000e+00 : f32
    %364 = vector.broadcast %cst_207 : f32 to vector<16x32xf32>
    %365 = arith.subf %364, %363 : vector<16x32xf32>
    %cst_208 = arith.constant 0.000000e+00 : f32
    %366 = vector.broadcast %cst_208 : f32 to vector<16x32xf32>
    %367 = arith.cmpf olt, %337, %366 : vector<16x32xf32>
    %cst_209 = arith.constant 0.000000e+00 : f32
    %368 = vector.broadcast %cst_209 : f32 to vector<16x32xf32>
    %369 = arith.subf %368, %365 : vector<16x32xf32>
    %370 = arith.select %367, %369, %365 : vector<16x32xi1>, vector<16x32xf32>
    %cst_210 = arith.constant 1.000000e+00 : f32
    %371 = vector.broadcast %cst_210 : f32 to vector<16x32xf32>
    %372 = arith.addf %371, %370 : vector<16x32xf32>
    %373 = arith.mulf %335, %372 : vector<16x32xf32>
    %c0_211 = arith.constant 0 : index
    %c0_212 = arith.constant 0 : index
    %374 = vector.load %arg29[%c0_211, %c0_212] : memref<1x32xf32, #tpu.memory_space<vmem>>, vector<1x32xf32>
    %c0_213 = arith.constant 0 : index
    %c0_214 = arith.constant 0 : index
    %375 = vector.load %arg30[%c0_213, %c0_214] : memref<1x32xf32, #tpu.memory_space<vmem>>, vector<1x32xf32>
    %cst_215 = arith.constant dense<0.000000e+00> : vector<16xf32>
    %376 = vector.multi_reduction <add>, %373, %cst_215 [1] : vector<16x32xf32> to vector<16xf32>
    %377 = vector.shape_cast %376 : vector<16xf32> to vector<16x1xf32>
    %cst_216 = arith.constant 3.200000e+01 : f32
    %378 = vector.broadcast %cst_216 : f32 to vector<16x1xf32>
    %379 = arith.divf %377, %378 : vector<16x1xf32>
    %380 = vector.broadcast %379 : vector<16x1xf32> to vector<16x32xf32>
    %381 = arith.subf %373, %380 : vector<16x32xf32>
    %382 = arith.mulf %381, %381 : vector<16x32xf32>
    %cst_217 = arith.constant dense<0.000000e+00> : vector<16xf32>
    %383 = vector.multi_reduction <add>, %382, %cst_217 [1] : vector<16x32xf32> to vector<16xf32>
    %384 = vector.shape_cast %383 : vector<16xf32> to vector<16x1xf32>
    %cst_218 = arith.constant 3.200000e+01 : f32
    %385 = vector.broadcast %cst_218 : f32 to vector<16x1xf32>
    %386 = arith.divf %384, %385 : vector<16x1xf32>
    %cst_219 = arith.constant 9.99999974E-6 : f32
    %387 = vector.broadcast %cst_219 : f32 to vector<16x1xf32>
    %388 = arith.addf %386, %387 : vector<16x1xf32>
    %389 = math.sqrt %388 : vector<16x1xf32>
    %390 = vector.broadcast %389 : vector<16x1xf32> to vector<16x32xf32>
    %391 = arith.divf %381, %390 : vector<16x32xf32>
    %392 = vector.broadcast %374 : vector<1x32xf32> to vector<16x32xf32>
    %393 = arith.mulf %391, %392 : vector<16x32xf32>
    %394 = vector.broadcast %375 : vector<1x32xf32> to vector<16x32xf32>
    %395 = arith.addf %393, %394 : vector<16x32xf32>
    %cst_220 = arith.constant dense<0.000000e+00> : vector<256x3xf32>
    %396 = tpu.matmul %9, %333, %cst_220 {dimension_numbers = #tpu.dot_dimension_numbers<[1], [0], [0], [1], [0, 0, 1, 1], [], []>} : vector<256x16xf32>, vector<16x3xf32>, vector<256x3xf32> -> vector<256x3xf32>
    %397 = arith.mulf %396, %396 : vector<256x3xf32>
    %cst_221 = arith.constant dense<0.000000e+00> : vector<256xf32>
    %398 = vector.multi_reduction <add>, %397, %cst_221 [1] : vector<256x3xf32> to vector<256xf32>
    %399 = vector.shape_cast %398 : vector<256xf32> to vector<256x1xf32>
    %c2 = arith.constant 2 : index
    %c0_222 = arith.constant 0 : index
    %c0_223 = arith.constant 0 : index
    %400 = vector.load %arg15[%c2, %c0_222, %c0_223] : memref<3x32x32xf32, #tpu.memory_space<vmem>>, vector<1x32x32xf32>
    %401 = vector.shape_cast %400 : vector<1x32x32xf32> to vector<32x32xf32>
    %cst_224 = arith.constant dense<0.000000e+00> : vector<16x32xf32>
    %402 = tpu.matmul %395, %401, %cst_224 {dimension_numbers = #tpu.dot_dimension_numbers<[1], [0], [0], [1], [0, 0, 1, 1], [], []>} : vector<16x32xf32>, vector<32x32xf32>, vector<16x32xf32> -> vector<16x32xf32>
    %c2_225 = arith.constant 2 : index
    %c0_226 = arith.constant 0 : index
    %c0_227 = arith.constant 0 : index
    %403 = vector.load %arg16[%c2_225, %c0_226, %c0_227] : memref<3x32x32xf32, #tpu.memory_space<vmem>>, vector<1x32x32xf32>
    %404 = vector.shape_cast %403 : vector<1x32x32xf32> to vector<32x32xf32>
    %cst_228 = arith.constant dense<0.000000e+00> : vector<16x32xf32>
    %405 = tpu.matmul %395, %404, %cst_228 {dimension_numbers = #tpu.dot_dimension_numbers<[1], [0], [0], [1], [0, 0, 1, 1], [], []>} : vector<16x32xf32>, vector<32x32xf32>, vector<16x32xf32> -> vector<16x32xf32>
    %cst_229 = arith.constant dense<0.000000e+00> : vector<256x32xf32>
    %406 = tpu.matmul %6, %402, %cst_229 {dimension_numbers = #tpu.dot_dimension_numbers<[1], [0], [0], [1], [0, 0, 1, 1], [], []>} : vector<256x16xf32>, vector<16x32xf32>, vector<256x32xf32> -> vector<256x32xf32>
    %cst_230 = arith.constant dense<0.000000e+00> : vector<256x32xf32>
    %407 = tpu.matmul %7, %405, %cst_230 {dimension_numbers = #tpu.dot_dimension_numbers<[1], [0], [0], [1], [0, 0, 1, 1], [], []>} : vector<256x16xf32>, vector<16x32xf32>, vector<256x32xf32> -> vector<256x32xf32>
    %408 = arith.addf %406, %407 : vector<256x32xf32>
    %c2_231 = arith.constant 2 : index
    %c0_232 = arith.constant 0 : index
    %c0_233 = arith.constant 0 : index
    %409 = vector.load %arg17[%c2_231, %c0_232, %c0_233] : memref<3x1x32xf32, #tpu.memory_space<vmem>>, vector<1x1x32xf32>
    %410 = vector.shape_cast %409 : vector<1x1x32xf32> to vector<1x32xf32>
    %411 = vector.broadcast %399 : vector<256x1xf32> to vector<256x32xf32>
    %412 = vector.broadcast %410 : vector<1x32xf32> to vector<256x32xf32>
    %413 = arith.mulf %411, %412 : vector<256x32xf32>
    %414 = arith.addf %408, %413 : vector<256x32xf32>
    %c2_234 = arith.constant 2 : index
    %c0_235 = arith.constant 0 : index
    %c0_236 = arith.constant 0 : index
    %415 = vector.load %arg18[%c2_234, %c0_235, %c0_236] : memref<3x1x32xf32, #tpu.memory_space<vmem>>, vector<1x1x32xf32>
    %416 = vector.shape_cast %415 : vector<1x1x32xf32> to vector<1x32xf32>
    %417 = vector.broadcast %416 : vector<1x32xf32> to vector<256x32xf32>
    %418 = arith.addf %414, %417 : vector<256x32xf32>
    %cst_237 = arith.constant 0.000000e+00 : f32
    %419 = vector.broadcast %cst_237 : f32 to vector<256x32xf32>
    %420 = arith.subf %419, %418 : vector<256x32xf32>
    %421 = math.exp %420 : vector<256x32xf32>
    %cst_238 = arith.constant 1.000000e+00 : f32
    %422 = vector.broadcast %cst_238 : f32 to vector<256x32xf32>
    %423 = arith.addf %422, %421 : vector<256x32xf32>
    %cst_239 = arith.constant 1.000000e+00 : f32
    %424 = vector.broadcast %cst_239 : f32 to vector<256x32xf32>
    %425 = arith.divf %424, %423 : vector<256x32xf32>
    %426 = arith.mulf %418, %425 : vector<256x32xf32>
    %c2_240 = arith.constant 2 : index
    %c0_241 = arith.constant 0 : index
    %c0_242 = arith.constant 0 : index
    %427 = vector.load %arg19[%c2_240, %c0_241, %c0_242] : memref<3x32x32xf32, #tpu.memory_space<vmem>>, vector<1x32x32xf32>
    %428 = vector.shape_cast %427 : vector<1x32x32xf32> to vector<32x32xf32>
    %cst_243 = arith.constant dense<0.000000e+00> : vector<256x32xf32>
    %429 = tpu.matmul %426, %428, %cst_243 {dimension_numbers = #tpu.dot_dimension_numbers<[1], [0], [0], [1], [0, 0, 1, 1], [], []>} : vector<256x32xf32>, vector<32x32xf32>, vector<256x32xf32> -> vector<256x32xf32>
    %c2_244 = arith.constant 2 : index
    %c0_245 = arith.constant 0 : index
    %c0_246 = arith.constant 0 : index
    %430 = vector.load %arg20[%c2_244, %c0_245, %c0_246] : memref<3x1x32xf32, #tpu.memory_space<vmem>>, vector<1x1x32xf32>
    %431 = vector.shape_cast %430 : vector<1x1x32xf32> to vector<1x32xf32>
    %432 = vector.broadcast %431 : vector<1x32xf32> to vector<256x32xf32>
    %433 = arith.addf %429, %432 : vector<256x32xf32>
    %cst_247 = arith.constant 0.000000e+00 : f32
    %434 = vector.broadcast %cst_247 : f32 to vector<256x32xf32>
    %435 = arith.subf %434, %433 : vector<256x32xf32>
    %436 = math.exp %435 : vector<256x32xf32>
    %cst_248 = arith.constant 1.000000e+00 : f32
    %437 = vector.broadcast %cst_248 : f32 to vector<256x32xf32>
    %438 = arith.addf %437, %436 : vector<256x32xf32>
    %cst_249 = arith.constant 1.000000e+00 : f32
    %439 = vector.broadcast %cst_249 : f32 to vector<256x32xf32>
    %440 = arith.divf %439, %438 : vector<256x32xf32>
    %441 = arith.mulf %433, %440 : vector<256x32xf32>
    %442 = vector.broadcast %13 : vector<256x1xf32> to vector<256x32xf32>
    %443 = arith.mulf %442, %441 : vector<256x32xf32>
    %cst_250 = arith.constant dense<0.000000e+00> : vector<16x32xf32>
    %444 = tpu.matmul %8, %443, %cst_250 {dimension_numbers = #tpu.dot_dimension_numbers<[1], [0], [0], [1], [0, 0, 1, 1], [], []>} : vector<16x256xf32>, vector<256x32xf32>, vector<16x32xf32> -> vector<16x32xf32>
    %c2_251 = arith.constant 2 : index
    %c0_252 = arith.constant 0 : index
    %c0_253 = arith.constant 0 : index
    %445 = vector.load %arg24[%c2_251, %c0_252, %c0_253] : memref<3x32x32xf32, #tpu.memory_space<vmem>>, vector<1x32x32xf32>
    %446 = vector.shape_cast %445 : vector<1x32x32xf32> to vector<32x32xf32>
    %cst_254 = arith.constant dense<0.000000e+00> : vector<16x32xf32>
    %447 = tpu.matmul %395, %446, %cst_254 {dimension_numbers = #tpu.dot_dimension_numbers<[1], [0], [0], [1], [0, 0, 1, 1], [], []>} : vector<16x32xf32>, vector<32x32xf32>, vector<16x32xf32> -> vector<16x32xf32>
    %c2_255 = arith.constant 2 : index
    %c0_256 = arith.constant 0 : index
    %c0_257 = arith.constant 0 : index
    %448 = vector.load %arg25[%c2_255, %c0_256, %c0_257] : memref<3x32x32xf32, #tpu.memory_space<vmem>>, vector<1x32x32xf32>
    %449 = vector.shape_cast %448 : vector<1x32x32xf32> to vector<32x32xf32>
    %cst_258 = arith.constant dense<0.000000e+00> : vector<16x32xf32>
    %450 = tpu.matmul %444, %449, %cst_258 {dimension_numbers = #tpu.dot_dimension_numbers<[1], [0], [0], [1], [0, 0, 1, 1], [], []>} : vector<16x32xf32>, vector<32x32xf32>, vector<16x32xf32> -> vector<16x32xf32>
    %451 = arith.addf %447, %450 : vector<16x32xf32>
    %c2_259 = arith.constant 2 : index
    %c0_260 = arith.constant 0 : index
    %c0_261 = arith.constant 0 : index
    %452 = vector.load %arg26[%c2_259, %c0_260, %c0_261] : memref<3x1x32xf32, #tpu.memory_space<vmem>>, vector<1x1x32xf32>
    %453 = vector.shape_cast %452 : vector<1x1x32xf32> to vector<1x32xf32>
    %454 = vector.broadcast %453 : vector<1x32xf32> to vector<16x32xf32>
    %455 = arith.addf %451, %454 : vector<16x32xf32>
    %cst_262 = arith.constant 0.000000e+00 : f32
    %456 = vector.broadcast %cst_262 : f32 to vector<16x32xf32>
    %457 = arith.subf %456, %455 : vector<16x32xf32>
    %458 = math.exp %457 : vector<16x32xf32>
    %cst_263 = arith.constant 1.000000e+00 : f32
    %459 = vector.broadcast %cst_263 : f32 to vector<16x32xf32>
    %460 = arith.addf %459, %458 : vector<16x32xf32>
    %cst_264 = arith.constant 1.000000e+00 : f32
    %461 = vector.broadcast %cst_264 : f32 to vector<16x32xf32>
    %462 = arith.divf %461, %460 : vector<16x32xf32>
    %463 = arith.mulf %455, %462 : vector<16x32xf32>
    %c2_265 = arith.constant 2 : index
    %c0_266 = arith.constant 0 : index
    %c0_267 = arith.constant 0 : index
    %464 = vector.load %arg27[%c2_265, %c0_266, %c0_267] : memref<3x32x32xf32, #tpu.memory_space<vmem>>, vector<1x32x32xf32>
    %465 = vector.shape_cast %464 : vector<1x32x32xf32> to vector<32x32xf32>
    %cst_268 = arith.constant dense<0.000000e+00> : vector<16x32xf32>
    %466 = tpu.matmul %463, %465, %cst_268 {dimension_numbers = #tpu.dot_dimension_numbers<[1], [0], [0], [1], [0, 0, 1, 1], [], []>} : vector<16x32xf32>, vector<32x32xf32>, vector<16x32xf32> -> vector<16x32xf32>
    %c2_269 = arith.constant 2 : index
    %c0_270 = arith.constant 0 : index
    %c0_271 = arith.constant 0 : index
    %467 = vector.load %arg28[%c2_269, %c0_270, %c0_271] : memref<3x1x32xf32, #tpu.memory_space<vmem>>, vector<1x1x32xf32>
    %468 = vector.shape_cast %467 : vector<1x1x32xf32> to vector<1x32xf32>
    %469 = vector.broadcast %468 : vector<1x32xf32> to vector<16x32xf32>
    %470 = arith.addf %466, %469 : vector<16x32xf32>
    %cst_272 = arith.constant 5.000000e-01 : f32
    %471 = vector.broadcast %cst_272 : f32 to vector<16x32xf32>
    %472 = arith.mulf %471, %470 : vector<16x32xf32>
    %cst_273 = arith.constant 0.707106769 : f32
    %473 = vector.broadcast %cst_273 : f32 to vector<16x32xf32>
    %474 = arith.mulf %470, %473 : vector<16x32xf32>
    %475 = math.absf %474 : vector<16x32xf32>
    %cst_274 = arith.constant 0.327591091 : f32
    %476 = vector.broadcast %cst_274 : f32 to vector<16x32xf32>
    %477 = arith.mulf %476, %475 : vector<16x32xf32>
    %cst_275 = arith.constant 1.000000e+00 : f32
    %478 = vector.broadcast %cst_275 : f32 to vector<16x32xf32>
    %479 = arith.addf %478, %477 : vector<16x32xf32>
    %cst_276 = arith.constant 1.000000e+00 : f32
    %480 = vector.broadcast %cst_276 : f32 to vector<16x32xf32>
    %481 = arith.divf %480, %479 : vector<16x32xf32>
    %cst_277 = arith.constant 1.06140542 : f32
    %482 = vector.broadcast %cst_277 : f32 to vector<16x32xf32>
    %483 = arith.mulf %482, %481 : vector<16x32xf32>
    %cst_278 = arith.constant -1.45315206 : f32
    %484 = vector.broadcast %cst_278 : f32 to vector<16x32xf32>
    %485 = arith.addf %483, %484 : vector<16x32xf32>
    %486 = arith.mulf %485, %481 : vector<16x32xf32>
    %cst_279 = arith.constant 1.42141378 : f32
    %487 = vector.broadcast %cst_279 : f32 to vector<16x32xf32>
    %488 = arith.addf %486, %487 : vector<16x32xf32>
    %489 = arith.mulf %488, %481 : vector<16x32xf32>
    %cst_280 = arith.constant -0.284496725 : f32
    %490 = vector.broadcast %cst_280 : f32 to vector<16x32xf32>
    %491 = arith.addf %489, %490 : vector<16x32xf32>
    %492 = arith.mulf %491, %481 : vector<16x32xf32>
    %cst_281 = arith.constant 0.254829586 : f32
    %493 = vector.broadcast %cst_281 : f32 to vector<16x32xf32>
    %494 = arith.addf %492, %493 : vector<16x32xf32>
    %495 = arith.mulf %494, %481 : vector<16x32xf32>
    %496 = arith.mulf %475, %475 : vector<16x32xf32>
    %cst_282 = arith.constant 0.000000e+00 : f32
    %497 = vector.broadcast %cst_282 : f32 to vector<16x32xf32>
    %498 = arith.subf %497, %496 : vector<16x32xf32>
    %499 = math.exp %498 : vector<16x32xf32>
    %500 = arith.mulf %495, %499 : vector<16x32xf32>
    %cst_283 = arith.constant 1.000000e+00 : f32
    %501 = vector.broadcast %cst_283 : f32 to vector<16x32xf32>
    %502 = arith.subf %501, %500 : vector<16x32xf32>
    %cst_284 = arith.constant 0.000000e+00 : f32
    %503 = vector.broadcast %cst_284 : f32 to vector<16x32xf32>
    %504 = arith.cmpf olt, %474, %503 : vector<16x32xf32>
    %cst_285 = arith.constant 0.000000e+00 : f32
    %505 = vector.broadcast %cst_285 : f32 to vector<16x32xf32>
    %506 = arith.subf %505, %502 : vector<16x32xf32>
    %507 = arith.select %504, %506, %502 : vector<16x32xi1>, vector<16x32xf32>
    %cst_286 = arith.constant 1.000000e+00 : f32
    %508 = vector.broadcast %cst_286 : f32 to vector<16x32xf32>
    %509 = arith.addf %508, %507 : vector<16x32xf32>
    %510 = arith.mulf %472, %509 : vector<16x32xf32>
    %c0_287 = arith.constant 0 : index
    %c0_288 = arith.constant 0 : index
    %511 = vector.load %arg29[%c0_287, %c0_288] : memref<1x32xf32, #tpu.memory_space<vmem>>, vector<1x32xf32>
    %c0_289 = arith.constant 0 : index
    %c0_290 = arith.constant 0 : index
    %512 = vector.load %arg30[%c0_289, %c0_290] : memref<1x32xf32, #tpu.memory_space<vmem>>, vector<1x32xf32>
    %cst_291 = arith.constant dense<0.000000e+00> : vector<16xf32>
    %513 = vector.multi_reduction <add>, %510, %cst_291 [1] : vector<16x32xf32> to vector<16xf32>
    %514 = vector.shape_cast %513 : vector<16xf32> to vector<16x1xf32>
    %cst_292 = arith.constant 3.200000e+01 : f32
    %515 = vector.broadcast %cst_292 : f32 to vector<16x1xf32>
    %516 = arith.divf %514, %515 : vector<16x1xf32>
    %517 = vector.broadcast %516 : vector<16x1xf32> to vector<16x32xf32>
    %518 = arith.subf %510, %517 : vector<16x32xf32>
    %519 = arith.mulf %518, %518 : vector<16x32xf32>
    %cst_293 = arith.constant dense<0.000000e+00> : vector<16xf32>
    %520 = vector.multi_reduction <add>, %519, %cst_293 [1] : vector<16x32xf32> to vector<16xf32>
    %521 = vector.shape_cast %520 : vector<16xf32> to vector<16x1xf32>
    %cst_294 = arith.constant 3.200000e+01 : f32
    %522 = vector.broadcast %cst_294 : f32 to vector<16x1xf32>
    %523 = arith.divf %521, %522 : vector<16x1xf32>
    %cst_295 = arith.constant 9.99999974E-6 : f32
    %524 = vector.broadcast %cst_295 : f32 to vector<16x1xf32>
    %525 = arith.addf %523, %524 : vector<16x1xf32>
    %526 = math.sqrt %525 : vector<16x1xf32>
    %527 = vector.broadcast %526 : vector<16x1xf32> to vector<16x32xf32>
    %528 = arith.divf %518, %527 : vector<16x32xf32>
    %529 = vector.broadcast %511 : vector<1x32xf32> to vector<16x32xf32>
    %530 = arith.mulf %528, %529 : vector<16x32xf32>
    %531 = vector.broadcast %512 : vector<1x32xf32> to vector<16x32xf32>
    %532 = arith.addf %530, %531 : vector<16x32xf32>
    %c0_296 = arith.constant 0 : index
    %c0_297 = arith.constant 0 : index
    %533 = vector.load %arg31[%c0_296, %c0_297] : memref<32x128xf32, #tpu.memory_space<vmem>>, vector<32x128xf32>
    %cst_298 = arith.constant dense<0.000000e+00> : vector<16x128xf32>
    %534 = tpu.matmul %532, %533, %cst_298 {dimension_numbers = #tpu.dot_dimension_numbers<[1], [0], [0], [1], [0, 0, 1, 1], [], []>} : vector<16x32xf32>, vector<32x128xf32>, vector<16x128xf32> -> vector<16x128xf32>
    %c0_299 = arith.constant 0 : index
    %c0_300 = arith.constant 0 : index
    %535 = vector.load %arg32[%c0_299, %c0_300] : memref<1x128xf32, #tpu.memory_space<vmem>>, vector<1x128xf32>
    %536 = vector.broadcast %535 : vector<1x128xf32> to vector<16x128xf32>
    %537 = arith.addf %534, %536 : vector<16x128xf32>
    %c0_301 = arith.constant 0 : index
    %c0_302 = arith.constant 0 : index
    %c0_303 = arith.constant 0 : index
    %538 = vector.load %arg33[%c0_301, %c0_302, %c0_303] : memref<1x16x128xf32, #tpu.memory_space<vmem>>, vector<1x16x128xf32>
    %539 = vector.shape_cast %538 : vector<1x16x128xf32> to vector<16x128xf32>
    %540 = vector.shape_cast %537 : vector<16x128xf32> to vector<1x16x128xf32>
    tpu.vector_store %arg33[%c0_301, %c0_302, %c0_303], %540 {strides = array<i32>} : memref<1x16x128xf32, #tpu.memory_space<vmem>>, vector<1x16x128xf32>,
    return
  }
  func.func @transform_0(%arg0: i32) -> (i32, i32, i32) {
    %c0_i32 = arith.constant 0 : i32
    %c0_i32_0 = arith.constant 0 : i32
    %c0_i32_1 = arith.constant 0 : i32
    return %arg0, %c0_i32, %c0_i32_0 : i32, i32, i32
  }
  func.func @transform_1(%arg0: i32) -> (i32, i32, i32) {
    %c0_i32 = arith.constant 0 : i32
    %c0_i32_0 = arith.constant 0 : i32
    %c0_i32_1 = arith.constant 0 : i32
    return %arg0, %c0_i32, %c0_i32_0 : i32, i32, i32
  }
  func.func @transform_2(%arg0: i32) -> (i32, i32, i32) {
    %c0_i32 = arith.constant 0 : i32
    %c0_i32_0 = arith.constant 0 : i32
    %c0_i32_1 = arith.constant 0 : i32
    return %arg0, %c0_i32, %c0_i32_0 : i32, i32, i32
  }
  func.func @transform_3(%arg0: i32) -> (i32, i32) {
    %c0_i32 = arith.constant 0 : i32
    %c0_i32_0 = arith.constant 0 : i32
    %c0_i32_1 = arith.constant 0 : i32
    return %c0_i32, %c0_i32_0 : i32, i32
  }
  func.func @transform_4(%arg0: i32) -> (i32, i32) {
    %c0_i32 = arith.constant 0 : i32
    %c0_i32_0 = arith.constant 0 : i32
    %c0_i32_1 = arith.constant 0 : i32
    return %c0_i32, %c0_i32_0 : i32, i32
  }
  func.func @transform_5(%arg0: i32) -> (i32, i32) {
    %c0_i32 = arith.constant 0 : i32
    %c0_i32_0 = arith.constant 0 : i32
    %c0_i32_1 = arith.constant 0 : i32
    return %c0_i32, %c0_i32_0 : i32, i32
  }
  func.func @transform_6(%arg0: i32) -> (i32, i32) {
    %c0_i32 = arith.constant 0 : i32
    %c0_i32_0 = arith.constant 0 : i32
    %c0_i32_1 = arith.constant 0 : i32
    return %c0_i32, %c0_i32_0 : i32, i32
  }
  func.func @transform_7(%arg0: i32) -> (i32, i32) {
    %c0_i32 = arith.constant 0 : i32
    %c0_i32_0 = arith.constant 0 : i32
    %c0_i32_1 = arith.constant 0 : i32
    return %c0_i32, %c0_i32_0 : i32, i32
  }
  func.func @transform_8(%arg0: i32) -> (i32, i32) {
    %c0_i32 = arith.constant 0 : i32
    %c0_i32_0 = arith.constant 0 : i32
    %c0_i32_1 = arith.constant 0 : i32
    return %c0_i32, %c0_i32_0 : i32, i32
  }
  func.func @transform_9(%arg0: i32) -> (i32, i32) {
    %c0_i32 = arith.constant 0 : i32
    %c0_i32_0 = arith.constant 0 : i32
    %c0_i32_1 = arith.constant 0 : i32
    return %c0_i32, %c0_i32_0 : i32, i32
  }
  func.func @transform_10(%arg0: i32) -> (i32, i32) {
    %c0_i32 = arith.constant 0 : i32
    %c0_i32_0 = arith.constant 0 : i32
    %c0_i32_1 = arith.constant 0 : i32
    return %c0_i32, %c0_i32_0 : i32, i32
  }
  func.func @transform_11(%arg0: i32) -> (i32, i32) {
    %c0_i32 = arith.constant 0 : i32
    %c0_i32_0 = arith.constant 0 : i32
    %c0_i32_1 = arith.constant 0 : i32
    return %c0_i32, %c0_i32_0 : i32, i32
  }
  func.func @transform_12(%arg0: i32) -> (i32, i32) {
    %c0_i32 = arith.constant 0 : i32
    %c0_i32_0 = arith.constant 0 : i32
    %c0_i32_1 = arith.constant 0 : i32
    return %c0_i32, %c0_i32_0 : i32, i32
  }
  func.func @transform_13(%arg0: i32) -> (i32, i32) {
    %c0_i32 = arith.constant 0 : i32
    %c0_i32_0 = arith.constant 0 : i32
    %c0_i32_1 = arith.constant 0 : i32
    return %c0_i32, %c0_i32_0 : i32, i32
  }
  func.func @transform_14(%arg0: i32) -> (i32, i32, i32) {
    %c0_i32 = arith.constant 0 : i32
    %c0_i32_0 = arith.constant 0 : i32
    %c0_i32_1 = arith.constant 0 : i32
    %c0_i32_2 = arith.constant 0 : i32
    return %c0_i32, %c0_i32_0, %c0_i32_1 : i32, i32, i32
  }
  func.func @transform_15(%arg0: i32) -> (i32, i32, i32) {
    %c0_i32 = arith.constant 0 : i32
    %c0_i32_0 = arith.constant 0 : i32
    %c0_i32_1 = arith.constant 0 : i32
    %c0_i32_2 = arith.constant 0 : i32
    return %c0_i32, %c0_i32_0, %c0_i32_1 : i32, i32, i32
  }
  func.func @transform_16(%arg0: i32) -> (i32, i32, i32) {
    %c0_i32 = arith.constant 0 : i32
    %c0_i32_0 = arith.constant 0 : i32
    %c0_i32_1 = arith.constant 0 : i32
    %c0_i32_2 = arith.constant 0 : i32
    return %c0_i32, %c0_i32_0, %c0_i32_1 : i32, i32, i32
  }
  func.func @transform_17(%arg0: i32) -> (i32, i32, i32) {
    %c0_i32 = arith.constant 0 : i32
    %c0_i32_0 = arith.constant 0 : i32
    %c0_i32_1 = arith.constant 0 : i32
    %c0_i32_2 = arith.constant 0 : i32
    return %c0_i32, %c0_i32_0, %c0_i32_1 : i32, i32, i32
  }
  func.func @transform_18(%arg0: i32) -> (i32, i32, i32) {
    %c0_i32 = arith.constant 0 : i32
    %c0_i32_0 = arith.constant 0 : i32
    %c0_i32_1 = arith.constant 0 : i32
    %c0_i32_2 = arith.constant 0 : i32
    return %c0_i32, %c0_i32_0, %c0_i32_1 : i32, i32, i32
  }
  func.func @transform_19(%arg0: i32) -> (i32, i32, i32) {
    %c0_i32 = arith.constant 0 : i32
    %c0_i32_0 = arith.constant 0 : i32
    %c0_i32_1 = arith.constant 0 : i32
    %c0_i32_2 = arith.constant 0 : i32
    return %c0_i32, %c0_i32_0, %c0_i32_1 : i32, i32, i32
  }
  func.func @transform_20(%arg0: i32) -> (i32, i32, i32) {
    %c0_i32 = arith.constant 0 : i32
    %c0_i32_0 = arith.constant 0 : i32
    %c0_i32_1 = arith.constant 0 : i32
    %c0_i32_2 = arith.constant 0 : i32
    return %c0_i32, %c0_i32_0, %c0_i32_1 : i32, i32, i32
  }
  func.func @transform_21(%arg0: i32) -> (i32, i32, i32) {
    %c0_i32 = arith.constant 0 : i32
    %c0_i32_0 = arith.constant 0 : i32
    %c0_i32_1 = arith.constant 0 : i32
    %c0_i32_2 = arith.constant 0 : i32
    return %c0_i32, %c0_i32_0, %c0_i32_1 : i32, i32, i32
  }
  func.func @transform_22(%arg0: i32) -> (i32, i32, i32) {
    %c0_i32 = arith.constant 0 : i32
    %c0_i32_0 = arith.constant 0 : i32
    %c0_i32_1 = arith.constant 0 : i32
    %c0_i32_2 = arith.constant 0 : i32
    return %c0_i32, %c0_i32_0, %c0_i32_1 : i32, i32, i32
  }
  func.func @transform_23(%arg0: i32) -> (i32, i32, i32) {
    %c0_i32 = arith.constant 0 : i32
    %c0_i32_0 = arith.constant 0 : i32
    %c0_i32_1 = arith.constant 0 : i32
    %c0_i32_2 = arith.constant 0 : i32
    return %c0_i32, %c0_i32_0, %c0_i32_1 : i32, i32, i32
  }
  func.func @transform_24(%arg0: i32) -> (i32, i32, i32) {
    %c0_i32 = arith.constant 0 : i32
    %c0_i32_0 = arith.constant 0 : i32
    %c0_i32_1 = arith.constant 0 : i32
    %c0_i32_2 = arith.constant 0 : i32
    return %c0_i32, %c0_i32_0, %c0_i32_1 : i32, i32, i32
  }
  func.func @transform_25(%arg0: i32) -> (i32, i32, i32) {
    %c0_i32 = arith.constant 0 : i32
    %c0_i32_0 = arith.constant 0 : i32
    %c0_i32_1 = arith.constant 0 : i32
    %c0_i32_2 = arith.constant 0 : i32
    return %c0_i32, %c0_i32_0, %c0_i32_1 : i32, i32, i32
  }
  func.func @transform_26(%arg0: i32) -> (i32, i32, i32) {
    %c0_i32 = arith.constant 0 : i32
    %c0_i32_0 = arith.constant 0 : i32
    %c0_i32_1 = arith.constant 0 : i32
    %c0_i32_2 = arith.constant 0 : i32
    return %c0_i32, %c0_i32_0, %c0_i32_1 : i32, i32, i32
  }
  func.func @transform_27(%arg0: i32) -> (i32, i32, i32) {
    %c0_i32 = arith.constant 0 : i32
    %c0_i32_0 = arith.constant 0 : i32
    %c0_i32_1 = arith.constant 0 : i32
    %c0_i32_2 = arith.constant 0 : i32
    return %c0_i32, %c0_i32_0, %c0_i32_1 : i32, i32, i32
  }
  func.func @transform_28(%arg0: i32) -> (i32, i32) {
    %c0_i32 = arith.constant 0 : i32
    %c0_i32_0 = arith.constant 0 : i32
    %c0_i32_1 = arith.constant 0 : i32
    return %c0_i32, %c0_i32_0 : i32, i32
  }
  func.func @transform_29(%arg0: i32) -> (i32, i32) {
    %c0_i32 = arith.constant 0 : i32
    %c0_i32_0 = arith.constant 0 : i32
    %c0_i32_1 = arith.constant 0 : i32
    return %c0_i32, %c0_i32_0 : i32, i32
  }
  func.func @transform_30(%arg0: i32) -> (i32, i32) {
    %c0_i32 = arith.constant 0 : i32
    %c0_i32_0 = arith.constant 0 : i32
    %c0_i32_1 = arith.constant 0 : i32
    return %c0_i32, %c0_i32_0 : i32, i32
  }
  func.func @transform_31(%arg0: i32) -> (i32, i32) {
    %c0_i32 = arith.constant 0 : i32
    %c0_i32_0 = arith.constant 0 : i32
    %c0_i32_1 = arith.constant 0 : i32
    return %c0_i32, %c0_i32_0 : i32, i32
  }
  func.func @transform_32(%arg0: i32) -> (i32, i32, i32) {
    %c0_i32 = arith.constant 0 : i32
    %c0_i32_0 = arith.constant 0 : i32
    %c0_i32_1 = arith.constant 0 : i32
    return %arg0, %c0_i32, %c0_i32_0 : i32, i32, i32
  }
}

</mosaic_0001>

<bundles_post_ra>
// kernel: tpu_custom_call.1
= control target key start
LH: loop header
LB: loop body
LE: loop exit
PB: predicated region body
PF: predicated region fallthrough
CT: control target
= control target key end

     0   :  { %s15043_s6 = smov 1   ;;  %s15044_s10 = smov 2   ;;  %s19619_s0 = inlined_call_operand.smem [shape: u32[33], index: -1, kind: input, shape index: {}] }
   0x1   :  { %s15101_s5 = sld [smem:[%s19619_s0]]   ;;  %s15045_s14 = smov 3  }
   0x2   :  { %s15106_s9 = sld [smem:[%s19619_s0 + %s15043_s6]]   ;;  %s15046_s18 = smov 4  }
   0x3   :  { %s15111_s13 = sld [smem:[%s19619_s0 + %s15044_s10]]   ;;  %s15047_s22 = smov 5  }
   0x4   :  { %s15116_s17 = sld [smem:[%s19619_s0 + %s15045_s14]]   ;;  %s15048_s26 = smov 6  }
   0x5   :  { %s15121_s21 = sld [smem:[%s19619_s0 + %s15046_s18]]   ;;  %s15049_s30 = smov 7  }
   0x6   :  { %s15126_s25 = sld [smem:[%s19619_s0 + %s15047_s22]]   ;;  %s15050_s4 = smov 8  }
   0x7   :  { %19887 = sst [smem:[#allocation27_spill]] %s15101_s5  ;;  %s15051_s10 = smov 9  }
   0x8   :  { %19888 = sst [smem:[#allocation28_spill]] %s15106_s9  ;;  %s15052_s15 = smov 10  }
   0x9   :  { %s15131_s29 = sld [smem:[%s19619_s0 + %s15048_s26]]   ;;  %s15053_s20 = smov 11  }
   0xa   :  { %s15136_s3 = sld [smem:[%s19619_s0 + %s15049_s30]]   ;;  %s15054_s26 = smov 12  }
   0xb   :  { %s15141_s8 = sld [smem:[%s19619_s0 + %s15050_s4]]   ;;  %s15055_s1 = smov 13  }
   0xc   :  { %s15146_s14 = sld [smem:[%s19619_s0 + %s15051_s10]]   ;;  %s15056_s7 = smov 14  }
   0xd   :  { %s15151_s19 = sld [smem:[%s19619_s0 + %s15052_s15]]   ;;  %s15057_s15 = smov 15  }
   0xe   :  { %s15156_s24 = sld [smem:[%s19619_s0 + %s15053_s20]]   ;;  %s15058_s22 = smov 16  }
   0xf   :  { %s15161_s30 = sld [smem:[%s19619_s0 + %s15054_s26]]   ;;  %s15059_s28 = smov 17  }
  0x10   :  { %19889 = sst [smem:[#allocation29_spill]] %s15136_s3 }
  0x11   :  { %19890 = sst [smem:[#allocation30_spill]] %s15141_s8 }
  0x12   :  { %s15166_s6 = sld [smem:[%s19619_s0 + %s15055_s1]]  }
  0x13   :  { %s15171_s12 = sld [smem:[%s19619_s0 + %s15056_s7]]   ;;  %s15060_s7 = smov 18  }
  0x14   :  { %s15176_s20 = sld [smem:[%s19619_s0 + %s15057_s15]]   ;;  %s15061_s15 = smov 19  }
  0x15   :  { %s15181_s27 = sld [smem:[%s19619_s0 + %s15058_s22]]   ;;  %s15062_s22 = smov 20  }
  0x16   :  { %s15186_s4 = sld [smem:[%s19619_s0 + %s15059_s28]]   ;;  %s15063_s28 = smov 21  }
  0x18   :  { %19891 = sst [smem:[#allocation31_spill]] %s15166_s6 }
  0x19   :  { %19892 = sst [smem:[#allocation32_spill]] %s15171_s12 }
  0x1a   :  { %19893 = sst [smem:[#allocation33_spill]] %s15176_s20 }
  0x1b   :  { %19894 = sst [smem:[#allocation34_spill]] %s15181_s27 }
  0x1c   :  { %19895 = sst [smem:[#allocation35_spill]] %s15186_s4 }
  0x1d   :  { %s15191_s12 = sld [smem:[%s19619_s0 + %s15060_s7]]   ;;  %s15064_s7 = smov 22  }
  0x1e   :  { %s15196_s20 = sld [smem:[%s19619_s0 + %s15061_s15]]   ;;  %s15065_s15 = smov 23  }
  0x1f   :  { %s15201_s27 = sld [smem:[%s19619_s0 + %s15062_s22]]   ;;  %s15066_s22 = smov 24  }
  0x20   :  { %s15206_s4 = sld [smem:[%s19619_s0 + %s15063_s28]]   ;;  %s15067_s28 = smov 25  }
  0x23   :  { %19896 = sst [smem:[#allocation36_spill]] %s15191_s12 }
  0x24   :  { %19897 = sst [smem:[#allocation37_spill]] %s15196_s20 }
  0x25   :  { %19898 = sst [smem:[#allocation38_spill]] %s15201_s27 }
  0x26   :  { %19899 = sst [smem:[#allocation39_spill]] %s15206_s4 }
  0x27   :  { %s15211_s12 = sld [smem:[%s19619_s0 + %s15064_s7]]   ;;  %s15068_s7 = smov 26  }
  0x28   :  { %s15216_s20 = sld [smem:[%s19619_s0 + %s15065_s15]]   ;;  %s15069_s15 = smov 27  }
  0x29   :  { %s15221_s27 = sld [smem:[%s19619_s0 + %s15066_s22]]   ;;  %s15070_s22 = smov 28  }
  0x2a   :  { %s15226_s4 = sld [smem:[%s19619_s0 + %s15067_s28]]   ;;  %s15071_s28 = smov 29  }
  0x2b   :  { %s15241_s9 = sld [smem:[%s19619_s0 + %s15070_s22]]   ;;  %s15074_s22 = smov 32  }
  0x2d   :  { %19900 = sst [smem:[#allocation40_spill]] %s15211_s12 }
  0x2e   :  { %19901 = sst [smem:[#allocation41_spill]] %s15216_s20 }
  0x2f   :  { %s15231_s12 = sld [smem:[%s19619_s0 + %s15068_s7]]   ;;  %s15072_s7 = smov 30  }
  0x30   :  { %19902 = sst [smem:[#allocation42_spill]] %s15226_s4 }
  0x31   :  { %s15236_s20 = sld [smem:[%s19619_s0 + %s15069_s15]]   ;;  %s15073_s15 = smov 31  }
  0x32   :  { %19904 = sst [smem:[#allocation44_spill]] %s15241_s9 }
  0x33   :  { %s15246_s4 = sld [smem:[%s19619_s0 + %s15071_s28]]  }
  0x34   :  { %s15251_s3 = sld [smem:[%s19619_s0 + %s15072_s7]]  }
  0x35   :  { %s15261_s9 = sld [smem:[%s19619_s0 + %s15074_s22]]  }
  0x37   :  { %19903 = sst [smem:[#allocation43_spill]] %s15236_s20 }
  0x38   :  { %s15256_s20 = sld [smem:[%s19619_s0 + %s15073_s15]]  }
  0x39   :  { %19905 = sst [smem:[#allocation45_spill]] %s15246_s4 }
  0x3a   :  { %19906 = sst [smem:[#allocation46_spill]] %s15251_s3 }
  0x3b   :  { %19907 = sst [smem:[#allocation47_spill]] %s15261_s9 }
  0x3c   :  { %70 = vsyncpa [#allocation3], 0 }
  0x3d   :  { %71 = vsyncpa [#allocation6], 0 }
  0x3e   :  { %72 = vsyncpa [#allocation9], 0 }
  0x3f   :  { %73 = vsyncpa [#allocation12], 0 }
  0x40   :  { %74 = vsyncpa [#allocation15], 0 }
  0x41   :  { %75 = vsyncpa [#allocation18], 0 }
  0x42   :  { %76 = vsyncpa [#allocation4], 0 }
  0x43   :  { %78 = vsyncpa [#allocation4 + $0x1], 0  ;;  %s15263_s28 = smov 0   ;;  %s15265_s1 = smov 0  }
  0x44   :  { %s15267_s2 = smov 0   ;;  %s15269_s7 = smov 0  }
  0x45 LB: > { %s19908_s9 = sld [smem:[#allocation47_spill]]  ;;  %s19909_s4 = sld [smem:[#allocation45_spill]]  ;;  %s15029_s28 = sphi %s15263_s28, %s20423_s28   ;;  %s15041_s7 = sphi %s15269_s7, %s20420_s7   ;;  %s15037_s2 = sphi %s15267_s2, %s20422_s2   ;;  %s15033_s1 = sphi %s15265_s1, %s20424_s1  }
  0x46   : > { %s19910_s3 = sld [smem:[#allocation46_spill]]  ;;  %s19912_s6 = sld [smem:[#allocation31_spill]] }
  0x47   : > { %s19911_s8 = sld [smem:[#allocation30_spill]]  ;;  %19913 = sst [smem:[#allocation48_spill]] %s15029_s28 }
  0x48   : > { %19914 = sst [smem:[#allocation49_spill]] %s15037_s2  ;;  %s15284_s0 = sadd.s32 4294967295, %s15041_s7  }
  0x49   : > { %19915 = sst [smem:[#allocation50_spill]] %s15041_s7  ;;  %s10498_s10 = sadd.s32 4294967294, %s15041_s7  }
  0x4a   : > { %s15288_s11 = sadd.s32 1, %s15041_s7   ;;  %s778_s15 = sadd.s32 1, %s15037_s2 }
  0x4b   : > { %19916 = sst [smem:[#allocation51_spill]] %s15288_s11  ;;  %s775_s16 = ssub.s32 %s15041_s7, %s15288_s11 }
  0x4c   : > { %p788_p0 = scmp.ne.s32.totalorder %s15037_s2, %s15033_s1  ;;  %p776_p1 = scmp.eq.s32.totalorder %s775_s16, 0 }
  0x4d   : > { %p789_p2 = scmp.eq.s32.totalorder %s15284_s0, 7  ;;  %p794_p3 = scmp.ne.s32.totalorder %s15033_s1, %s15029_s28 }
  0x4e   : > { %p795_p4 = scmp.eq.s32.totalorder %s10498_s10, 7  ;;  %p10499_p7 = scmp.ge.s32.totalorder %s15041_s7, 1 }
  0x4f   : > { %s15299_s18 = scalar_select %p776_p1, %s15037_s2, %s778_s15  }
  0x50   : > { %p15301_p5 = por %p789_p2, %p788_p0  ;;  %p15305_p6 = por %p795_p4, %p794_p3 }
  0x51   : > { %19917 = sst [smem:[#allocation52_spill]] %s15299_s18  ;;  %p802_p8 = scmp.lt.s32.totalorder %s15041_s7, 9 }
  0x52   : > { %s19918_s22 = scalar_select %p15301_p5, 1, 0 }
  0x53   : > { %s19920_s23 = scalar_select %p15305_p6, 1, 0 }
  0x54   : > { %19919 = sst [smem:[#allocation53_spill]] %s19918_s22  ;;  %p19636_p9 = scmp.eq.s32.totalorder %s15284_s0, 0 }
  0x55   : > { %19921 = sst [smem:[#allocation54_spill]] %s19920_s23  ;;  %p15312_p10 = pnand %p10499_p7, %p802_p8 }
  0x56   : > { %s15075_s10 = smov [#allocation5]   ;;  %s15076_s18 = smov [#allocation8]  }
  0x57   : > { %s19922_s26 = scalar_select %p15312_p10, 1, 0 }
  0x58   : > { %s833_s15 = sshll.u32 %s15075_s10, 4  ;;  %p13208_p11 = pneg %p15312_p10  ;;  %s15318_s15 = int_to_ptr.vmem [resolvable:$true] %s833_s15 }
  0x59   : > { %s861_s2 = sshll.u32 %s15076_s18, 4  ;;  %s15077_s11 = smov [#allocation11]   ;;  %s15326_s2 = int_to_ptr.vmem [resolvable:$true] %s861_s2 }
  0x5a   : > { %p15322_p12 = pnand %p19636_p9, %p13208_p11  ;;  %s15328_s23 = sshll.u32 %s15077_s11, 4  ;;  %s886_s23 = int_to_ptr.vmem [resolvable:$true] %s15328_s23 }
  0x5b   : > { %s14675_s28 = scalar_lea.hbm %s15131_s29, 256 }
  0x5c   : > { %p14676_p13 = scmp.ne.s32.totalorder %s15131_s29, %s14675_s28  ;;  %p15334_p0 = pneg %p15322_p12 }
  0x5d   : > { %p14682_p3 = scmp.lt.u32.totalorder %s14675_s28, %s15131_s29 }
  0x5e   : > { %p14678_p1 = pnand %p15334_p0, %p14676_p13 }
  0x60   : > { %p14679_p2 = pneg %p14678_p1 }
  0x62   : > { %p14684_p4 = pnand %p14682_p3, %p14679_p2 }
  0x64   : > { %14687 = shalt.err (!%p14684_p4)
}
  0x65   : > { %s14688_s11 = scalar_lea.vmem %s15318_s15, 256  ;;  %p14696_p9 = scmp.lt.s32.totalorder %s15318_s15, %s15318_s15 }
  0x66   : > { %p14689_p7 = scmp.ne.s32.totalorder %s15318_s15, %s14688_s11  ;;  %p14697_p6 = scmp.lt.s32.totalorder %s14688_s11, %s14688_s11 }
  0x68   : > { %p14691_p8 = pnand %p14689_p7, %p15334_p0  ;;  %p14698_p5 = por %p14697_p6, %p14696_p9 }
  0x6a   : > { %p14692_p11 = pneg %p14691_p8 }
  0x6c   : > { %p14699_p10 = pnand %p14698_p5, %p14692_p11 }
  0x6e   : > { %14702 = shalt.err (!%p14699_p10)
}
  0x6f   : > { %s19642_s18 = smov 128   ;;  %s19644_s28 = smov 8  }
  0x70   : > { %13214 = dma.hbm_to_vmem [thread:$0]  (!%p15322_p12), %s15131_s29, 256, %s15318_s15, [#allocation6], %s19642_s18, %s19642_s18, %s19644_s28  }
  0x71   : > { %s14703_s7 = scalar_lea.hbm %s15146_s14, 16 }
  0x72   : > { %p14704_p13 = scmp.ne.s32.totalorder %s15146_s14, %s14703_s7  ;;  %p14710_p9 = scmp.lt.u32.totalorder %s14703_s7, %s15146_s14 }
  0x74   : > { %p14706_p6 = pnand %p14704_p13, %p15334_p0 }
  0x76   : > { %p14707_p5 = pneg %p14706_p6 }
  0x78   : > { %p14712_p10 = pnand %p14710_p9, %p14707_p5 }
  0x7a   : > { %14715 = shalt.err (!%p14712_p10)
}
  0x7b   : > { %s14716_s11 = scalar_lea.vmem %s15326_s2, 16  ;;  %s14723_s22 = scalar_lea.vmem %s15326_s2, 32 }
  0x7c   : > { %p14717_p1 = scmp.ne.s32.totalorder %s15326_s2, %s14716_s11  ;;  %p14724_p4 = scmp.lt.s32.totalorder %s15326_s2, %s15326_s2 }
  0x7d   : > { %p14725_p7 = scmp.lt.s32.totalorder %s14723_s22, %s14716_s11 }
  0x7e   : > { %p14719_p2 = pnand %p14717_p1, %p15334_p0 }
  0x7f   : > { %p14726_p8 = por %p14725_p7, %p14724_p4 }
  0x80   : > { %p14720_p3 = pneg %p14719_p2 }
  0x82   : > { %p14727_p11 = pnand %p14726_p8, %p14720_p3 }
  0x84   : > { %14730 = shalt.err (!%p14727_p11)
}
  0x85   : > { %13220 = dma.hbm_to_vmem [thread:$0]  (!%p15322_p12), %s15146_s14, 16, %s15326_s2, [#allocation9]  }
  0x86   : > { %s14731_s7 = scalar_lea.hbm %s15156_s24, 16 }
  0x87   : > { %p14732_p13 = scmp.ne.s32.totalorder %s15156_s24, %s14731_s7  ;;  %p14738_p9 = scmp.lt.u32.totalorder %s14731_s7, %s15156_s24 }
  0x89   : > { %p14734_p6 = pnand %p14732_p13, %p15334_p0 }
  0x8b   : > { %p14735_p5 = pneg %p14734_p6 }
  0x8d   : > { %p14740_p10 = pnand %p14738_p9, %p14735_p5 }
  0x8f   : > { %14743 = shalt.err (!%p14740_p10)
}
  0x90   : > { %s14744_s22 = scalar_lea.vmem %s886_s23, 16  ;;  %s14751_s15 = scalar_lea.vmem %s886_s23, 32 }
  0x91   : > { %p14745_p1 = scmp.ne.s32.totalorder %s886_s23, %s14744_s22  ;;  %p14752_p4 = scmp.lt.s32.totalorder %s886_s23, %s886_s23 }
  0x92   : > { %p14753_p7 = scmp.lt.s32.totalorder %s14751_s15, %s14744_s22 }
  0x93   : > { %p14747_p2 = pnand %p14745_p1, %p15334_p0 }
  0x94   : > { %p14754_p8 = por %p14753_p7, %p14752_p4 }
  0x95   : > { %p14748_p3 = pneg %p14747_p2 }
  0x97   : > { %p14755_p11 = pnand %p14754_p8, %p14748_p3 }
  0x99   : > { %14758 = shalt.err (!%p14755_p11)
}
  0x9a   : > { %13226 = dma.hbm_to_vmem [thread:$0]  (!%p15322_p12), %s15156_s24, 16, %s886_s23, [#allocation12]  }
  0x9b   : > { %s15080_s2 = smov [#allocation14]   ;;  %s15081_s7 = smov [#allocation2]  }
  0x9c   : > { %s907_s11 = sshll.u32 %s15080_s2, 4  ;;  %s820_s18 = sshll.u32 %s15081_s7, 4  ;;  %s908_s11 = int_to_ptr.vmem [resolvable:$true] %s907_s11  ;;  %s821_s18 = int_to_ptr.vmem [resolvable:$true] %s820_s18 }
  0x9d   : > { %s14759_s28 = scalar_lea.hbm %s19912_s6, 16 }
  0x9e   : > { %p14760_p13 = scmp.ne.s32.totalorder %s19912_s6, %s14759_s28  ;;  %p14766_p9 = scmp.lt.u32.totalorder %s14759_s28, %s19912_s6 }
  0xa0   : > { %p14762_p6 = pnand %p14760_p13, %p15334_p0 }
  0xa2   : > { %p14763_p5 = pneg %p14762_p6 }
  0xa4   : > { %p14768_p10 = pnand %p14766_p9, %p14763_p5 }
  0xa6   : > { %14771 = shalt.err (!%p14768_p10)
}
  0xa7   : > { %s14772_s22 = scalar_lea.vmem %s908_s11, 16  ;;  %s14779_s23 = scalar_lea.vmem %s908_s11, 32 }
  0xa8   : > { %p14773_p1 = scmp.ne.s32.totalorder %s908_s11, %s14772_s22  ;;  %p14780_p4 = scmp.lt.s32.totalorder %s908_s11, %s908_s11 }
  0xa9   : > { %p14781_p7 = scmp.lt.s32.totalorder %s14779_s23, %s14772_s22 }
  0xaa   : > { %p14775_p2 = pnand %p14773_p1, %p15334_p0 }
  0xab   : > { %p14782_p8 = por %p14781_p7, %p14780_p4 }
  0xac   : > { %p14776_p3 = pneg %p14775_p2 }
  0xae   : > { %p14783_p11 = pnand %p14782_p8, %p14776_p3 }
  0xb0   : > { %14786 = shalt.err (!%p14783_p11)
}
  0xb1   : > { %13232 = dma.hbm_to_vmem [thread:$0]  (!%p15322_p12), %s19912_s6, 16, %s908_s11, [#allocation15]  }
  0xb2   : > { %s14787_s28 = scalar_lea.hbm %s15126_s25, 512 }
  0xb3   : > { %p14788_p13 = scmp.ne.s32.totalorder %s15126_s25, %s14787_s28  ;;  %p14794_p9 = scmp.lt.u32.totalorder %s14787_s28, %s15126_s25 }
  0xb5   : > { %p14790_p6 = pnand %p14788_p13, %p15334_p0 }
  0xb7   : > { %p14791_p5 = pneg %p14790_p6 }
  0xb9   : > { %p14796_p10 = pnand %p14794_p9, %p14791_p5 }
  0xbb   : > { %14799 = shalt.err (!%p14796_p10)
}
  0xbc   : > { %s14800_s15 = scalar_lea.vmem %s821_s18, 512  ;;  %p14808_p4 = scmp.lt.s32.totalorder %s821_s18, %s821_s18 }
  0xbd   : > { %p14801_p1 = scmp.ne.s32.totalorder %s821_s18, %s14800_s15  ;;  %p14809_p7 = scmp.lt.s32.totalorder %s14800_s15, %s14800_s15 }
  0xbf   : > { %p14803_p2 = pnand %p14801_p1, %p15334_p0  ;;  %p14810_p8 = por %p14809_p7, %p14808_p4 }
  0xc1   : > { %p14804_p3 = pneg %p14803_p2 }
  0xc3   : > { %p14811_p11 = pnand %p14810_p8, %p14804_p3 }
  0xc5   : > { %14814 = shalt.err (!%p14811_p11)
}
  0xc6   : > { %s15082_s2 = smov 256   ;;  %s15083_s11 = smov 16  }
  0xc7   : > { %13211 = dma.hbm_to_vmem [thread:$0]  (!%p15322_p12), %s15126_s25, 512, %s821_s18, [#allocation3], %s15082_s2, %s15082_s2, %s15083_s11  }
  0xc8   : > { %s15084_s7 = smov [#allocation7]   ;;  %s15085_s23 = smov [#allocation10]  }
  0xc9   : > { %s850_s22 = sshll.u32 %s15084_s7, 4  ;;  %s871_s28 = sshll.u32 %s15085_s23, 4  ;;  %s851_s22 = int_to_ptr.vmem [resolvable:$true] %s850_s22  ;;  %s872_s28 = int_to_ptr.vmem [resolvable:$true] %s871_s28 }
  0xca   : > { %s14815_s6 = scalar_lea.hbm %s19911_s8, 16 }
  0xcb   : > { %p14816_p13 = scmp.ne.s32.totalorder %s19911_s8, %s14815_s6  ;;  %p14822_p9 = scmp.lt.u32.totalorder %s14815_s6, %s19911_s8 }
  0xcd   : > { %p14818_p6 = pnand %p14816_p13, %p15334_p0 }
  0xcf   : > { %p14819_p5 = pneg %p14818_p6 }
  0xd1   : > { %p14824_p10 = pnand %p14822_p9, %p14819_p5 }
  0xd3   : > { %14827 = shalt.err (!%p14824_p10)
}
  0xd4   : > { %s14828_s15 = scalar_lea.vmem %s851_s22, 16  ;;  %s14835_s18 = scalar_lea.vmem %s851_s22, 32 }
  0xd5   : > { %p14829_p1 = scmp.ne.s32.totalorder %s851_s22, %s14828_s15  ;;  %p14836_p4 = scmp.lt.s32.totalorder %s851_s22, %s851_s22 }
  0xd6   : > { %p14837_p7 = scmp.lt.s32.totalorder %s14835_s18, %s14828_s15 }
  0xd7   : > { %p14831_p2 = pnand %p14829_p1, %p15334_p0 }
  0xd8   : > { %p14838_p8 = por %p14837_p7, %p14836_p4 }
  0xd9   : > { %p14832_p3 = pneg %p14831_p2 }
  0xdb   : > { %p14839_p11 = pnand %p14838_p8, %p14832_p3 }
  0xdd   : > { %14842 = shalt.err (!%p14839_p11)
}
  0xde   : > { %13217 = dma.hbm_to_vmem [thread:$0]  (!%p15322_p12), %s19911_s8, 16, %s851_s22, [#allocation6]  }
  0xdf   : > { %s14843_s6 = scalar_lea.hbm %s15151_s19, 512 }
  0xe0   : > { %p14844_p13 = scmp.ne.s32.totalorder %s15151_s19, %s14843_s6  ;;  %p14850_p9 = scmp.lt.u32.totalorder %s14843_s6, %s15151_s19 }
  0xe2   : > { %p14846_p6 = pnand %p14844_p13, %p15334_p0 }
  0xe4   : > { %p14847_p5 = pneg %p14846_p6 }
  0xe6   : > { %p14852_p10 = pnand %p14850_p9, %p14847_p5 }
  0xe8   : > { %14855 = shalt.err (!%p14852_p10)
}
  0xe9   : > { %s14856_s2 = scalar_lea.vmem %s872_s28, 512  ;;  %p14864_p4 = scmp.lt.s32.totalorder %s872_s28, %s872_s28 }
  0xea   : > { %p14857_p1 = scmp.ne.s32.totalorder %s872_s28, %s14856_s2  ;;  %p14865_p7 = scmp.lt.s32.totalorder %s14856_s2, %s14856_s2 }
  0xec   : > { %p14859_p2 = pnand %p14857_p1, %p15334_p0  ;;  %p14866_p8 = por %p14865_p7, %p14864_p4 }
  0xee   : > { %p14860_p3 = pneg %p14859_p2 }
  0xf0   : > { %p14867_p11 = pnand %p14866_p8, %p14860_p3 }
  0xf2   : > { %14870 = shalt.err (!%p14867_p11)
}
  0xf3   : > { %s19925_s11 = smov 8   ;;  %s19926_s7 = smov 128  }
  0xf4   : > { %13223 = dma.hbm_to_vmem [thread:$0]  (!%p15322_p12), %s15151_s19, 512, %s872_s28, [#allocation9], %s19926_s7, %s19926_s7, %s19925_s11  }
  0xf5   : > { %s15086_s22 = smov [#allocation13]   ;;  %s15087_s15 = smov [#allocation16]  }
  0xf6   : > { %s896_s23 = sshll.u32 %s15086_s22, 4  ;;  %s947_s18 = sshll.u32 %s15087_s15, 4  ;;  %s897_s23 = int_to_ptr.vmem [resolvable:$true] %s896_s23  ;;  %s948_s18 = int_to_ptr.vmem [resolvable:$true] %s947_s18 }
  0xf7   : > { %s14871_s6 = scalar_lea.hbm %s15161_s30, 16 }
  0xf8   : > { %p14872_p13 = scmp.ne.s32.totalorder %s15161_s30, %s14871_s6  ;;  %p14878_p9 = scmp.lt.u32.totalorder %s14871_s6, %s15161_s30 }
  0xfa   : > { %p14874_p6 = pnand %p14872_p13, %p15334_p0 }
  0xfc   : > { %p14875_p5 = pneg %p14874_p6 }
  0xfe   : > { %p14880_p10 = pnand %p14878_p9, %p14875_p5 }
 0x100   : > { %14883 = shalt.err (!%p14880_p10)
}
 0x101   : > { %s14884_s2 = scalar_lea.vmem %s897_s23, 16  ;;  %s14891_s28 = scalar_lea.vmem %s897_s23, 32 }
 0x102   : > { %p14885_p1 = scmp.ne.s32.totalorder %s897_s23, %s14884_s2  ;;  %p14892_p4 = scmp.lt.s32.totalorder %s897_s23, %s897_s23 }
 0x103   : > { %p14893_p7 = scmp.lt.s32.totalorder %s14891_s28, %s14884_s2 }
 0x104   : > { %p14887_p2 = pnand %p14885_p1, %p15334_p0 }
 0x105   : > { %p14894_p8 = por %p14893_p7, %p14892_p4 }
 0x106   : > { %p14888_p3 = pneg %p14887_p2 }
 0x108   : > { %p14895_p11 = pnand %p14894_p8, %p14888_p3 }
 0x10a   : > { %14898 = shalt.err (!%p14895_p11)
}
 0x10b   : > { %13229 = dma.hbm_to_vmem [thread:$0]  (!%p15322_p12), %s15161_s30, 16, %s897_s23, [#allocation12]  }
 0x10c   : > { %s14899_s22 = scalar_lea.hbm %s15221_s27, 1536 }
 0x10d   : > { %p14900_p13 = scmp.ne.s32.totalorder %s15221_s27, %s14899_s22  ;;  %p14906_p9 = scmp.lt.u32.totalorder %s14899_s22, %s15221_s27 }
 0x10f   : > { %p14902_p6 = pnand %p14900_p13, %p15334_p0 }
 0x111   : > { %p14903_p5 = pneg %p14902_p6 }
 0x113   : > { %p14908_p10 = pnand %p14906_p9, %p14903_p5 }
 0x115   : > { %14911 = shalt.err (!%p14908_p10)
}
 0x116   : > { %s14912_s15 = scalar_lea.vmem %s948_s18, 1536  ;;  %p14920_p4 = scmp.lt.s32.totalorder %s948_s18, %s948_s18 }
 0x117   : > { %p14913_p1 = scmp.ne.s32.totalorder %s948_s18, %s14912_s15  ;;  %p14921_p7 = scmp.lt.s32.totalorder %s14912_s15, %s14912_s15 }
 0x119   : > { %p14915_p2 = pnand %p14913_p1, %p15334_p0  ;;  %p14922_p8 = por %p14921_p7, %p14920_p4 }
 0x11b   : > { %p14916_p3 = pneg %p14915_p2 }
 0x11d   : > { %p14923_p11 = pnand %p14922_p8, %p14916_p3 }
 0x11f   : > { %14926 = shalt.err (!%p14923_p11)
}
 0x120   : > { %13235 = dma.hbm_to_vmem [thread:$0]  (!%p15322_p12), %s15221_s27, 1536, %s948_s18, [#allocation15], %s19926_s7, %s19926_s7, %s19925_s11  }
 0x121   : > { %s15088_s23 = smov [#allocation17]   ;;  %s14927_s2 = scalar_lea.hbm %s15231_s12, 1536 }
 0x122   : > { %s963_s6 = sshll.u32 %s15088_s23, 4  ;;  %p14928_p13 = scmp.ne.s32.totalorder %s15231_s12, %s14927_s2  ;;  %s964_s6 = int_to_ptr.vmem [resolvable:$true] %s963_s6 }
 0x123   : > { %p14934_p9 = scmp.lt.u32.totalorder %s14927_s2, %s15231_s12 }
 0x124   : > { %p14930_p6 = pnand %p14928_p13, %p15334_p0 }
 0x126   : > { %p14931_p5 = pneg %p14930_p6 }
 0x128   : > { %p14936_p10 = pnand %p14934_p9, %p14931_p5 }
 0x12a   : > { %14939 = shalt.err (!%p14936_p10)
}
 0x12b   : > { %s14940_s28 = scalar_lea.vmem %s964_s6, 1536  ;;  %p14948_p4 = scmp.lt.s32.totalorder %s964_s6, %s964_s6 }
 0x12c   : > { %p14941_p1 = scmp.ne.s32.totalorder %s964_s6, %s14940_s28  ;;  %p14949_p7 = scmp.lt.s32.totalorder %s14940_s28, %s14940_s28 }
 0x12e   : > { %p14943_p2 = pnand %p14941_p1, %p15334_p0  ;;  %p14950_p8 = por %p14949_p7, %p14948_p4 }
 0x130   : > { %p14944_p3 = pneg %p14943_p2 }
 0x132   : > { %p14951_p11 = pnand %p14950_p8, %p14944_p3 }
 0x134   : > { %14954 = shalt.err (!%p14951_p11)
}
 0x135   : > { %13238 = dma.hbm_to_vmem [thread:$0]  (!%p15322_p12), %s15231_s12, 1536, %s964_s6, [#allocation18], %s19926_s7, %s19926_s7, %s19925_s11  }
 0x136   : > { %p19927_p13 = scmp.ne.s32.totalorder %s19922_s26, 0 }
 0x138   : > { %1018 = sbr.rel (%p19927_p13) target bundleno = 7594 (0x1daa), region = 148 }
 0x13f   : > { %p19928_p6 = scmp.eq.s32.totalorder %s15284_s0, 0 }
 0x141   : > { %15000 = dma.done.wait (%p19928_p6), [#allocation3], 512   ;;  %p19929_p0 = pmov %p19928_p6 }
 0x143   : > { %15002 = vsyncadd (%p19929_p0), [#allocation3], 4294966784  ;;  %p19930_p5 = pmov %p19929_p0 }
 0x144   : > { %p19931_p9 = pmov %p19929_p0 }
 0x145   : > { %15004 = dma.done.wait (%p19930_p5), [#allocation6], 272  }
 0x146   : > { %15006 = vsyncadd (%p19931_p9), [#allocation6], 4294967024  ;;  %p19932_p10 = pmov %p19929_p0 }
 0x147   : > { %p19933_p12 = pmov %p19929_p0 }
 0x148   : > { %15008 = dma.done.wait (%p19932_p10), [#allocation9], 528  }
 0x149   : > { %15010 = vsyncadd (%p19933_p12), [#allocation9], 4294966768  ;;  %p19934_p1 = pmov %p19929_p0 }
 0x14a   : > { %p19935_p2 = pmov %p19929_p0 }
 0x14b   : > { %15012 = dma.done.wait (%p19934_p1), [#allocation12], 32  }
 0x14c   : > { %15014 = vsyncadd (%p19935_p2), [#allocation12], 4294967264  ;;  %p19936_p3 = pmov %p19929_p0 }
 0x14d   : > { %p19937_p4 = pmov %p19929_p0 }
 0x14e   : > { %15016 = dma.done.wait (%p19936_p3), [#allocation15], 1552  }
 0x14f   : > { %15018 = vsyncadd (%p19937_p4), [#allocation15], 4294965744  ;;  %p19938_p7 = pmov %p19929_p0 }
 0x150   : > { %p19939_p8 = pmov %p19929_p0 }
 0x151   : > { %15020 = dma.done.wait (%p19938_p7), [#allocation18], 1536  }
 0x152   : > { %15022 = vsyncadd (%p19939_p8), [#allocation18], 4294965760  ;;  %p1146_p11 = scmp.lt.s32.totalorder %s15284_s0, 7  ;;  %vm1267_vm0 = vcmask 130048   ;;  %v15493_v2 = vld [vmem:[%s15116_s17] sm:$0xff]  ;;  %v15498_v4 = vld [vmem:[%s15116_s17 + $0x8] sm:$0xff] }
 0x153   : > { %11814 = vmatprep.mubr.msk.f32.mxu0 %vm1267_vm0, %v15493_v2  ;;  %v15501_v5 = vld [vmem:[%s15116_s17 + $0x10] sm:$0xff]  ;;  %v15508_v6 = vld [vmem:[%s15116_s17 + $0x18] sm:$0xff]  ;;  %v15511_v7 = vld [vmem:[%s15116_s17 + $0x20] sm:$0xff]  ;;  %s19997_s5 = sld [smem:[#allocation27_spill]]  ;;  %s20001_s7 = sld [smem:[#allocation29_spill]]  ;;  %vm1902_vm1 = vcmask 261120  }
 0x154   : > { %s1147_s26 = scalar_select %p1146_p11, %s15284_s0, 7  ;;  %v15518_v8 = vld [vmem:[%s15116_s17 + $0x28] sm:$0xff]  ;;  %v15521_v9 = vld [vmem:[%s15116_s17 + $0x30] sm:$0xff]  ;;  %v15528_v10 = vld [vmem:[%s15116_s17 + $0x38] sm:$0xff]  ;;  %vm2571_vm14 = vcmask 23552  }
 0x155   : > { %v15531_v11 = vld [vmem:[%s15116_s17 + $0x40] sm:$0xff]  ;;  %v15538_v12 = vld [vmem:[%s15116_s17 + $0x48] sm:$0xff]  ;;  %v15541_v13 = vld [vmem:[%s15116_s17 + $0x50] sm:$0xff]  ;;  %s20004_s18 = sld [smem:[#allocation28_spill]]  ;;  %s20005_s22 = sld [smem:[#allocation32_spill]] }
 0x156   : > { %s15488_s16 = sshll.u32 %s1147_s26, 4  ;;  %v15548_v14 = vld [vmem:[%s15116_s17 + $0x58] sm:$0xff]  ;;  %v15551_v15 = vld [vmem:[%s15116_s17 + $0x60] sm:$0xff]  ;;  %v15558_v16 = vld [vmem:[%s15116_s17 + $0x68] sm:$0xff]  ;;  %s20015_s23 = sld [smem:[#allocation33_spill]] }
 0x157   : > { %s1160_s10 = scalar_lea.vmem %s15111_s13, %s15488_s16  ;;  %v15561_v17 = vld [vmem:[%s15116_s17 + $0x70] sm:$0xff]  ;;  %v15568_v18 = vld [vmem:[%s15116_s17 + $0x78] sm:$0xff]  ;;  %v15571_v19 = vld [vmem:[%s15116_s17 + $0x80] sm:$0xff]  ;;  %s20099_s6 = sld [smem:[#allocation36_spill]] }
 0x158   : > { %v1165_v0 = vld [vmem:[%s1160_s10] sm:$0xff]  ;;  %v1166_v1 = vld [vmem:[%s1160_s10 + $0x8] sm:$0xff]  ;;  %v15581_v21 = vld [vmem:[%s15116_s17 + $0x90] sm:$0xff]  ;;  %s20103_s2 = sld [smem:[#allocation34_spill]]  ;;  %s20111_s28 = sld [smem:[#allocation35_spill]] }
 0x159   : > { %v12696_v3 = vpack.c.bf16 %v1166_v1, %v1165_v0  ;;  %v15578_v20 = vld [vmem:[%s15116_s17 + $0x88] sm:$0xff]  ;;  %19940 = vst [vmem:[#allocation55_spill] sm:$0xff] %v15581_v21  ;;  %v15588_v22 = vld [vmem:[%s15116_s17 + $0x98] sm:$0xff]  ;;  %v15591_v23 = vld [vmem:[%s15116_s17 + $0xa0] sm:$0xff]  ;;  %s1150_s11 = scalar_lea.vmem %s19997_s5, %s15488_s16  ;;  %s20136_s10 = sld [smem:[#allocation37_spill]] }
 0x15a   : > { %19941 = vst [vmem:[#allocation56_spill] sm:$0xff] %v15588_v22  ;;  %19942 = vst [vmem:[#allocation57_spill] sm:$0xff] %v15591_v23  ;;  %v15598_v24 = vld [vmem:[%s15116_s17 + $0xa8] sm:$0xff]  ;;  %v15601_v25 = vld [vmem:[%s15116_s17 + $0xb0] sm:$0xff] }
 0x15b   : > { %12697 = vmatprep.subr.bf16.mxu0 %v12696_v3  ;;  %19943 = vst [vmem:[#allocation58_spill] sm:$0xff] %v15598_v24  ;;  %19944 = vst [vmem:[#allocation59_spill] sm:$0xff] %v15601_v25  ;;  %v15608_v26 = vld [vmem:[%s15116_s17 + $0xb8] sm:$0xff]  ;;  %v15611_v27 = vld [vmem:[%s15116_s17 + $0xc0] sm:$0xff]  ;;  %s15943_s15 = scalar_lea.vmem %s20004_s18, %s15488_s16 }
 0x15c   : > { %12699 = vmatpush3.bf16.msra.mxu0 %v12696_v3  ;;  %19945 = vst [vmem:[#allocation60_spill] sm:$0xff] %v15608_v26  ;;  %19946 = vst [vmem:[#allocation61_spill] sm:$0xff] %v15611_v27  ;;  %v15618_v28 = vld [vmem:[%s15116_s17 + $0xc8] sm:$0xff]  ;;  %v15621_v29 = vld [vmem:[%s15116_s17 + $0xd0] sm:$0xff] }
 0x15d   : > { %19947 = vst [vmem:[#allocation62_spill] sm:$0xff] %v15618_v28  ;;  %19948 = vst [vmem:[#allocation63_spill] sm:$0xff] %v15621_v29  ;;  %v15628_v30 = vld [vmem:[%s15116_s17 + $0xd8] sm:$0xff]  ;;  %v15631_v31 = vld [vmem:[%s15116_s17 + $0xe0] sm:$0xff] }
 0x15e   : > { %19949 = vst [vmem:[#allocation64_spill] sm:$0xff] %v15628_v30  ;;  %19950 = vst [vmem:[#allocation65_spill] sm:$0xff] %v15631_v31  ;;  %v15638_v32 = vld [vmem:[%s15116_s17 + $0xe8] sm:$0xff]  ;;  %v15641_v33 = vld [vmem:[%s15116_s17 + $0xf0] sm:$0xff]  ;;  %s20104_s26 = smov %s20103_s2  ;;  %s20112_s16 = smov %s20111_s28 }
 0x15f   : > { %11815 = vmatmul.mubr.msk.f32.vlgmr.msra.gmra.mrb[0].mxu0 %vm1267_vm0, %v15498_v4  ;;  %19951 = vst [vmem:[#allocation66_spill] sm:$0xff] %v15638_v32  ;;  %19952 = vst [vmem:[#allocation67_spill] sm:$0xff] %v15641_v33  ;;  %v15648_v34 = vld [vmem:[%s15116_s17 + $0xf8] sm:$0xff]  ;;  %v15653_v35 = vld [vmem:[%s15121_s21 + $0x8] sm:$0xff] }
 0x160   : > { %11817 = vmatprep.mubr.msk.f32.mxu0 %vm1267_vm0, %v15501_v5  ;;  %19953 = vst [vmem:[#allocation68_spill] sm:$0xff] %v15648_v34  ;;  %v15656_v37 = vld [vmem:[%s15121_s21] sm:$0xff]  ;;  %v15662_v42 = vld [vmem:[%s15121_s21 + $0x10] sm:$0xff]  ;;  %v15665_v43 = vld [vmem:[%s15121_s21 + $0x18] sm:$0xff] }
 0x161   : > { %v15671_v49 = vld [vmem:[%s15121_s21 + $0x20] sm:$0xff]  ;;  %v15674_v50 = vld [vmem:[%s15121_s21 + $0x28] sm:$0xff]  ;;  %v15681_v57 = vld [vmem:[%s15121_s21 + $0x30] sm:$0xff] }
 0x162   : > { %v15684_v58 = vld [vmem:[%s15121_s21 + $0x38] sm:$0xff]  ;;  %v15691_v1 = vld [vmem:[%s15121_s21 + $0x40] sm:$0xff]  ;;  %v15694_v3 = vld [vmem:[%s15121_s21 + $0x48] sm:$0xff] }
 0x163   : > { %11818 = vmatmul.mubr.msk.f32.gmra.mrb[2].mxu0 %vm1267_vm0, %v15508_v6 }
 0x164   : > { %11820 = vmatprep.mubr.msk.f32.mxu0 %vm1267_vm0, %v15511_v7 }
 0x167   : > { %11821 = vmatmul.mubr.msk.f32.gmra.mrb[4].mxu0 %vm1267_vm0, %v15518_v8 }
 0x168   : > { %11823 = vmatprep.mubr.msk.f32.mxu0 %vm1267_vm0, %v15521_v9 }
 0x16b   : > { %11824 = vmatmul.mubr.msk.f32.gmra.mrb[6].mxu0 %vm1267_vm0, %v15528_v10 }
 0x16c   : > { %11826 = vmatprep.mubr.msk.f32.mxu0 %vm1267_vm0, %v15531_v11 }
 0x16f   : > { %11827 = vmatmul.mubr.msk.f32.gmra.mrb[8].mxu0 %vm1267_vm0, %v15538_v12 }
 0x170   : > { %11829 = vmatprep.mubr.msk.f32.mxu0 %vm1267_vm0, %v15541_v13 }
 0x173   : > { %11830 = vmatmul.mubr.msk.f32.gmra.mrb[10].mxu0 %vm1267_vm0, %v15548_v14 }
 0x174   : > { %11832 = vmatprep.mubr.msk.f32.mxu0 %vm1267_vm0, %v15551_v15 }
 0x177   : > { %11833 = vmatmul.mubr.msk.f32.gmra.mrb[12].mxu0 %vm1267_vm0, %v15558_v16 }
 0x178   : > { %11835 = vmatprep.mubr.msk.f32.mxu0 %vm1267_vm0, %v15561_v17 }
 0x17b   : > { %11836 = vmatmul.mubr.msk.f32.gmra.mrb[14].mxu0 %vm1267_vm0, %v15568_v18 }
 0x17c   : > { %11838 = vmatprep.mubr.msk.f32.mxu0 %vm1267_vm0, %v15571_v19 }
 0x17f   : > { %11839 = vmatmul.mubr.msk.f32.gmra.mrb[16].mxu0 %vm1267_vm0, %v15578_v20 }
 0x180   : > { %11841 = vmatprep.mubr.msk.f32.mxu0 %vm1267_vm0, %v15581_v21 }
 0x183   : > { %11842 = vmatmul.mubr.msk.f32.gmra.mrb[18].mxu0 %vm1267_vm0, %v15588_v22 }
 0x184   : > { %11844 = vmatprep.mubr.msk.f32.mxu0 %vm1267_vm0, %v15591_v23 }
 0x187   : > { %11845 = vmatmul.mubr.msk.f32.gmra.mrb[20].mxu0 %vm1267_vm0, %v15598_v24 }
 0x188   : > { %11847 = vmatprep.mubr.msk.f32.mxu0 %vm1267_vm0, %v15601_v25 }
 0x18b   : > { %11848 = vmatmul.mubr.msk.f32.gmra.mrb[22].mxu0 %vm1267_vm0, %v15608_v26 }
 0x18c   : > { %11850 = vmatprep.mubr.msk.f32.mxu0 %vm1267_vm0, %v15611_v27 }
 0x18f   : > { %11851 = vmatmul.mubr.msk.f32.gmra.mrb[24].mxu0 %vm1267_vm0, %v15618_v28 }
 0x190   : > { %11853 = vmatprep.mubr.msk.f32.mxu0 %vm1267_vm0, %v15621_v29  ;;  %v15779_v29 = vld [vmem:[%s15121_s21 + $0xd0] sm:$0xff] }
 0x191   : > { %19963 = vst [vmem:[#allocation78_spill] sm:$0xff] %v15779_v29 }
 0x193   : > { %11854 = vmatmul.mubr.msk.f32.gmra.mrb[26].mxu0 %vm1267_vm0, %v15628_v30  ;;  %v15775_v30 = vld [vmem:[%s15121_s21 + $0xd8] sm:$0xff] }
 0x194   : > { %11856 = vmatprep.mubr.msk.f32.mxu0 %vm1267_vm0, %v15631_v31  ;;  %v15769_v31 = vld [vmem:[%s15121_s21 + $0xc0] sm:$0xff]  ;;  %19962 = vst [vmem:[#allocation77_spill] sm:$0xff] %v15775_v30 }
 0x195   : > { %19961 = vst [vmem:[#allocation76_spill] sm:$0xff] %v15769_v31 }
 0x197   : > { %11857 = vmatmul.mubr.msk.f32.gmra.mrb[28].mxu0 %vm1267_vm0, %v15638_v32  ;;  %v15765_v32 = vld [vmem:[%s15121_s21 + $0xc8] sm:$0xff] }
 0x198   : > { %11859 = vmatprep.mubr.msk.f32.mxu0 %vm1267_vm0, %v15641_v33  ;;  %v15759_v33 = vld [vmem:[%s15121_s21 + $0xb0] sm:$0xff]  ;;  %19960 = vst [vmem:[#allocation75_spill] sm:$0xff] %v15765_v32 }
 0x199   : > { %19959 = vst [vmem:[#allocation74_spill] sm:$0xff] %v15759_v33 }
 0x19b   : > { %11860 = vmatmul.mubr.msk.f32.gmra.mrb[30].mxu0 %vm1267_vm0, %v15648_v34  ;;  %v15755_v34 = vld [vmem:[%s15121_s21 + $0xb8] sm:$0xff] }
 0x19c   : > { %19958 = vst [vmem:[#allocation73_spill] sm:$0xff] %v15755_v34 }
 0x232   : > { %v11816_v36 = vpop.f32.mrb[0].mxu0 }
 0x233   : > { %v1590_v38 = vmul.f32 %v11816_v36, %v15653_v35  ;;  %v1430_v39 = vpop.f32.mrb[1].mxu0 }
 0x234   : > { %v1589_v40 = vmul.f32 %v1430_v39, %v15656_v37 }
 0x235   : > { %v1624_v41 = vsel %vm1267_vm0, %v1590_v38, 0.0 }
 0x236   : > { %1625 = vadd.xlane.f32.xlu1 %v1624_v41  ;;  %v11819_v44 = vpop.f32.mrb[2].mxu0  ;;  %v1621_v48 = vsel %vm1267_vm0, %v1589_v40, 0.0 }
 0x237   : > { %v1440_v45 = vpop.f32.mrb[3].mxu0  ;;  %v1592_v47 = vmul.f32 %v11819_v44, %v15665_v43 }
 0x238   : > { %v1591_v46 = vmul.f32 %v1440_v45, %v15662_v42  ;;  %v15701_v45 = vld [vmem:[%s15121_s21 + $0x50] sm:$0xff] }
 0x239   : > { %v1630_v56 = vsel %vm1267_vm0, %v1592_v47, 0.0 }
 0x23a   : > { %1622 = vadd.xlane.f32.xlu1 %v1621_v48  ;;  %v11822_v51 = vpop.f32.mrb[4].mxu0  ;;  %v1627_v52 = vsel %vm1267_vm0, %v1591_v46, 0.0  ;;  %v15704_v46 = vld [vmem:[%s15121_s21 + $0x58] sm:$0xff] }
 0x23b   : > { %1628 = vadd.xlane.f32.xlu0 %v1627_v52  ;;  %v1450_v53 = vpop.f32.mrb[5].mxu0  ;;  %v1594_v55 = vmul.f32 %v11822_v51, %v15674_v50 }
 0x23c   : > { %v1593_v54 = vmul.f32 %v1450_v53, %v15671_v49 }
 0x23d   : > { %v1636_v0 = vsel %vm1267_vm0, %v1594_v55, 0.0  ;;  %v15711_v55 = vld [vmem:[%s15121_s21 + $0x60] sm:$0xff] }
 0x23e   : > { %1631 = vadd.xlane.f32.xlu1 %v1630_v56  ;;  %v11825_v59 = vpop.f32.mrb[6].mxu0  ;;  %v1633_v60 = vsel %vm1267_vm0, %v1593_v54, 0.0  ;;  %v15714_v56 = vld [vmem:[%s15121_s21 + $0x68] sm:$0xff] }
 0x23f   : > { %1634 = vadd.xlane.f32.xlu0 %v1633_v60  ;;  %v1460_v61 = vpop.f32.mrb[7].mxu0  ;;  %v1596_v63 = vmul.f32 %v11825_v59, %v15684_v58 }
 0x240   : > { %v1595_v62 = vmul.f32 %v1460_v61, %v15681_v57 }
 0x241   : > { %v1642_v44 = vsel %vm1267_vm0, %v1596_v63, 0.0 }
 0x242   : > { %1637 = vadd.xlane.f32.xlu1 %v1636_v0  ;;  %v11828_v36 = vpop.f32.mrb[8].mxu0  ;;  %v1639_v38 = vsel %vm1267_vm0, %v1595_v62, 0.0 }
 0x243   : > { %1640 = vadd.xlane.f32.xlu0 %v1639_v38  ;;  %v1470_v39 = vpop.f32.mrb[9].mxu0  ;;  %v1598_v41 = vmul.f32 %v11828_v36, %v15694_v3 }
 0x244   : > { %v1597_v40 = vmul.f32 %v1470_v39, %v15691_v1 }
 0x245   : > { %v1648_v54 = vsel %vm1267_vm0, %v1598_v41, 0.0 }
 0x246   : > { %1643 = vadd.xlane.f32.xlu1 %v1642_v44  ;;  %v11831_v47 = vpop.f32.mrb[10].mxu0  ;;  %v1645_v48 = vsel %vm1267_vm0, %v1597_v40, 0.0  ;;  %v15726_v40 = vld [vmem:[%s15121_s21 + $0x88] sm:$0xff] }
 0x247   : > { %1646 = vadd.xlane.f32.xlu0 %v1645_v48  ;;  %v1480_v51 = vpop.f32.mrb[11].mxu0  ;;  %v1600_v53 = vmul.f32 %v11831_v47, %v15704_v46  ;;  %v15730_v47 = vld [vmem:[%s15121_s21 + $0x80] sm:$0xff] }
 0x248   : > { %v1599_v52 = vmul.f32 %v1480_v51, %v15701_v45 }
 0x249   : > { %v1654_v0 = vsel %vm1267_vm0, %v1600_v53, 0.0 }
 0x24a   : > { %1649 = vadd.xlane.f32.xlu1 %v1648_v54  ;;  %v11834_v59 = vpop.f32.mrb[12].mxu0  ;;  %v1651_v60 = vsel %vm1267_vm0, %v1599_v52, 0.0  ;;  %v15734_v52 = vld [vmem:[%s15121_s21 + $0x98] sm:$0xff] }
 0x24b   : > { %1652 = vadd.xlane.f32.xlu0 %v1651_v60  ;;  %v1490_v61 = vpop.f32.mrb[13].mxu0  ;;  %v1602_v63 = vmul.f32 %v11834_v59, %v15714_v56  ;;  %19954 = vst [vmem:[#allocation69_spill] sm:$0xff] %v15734_v52  ;;  %v15739_v59 = vld [vmem:[%s15121_s21 + $0x90] sm:$0xff] }
 0x24c   : > { %v1601_v62 = vmul.f32 %v1490_v61, %v15711_v55  ;;  %19955 = vst [vmem:[#allocation70_spill] sm:$0xff] %v15739_v59 }
 0x24d   : > { %v1660_v41 = vsel %vm1267_vm0, %v1602_v63, 0.0 }
 0x24e   : > { %1655 = vadd.xlane.f32.xlu1 %v1654_v0  ;;  %v15720_v36 = vpop.f32.mrb[14].mxu0  ;;  %v1657_v38 = vsel %vm1267_vm0, %v1601_v62, 0.0  ;;  %v15744_v0 = vld [vmem:[%s15121_s21 + $0xa8] sm:$0xff] }
 0x24f   : > { %1658 = vadd.xlane.f32.xlu0 %v1657_v38  ;;  %v15723_v39 = vpop.f32.mrb[15].mxu0  ;;  %19956 = vst [vmem:[#allocation71_spill] sm:$0xff] %v15744_v0 }
 0x252   : > { %1661 = vadd.xlane.f32.xlu1 %v1660_v41  ;;  %v11840_v44 = vpop.f32.mrb[16].mxu0 }
 0x253   : > { %v1606_v48 = vmul.f32 %v11840_v44, %v15726_v40  ;;  %v1510_v51 = vpop.f32.mrb[17].mxu0  ;;  %v15749_v44 = vld [vmem:[%s15121_s21 + $0xa0] sm:$0xff] }
 0x254   : > { %v1605_v53 = vmul.f32 %v1510_v51, %v15730_v47  ;;  %19957 = vst [vmem:[#allocation72_spill] sm:$0xff] %v15749_v44 }
 0x255   : > { %v1672_v54 = vsel %vm1267_vm0, %v1606_v48, 0.0 }
 0x256   : > { %1673 = vadd.xlane.f32.xlu0 %v1672_v54  ;;  %v11843_v60 = vpop.f32.mrb[18].mxu0  ;;  %v1669_v38 = vsel %vm1267_vm0, %v1605_v53, 0.0 }
 0x257   : > { %v1608_v61 = vmul.f32 %v11843_v60, %v15734_v52  ;;  %v1520_v62 = vpop.f32.mrb[19].mxu0 }
 0x258   : > { %v1607_v63 = vmul.f32 %v1520_v62, %v15739_v59 }
 0x259   : > { %v1678_v41 = vsel %vm1267_vm0, %v1608_v61, 0.0 }
 0x25a   : > { %1670 = vadd.xlane.f32.xlu0 %v1669_v38  ;;  %1679 = vadd.xlane.f32.xlu1 %v1678_v41  ;;  %v11846_v48 = vpop.f32.mrb[20].mxu0  ;;  %v1675_v60 = vsel %vm1267_vm0, %v1607_v63, 0.0 }
 0x25b   : > { %v1610_v51 = vmul.f32 %v11846_v48, %v15744_v0  ;;  %v1530_v54 = vpop.f32.mrb[21].mxu0 }
 0x25c   : > { %v1609_v62 = vmul.f32 %v1530_v54, %v15749_v44 }
 0x25d   : > { %v1684_v53 = vsel %vm1267_vm0, %v1610_v51, 0.0 }
 0x25e   : > { %1676 = vadd.xlane.f32.xlu0 %v1675_v60  ;;  %1685 = vadd.xlane.f32.xlu1 %v1684_v53  ;;  %v11849_v61 = vpop.f32.mrb[22].mxu0  ;;  %v1681_v48 = vsel %vm1267_vm0, %v1609_v62, 0.0 }
 0x25f   : > { %v1612_v38 = vmul.f32 %v11849_v61, %v15755_v34  ;;  %v1540_v41 = vpop.f32.mrb[23].mxu0 }
 0x260   : > { %v1611_v63 = vmul.f32 %v1540_v41, %v15759_v33 }
 0x261   : > { %v1690_v54 = vsel %vm1267_vm0, %v1612_v38, 0.0 }
 0x262   : > { %1682 = vadd.xlane.f32.xlu0 %v1681_v48  ;;  %1691 = vadd.xlane.f32.xlu1 %v1690_v54  ;;  %v11852_v51 = vpop.f32.mrb[24].mxu0  ;;  %v1687_v61 = vsel %vm1267_vm0, %v1611_v63, 0.0 }
 0x263   : > { %v1614_v60 = vmul.f32 %v11852_v51, %v15765_v32  ;;  %v1550_v53 = vpop.f32.mrb[25].mxu0 }
 0x264   : > { %v1613_v62 = vmul.f32 %v1550_v53, %v15769_v31  ;;  %v15785_v53 = vld [vmem:[%s15121_s21 + $0xe8] sm:$0xff] }
 0x265   : > { %v1696_v41 = vsel %vm1267_vm0, %v1614_v60, 0.0  ;;  %19964 = vst [vmem:[#allocation79_spill] sm:$0xff] %v15785_v53  ;;  %v15789_v60 = vld [vmem:[%s15121_s21 + $0xe0] sm:$0xff] }
 0x266   : > { %1688 = vadd.xlane.f32.xlu0 %v1687_v61  ;;  %1697 = vadd.xlane.f32.xlu1 %v1696_v41  ;;  %v11855_v38 = vpop.f32.mrb[26].mxu0  ;;  %v1693_v51 = vsel %vm1267_vm0, %v1613_v62, 0.0  ;;  %19965 = vst [vmem:[#allocation80_spill] sm:$0xff] %v15789_v60  ;;  %v15795_v62 = vld [vmem:[%s15121_s21 + $0xf8] sm:$0xff] }
 0x267   : > { %v1616_v48 = vmul.f32 %v11855_v38, %v15775_v30  ;;  %v1560_v54 = vpop.f32.mrb[27].mxu0  ;;  %19966 = vst [vmem:[#allocation81_spill] sm:$0xff] %v15795_v62 }
 0x268   : > { %v1615_v63 = vmul.f32 %v1560_v54, %v15779_v29  ;;  %v15799_v29 = vld [vmem:[%s15121_s21 + $0xf0] sm:$0xff] }
 0x269   : > { %v1702_v28 = vsel %vm1267_vm0, %v1616_v48, 0.0  ;;  %19967 = vst [vmem:[#allocation82_spill] sm:$0xff] %v15799_v29  ;;  %v15802_v48 = vld [vmem:[%s15121_s21 + $0x78] sm:$0xff] }
 0x26a   : > { %1694 = vadd.xlane.f32.xlu0 %v1693_v51  ;;  %1703 = vadd.xlane.f32.xlu1 %v1702_v28  ;;  %v11858_v61 = vpop.f32.mrb[28].mxu0  ;;  %v1699_v38 = vsel %vm1267_vm0, %v1615_v63, 0.0 }
 0x26b   : > { %v1618_v41 = vmul.f32 %v11858_v61, %v15785_v53  ;;  %v1570_v32 = vpop.f32.mrb[29].mxu0 }
 0x26c   : > { %v1617_v30 = vmul.f32 %v1570_v32, %v15789_v60  ;;  %v1604_v32 = vmul.f32 %v15720_v36, %v15802_v48 }
 0x26d   : > { %v1708_v54 = vsel %vm1267_vm0, %v1618_v41, 0.0  ;;  %v15811_v41 = vld [vmem:[%s15121_s21 + $0x70] sm:$0xff] }
 0x26e   : > { %1700 = vadd.xlane.f32.xlu0 %v1699_v38  ;;  %1709 = vadd.xlane.f32.xlu1 %v1708_v54  ;;  %v11861_v28 = vpop.f32.mrb[30].mxu0  ;;  %v1705_v53 = vsel %vm1267_vm0, %v1617_v30, 0.0  ;;  %v1603_v54 = vmul.f32 %v15723_v39, %v15811_v41 }
 0x26f   : > { %v1620_v51 = vmul.f32 %v11861_v28, %v15795_v62  ;;  %v1580_v61 = vpop.f32.mrb[31].mxu0  ;;  %v1666_v28 = vsel %vm1267_vm0, %v1604_v32, 0.0 }
 0x270   : > { %v1619_v63 = vmul.f32 %v1580_v61, %v15799_v29  ;;  %v1663_v30 = vsel %vm1267_vm0, %v1603_v54, 0.0  ;;  %v1232_v61 = vld [vmem:[#allocation2 + $0x8] sm:$0xff] }
 0x271   : > { %v1714_v60 = vsel %vm1267_vm0, %v1620_v51, 0.0  ;;  %1781 = vmatprep.mubr.f32.mxu1 %v1232_v61 }
 0x272   : > { %1706 = vadd.xlane.f32.xlu0 %v1705_v53  ;;  %1715 = vadd.xlane.f32.xlu1 %v1714_v60  ;;  %v1711_v38 = vsel %vm1267_vm0, %v1619_v63, 0.0 }
 0x276   : > { %1667 = vadd.xlane.f32.xlu1 %v1666_v28  ;;  %1712 = vadd.xlane.f32.xlu0 %v1711_v38 }
 0x27a   : > { %1664 = vadd.xlane.f32.xlu0 %v1663_v30 }
 0x2c3   : > { %v15818_v36 = vpop.xlane.xlu1 %1625 }
 0x2c4   : > { %19968 = vst [vmem:[#allocation83_spill] sm:$0xff] %v15818_v36 }
 0x2c7   : > { %v15820_v51 = vpop.xlane.xlu1 %1622 }
 0x2c8   : > { %19969 = vst [vmem:[#allocation84_spill] sm:$0xff] %v15820_v51  ;;  %v15822_v53 = vpop.xlane.xlu0 %1628  ;;  %v12702_v25 = vpack.c.bf16 %v15818_v36, %v15820_v51 }
 0x2c9   : > { %19970 = vst [vmem:[#allocation85_spill] sm:$0xff] %v15822_v53 }
 0x2cb   : > { %v15824_v60 = vpop.xlane.xlu1 %1631 }
 0x2cc   : > { %19971 = vst [vmem:[#allocation86_spill] sm:$0xff] %v15824_v60  ;;  %v15826_v63 = vpop.xlane.xlu0 %1634  ;;  %v12706_v23 = vpack.c.bf16 %v15824_v60, %v15822_v53 }
 0x2cd   : > { %19972 = vst [vmem:[#allocation87_spill] sm:$0xff] %v15826_v63 }
 0x2cf   : > { %v15828_v39 = vpop.xlane.xlu1 %1637 }
 0x2d0   : > { %19973 = vst [vmem:[#allocation88_spill] sm:$0xff] %v15828_v39  ;;  %v15830_v32 = vpop.xlane.xlu0 %1640 }
 0x2d1   : > { %19974 = vst [vmem:[#allocation89_spill] sm:$0xff] %v15830_v32 }
 0x2d3   : > { %v15832_v38 = vpop.xlane.xlu1 %1643 }
 0x2d4   : > { %19975 = vst [vmem:[#allocation90_spill] sm:$0xff] %v15832_v38  ;;  %v15834_v54 = vpop.xlane.xlu0 %1646 }
 0x2d5   : > { %19976 = vst [vmem:[#allocation91_spill] sm:$0xff] %v15834_v54 }
 0x2d7   : > { %v15836_v28 = vpop.xlane.xlu1 %1649 }
 0x2d8   : > { %19977 = vst [vmem:[#allocation92_spill] sm:$0xff] %v15836_v28  ;;  %v15838_v30 = vpop.xlane.xlu0 %1652 }
 0x2d9   : > { %19978 = vst [vmem:[#allocation93_spill] sm:$0xff] %v15838_v30 }
 0x2db   : > { %v15840_v61 = vpop.xlane.xlu1 %1655 }
 0x2dc   : > { %19979 = vst [vmem:[#allocation94_spill] sm:$0xff] %v15840_v61  ;;  %v15842_v62 = vpop.xlane.xlu0 %1658 }
 0x2dd   : > { %19980 = vst [vmem:[#allocation95_spill] sm:$0xff] %v15842_v62 }
 0x2df   : > { %v15844_v29 = vpop.xlane.xlu1 %1661 }
 0x2e0   : > { %19981 = vst [vmem:[#allocation96_spill] sm:$0xff] %v15844_v29 }
 0x2e3   : > { %v15846_v27 = vpop.xlane.xlu0 %1673 }
 0x2e4   : > { %19982 = vst [vmem:[#allocation97_spill] sm:$0xff] %v15846_v27 }
 0x2e7   : > { %v15848_v31 = vpop.xlane.xlu0 %1670  ;;  %v15850_v26 = vpop.xlane.xlu1 %1679 }
 0x2e8   : > { %19983 = vst [vmem:[#allocation98_spill] sm:$0xff] %v15848_v31  ;;  %19984 = vst [vmem:[#allocation99_spill] sm:$0xff] %v15850_v26  ;;  %v12700_v34 = vpack.c.bf16 %v15846_v27, %v15848_v31 }
 0x2ea   : > { %12701 = vmatprep.subr.bf16.mxu1 %v12700_v34 }
 0x2eb   : > { %12703 = vmatpush3.bf16.msra.mxu1 %v12702_v25  ;;  %v15856_v33 = vpop.xlane.xlu0 %1676  ;;  %v15858_v24 = vpop.xlane.xlu1 %1685  ;;  %v12710_v25 = vpack.c.bf16 %v15828_v39, %v15826_v63  ;;  %v10565_v63 = vld [vmem:[#allocation8] ss:$0 sm:$0xff] }
 0x2ec   : > { %19985 = vst [vmem:[#allocation100_spill] sm:$0xff] %v15856_v33  ;;  %19986 = vst [vmem:[#allocation101_spill] sm:$0xff] %v15858_v24  ;;  %v12704_v0 = vpack.c.bf16 %v15850_v26, %v15856_v33 }
 0x2ee   : > { %12705 = vmatprep.subr.bf16.mxu1 %v12704_v0 }
 0x2ef   : > { %12707 = vmatpush3.bf16.msra.mxu1 %v12706_v23  ;;  %v15864_v44 = vpop.xlane.xlu0 %1682  ;;  %v15866_v31 = vpop.xlane.xlu1 %1691  ;;  %v12714_v23 = vpack.c.bf16 %v15832_v38, %v15830_v32  ;;  %v2017_v38 = vld [vmem:[#allocation10 + $0x18] sm:$0xff] }
 0x2f0   : > { %19987 = vst [vmem:[#allocation102_spill] sm:$0xff] %v15864_v44  ;;  %19988 = vst [vmem:[#allocation103_spill] sm:$0xff] %v15866_v31  ;;  %v12708_v34 = vpack.c.bf16 %v15858_v24, %v15864_v44 }
 0x2f2   : > { %12709 = vmatprep.subr.bf16.mxu1 %v12708_v34 }
 0x2f3   : > { %12711 = vmatpush3.bf16.msra.mxu1 %v12710_v25  ;;  %v15872_v27 = vpop.xlane.xlu0 %1688  ;;  %v15874_v33 = vpop.xlane.xlu1 %1697  ;;  %v12718_v25 = vpack.c.bf16 %v15836_v28, %v15834_v54 }
 0x2f4   : > { %19989 = vst [vmem:[#allocation104_spill] sm:$0xff] %v15872_v27  ;;  %19990 = vst [vmem:[#allocation105_spill] sm:$0xff] %v15874_v33  ;;  %v12712_v0 = vpack.c.bf16 %v15866_v31, %v15872_v27 }
 0x2f6   : > { %12713 = vmatprep.subr.bf16.mxu1 %v12712_v0 }
 0x2f7   : > { %12715 = vmatpush3.bf16.msra.mxu1 %v12714_v23  ;;  %v15880_v26 = vpop.xlane.xlu0 %1694  ;;  %v15882_v44 = vpop.xlane.xlu1 %1703  ;;  %v12722_v23 = vpack.c.bf16 %v15840_v61, %v15838_v30  ;;  %v10561_v30 = vld [vmem:[%s20001_s7] ss:$0 sm:$0xff]  ;;  %s20178_s7 = sld [smem:[#allocation42_spill]] }
 0x2f8   : > { %19991 = vst [vmem:[#allocation106_spill] sm:$0xff] %v15880_v26  ;;  %19992 = vst [vmem:[#allocation107_spill] sm:$0xff] %v15882_v44  ;;  %v12716_v34 = vpack.c.bf16 %v15874_v33, %v15880_v26 }
 0x2fa   : > { %12717 = vmatprep.subr.bf16.mxu1 %v12716_v34  ;;  %v12726_v34 = vpack.c.bf16 %v15844_v29, %v15842_v62  ;;  %v1231_v29 = vld [vmem:[#allocation2] sm:$0xff] }
 0x2fb   : > { %12719 = vmatpush3.bf16.msra.mxu1 %v12718_v25  ;;  %v15888_v24 = vpop.xlane.xlu0 %1700  ;;  %v15890_v27 = vpop.xlane.xlu1 %1709 }
 0x2fc   : > { %19993 = vst [vmem:[#allocation108_spill] sm:$0xff] %v15888_v24  ;;  %19994 = vst [vmem:[#allocation109_spill] sm:$0xff] %v15890_v27  ;;  %v12720_v0 = vpack.c.bf16 %v15882_v44, %v15888_v24  ;;  %v1811_v24 = vld [vmem:[#allocation5 + $0x8] sm:$0xff] }
 0x2fd   : > { %s20179_s18 = smov %s20178_s7 }
 0x2fe   : > { %12721 = vmatprep.subr.bf16.mxu1 %v12720_v0 }
 0x2ff   : > { %12723 = vmatpush3.bf16.msra.mxu1 %v12722_v23  ;;  %v15896_v31 = vpop.xlane.xlu0 %1706  ;;  %v15900_v33 = vpop.xlane.xlu1 %1715  ;;  %v1810_v23 = vld [vmem:[#allocation5] sm:$0xff] }
 0x300   : > { %19995 = vst [vmem:[#allocation110_spill] sm:$0xff] %v15896_v31  ;;  %v12724_v26 = vpack.c.bf16 %v15890_v27, %v15896_v31  ;;  %19996 = vst [vmem:[#allocation111_spill] sm:$0xff] %v15900_v33  ;;  %v12732_v27 = vpack.c.bf16 %v1811_v24, %v1810_v23 }
 0x302   : > { %12725 = vmatprep.subr.bf16.mxu1 %v12724_v26  ;;  %v1234_v26 = vld [vmem:[#allocation2 + $0x18] sm:$0xff] }
 0x303   : > { %12727 = vmatpush3.bf16.msra.mxu1 %v12726_v34  ;;  %v15904_v25 = vpop.xlane.xlu0 %1712  ;;  %v15908_v44 = vpop.xlane.xlu1 %1667  ;;  %v1233_v34 = vld [vmem:[#allocation2 + $0x10] sm:$0xff] }
 0x304   : > { %19998 = vst [vmem:[#allocation112_spill] sm:$0xff] %v15904_v25  ;;  %v12728_v0 = vpack.c.bf16 %v15900_v33, %v15904_v25  ;;  %19999 = vst [vmem:[#allocation113_spill] sm:$0xff] %v15908_v44  ;;  %v1161_v25 = vld [vmem:[%s1150_s11] sm:$0xff] }
 0x306   : > { %12729 = vmatprep.subr.bf16.mxu1 %v12728_v0  ;;  %v1162_v0 = vld [vmem:[%s1150_s11 + $0x8] sm:$0xff]  ;;  %s20177_s11 = sld [smem:[#allocation41_spill]] }
 0x307   : > { %v15910_v31 = vpop.xlane.xlu0 %1664 }
 0x308   : > { %20000 = vst [vmem:[#allocation114_spill] sm:$0xff] %v15910_v31  ;;  %v12730_v62 = vpack.c.bf16 %v15908_v44, %v15910_v31 }
 0x30a   : > { %12731 = vmatpush3.bf16.msra.mxu1 %v12730_v62 }
 0x30b   : > { %12733 = vmatprep.subr.bf16.mxu1 %v12732_v27 }
 0x30d   : > { %1782 = vmatmul.mubr.f32.vlgmr.msra.gmra.mrb[0].mxu1 %v1231_v29 }
 0x30e   : > { %1786 = vmatprep.mubr.f32.mxu1 %v1234_v26  ;;  %12735 = vmatpush3.bf16.msra.mxu1 %v12732_v27 }
 0x311   : > { %1787 = vmatmul.mubr.f32.gmra.mrb[2].mxu1 %v1233_v34 }
 0x312   : > { %11866 = vmatprep.mubr.msk.f32.mxu1 %vm1267_vm0, %v1161_v25 }
 0x315   : > { %11867 = vmatmul.mubr.msk.f32.vlgmr.msra.gmra.mrb[4].mxu1 %vm1267_vm0, %v1162_v0 }
 0x3e0   : > { %v11130_v24 = vpop.f32.mrb[0].mxu1 }
 0x3e1   : > { %v11131_v23 = vpop.f32.mrb[1].mxu1 }
 0x3e2   : > { %v15918_v33 = vadd.f32 %v11131_v23, %v11130_v24 }
 0x3e4   : > { %20002 = vst [vmem:[#allocation115_spill] sm:$0xff] %v15918_v33  ;;  %v11133_v62 = vpop.f32.mrb[2].mxu1 }
 0x3e5   : > { %v11134_v31 = vpop.f32.mrb[3].mxu1 }
 0x3e6   : > { %v15920_v44 = vadd.f32 %v11134_v31, %v11133_v62 }
 0x3e8   : > { %20003 = vst [vmem:[#allocation116_spill] sm:$0xff] %v15920_v44  ;;  %v11868_v29 = vpop.f32.mrb[4].mxu1 }
 0x3e9   : > { %v1897_v26 = vadd.f32 %v11868_v29, %v10561_v30  ;;  %v1891_v27 = vpop.f32.mrb[5].mxu1 }
 0x3ea   : > { %v1892_v61 = vadd.f32 %v10561_v30, %v1891_v27  ;;  %v2014_v30 = vld [vmem:[#allocation10] sm:$0xff]  ;;  %v2015_v27 = vld [vmem:[#allocation10 + $0x8] sm:$0xff] }
 0x3eb   : > { %v1906_v34 = vsel %vm1902_vm1, %v1897_v26, 0.0  ;;  %v12736_v32 = vpack.c.bf16 %v2015_v27, %v2014_v30 }
 0x3ec   : > { %1907 = vadd.xlane.f32.xlu1 %v1906_v34  ;;  %v1903_v25 = vsel %vm1902_vm1, %v1892_v61, 0.0  ;;  %v2016_v34 = vld [vmem:[#allocation10 + $0x10] sm:$0xff] }
 0x3ed   : > { %1904 = vadd.xlane.f32.xlu0 %v1903_v25  ;;  %v12740_v25 = vpack.c.bf16 %v2017_v38, %v2016_v34  ;;  %12737 = vmatprep.subr.bf16.mxu1 %v12736_v32 }
 0x3ee   : > { %12739 = vmatpush3.bf16.msra.mxu1 %v12736_v32 }
 0x3ef   : > { %12741 = vmatprep.subr.bf16.mxu1 %v12740_v25 }
 0x3f2   : > { %12743 = vmatpush3.bf16.msra.mxu1 %v12740_v25 }
 0x479   : > { %v1908_v0 = vpop.xlane.xlu1 %1907 }
 0x47a   : > { %v1911_v54 = vmul.f32 0.03125, %v1908_v0  ;;  %v1905_v24 = vpop.xlane.xlu0 %1904 }
 0x47b   : > { %v1910_v23 = vmul.f32 0.03125, %v1905_v24 }
 0x47c   : > { %v1913_v33 = vsub.f32 %v1897_v26, %v1911_v54 }
 0x47d   : > { %v1912_v28 = vsub.f32 %v1892_v61, %v1910_v23 }
 0x47e   : > { %v1915_v31 = vmul.f32 %v1913_v33, %v1913_v33 }
 0x47f   : > { %v1914_v62 = vmul.f32 %v1912_v28, %v1912_v28 }
 0x480   : > { %v1919_v44 = vsel %vm1902_vm1, %v1915_v31, 0.0 }
 0x481   : > { %1920 = vadd.xlane.f32.xlu1 %v1919_v44  ;;  %v1916_v29 = vsel %vm1902_vm1, %v1914_v62, 0.0 }
 0x482   : > { %1917 = vadd.xlane.f32.xlu0 %v1916_v29 }
 0x50e   : > { %v1921_v54 = vpop.xlane.xlu1 %1920 }
 0x50f   : > { %v1923_v61 = vmul.f32 0.03125, %v1921_v54  ;;  %v1918_v26 = vpop.xlane.xlu0 %1917 }
 0x510   : > { %v1922_v0 = vmul.f32 0.03125, %v1918_v26 }
 0x511   : > { %v1925_v24 = vadd.f32 1e-05, %v1923_v61  ;;  %v10564_v61 = vld [vmem:[#allocation7] ss:$0 sm:$0xff] }
 0x512   : > { %v1924_v23 = vadd.f32 1e-05, %v1922_v0 }
 0x513   : > { %13347 = vrsqrt.f32 %v1925_v24  ;;  %vm1935_vm2 = vcmp.eq.f32.partialorder %v1925_v24, inf  ;;  %v1938_v29 = vand.u32 2147483648, %v1925_v24  ;;  %vm1937_vm3 = vcmp.eq.f32.partialorder %v1925_v24, 0.0 }
 0x514   : > { %13349 = vrsqrt.f32 %v1924_v23  ;;  %vm1928_vm4 = vcmp.eq.f32.partialorder %v1924_v23, inf  ;;  %v1931_v32 = vand.u32 2147483648, %v1924_v23  ;;  %vm1930_vm5 = vcmp.eq.f32.partialorder %v1924_v23, 0.0 }
 0x51d   : > { %v13348_v44 = vpop.eup %13347 }
 0x51e   : > { %v13350_v31 = vpop.eup %13349  ;;  %v1934_v62 = vmul.f32 %v13348_v44, %v1925_v24 }
 0x51f   : > { %v1927_v30 = vmul.f32 %v13350_v31, %v1924_v23 }
 0x520   : > { %v1936_v27 = vsel %vm1935_vm2, %v1925_v24, %v1934_v62 }
 0x521   : > { %v1939_v38 = vsel %vm1937_vm3, %v1938_v29, %v1936_v27  ;;  %v1929_v34 = vsel %vm1928_vm4, %v1924_v23, %v1927_v30 }
 0x522   : > { %13351 = vrcp.f32 %v1939_v38  ;;  %v1932_v25 = vsel %vm1930_vm5, %v1931_v32, %v1929_v34 }
 0x523   : > { %13353 = vrcp.f32 %v1932_v25 }
 0x52c   : > { %v13352_v54 = vpop.eup %13351 }
 0x52d   : > { %v13354_v26 = vpop.eup %13353  ;;  %v1943_v0 = vmul.f32 %v13352_v54, %v1913_v33 }
 0x52e   : > { %v1941_v39 = vmul.f32 %v13354_v26, %v1912_v28 }
 0x52f   : > { %v1951_v44 = vmul.f32 %v10564_v61, %v1943_v0 }
 0x530   : > { %v1950_v53 = vmul.f32 %v10564_v61, %v1941_v39 }
 0x531   : > { %v1959_v60 = vadd.f32 %v10565_v63, %v1951_v44 }
 0x532   : > { %v1958_v31 = vadd.f32 %v10565_v63, %v1950_v53 }
 0x533   : > { %v1963_v62 = vmul.f32 0.70710677, %v1959_v60 }
 0x534   : > { %v1962_v24 = vmul.f32 0.70710677, %v1958_v31 }
 0x535   : > { %v1965_v51 = vand.u32 2147483647, %v1963_v62  ;;  %vm2005_vm6 = vcmp.lt.f32.partialorder %v1963_v62, 0.0 }
 0x536   : > { %v1964_v36 = vand.u32 2147483647, %v1962_v24  ;;  %vm2004_vm7 = vcmp.lt.f32.partialorder %v1962_v24, 0.0 }
 0x537   : > { %v1967_v29 = vmul.f32 0.3275911, %v1965_v51  ;;  %v1993_v32 = vmul.f32 %v1965_v51, %v1965_v51 }
 0x538   : > { %v1966_v30 = vmul.f32 0.3275911, %v1964_v36  ;;  %v1992_v38 = vmul.f32 %v1964_v36, %v1964_v36 }
 0x539   : > { %v1969_v23 = vadd.f32 1.0, %v1967_v29  ;;  %v1995_v33 = vsub.f32 0.0, %v1993_v32 }
 0x53a   : > { %v1968_v27 = vadd.f32 1.0, %v1966_v30  ;;  %v1994_v28 = vsub.f32 0.0, %v1992_v38 }
 0x53b   : > { %13355 = vrcp.f32 %v1969_v23  ;;  %v1998_v63 = vmul.f32 1.442695, %v1995_v33 }
 0x53c   : > { %13357 = vrcp.f32 %v1968_v27  ;;  %v1996_v26 = vmul.f32 1.442695, %v1994_v28 }
 0x53d   : > { %13359 = vpow2.f32 %v1998_v63 }
 0x53e   : > { %13361 = vpow2.f32 %v1996_v26  ;;  %v1960_v26 = vmul.f32 0.5, %v1958_v31 }
 0x545   : > { %v13356_v34 = vpop.eup %13355 }
 0x546   : > { %v13358_v25 = vpop.eup %13357  ;;  %v1975_v54 = vmul.f32 1.0614054, %v13356_v34 }
 0x547   : > { %v1974_v39 = vmul.f32 1.0614054, %v13358_v25  ;;  %v13360_v59 = vpop.eup %13359 }
 0x548   : > { %v1977_v61 = vadd.f32 -1.4531521, %v1975_v54 }
 0x549   : > { %v1976_v53 = vadd.f32 -1.4531521, %v1974_v39  ;;  %v13362_v39 = vpop.eup %13361 }
 0x54a   : > { %v1979_v0 = vmul.f32 %v13356_v34, %v1977_v61 }
 0x54b   : > { %v1978_v44 = vmul.f32 %v13358_v25, %v1976_v53 }
 0x54c   : > { %v1981_v22 = vadd.f32 1.4214138, %v1979_v0 }
 0x54d   : > { %v1980_v52 = vadd.f32 1.4214138, %v1978_v44 }
 0x54e   : > { %v1983_v29 = vmul.f32 %v13356_v34, %v1981_v22 }
 0x54f   : > { %v1982_v30 = vmul.f32 %v13358_v25, %v1980_v52 }
 0x550   : > { %v1985_v51 = vadd.f32 -0.28449672, %v1983_v29 }
 0x551   : > { %v1984_v36 = vadd.f32 -0.28449672, %v1982_v30  ;;  %v1961_v30 = vmul.f32 0.5, %v1959_v60 }
 0x552   : > { %v1987_v23 = vmul.f32 %v13356_v34, %v1985_v51 }
 0x553   : > { %v1986_v27 = vmul.f32 %v13358_v25, %v1984_v36 }
 0x554   : > { %v1989_v32 = vadd.f32 0.2548296, %v1987_v23 }
 0x555   : > { %v1988_v38 = vadd.f32 0.2548296, %v1986_v27 }
 0x556   : > { %v1991_v21 = vmul.f32 %v13356_v34, %v1989_v32 }
 0x557   : > { %v1990_v54 = vmul.f32 %v13358_v25, %v1988_v38 }
 0x558   : > { %v2001_v33 = vmul.f32 %v13360_v59, %v1991_v21  ;;  %v10566_v21 = vld [vmem:[#allocation11] ss:$0 sm:$0xff] }
 0x559   : > { %v2000_v28 = vmul.f32 %v13362_v39, %v1990_v54 }
 0x55a   : > { %v2003_v61 = vsub.f32 1.0, %v2001_v33 }
 0x55b   : > { %v2002_v53 = vsub.f32 1.0, %v2000_v28 }
 0x55c   : > { %v2007_v0 = vsub.f32 0.0, %v2003_v61 }
 0x55d   : > { %v2006_v44 = vsub.f32 0.0, %v2002_v53 }
 0x55e   : > { %v2009_v22 = vsel %vm2005_vm6, %v2007_v0, %v2003_v61  ;;  %v2668_v0 = vld [vmem:[%s20005_s22] sm:$0xff] }
 0x55f   : > { %v2008_v52 = vsel %vm2004_vm7, %v2006_v44, %v2002_v53  ;;  %v2011_v63 = vadd.f32 1.0, %v2009_v22  ;;  %v15947_v53 = vsub.f32 %v15493_v2, %v15656_v37  ;;  %v2669_v44 = vld [vmem:[%s20005_s22 + $0x8] sm:$0xff]  ;;  %v2670_v22 = vld [vmem:[%s20005_s22 + $0x10] sm:$0xff]  ;;  %v15963_v37 = vsub.f32 %v15501_v5, %v15662_v42 }
 0x560   : > { %v2010_v29 = vadd.f32 1.0, %v2008_v52  ;;  %v1163_v52 = vld [vmem:[%s15943_s15] sm:$0xff]  ;;  %v15981_v5 = vsub.f32 %v15518_v8, %v15674_v50  ;;  %v15999_v8 = vsub.f32 %v15531_v11, %v15691_v1  ;;  %v16017_v11 = vsub.f32 %v15548_v14, %v15704_v46  ;;  %v20035_v46 = vld [vmem:[#allocation58_spill] sm:$0xff] }
 0x561   : > { %v2013_v36 = vmul.f32 %v2011_v63, %v1961_v30  ;;  %20006 = vst [vmem:[#allocation117_spill] sm:$0xff] %v15947_v53  ;;  %v1164_v63 = vld [vmem:[%s15943_s15 + $0x8] sm:$0xff]  ;;  %20008 = vst [vmem:[#allocation119_spill] sm:$0xff] %v15963_v37  ;;  %v16035_v14 = vsub.f32 %v15561_v17, %v15811_v41  ;;  %v16053_v17 = vsub.f32 %v15571_v19, %v15730_v47 }
 0x562   : > { %v2012_v51 = vmul.f32 %v2010_v29, %v1960_v26  ;;  %v12748_v26 = vpack.c.bf16 %v2669_v44, %v2668_v0  ;;  %v2671_v29 = vld [vmem:[%s20005_s22 + $0x18] sm:$0xff]  ;;  %v12744_v30 = vpack.c.bf16 %v1164_v63, %v1163_v52  ;;  %20011 = vst [vmem:[#allocation122_spill] sm:$0xff] %v15981_v5  ;;  %20014 = vst [vmem:[#allocation125_spill] sm:$0xff] %v15999_v8  ;;  %v20028_v19 = vld [vmem:[#allocation69_spill] sm:$0xff] }
 0x563   : > { %v12752_v2 = vpack.c.bf16 %v2671_v29, %v2670_v22  ;;  %20018 = vst [vmem:[#allocation128_spill] sm:$0xff] %v16017_v11  ;;  %20021 = vst [vmem:[#allocation131_spill] sm:$0xff] %v16035_v14  ;;  %v20031_v1 = vld [vmem:[#allocation72_spill] sm:$0xff]  ;;  %v20058_v44 = vld [vmem:[#allocation79_spill] sm:$0xff] }
 0x564   : > { %11877 = vmatprep.mubr.msk.f32.mxu1 %vm1902_vm1, %v2012_v51  ;;  %12749 = vmatprep.subr.bf16.mxu0 %v12748_v26  ;;  %v15959_v51 = vsub.f32 %v15498_v4, %v15653_v35  ;;  %v15975_v4 = vsub.f32 %v15511_v7, %v15671_v49  ;;  %v15993_v7 = vsub.f32 %v15528_v10, %v15684_v58  ;;  %v2754_v35 = vld [vmem:[%s20015_s23 + $0x8] sm:$0xff]  ;;  %v20026_v49 = vld [vmem:[#allocation55_spill] sm:$0xff]  ;;  %v20059_v22 = vld [vmem:[#allocation66_spill] sm:$0xff] }
 0x565   : > { %11878 = vmatmul.mubr.msk.f32.vlgmr.msra.gmra.mrb[6].mxu1 %vm1902_vm1, %v2013_v36  ;;  %12745 = vmatprep.subr.bf16.mxu1 %v12744_v30  ;;  %v15969_v36 = vsub.f32 %v15508_v6, %v15665_v43  ;;  %v15987_v6 = vsub.f32 %v15521_v9, %v15681_v57  ;;  %v16005_v9 = vsub.f32 %v15538_v12, %v15694_v3  ;;  %v20025_v43 = vld [vmem:[#allocation70_spill] sm:$0xff]  ;;  %v20029_v57 = vld [vmem:[#allocation56_spill] sm:$0xff] }
 0x566   : > { %11884 = vmatprep.mubr.msk.f32.mxu1 %vm1267_vm0, %v15947_v53  ;;  %20007 = vst [vmem:[#allocation118_spill] sm:$0xff] %v15959_v51  ;;  %12751 = vmatpush3.bf16.msra.mxu0 %v12748_v26  ;;  %20010 = vst [vmem:[#allocation121_spill] sm:$0xff] %v15975_v4  ;;  %v16011_v10 = vsub.f32 %v15541_v13, %v15701_v45  ;;  %v16023_v12 = vsub.f32 %v15551_v15, %v15711_v55  ;;  %v20034_v45 = vld [vmem:[#allocation71_spill] sm:$0xff]  ;;  %v20041_v41 = vld [vmem:[#allocation60_spill] sm:$0xff] }
 0x567   : > { %12747 = vmatpush3.bf16.msra.mxu1 %v12744_v30  ;;  %12753 = vmatprep.subr.bf16.mxu0 %v12752_v2  ;;  %20009 = vst [vmem:[#allocation120_spill] sm:$0xff] %v15969_v36  ;;  %20012 = vst [vmem:[#allocation123_spill] sm:$0xff] %v15987_v6  ;;  %v16029_v13 = vsub.f32 %v15558_v16, %v15714_v56  ;;  %v16041_v15 = vsub.f32 %v15568_v18, %v15802_v48  ;;  %v2753_v16 = vld [vmem:[%s20015_s23] sm:$0xff]  ;;  %v20037_v56 = vld [vmem:[#allocation74_spill] sm:$0xff] }
 0x568   : > { %20013 = vst [vmem:[#allocation124_spill] sm:$0xff] %v15993_v7  ;;  %20016 = vst [vmem:[#allocation126_spill] sm:$0xff] %v16005_v9  ;;  %v16049_v42 = vpack.c.bf16 %v2754_v35, %v2753_v16  ;;  %v16060_v18 = vsub.f32 %v15578_v20, %v15726_v40  ;;  %v16066_v50 = vsub.f32 %v20026_v49, %v20025_v43  ;;  %v20032_v20 = vld [vmem:[#allocation57_spill] sm:$0xff]  ;;  %v20038_v40 = vld [vmem:[#allocation59_spill] sm:$0xff] }
 0x569   : > { %20017 = vst [vmem:[#allocation127_spill] sm:$0xff] %v16011_v10  ;;  %20019 = vst [vmem:[#allocation129_spill] sm:$0xff] %v16023_v12  ;;  %v16072_v58 = vsub.f32 %v20029_v57, %v20028_v19  ;;  %v16078_v3 = vsub.f32 %v20032_v20, %v20031_v1  ;;  %v16082_v55 = vsub.f32 %v20035_v46, %v20034_v45  ;;  %v20040_v48 = vld [vmem:[#allocation73_spill] sm:$0xff]  ;;  %v20061_v63 = vld [vmem:[#allocation82_spill] sm:$0xff] }
 0x56a   : > { %11885 = vmatmul.mubr.msk.f32.vlgmr.msra.gmra.mrb[8].mxu1 %vm1267_vm0, %v15959_v51  ;;  %12755 = vmatpush3.bf16.msra.mxu0 %v12752_v2  ;;  %20020 = vst [vmem:[#allocation130_spill] sm:$0xff] %v16029_v13  ;;  %20022 = vst [vmem:[#allocation132_spill] sm:$0xff] %v16041_v15  ;;  %v16086_v47 = vsub.f32 %v20038_v40, %v20037_v56  ;;  %v16130_v52 = vsub.f32 %v20059_v22, %v20058_v44  ;;  %v20062_v26 = vld [vmem:[#allocation67_spill] sm:$0xff]  ;;  %v20064_v30 = vld [vmem:[#allocation81_spill] sm:$0xff] }
 0x56b   : > { %11887 = vmatprep.mubr.msk.f32.mxu1 %vm1267_vm0, %v15963_v37  ;;  %20023 = vst [vmem:[#allocation133_spill] sm:$0xff] %v16053_v17  ;;  %12757 = vmatprep.subr.bf16.mxu0 %v16049_v42  ;;  %20024 = vst [vmem:[#allocation134_spill] sm:$0xff] %v16060_v18  ;;  %v16136_v29 = vsub.f32 %v20062_v26, %v20061_v63  ;;  %v20065_v2 = vld [vmem:[#allocation68_spill] sm:$0xff] }
 0x56c   : > { %20027 = vst [vmem:[#allocation70_spill] sm:$0xff] %v16066_v50  ;;  %20030 = vst [vmem:[#allocation55_spill] sm:$0xff] %v16072_v58  ;;  %v16142_v16 = vsub.f32 %v20065_v2, %v20064_v30 }
 0x56d   : > { %20033 = vst [vmem:[#allocation69_spill] sm:$0xff] %v16078_v3  ;;  %20036 = vst [vmem:[#allocation56_spill] sm:$0xff] %v16082_v55 }
 0x56e   : > { %11888 = vmatmul.mubr.msk.f32.gmra.mrb[10].mxu1 %vm1267_vm0, %v15969_v36  ;;  %20039 = vst [vmem:[#allocation72_spill] sm:$0xff] %v16086_v47  ;;  %20060 = vst [vmem:[#allocation60_spill] sm:$0xff] %v16130_v52 }
 0x56f   : > { %11890 = vmatprep.mubr.msk.f32.mxu1 %vm1267_vm0, %v15975_v4 }
 0x572   : > { %11891 = vmatmul.mubr.msk.f32.gmra.mrb[12].mxu1 %vm1267_vm0, %v15981_v5  ;;  %v16505_v5 = vld [vmem:[%s20111_s28] ss:$0 sm:$0xff]  ;;  %s20207_s28 = sld [smem:[#allocation38_spill]] }
 0x573   : > { %11893 = vmatprep.mubr.msk.f32.mxu1 %vm1267_vm0, %v15987_v6 }
 0x576   : > { %11894 = vmatmul.mubr.msk.f32.gmra.mrb[14].mxu1 %vm1267_vm0, %v15993_v7 }
 0x577   : > { %11896 = vmatprep.mubr.msk.f32.mxu1 %vm1267_vm0, %v15999_v8 }
 0x578   : > { %s20208_s8 = smov %s20207_s28 }
 0x57a   : > { %11897 = vmatmul.mubr.msk.f32.gmra.mrb[16].mxu1 %vm1267_vm0, %v16005_v9 }
 0x57b   : > { %11899 = vmatprep.mubr.msk.f32.mxu1 %vm1267_vm0, %v16011_v10 }
 0x57e   : > { %11900 = vmatmul.mubr.msk.f32.gmra.mrb[18].mxu1 %vm1267_vm0, %v16017_v11  ;;  %v16494_v11 = vld [vmem:[%s20103_s2] ss:$0 sm:$0xff]  ;;  %s20180_s2 = sld [smem:[#allocation43_spill]] }
 0x57f   : > { %11902 = vmatprep.mubr.msk.f32.mxu1 %vm1267_vm0, %v16023_v12 }
 0x582   : > { %11903 = vmatmul.mubr.msk.f32.gmra.mrb[20].mxu1 %vm1267_vm0, %v16029_v13 }
 0x583   : > { %11905 = vmatprep.mubr.msk.f32.mxu1 %vm1267_vm0, %v16035_v14 }
 0x584   : > { %s20181_s5 = smov %s20180_s2 }
 0x586   : > { %11906 = vmatmul.mubr.msk.f32.gmra.mrb[22].mxu1 %vm1267_vm0, %v16041_v15 }
 0x587   : > { %11908 = vmatprep.mubr.msk.f32.mxu1 %vm1267_vm0, %v16053_v17 }
 0x58a   : > { %11909 = vmatmul.mubr.msk.f32.gmra.mrb[24].mxu1 %vm1267_vm0, %v16060_v18 }
 0x58b   : > { %11911 = vmatprep.mubr.msk.f32.mxu1 %vm1267_vm0, %v16066_v50 }
 0x58e   : > { %11912 = vmatmul.mubr.msk.f32.gmra.mrb[26].mxu1 %vm1267_vm0, %v16072_v58 }
 0x58f   : > { %11914 = vmatprep.mubr.msk.f32.mxu1 %vm1267_vm0, %v16078_v3 }
 0x592   : > { %11915 = vmatmul.mubr.msk.f32.gmra.mrb[28].mxu1 %vm1267_vm0, %v16082_v55 }
 0x593   : > { %11917 = vmatprep.mubr.msk.f32.mxu1 %vm1267_vm0, %v16086_v47 }
 0x638   : > { %v11879_v59 = vpop.f32.mrb[6].mxu1 }
 0x639   : > { %v2103_v34 = vadd.f32 %v11879_v59, %v10566_v21  ;;  %v2097_v25 = vpop.f32.mrb[7].mxu1  ;;  %v20043_v59 = vld [vmem:[#allocation76_spill] sm:$0xff] }
 0x63a   : > { %v2098_v23 = vadd.f32 %v10566_v21, %v2097_v25  ;;  %v16094_v21 = vsub.f32 %v20041_v41, %v20040_v48  ;;  %20063 = vst [vmem:[#allocation76_spill] sm:$0xff] %v16136_v29 }
 0x63b   : > { %v2111_v62 = vsel %vm1902_vm1, %v2103_v34, 0.0 }
 0x63c   : > { %2112 = vadd.xlane.f32.xlu1 %v2111_v62  ;;  %v2108_v31 = vsel %vm1902_vm1, %v2098_v23, 0.0  ;;  %20042 = vst [vmem:[#allocation57_spill] sm:$0xff] %v16094_v21  ;;  %11918 = vmatmul.mubr.msk.f32.gmra.mrb[30].mxu1 %vm1267_vm0, %v16094_v21  ;;  %v20047_v62 = vld [vmem:[#allocation62_spill] sm:$0xff] }
 0x63d   : > { %2109 = vadd.xlane.f32.xlu0 %v2108_v31 }
 0x6c9   : > { %v2113_v60 = vpop.xlane.xlu1 %2112 }
 0x6ca   : > { %v2115_v24 = vmul.f32 0.03125, %v2113_v60  ;;  %v2110_v27 = vpop.xlane.xlu0 %2109  ;;  %v20049_v60 = vld [vmem:[#allocation78_spill] sm:$0xff] }
 0x6cb   : > { %v2114_v32 = vmul.f32 0.03125, %v2110_v27 }
 0x6cc   : > { %v15931_v38 = vsub.f32 %v2103_v34, %v2115_v24  ;;  %v20044_v34 = vld [vmem:[#allocation61_spill] sm:$0xff]  ;;  %v20050_v24 = vld [vmem:[#allocation63_spill] sm:$0xff] }
 0x6cd   : > { %v15933_v54 = vsub.f32 %v2098_v23, %v2114_v32  ;;  %v16100_v25 = vsub.f32 %v20044_v34, %v20043_v59  ;;  %v20046_v23 = vld [vmem:[#allocation75_spill] sm:$0xff]  ;;  %v16112_v27 = vsub.f32 %v20050_v24, %v20049_v60  ;;  %v20052_v32 = vld [vmem:[#allocation77_spill] sm:$0xff]  ;;  %20066 = vst [vmem:[#allocation61_spill] sm:$0xff] %v16142_v16  ;;  %v10569_v60 = vld [vmem:[#allocation13] ss:$0 sm:$0xff] }
 0x6ce   : > { %v2119_v39 = vmul.f32 %v15931_v38, %v15931_v38  ;;  %v16106_v31 = vsub.f32 %v20047_v62, %v20046_v23 }
 0x6cf   : > { %v2118_v33 = vmul.f32 %v15933_v54, %v15933_v54  ;;  %20045 = vst [vmem:[#allocation71_spill] sm:$0xff] %v16100_v25  ;;  %11920 = vmatprep.mubr.msk.f32.mxu1 %vm1267_vm0, %v16100_v25  ;;  %20051 = vst [vmem:[#allocation74_spill] sm:$0xff] %v16112_v27 }
 0x6d0   : > { %v2123_v28 = vsel %vm1902_vm1, %v2119_v39, 0.0  ;;  %20048 = vst [vmem:[#allocation58_spill] sm:$0xff] %v16106_v31  ;;  %11921 = vmatmul.mubr.msk.f32.gmra.mrb[32].mxu1 %vm1267_vm0, %v16106_v31  ;;  %v20053_v39 = vld [vmem:[#allocation64_spill] sm:$0xff] }
 0x6d1   : > { %2124 = vadd.xlane.f32.xlu1 %v2123_v28  ;;  %v2120_v61 = vsel %vm1902_vm1, %v2118_v33, 0.0  ;;  %v16118_v33 = vsub.f32 %v20053_v39, %v20052_v32  ;;  %11923 = vmatprep.mubr.msk.f32.mxu1 %vm1267_vm0, %v16112_v27  ;;  %v20055_v28 = vld [vmem:[#allocation80_spill] sm:$0xff]  ;;  %v10570_v39 = vld [vmem:[#allocation14] ss:$0 sm:$0xff] }
 0x6d2   : > { %2121 = vadd.xlane.f32.xlu0 %v2120_v61  ;;  %v20056_v61 = vld [vmem:[#allocation65_spill] sm:$0xff] }
 0x6d3   : > { %20054 = vst [vmem:[#allocation59_spill] sm:$0xff] %v16118_v33  ;;  %v16124_v0 = vsub.f32 %v20056_v61, %v20055_v28 }
 0x6d4   : > { %11924 = vmatmul.mubr.msk.f32.gmra.mrb[34].mxu1 %vm1267_vm0, %v16118_v33 }
 0x6d5   : > { %20057 = vst [vmem:[#allocation73_spill] sm:$0xff] %v16124_v0  ;;  %11926 = vmatprep.mubr.msk.f32.mxu1 %vm1267_vm0, %v16124_v0 }
 0x6d8   : > { %11927 = vmatmul.mubr.msk.f32.gmra.mrb[36].mxu1 %vm1267_vm0, %v16130_v52 }
 0x6d9   : > { %11929 = vmatprep.mubr.msk.f32.mxu1 %vm1267_vm0, %v16136_v29 }
 0x6dc   : > { %11930 = vmatmul.mubr.msk.f32.gmra.mrb[38].mxu1 %vm1267_vm0, %v16142_v16 }
 0x75e   : > { %v2125_v35 = vpop.xlane.xlu1 %2124 }
 0x75f   : > { %v2127_v43 = vmul.f32 0.03125, %v2125_v35  ;;  %v2122_v49 = vpop.xlane.xlu0 %2121 }
 0x760   : > { %v2126_v19 = vmul.f32 0.03125, %v2122_v49 }
 0x761   : > { %v2129_v57 = vadd.f32 1e-05, %v2127_v43 }
 0x762   : > { %v2128_v1 = vadd.f32 1e-05, %v2126_v19 }
 0x763   : > { %13363 = vrsqrt.f32 %v2129_v57  ;;  %vm2139_vm8 = vcmp.eq.f32.partialorder %v2129_v57, inf  ;;  %v2142_v56 = vand.u32 2147483648, %v2129_v57  ;;  %vm2141_vm9 = vcmp.eq.f32.partialorder %v2129_v57, 0.0 }
 0x764   : > { %13365 = vrsqrt.f32 %v2128_v1  ;;  %vm2132_vm10 = vcmp.eq.f32.partialorder %v2128_v1, inf  ;;  %v2135_v41 = vand.u32 2147483648, %v2128_v1  ;;  %vm2134_vm11 = vcmp.eq.f32.partialorder %v2128_v1, 0.0 }
 0x76d   : > { %v13364_v20 = vpop.eup %13363 }
 0x76e   : > { %v13366_v45 = vpop.eup %13365  ;;  %v2138_v46 = vmul.f32 %v13364_v20, %v2129_v57 }
 0x76f   : > { %v2131_v40 = vmul.f32 %v13366_v45, %v2128_v1 }
 0x770   : > { %v2140_v48 = vsel %vm2139_vm8, %v2129_v57, %v2138_v46 }
 0x771   : > { %v2143_v59 = vsel %vm2141_vm9, %v2142_v56, %v2140_v48  ;;  %v2133_v34 = vsel %vm2132_vm10, %v2128_v1, %v2131_v40 }
 0x772   : > { %13367 = vrcp.f32 %v2143_v59  ;;  %v2136_v23 = vsel %vm2134_vm11, %v2135_v41, %v2133_v34 }
 0x773   : > { %13369 = vrcp.f32 %v2136_v23 }
 0x77c   : > { %v13368_v62 = vpop.eup %13367 }
 0x77d   : > { %v13370_v24 = vpop.eup %13369  ;;  %v2147_v32 = vmul.f32 %v13368_v62, %v15931_v38 }
 0x77e   : > { %v2145_v28 = vmul.f32 %v13370_v24, %v15933_v54 }
 0x77f   : > { %v2155_v61 = vmul.f32 %v10569_v60, %v2147_v32 }
 0x780   : > { %v2154_v44 = vmul.f32 %v10569_v60, %v2145_v28 }
 0x781   : > { %v2163_v22 = vadd.f32 %v10570_v39, %v2155_v61 }
 0x782   : > { %v2162_v63 = vadd.f32 %v10570_v39, %v2154_v44 }
 0x783   : > { %v2167_v26 = vmul.f32 0.70710677, %v2163_v22 }
 0x784   : > { %v2166_v30 = vmul.f32 0.70710677, %v2162_v63 }
 0x785   : > { %v2169_v2 = vand.u32 2147483647, %v2167_v26  ;;  %vm2209_vm12 = vcmp.lt.f32.partialorder %v2167_v26, 0.0 }
 0x786   : > { %v2168_v35 = vand.u32 2147483647, %v2166_v30  ;;  %vm2208_vm13 = vcmp.lt.f32.partialorder %v2166_v30, 0.0 }
 0x787   : > { %v2171_v43 = vmul.f32 0.3275911, %v2169_v2  ;;  %v2197_v1 = vmul.f32 %v2169_v2, %v2169_v2 }
 0x788   : > { %v2170_v49 = vmul.f32 0.3275911, %v2168_v35  ;;  %v2196_v20 = vmul.f32 %v2168_v35, %v2168_v35 }
 0x789   : > { %v2173_v19 = vadd.f32 1.0, %v2171_v43  ;;  %v2199_v45 = vsub.f32 0.0, %v2197_v1 }
 0x78a   : > { %v2172_v57 = vadd.f32 1.0, %v2170_v49  ;;  %v2198_v54 = vsub.f32 0.0, %v2196_v20 }
 0x78b   : > { %13371 = vrcp.f32 %v2173_v19  ;;  %v2202_v59 = vmul.f32 1.442695, %v2199_v45 }
 0x78c   : > { %13373 = vrcp.f32 %v2172_v57  ;;  %v2200_v34 = vmul.f32 1.442695, %v2198_v54 }
 0x78d   : > { %13375 = vpow2.f32 %v2202_v59 }
 0x78e   : > { %13377 = vpow2.f32 %v2200_v34 }
 0x795   : > { %v13372_v38 = vpop.eup %13371 }
 0x796   : > { %v13374_v46 = vpop.eup %13373  ;;  %v2179_v56 = vmul.f32 1.0614054, %v13372_v38 }
 0x797   : > { %v2178_v40 = vmul.f32 1.0614054, %v13374_v46  ;;  %v13376_v19 = vpop.eup %13375 }
 0x798   : > { %v2181_v48 = vadd.f32 -1.4531521, %v2179_v56  ;;  %v13378_v1 = vpop.eup %13377 }
 0x799   : > { %v2180_v41 = vadd.f32 -1.4531521, %v2178_v40 }
 0x79a   : > { %v2183_v23 = vmul.f32 %v13372_v38, %v2181_v48 }
 0x79b   : > { %v2182_v62 = vmul.f32 %v13374_v46, %v2180_v41 }
 0x79c   : > { %v2185_v60 = vadd.f32 1.4214138, %v2183_v23  ;;  %v2164_v23 = vmul.f32 0.5, %v2162_v63  ;;  %v16167_v63 = vpop.f32.mrb[8].mxu1 }
 0x79d   : > { %v2184_v24 = vadd.f32 1.4214138, %v2182_v62  ;;  %20067 = vst [vmem:[#allocation75_spill] sm:$0xff] %v16167_v63  ;;  %v2540_v26 = vmul.f32 %v16167_v63, %v16167_v63  ;;  %v16171_v30 = vpop.f32.mrb[9].mxu1 }
 0x79e   : > { %v2187_v32 = vmul.f32 %v13372_v38, %v2185_v60  ;;  %v2756_v60 = vld [vmem:[%s20015_s23 + $0x18] sm:$0xff]  ;;  %20068 = vst [vmem:[#allocation62_spill] sm:$0xff] %v16171_v30 }
 0x79f   : > { %v2186_v39 = vmul.f32 %v13374_v46, %v2184_v24  ;;  %v2165_v24 = vmul.f32 0.5, %v2163_v22  ;;  %v14463_v22 = vld [vmem:[%s15121_s21] sm:$0xff] }
 0x7a0   : > { %v2189_v28 = vadd.f32 -0.28449672, %v2187_v32 }
 0x7a1   : > { %v2188_v61 = vadd.f32 -0.28449672, %v2186_v39 }
 0x7a2   : > { %v2191_v44 = vmul.f32 %v13372_v38, %v2189_v28  ;;  %v2575_v28 = vsel %vm2571_vm14, %v2540_v26, 0.0 }
 0x7a3   : > { %v2190_v2 = vmul.f32 %v13374_v46, %v2188_v61  ;;  %v16176_v61 = vpop.f32.mrb[10].mxu1  ;;  %2576 = vadd.xlane.f32.xlu1 %v2575_v28 }
 0x7a4   : > { %v2193_v35 = vadd.f32 0.2548296, %v2191_v44  ;;  %20069 = vst [vmem:[#allocation78_spill] sm:$0xff] %v16176_v61 }
 0x7a5   : > { %v2192_v43 = vadd.f32 0.2548296, %v2190_v2  ;;  %v2542_v2 = vmul.f32 %v16176_v61, %v16176_v61 }
 0x7a6   : > { %v2195_v49 = vmul.f32 %v13372_v38, %v2193_v35  ;;  %v2755_v38 = vld [vmem:[%s20015_s23 + $0x10] sm:$0xff]  ;;  %v16181_v35 = vpop.f32.mrb[11].mxu1 }
 0x7a7   : > { %v2194_v57 = vmul.f32 %v13374_v46, %v2192_v43  ;;  %v12760_v39 = vpack.c.bf16 %v2756_v60, %v2755_v38  ;;  %20070 = vst [vmem:[#allocation63_spill] sm:$0xff] %v16181_v35  ;;  %v2541_v43 = vmul.f32 %v16181_v35, %v16181_v35 }
 0x7a8   : > { %v2205_v20 = vmul.f32 %v13376_v19, %v2195_v49  ;;  %v2581_v49 = vsel %vm2571_vm14, %v2542_v2, 0.0  ;;  %v16186_v19 = vpop.f32.mrb[12].mxu1 }
 0x7a9   : > { %v2204_v45 = vmul.f32 %v13378_v1, %v2194_v57  ;;  %20071 = vst [vmem:[#allocation77_spill] sm:$0xff] %v16186_v19  ;;  %2582 = vadd.xlane.f32.xlu1 %v2581_v49  ;;  %v2578_v57 = vsel %vm2571_vm14, %v2541_v43, 0.0  ;;  %v2544_v1 = vmul.f32 %v16186_v19, %v16186_v19 }
 0x7aa   : > { %v2207_v54 = vsub.f32 1.0, %v2205_v20  ;;  %v16191_v20 = vpop.f32.mrb[13].mxu1 }
 0x7ab   : > { %v2206_v56 = vsub.f32 1.0, %v2204_v45  ;;  %20072 = vst [vmem:[#allocation64_spill] sm:$0xff] %v16191_v20  ;;  %v2543_v45 = vmul.f32 %v16191_v20, %v16191_v20 }
 0x7ac   : > { %v2211_v40 = vsub.f32 0.0, %v2207_v54 }
 0x7ad   : > { %v2210_v48 = vsub.f32 0.0, %v2206_v56 }
 0x7ae   : > { %v2213_v41 = vsel %vm2209_vm12, %v2211_v40, %v2207_v54  ;;  %v2587_v54 = vsel %vm2571_vm14, %v2544_v1, 0.0  ;;  %v2584_v40 = vsel %vm2571_vm14, %v2543_v45, 0.0 }
 0x7af   : > { %v2212_v59 = vsel %vm2208_vm13, %v2210_v48, %v2206_v56  ;;  %v2215_v34 = vadd.f32 1.0, %v2213_v41  ;;  %v16196_v56 = vpop.f32.mrb[14].mxu1  ;;  %2588 = vadd.xlane.f32.xlu1 %v2587_v54 }
 0x7b0   : > { %v2214_v62 = vadd.f32 1.0, %v2212_v59  ;;  %20073 = vst [vmem:[#allocation80_spill] sm:$0xff] %v16196_v56  ;;  %v2546_v48 = vmul.f32 %v16196_v56, %v16196_v56  ;;  %v16201_v41 = vpop.f32.mrb[15].mxu1 }
 0x7b1   : > { %v16154_v32 = vmul.f32 %v2215_v34, %v2165_v24  ;;  %20074 = vst [vmem:[#allocation65_spill] sm:$0xff] %v16201_v41  ;;  %v2545_v59 = vmul.f32 %v16201_v41, %v16201_v41 }
 0x7b2   : > { %v16152_v46 = vmul.f32 %v2214_v62, %v2164_v23  ;;  %v2593_v34 = vsel %vm2571_vm14, %v2546_v48, 0.0  ;;  %v16206_v23 = vpop.f32.mrb[16].mxu1 }
 0x7b3   : > { %20075 = vst [vmem:[#allocation79_spill] sm:$0xff] %v16206_v23  ;;  %2594 = vadd.xlane.f32.xlu1 %v2593_v34  ;;  %v2590_v62 = vsel %vm2571_vm14, %v2545_v59, 0.0  ;;  %v2548_v38 = vmul.f32 %v16206_v23, %v16206_v23  ;;  %v16211_v60 = vpop.f32.mrb[17].mxu1 }
 0x7b4   : > { %11940 = vmatprep.mubr.msk.f32.mxu0 %vm1902_vm1, %v16152_v46  ;;  %20076 = vst [vmem:[#allocation66_spill] sm:$0xff] %v16211_v60  ;;  %v2547_v24 = vmul.f32 %v16211_v60, %v16211_v60 }
 0x7b5   : > { %11941 = vmatmul.mubr.msk.f32.vlgmr.msra.gmra.mrb[32].mxu0 %vm1902_vm1, %v16154_v32 }
 0x7b6   : > { %12759 = vmatpush3.bf16.msra.mxu0 %v16049_v42  ;;  %11951 = vmatprep.mubr.msk.f32.mxu0 %vm1902_vm1, %v16152_v46  ;;  %v2539_v42 = vmul.f32 %v16171_v30, %v16171_v30  ;;  %v2596_v26 = vsel %vm2571_vm14, %v2547_v24, 0.0 }
 0x7b7   : > { %12761 = vmatprep.subr.bf16.mxu0 %v12760_v39 }
 0x7b8   : > { %v2572_v44 = vsel %vm2571_vm14, %v2539_v42, 0.0 }
 0x7b9   : > { %2573 = vadd.xlane.f32.xlu0 %v2572_v44 }
 0x7ba   : > { %12763 = vmatpush3.bf16.msra.mxu0 %v12760_v39  ;;  %v2599_v39 = vsel %vm2571_vm14, %v2548_v38, 0.0 }
 0x7bb   : > { %2600 = vadd.xlane.f32.xlu1 %v2599_v39 }
 0x7bd   : > { %11952 = vmatmul.mubr.msk.f32.vlgmr.msra.gmra.mrb[34].mxu0 %vm1902_vm1, %v16154_v32  ;;  %2579 = vadd.xlane.f32.xlu0 %v2578_v57 }
 0x7be   : > { %11958 = vmatprep.mubr.msk.f32.mxu0 %vm1267_vm0, %v14463_v22  ;;  %v16216_v22 = vpop.f32.mrb[18].mxu1 }
 0x7bf   : > { %20077 = vst [vmem:[#allocation82_spill] sm:$0xff] %v16216_v22  ;;  %v2550_v42 = vmul.f32 %v16216_v22, %v16216_v22  ;;  %v16221_v28 = vpop.f32.mrb[19].mxu1 }
 0x7c0   : > { %20078 = vst [vmem:[#allocation67_spill] sm:$0xff] %v16221_v28  ;;  %v2549_v44 = vmul.f32 %v16221_v28, %v16221_v28  ;;  %v16226_v43 = vpop.f32.mrb[20].mxu1 }
 0x7c1   : > { %2585 = vadd.xlane.f32.xlu0 %v2584_v40  ;;  %v2605_v2 = vsel %vm2571_vm14, %v2550_v42, 0.0  ;;  %20079 = vst [vmem:[#allocation81_spill] sm:$0xff] %v16226_v43  ;;  %v2552_v57 = vmul.f32 %v16226_v43, %v16226_v43  ;;  %v16231_v1 = vpop.f32.mrb[21].mxu1 }
 0x7c2   : > { %2606 = vadd.xlane.f32.xlu1 %v2605_v2  ;;  %v2602_v49 = vsel %vm2571_vm14, %v2549_v44, 0.0  ;;  %20080 = vst [vmem:[#allocation68_spill] sm:$0xff] %v16231_v1  ;;  %v2551_v45 = vmul.f32 %v16231_v1, %v16231_v1  ;;  %v16236_v40 = vpop.f32.mrb[22].mxu1 }
 0x7c3   : > { %v2611_v54 = vsel %vm2571_vm14, %v2552_v57, 0.0  ;;  %20081 = vst [vmem:[#allocation135_spill] sm:$0xff] %v16236_v40  ;;  %v16239_v59 = vpop.f32.mrb[23].mxu1  ;;  %v2554_v34 = vmul.f32 %v16236_v40, %v16236_v40 }
 0x7c4   : > { %v2608_v48 = vsel %vm2571_vm14, %v2551_v45, 0.0  ;;  %20082 = vst [vmem:[#allocation136_spill] sm:$0xff] %v16239_v59  ;;  %v16245_v38 = vpop.f32.mrb[24].mxu1 }
 0x7c5   : > { %2591 = vadd.xlane.f32.xlu0 %v2590_v62  ;;  %v2553_v62 = vmul.f32 %v16239_v59, %v16239_v59  ;;  %20083 = vst [vmem:[#allocation137_spill] sm:$0xff] %v16245_v38  ;;  %v2617_v24 = vsel %vm2571_vm14, %v2554_v34, 0.0  ;;  %v16251_v42 = vpop.f32.mrb[25].mxu1 }
 0x7c6   : > { %2612 = vadd.xlane.f32.xlu1 %v2611_v54  ;;  %20084 = vst [vmem:[#allocation138_spill] sm:$0xff] %v16251_v42  ;;  %v2555_v44 = vmul.f32 %v16251_v42, %v16251_v42 }
 0x7c7   : > { %v2614_v39 = vsel %vm2571_vm14, %v2553_v62, 0.0 }
 0x7c8   : > { %v2620_v57 = vsel %vm2571_vm14, %v2555_v44, 0.0 }
 0x7c9   : > { %2597 = vadd.xlane.f32.xlu0 %v2596_v26  ;;  %v2556_v26 = vmul.f32 %v16245_v38, %v16245_v38 }
 0x7ca   : > { %2618 = vadd.xlane.f32.xlu1 %v2617_v24 }
 0x7cb   : > { %v2623_v2 = vsel %vm2571_vm14, %v2556_v26, 0.0 }
 0x7cd   : > { %2603 = vadd.xlane.f32.xlu0 %v2602_v49  ;;  %v16256_v49 = vpop.f32.mrb[26].mxu1 }
 0x7ce   : > { %20085 = vst [vmem:[#allocation139_spill] sm:$0xff] %v16256_v49  ;;  %v2558_v45 = vmul.f32 %v16256_v49, %v16256_v49  ;;  %2624 = vadd.xlane.f32.xlu1 %v2623_v2  ;;  %v16261_v54 = vpop.f32.mrb[27].mxu1 }
 0x7cf   : > { %20086 = vst [vmem:[#allocation140_spill] sm:$0xff] %v16261_v54  ;;  %v16265_v34 = vpop.f32.mrb[28].mxu1 }
 0x7d0   : > { %20087 = vst [vmem:[#allocation141_spill] sm:$0xff] %v16265_v34  ;;  %v2629_v62 = vsel %vm2571_vm14, %v2558_v45, 0.0  ;;  %v16271_v26 = vpop.f32.mrb[29].mxu1 }
 0x7d1   : > { %2609 = vadd.xlane.f32.xlu0 %v2608_v48  ;;  %v2557_v48 = vmul.f32 %v16261_v54, %v16261_v54  ;;  %20088 = vst [vmem:[#allocation142_spill] sm:$0xff] %v16271_v26  ;;  %v2559_v44 = vmul.f32 %v16271_v26, %v16271_v26  ;;  %v16275_v2 = vpop.f32.mrb[30].mxu1 }
 0x7d2   : > { %2630 = vadd.xlane.f32.xlu1 %v2629_v62  ;;  %20089 = vst [vmem:[#allocation143_spill] sm:$0xff] %v16275_v2  ;;  %v2562_v45 = vmul.f32 %v16275_v2, %v16275_v2 }
 0x7d3   : > { %v2626_v24 = vsel %vm2571_vm14, %v2557_v48, 0.0  ;;  %v2632_v16 = vsel %vm2571_vm14, %v2559_v44, 0.0  ;;  %v16281_v48 = vpop.f32.mrb[31].mxu1 }
 0x7d4   : > { %20090 = vst [vmem:[#allocation144_spill] sm:$0xff] %v16281_v48  ;;  %v2561_v62 = vmul.f32 %v16281_v48, %v16281_v48  ;;  %v16286_v29 = vpop.f32.mrb[32].mxu1 }
 0x7d5   : > { %2615 = vadd.xlane.f32.xlu0 %v2614_v39  ;;  %v2560_v39 = vmul.f32 %v16265_v34, %v16265_v34  ;;  %20091 = vst [vmem:[#allocation145_spill] sm:$0xff] %v16286_v29  ;;  %v16291_v44 = vpop.f32.mrb[33].mxu1 }
 0x7d6   : > { %v2638_v52 = vsel %vm2571_vm14, %v2561_v62, 0.0  ;;  %20092 = vst [vmem:[#allocation146_spill] sm:$0xff] %v16291_v44  ;;  %v16296_v0 = vpop.f32.mrb[34].mxu1 }
 0x7d7   : > { %20093 = vst [vmem:[#allocation147_spill] sm:$0xff] %v16296_v0  ;;  %v2566_v33 = vmul.f32 %v16296_v0, %v16296_v0  ;;  %v16301_v62 = vpop.f32.mrb[35].mxu1 }
 0x7d8   : > { %20094 = vst [vmem:[#allocation148_spill] sm:$0xff] %v16301_v62  ;;  %v16306_v27 = vpop.f32.mrb[36].mxu1 }
 0x7d9   : > { %2621 = vadd.xlane.f32.xlu0 %v2620_v57  ;;  %v2635_v57 = vsel %vm2571_vm14, %v2560_v39, 0.0  ;;  %v2564_v39 = vmul.f32 %v16286_v29, %v16286_v29  ;;  %20095 = vst [vmem:[#allocation149_spill] sm:$0xff] %v16306_v27  ;;  %v2568_v31 = vmul.f32 %v16306_v27, %v16306_v27 }
 0x7da   : > { %2636 = vadd.xlane.f32.xlu1 %v2635_v57  ;;  %v2563_v57 = vmul.f32 %v16291_v44, %v16291_v44 }
 0x7dd   : > { %2627 = vadd.xlane.f32.xlu0 %v2626_v24  ;;  %v2641_v24 = vsel %vm2571_vm14, %v2562_v45, 0.0  ;;  %v2644_v45 = vsel %vm2571_vm14, %v2563_v57, 0.0  ;;  %v16311_v57 = vpop.f32.mrb[37].mxu1 }
 0x7de   : > { %2642 = vadd.xlane.f32.xlu1 %v2641_v24  ;;  %v2565_v24 = vmul.f32 %v16301_v62, %v16301_v62  ;;  %20096 = vst [vmem:[#allocation150_spill] sm:$0xff] %v16311_v57  ;;  %v16316_v25 = vpop.f32.mrb[38].mxu1 }
 0x7df   : > { %20097 = vst [vmem:[#allocation151_spill] sm:$0xff] %v16316_v25  ;;  %v2570_v21 = vmul.f32 %v16316_v25, %v16316_v25 }
 0x7e1   : > { %2633 = vadd.xlane.f32.xlu0 %v2632_v16  ;;  %v2647_v16 = vsel %vm2571_vm14, %v2564_v39, 0.0  ;;  %v2650_v39 = vsel %vm2571_vm14, %v2565_v24, 0.0  ;;  %v16321_v24 = vpop.f32.mrb[39].mxu1 }
 0x7e2   : > { %2648 = vadd.xlane.f32.xlu1 %v2647_v16  ;;  %v2567_v16 = vmul.f32 %v16311_v57, %v16311_v57  ;;  %20098 = vst [vmem:[#allocation152_spill] sm:$0xff] %v16321_v24 }
 0x7e5   : > { %2639 = vadd.xlane.f32.xlu0 %v2638_v52  ;;  %v2653_v52 = vsel %vm2571_vm14, %v2566_v33, 0.0  ;;  %v2656_v33 = vsel %vm2571_vm14, %v2567_v16, 0.0 }
 0x7e6   : > { %2654 = vadd.xlane.f32.xlu1 %v2653_v52  ;;  %v2569_v52 = vmul.f32 %v16321_v24, %v16321_v24 }
 0x7e9   : > { %2645 = vadd.xlane.f32.xlu0 %v2644_v45  ;;  %v2659_v45 = vsel %vm2571_vm14, %v2568_v31, 0.0  ;;  %v2662_v31 = vsel %vm2571_vm14, %v2569_v52, 0.0  ;;  %v14465_v52 = vld [vmem:[%s15121_s21 + $0x10] sm:$0xff] }
 0x7ea   : > { %2660 = vadd.xlane.f32.xlu1 %v2659_v45 }
 0x7ed   : > { %2651 = vadd.xlane.f32.xlu0 %v2650_v39  ;;  %v2665_v39 = vsel %vm2571_vm14, %v2570_v21, 0.0  ;;  %v14464_v21 = vld [vmem:[%s15121_s21 + $0x8] sm:$0xff] }
 0x7ee   : > { %2666 = vadd.xlane.f32.xlu1 %v2665_v39  ;;  %v14467_v39 = vld [vmem:[%s15121_s21 + $0x20] sm:$0xff] }
 0x7f1   : > { %2657 = vadd.xlane.f32.xlu0 %v2656_v33 }
 0x7f5   : > { %2663 = vadd.xlane.f32.xlu0 %v2662_v31  ;;  %v14469_v31 = vld [vmem:[%s15121_s21 + $0x30] sm:$0xff] }
 0x846   : > { %v16459_v58 = vpop.xlane.xlu0 %2573 }
 0x847   : > { %20101 = vst [vmem:[#allocation154_spill] sm:$0xff] %v16459_v58  ;;  %v3385_v9 = vmul.f32 %v16494_v11, %v16459_v58 }
 0x888   : > { %v11942_v16 = vpop.f32.mrb[32].mxu0 }
 0x889   : > { %v2744_v47 = vpop.f32.mrb[33].mxu0 }
 0x88a   : > { %v12768_v55 = vpack.c.bf16 %v11942_v16, %v2744_v47  ;;  %v14466_v47 = vld [vmem:[%s15121_s21 + $0x18] sm:$0xff]  ;;  %v14471_v16 = vld [vmem:[%s15121_s21 + $0x40] sm:$0xff] }
 0x890   : > { %v11953_v45 = vpop.f32.mrb[34].mxu0 }
 0x891   : > { %v2823_v3 = vpop.f32.mrb[35].mxu0 }
 0x892   : > { %v12764_v33 = vpack.c.bf16 %v11953_v45, %v2823_v3  ;;  %v14468_v3 = vld [vmem:[%s15121_s21 + $0x28] sm:$0xff] }
 0x893   : > { %v14472_v45 = vld [vmem:[%s15121_s21 + $0x48] sm:$0xff] }
 0x894   : > { %12765 = vmatprep.subr.bf16.mxu0 %v12764_v33 }
 0x895   : > { %12767 = vmatpush3.bf16.msra.mxu0 %v12764_v33  ;;  %v14473_v33 = vld [vmem:[%s15121_s21 + $0x50] sm:$0xff] }
 0x896   : > { %12769 = vmatprep.subr.bf16.mxu0 %v12768_v55 }
 0x898   : > { %11959 = vmatmul.mubr.msk.f32.vlgmr.msra.gmra.mrb[36].mxu0 %vm1267_vm0, %v14464_v21  ;;  %v14474_v21 = vld [vmem:[%s15121_s21 + $0x58] sm:$0xff] }
 0x899   : > { %12771 = vmatpush3.bf16.msra.mxu0 %v12768_v55  ;;  %11961 = vmatprep.mubr.msk.f32.mxu0 %vm1267_vm0, %v14465_v52  ;;  %v14470_v55 = vld [vmem:[%s15121_s21 + $0x38] sm:$0xff]  ;;  %v14475_v52 = vld [vmem:[%s15121_s21 + $0x60] sm:$0xff] }
 0x89c   : > { %11962 = vmatmul.mubr.msk.f32.gmra.mrb[38].mxu0 %vm1267_vm0, %v14466_v47  ;;  %v14476_v47 = vld [vmem:[%s15121_s21 + $0x68] sm:$0xff] }
 0x89d   : > { %11964 = vmatprep.mubr.msk.f32.mxu0 %vm1267_vm0, %v14467_v39  ;;  %v14477_v39 = vld [vmem:[%s15121_s21 + $0x70] sm:$0xff] }
 0x8a0   : > { %11965 = vmatmul.mubr.msk.f32.gmra.mrb[40].mxu0 %vm1267_vm0, %v14468_v3  ;;  %v14478_v3 = vld [vmem:[%s15121_s21 + $0x78] sm:$0xff] }
 0x8a1   : > { %11967 = vmatprep.mubr.msk.f32.mxu0 %vm1267_vm0, %v14469_v31  ;;  %v14479_v31 = vld [vmem:[%s15121_s21 + $0x80] sm:$0xff] }
 0x8a4   : > { %11968 = vmatmul.mubr.msk.f32.gmra.mrb[42].mxu0 %vm1267_vm0, %v14470_v55  ;;  %v14480_v55 = vld [vmem:[%s15121_s21 + $0x88] sm:$0xff] }
 0x8a5   : > { %11970 = vmatprep.mubr.msk.f32.mxu0 %vm1267_vm0, %v14471_v16  ;;  %v14481_v16 = vld [vmem:[%s15121_s21 + $0x90] sm:$0xff] }
 0x8a8   : > { %11971 = vmatmul.mubr.msk.f32.gmra.mrb[44].mxu0 %vm1267_vm0, %v14472_v45  ;;  %v14482_v45 = vld [vmem:[%s15121_s21 + $0x98] sm:$0xff] }
 0x8a9   : > { %11973 = vmatprep.mubr.msk.f32.mxu0 %vm1267_vm0, %v14473_v33  ;;  %v14483_v33 = vld [vmem:[%s15121_s21 + $0xa0] sm:$0xff] }
 0x8ac   : > { %11974 = vmatmul.mubr.msk.f32.gmra.mrb[46].mxu0 %vm1267_vm0, %v14474_v21  ;;  %v14484_v21 = vld [vmem:[%s15121_s21 + $0xa8] sm:$0xff] }
 0x8ad   : > { %11976 = vmatprep.mubr.msk.f32.mxu0 %vm1267_vm0, %v14475_v52  ;;  %v14485_v52 = vld [vmem:[%s15121_s21 + $0xb0] sm:$0xff] }
 0x8b0   : > { %11977 = vmatmul.mubr.msk.f32.gmra.mrb[48].mxu0 %vm1267_vm0, %v14476_v47  ;;  %v14486_v47 = vld [vmem:[%s15121_s21 + $0xb8] sm:$0xff] }
 0x8b1   : > { %11979 = vmatprep.mubr.msk.f32.mxu0 %vm1267_vm0, %v14477_v39  ;;  %v14487_v39 = vld [vmem:[%s15121_s21 + $0xc0] sm:$0xff] }
 0x8b4   : > { %11980 = vmatmul.mubr.msk.f32.gmra.mrb[50].mxu0 %vm1267_vm0, %v14478_v3  ;;  %v14488_v3 = vld [vmem:[%s15121_s21 + $0xc8] sm:$0xff] }
 0x8b5   : > { %11982 = vmatprep.mubr.msk.f32.mxu0 %vm1267_vm0, %v14479_v31  ;;  %v14489_v31 = vld [vmem:[%s15121_s21 + $0xd0] sm:$0xff] }
 0x8b8   : > { %11983 = vmatmul.mubr.msk.f32.gmra.mrb[52].mxu0 %vm1267_vm0, %v14480_v55  ;;  %v14490_v55 = vld [vmem:[%s15121_s21 + $0xd8] sm:$0xff] }
 0x8b9   : > { %11985 = vmatprep.mubr.msk.f32.mxu0 %vm1267_vm0, %v14481_v16  ;;  %v14491_v16 = vld [vmem:[%s15121_s21 + $0xe0] sm:$0xff] }
 0x8bc   : > { %11986 = vmatmul.mubr.msk.f32.gmra.mrb[54].mxu0 %vm1267_vm0, %v14482_v45  ;;  %v14492_v45 = vld [vmem:[%s15121_s21 + $0xe8] sm:$0xff] }
 0x8bd   : > { %11988 = vmatprep.mubr.msk.f32.mxu0 %vm1267_vm0, %v14483_v33  ;;  %v14493_v33 = vld [vmem:[%s15121_s21 + $0xf0] sm:$0xff] }
 0x8c0   : > { %11989 = vmatmul.mubr.msk.f32.gmra.mrb[56].mxu0 %vm1267_vm0, %v14484_v21  ;;  %v14494_v21 = vld [vmem:[%s15121_s21 + $0xf8] sm:$0xff] }
 0x8c1   : > { %11991 = vmatprep.mubr.msk.f32.mxu0 %vm1267_vm0, %v14485_v52  ;;  %v14495_v52 = vld [vmem:[%s15116_s17] sm:$0xff] }
 0x8c4   : > { %11992 = vmatmul.mubr.msk.f32.gmra.mrb[58].mxu0 %vm1267_vm0, %v14486_v47  ;;  %v14496_v47 = vld [vmem:[%s15116_s17 + $0x8] sm:$0xff] }
 0x8c5   : > { %11994 = vmatprep.mubr.msk.f32.mxu0 %vm1267_vm0, %v14487_v39  ;;  %v14497_v39 = vld [vmem:[%s15116_s17 + $0x10] sm:$0xff] }
 0x8c8   : > { %11995 = vmatmul.mubr.msk.f32.gmra.mrb[60].mxu0 %vm1267_vm0, %v14488_v3  ;;  %v14498_v3 = vld [vmem:[%s15116_s17 + $0x18] sm:$0xff] }
 0x8c9   : > { %11997 = vmatprep.mubr.msk.f32.mxu0 %vm1267_vm0, %v14489_v31  ;;  %v14499_v31 = vld [vmem:[%s15116_s17 + $0x20] sm:$0xff] }
 0x8cc   : > { %11998 = vmatmul.mubr.msk.f32.gmra.mrb[62].mxu0 %vm1267_vm0, %v14490_v55  ;;  %v14500_v55 = vld [vmem:[%s15116_s17 + $0x28] sm:$0xff] }
 0x8cd   : > { %12000 = vmatprep.mubr.msk.f32.mxu0 %vm1267_vm0, %v14491_v16  ;;  %v14501_v16 = vld [vmem:[%s15116_s17 + $0x30] sm:$0xff] }
 0x8d0   : > { %12001 = vmatmul.mubr.msk.f32.gmra.mrb[64].mxu0 %vm1267_vm0, %v14492_v45  ;;  %v14502_v45 = vld [vmem:[%s15116_s17 + $0x38] sm:$0xff] }
 0x8d1   : > { %12003 = vmatprep.mubr.msk.f32.mxu0 %vm1267_vm0, %v14493_v33  ;;  %v14503_v33 = vld [vmem:[%s15116_s17 + $0x40] sm:$0xff] }
 0x8d4   : > { %12004 = vmatmul.mubr.msk.f32.gmra.mrb[66].mxu0 %vm1267_vm0, %v14494_v21  ;;  %v14504_v21 = vld [vmem:[%s15116_s17 + $0x48] sm:$0xff] }
 0x8d5   : > { %12010 = vmatprep.mubr.msk.f32.mxu0 %vm1267_vm0, %v14495_v52  ;;  %v14505_v52 = vld [vmem:[%s15116_s17 + $0x50] sm:$0xff] }
 0x8d8   : > { %12011 = vmatmul.mubr.msk.f32.vlgmr.msra.gmra.mrb[36].mxu0 %vm1267_vm0, %v14496_v47  ;;  %v14506_v47 = vld [vmem:[%s15116_s17 + $0x58] sm:$0xff] }
 0x8d9   : > { %12013 = vmatprep.mubr.msk.f32.mxu0 %vm1267_vm0, %v14497_v39  ;;  %v14507_v39 = vld [vmem:[%s15116_s17 + $0x60] sm:$0xff] }
 0x8dc   : > { %12014 = vmatmul.mubr.msk.f32.gmra.mrb[38].mxu0 %vm1267_vm0, %v14498_v3  ;;  %v14508_v3 = vld [vmem:[%s15116_s17 + $0x68] sm:$0xff] }
 0x8dd   : > { %12016 = vmatprep.mubr.msk.f32.mxu0 %vm1267_vm0, %v14499_v31  ;;  %v14509_v31 = vld [vmem:[%s15116_s17 + $0x70] sm:$0xff] }
 0x8e0   : > { %12017 = vmatmul.mubr.msk.f32.gmra.mrb[40].mxu0 %vm1267_vm0, %v14500_v55  ;;  %v14510_v55 = vld [vmem:[%s15116_s17 + $0x78] sm:$0xff] }
 0x8e1   : > { %12019 = vmatprep.mubr.msk.f32.mxu0 %vm1267_vm0, %v14501_v16  ;;  %v14511_v16 = vld [vmem:[%s15116_s17 + $0x80] sm:$0xff] }
 0x8e4   : > { %12020 = vmatmul.mubr.msk.f32.gmra.mrb[42].mxu0 %vm1267_vm0, %v14502_v45  ;;  %v14512_v45 = vld [vmem:[%s15116_s17 + $0x88] sm:$0xff] }
 0x8e5   : > { %12022 = vmatprep.mubr.msk.f32.mxu0 %vm1267_vm0, %v14503_v33  ;;  %v14513_v33 = vld [vmem:[%s15116_s17 + $0x90] sm:$0xff] }
 0x8e8   : > { %12023 = vmatmul.mubr.msk.f32.gmra.mrb[44].mxu0 %vm1267_vm0, %v14504_v21  ;;  %v14514_v21 = vld [vmem:[%s15116_s17 + $0x98] sm:$0xff] }
 0x8e9   : > { %12025 = vmatprep.mubr.msk.f32.mxu0 %vm1267_vm0, %v14505_v52  ;;  %v14515_v52 = vld [vmem:[%s15116_s17 + $0xa0] sm:$0xff] }
 0x8ec   : > { %12026 = vmatmul.mubr.msk.f32.gmra.mrb[46].mxu0 %vm1267_vm0, %v14506_v47  ;;  %v14516_v47 = vld [vmem:[%s15116_s17 + $0xa8] sm:$0xff] }
 0x8ed   : > { %12028 = vmatprep.mubr.msk.f32.mxu0 %vm1267_vm0, %v14507_v39  ;;  %v14517_v39 = vld [vmem:[%s15116_s17 + $0xb0] sm:$0xff] }
 0x8f0   : > { %12029 = vmatmul.mubr.msk.f32.gmra.mrb[48].mxu0 %vm1267_vm0, %v14508_v3  ;;  %v14518_v3 = vld [vmem:[%s15116_s17 + $0xb8] sm:$0xff] }
 0x8f1   : > { %12031 = vmatprep.mubr.msk.f32.mxu0 %vm1267_vm0, %v14509_v31  ;;  %v14519_v31 = vld [vmem:[%s15116_s17 + $0xc0] sm:$0xff] }
 0x8f4   : > { %12032 = vmatmul.mubr.msk.f32.gmra.mrb[50].mxu0 %vm1267_vm0, %v14510_v55  ;;  %v14520_v55 = vld [vmem:[%s15116_s17 + $0xc8] sm:$0xff] }
 0x8f5   : > { %12034 = vmatprep.mubr.msk.f32.mxu0 %vm1267_vm0, %v14511_v16  ;;  %v14521_v16 = vld [vmem:[%s15116_s17 + $0xd0] sm:$0xff] }
 0x8f8   : > { %12035 = vmatmul.mubr.msk.f32.gmra.mrb[52].mxu0 %vm1267_vm0, %v14512_v45  ;;  %v14522_v45 = vld [vmem:[%s15116_s17 + $0xd8] sm:$0xff] }
 0x8f9   : > { %12037 = vmatprep.mubr.msk.f32.mxu0 %vm1267_vm0, %v14513_v33  ;;  %v14523_v33 = vld [vmem:[%s15116_s17 + $0xe0] sm:$0xff] }
 0x8fc   : > { %12038 = vmatmul.mubr.msk.f32.gmra.mrb[54].mxu0 %vm1267_vm0, %v14514_v21  ;;  %v14524_v21 = vld [vmem:[%s15116_s17 + $0xe8] sm:$0xff] }
 0x8fd   : > { %12040 = vmatprep.mubr.msk.f32.mxu0 %vm1267_vm0, %v14515_v52  ;;  %v14525_v52 = vld [vmem:[%s15116_s17 + $0xf0] sm:$0xff] }
 0x900   : > { %12041 = vmatmul.mubr.msk.f32.gmra.mrb[56].mxu0 %vm1267_vm0, %v14516_v47  ;;  %v14526_v47 = vld [vmem:[%s15116_s17 + $0xf8] sm:$0xff] }
 0x901   : > { %12043 = vmatprep.mubr.msk.f32.mxu0 %vm1267_vm0, %v14517_v39  ;;  %v3712_v39 = vld [vmem:[%s20099_s6] sm:$0xff] }
 0x904   : > { %12044 = vmatmul.mubr.msk.f32.gmra.mrb[58].mxu0 %vm1267_vm0, %v14518_v3  ;;  %v3713_v3 = vld [vmem:[%s20099_s6 + $0x8] sm:$0xff] }
 0x905   : > { %12046 = vmatprep.mubr.msk.f32.mxu0 %vm1267_vm0, %v14519_v31  ;;  %v12772_v31 = vpack.c.bf16 %v3713_v3, %v3712_v39 }
 0x907   : > { %12773 = vmatprep.subr.bf16.mxu1 %v12772_v31 }
 0x908   : > { %12047 = vmatmul.mubr.msk.f32.gmra.mrb[60].mxu0 %vm1267_vm0, %v14520_v55  ;;  %12775 = vmatpush3.bf16.msra.mxu1 %v12772_v31  ;;  %v3714_v55 = vld [vmem:[%s20099_s6 + $0x10] sm:$0xff] }
 0x909   : > { %12049 = vmatprep.mubr.msk.f32.mxu0 %vm1267_vm0, %v14521_v16  ;;  %v3715_v16 = vld [vmem:[%s20099_s6 + $0x18] sm:$0xff] }
 0x90c   : > { %12050 = vmatmul.mubr.msk.f32.gmra.mrb[62].mxu0 %vm1267_vm0, %v14522_v45  ;;  %v12776_v45 = vpack.c.bf16 %v3715_v16, %v3714_v55 }
 0x90d   : > { %12052 = vmatprep.mubr.msk.f32.mxu0 %vm1267_vm0, %v14523_v33  ;;  %v16457_v33 = vpop.xlane.xlu1 %2576 }
 0x90e   : > { %12777 = vmatprep.subr.bf16.mxu1 %v12776_v45  ;;  %20100 = vst [vmem:[#allocation153_spill] sm:$0xff] %v16457_v33  ;;  %v3386_v10 = vmul.f32 %v16494_v11, %v16457_v33 }
 0x90f   : > { %12779 = vmatpush3.bf16.msra.mxu1 %v12776_v45 }
 0x910   : > { %12053 = vmatmul.mubr.msk.f32.gmra.mrb[64].mxu0 %vm1267_vm0, %v14524_v21 }
 0x911   : > { %12055 = vmatprep.mubr.msk.f32.mxu0 %vm1267_vm0, %v14525_v52  ;;  %v16461_v21 = vpop.xlane.xlu1 %2582  ;;  %v16463_v52 = vpop.xlane.xlu0 %2579 }
 0x912   : > { %20102 = vst [vmem:[#allocation155_spill] sm:$0xff] %v16461_v21  ;;  %20105 = vst [vmem:[#allocation156_spill] sm:$0xff] %v16463_v52  ;;  %v3388_v37 = vmul.f32 %v16494_v11, %v16461_v21  ;;  %v3387_v24 = vmul.f32 %v16494_v11, %v16463_v52 }
 0x914   : > { %12056 = vmatmul.mubr.msk.f32.gmra.mrb[66].mxu0 %vm1267_vm0, %v14526_v47 }
 0x915   : > { %v16465_v47 = vpop.xlane.xlu1 %2588  ;;  %v16467_v50 = vpop.xlane.xlu0 %2585 }
 0x916   : > { %20106 = vst [vmem:[#allocation157_spill] sm:$0xff] %v16465_v47  ;;  %20107 = vst [vmem:[#allocation158_spill] sm:$0xff] %v16467_v50  ;;  %v3390_v44 = vmul.f32 %v16494_v11, %v16465_v47 }
 0x919   : > { %v16469_v39 = vpop.xlane.xlu1 %2594  ;;  %v16471_v3 = vpop.xlane.xlu0 %2591 }
 0x91a   : > { %20108 = vst [vmem:[#allocation159_spill] sm:$0xff] %v16469_v39  ;;  %20109 = vst [vmem:[#allocation160_spill] sm:$0xff] %v16471_v3 }
 0x91d   : > { %v16473_v31 = vpop.xlane.xlu1 %2600  ;;  %v16475_v55 = vpop.xlane.xlu0 %2597 }
 0x91e   : > { %20110 = vst [vmem:[#allocation161_spill] sm:$0xff] %v16473_v31  ;;  %20113 = vst [vmem:[#allocation162_spill] sm:$0xff] %v16475_v55 }
 0x921   : > { %v16477_v16 = vpop.xlane.xlu1 %2606  ;;  %v16479_v45 = vpop.xlane.xlu0 %2603 }
 0x922   : > { %20114 = vst [vmem:[#allocation163_spill] sm:$0xff] %v16477_v16  ;;  %20115 = vst [vmem:[#allocation164_spill] sm:$0xff] %v16479_v45  ;;  %v3395_v38 = vmul.f32 %v16494_v11, %v16479_v45 }
 0x925   : > { %v16481_v18 = vpop.xlane.xlu1 %2612  ;;  %v16483_v17 = vpop.xlane.xlu0 %2609 }
 0x926   : > { %20116 = vst [vmem:[#allocation165_spill] sm:$0xff] %v16481_v18  ;;  %20117 = vst [vmem:[#allocation166_spill] sm:$0xff] %v16483_v17  ;;  %v16564_v1 = vmul.f32 %v16494_v11, %v16483_v17 }
 0x929   : > { %v16485_v15 = vpop.xlane.xlu1 %2618  ;;  %v16487_v14 = vpop.xlane.xlu0 %2615 }
 0x92a   : > { %20118 = vst [vmem:[#allocation167_spill] sm:$0xff] %v16485_v15  ;;  %20119 = vst [vmem:[#allocation168_spill] sm:$0xff] %v16487_v14  ;;  %v16569_v43 = vmul.f32 %v16494_v11, %v16485_v15 }
 0x92d   : > { %v16489_v13 = vpop.xlane.xlu1 %2624  ;;  %v16491_v12 = vpop.xlane.xlu0 %2621 }
 0x92e   : > { %20120 = vst [vmem:[#allocation169_spill] sm:$0xff] %v16489_v13  ;;  %20121 = vst [vmem:[#allocation170_spill] sm:$0xff] %v16491_v12 }
 0x931   : > { %v16500_v8 = vpop.xlane.xlu1 %2630  ;;  %v16502_v7 = vpop.xlane.xlu0 %2627 }
 0x932   : > { %20122 = vst [vmem:[#allocation171_spill] sm:$0xff] %v16500_v8  ;;  %20123 = vst [vmem:[#allocation172_spill] sm:$0xff] %v16502_v7 }
 0x935   : > { %v16517_v62 = vpop.xlane.xlu1 %2636 }
 0x936   : > { %20124 = vst [vmem:[#allocation173_spill] sm:$0xff] %v16517_v62  ;;  %v16605_v19 = vmul.f32 %v16494_v11, %v16517_v62 }
 0x9ab   : > { %v12012_v6 = vpop.f32.mrb[36].mxu0 }
 0x9ac   : > { %v3418_v4 = vadd.f32 %v12012_v6, %v3386_v10  ;;  %v3219_v36 = vpop.f32.mrb[37].mxu0 }
 0x9ad   : > { %v3417_v51 = vadd.f32 %v3385_v9, %v3219_v36  ;;  %v16522_v36 = vpop.xlane.xlu0 %2633 }
 0x9ae   : > { %v16512_v25 = vadd.f32 %v16505_v5, %v3418_v4  ;;  %20125 = vst [vmem:[#allocation174_spill] sm:$0xff] %v16522_v36  ;;  %v3389_v4 = vmul.f32 %v16494_v11, %v16467_v50 }
 0x9af   : > { %v16515_v57 = vadd.f32 %v16505_v5, %v3417_v51  ;;  %v12015_v27 = vpop.f32.mrb[38].mxu0 }
 0x9b0   : > { %v3489_v0 = vsub.f32 0.0, %v16512_v25  ;;  %v3420_v6 = vadd.f32 %v12015_v27, %v3388_v37  ;;  %v3229_v10 = vpop.f32.mrb[39].mxu0  ;;  %v3392_v27 = vmul.f32 %v16494_v11, %v16469_v39 }
 0x9b1   : > { %v3488_v9 = vsub.f32 0.0, %v16515_v57  ;;  %v3419_v29 = vadd.f32 %v3387_v24, %v3229_v10  ;;  %v3391_v10 = vmul.f32 %v16494_v11, %v16471_v3 }
 0x9b2   : > { %v3522_v51 = vmul.f32 1.442695, %v3489_v0  ;;  %v16528_v48 = vadd.f32 %v16505_v5, %v3420_v6 }
 0x9b3   : > { %v3520_v2 = vmul.f32 1.442695, %v3488_v9  ;;  %v16531_v26 = vadd.f32 %v16505_v5, %v3419_v29  ;;  %v12018_v37 = vpop.f32.mrb[40].mxu0  ;;  %v3394_v29 = vmul.f32 %v16494_v11, %v16473_v31  ;;  %v16541_v9 = vpop.xlane.xlu1 %2642 }
 0x9b4   : > { %13379 = vpow2.f32 %v3522_v51  ;;  %v3491_v34 = vsub.f32 0.0, %v16528_v48  ;;  %v3422_v54 = vadd.f32 %v12018_v37, %v3390_v44  ;;  %v3239_v24 = vpop.f32.mrb[41].mxu0  ;;  %20126 = vst [vmem:[#allocation175_spill] sm:$0xff] %v16541_v9  ;;  %v3393_v44 = vmul.f32 %v16494_v11, %v16475_v55  ;;  %v16550_v37 = vpop.xlane.xlu0 %2639 }
 0x9b5   : > { %13381 = vpow2.f32 %v3520_v2  ;;  %v3490_v0 = vsub.f32 0.0, %v16531_v26  ;;  %v3421_v6 = vadd.f32 %v3389_v4, %v3239_v24  ;;  %v3396_v51 = vmul.f32 %v16494_v11, %v16477_v16  ;;  %20127 = vst [vmem:[#allocation176_spill] sm:$0xff] %v16550_v37 }
 0x9b6   : > { %v3526_v49 = vmul.f32 1.442695, %v3491_v34  ;;  %v16544_v42 = vadd.f32 %v16505_v5, %v3422_v54  ;;  %v16559_v54 = vmul.f32 %v16494_v11, %v16481_v18 }
 0x9b7   : > { %v3524_v2 = vmul.f32 1.442695, %v3490_v0  ;;  %v16553_v4 = vadd.f32 %v16505_v5, %v3421_v6  ;;  %v12021_v24 = vpop.f32.mrb[42].mxu0 }
 0x9b8   : > { %13383 = vpow2.f32 %v3526_v49  ;;  %v3493_v34 = vsub.f32 0.0, %v16544_v42  ;;  %v3424_v59 = vadd.f32 %v12021_v24, %v3392_v27  ;;  %v3249_v40 = vpop.f32.mrb[43].mxu0  ;;  %v16576_v49 = vmul.f32 %v16494_v11, %v16487_v14 }
 0x9b9   : > { %13385 = vpow2.f32 %v3524_v2  ;;  %v3492_v0 = vsub.f32 0.0, %v16553_v4  ;;  %v3423_v6 = vadd.f32 %v3391_v10, %v3249_v40  ;;  %v16580_v27 = vmul.f32 %v16494_v11, %v16489_v13 }
 0x9ba   : > { %v3530_v22 = vmul.f32 1.442695, %v3493_v34  ;;  %v16572_v28 = vadd.f32 %v16505_v5, %v3424_v59  ;;  %v16587_v10 = vmul.f32 %v16494_v11, %v16491_v12  ;;  %v16591_v59 = vmul.f32 %v16494_v11, %v16500_v8  ;;  %v16593_v34 = vpop.xlane.xlu1 %2648 }
 0x9bb   : > { %v3528_v2 = vmul.f32 1.442695, %v3492_v0  ;;  %v16583_v24 = vadd.f32 %v16505_v5, %v3423_v6  ;;  %v12024_v40 = vpop.f32.mrb[44].mxu0  ;;  %20128 = vst [vmem:[#allocation177_spill] sm:$0xff] %v16593_v34  ;;  %v16598_v0 = vmul.f32 %v16494_v11, %v16502_v7  ;;  %v16600_v6 = vpop.xlane.xlu0 %2645 }
 0x9bc   : > { %13387 = vpow2.f32 %v3530_v22  ;;  %v3495_v60 = vsub.f32 0.0, %v16572_v28  ;;  %v3426_v23 = vadd.f32 %v12024_v40, %v3394_v29  ;;  %v3259_v41 = vpop.f32.mrb[45].mxu0  ;;  %20129 = vst [vmem:[#allocation178_spill] sm:$0xff] %v16600_v6  ;;  %v16612_v29 = vmul.f32 %v16494_v11, %v16522_v36 }
 0x9bd   : > { %13389 = vpow2.f32 %v3528_v2  ;;  %v3494_v56 = vsub.f32 0.0, %v16583_v24  ;;  %v3425_v20 = vadd.f32 %v3393_v44, %v3259_v41  ;;  %v16616_v40 = vmul.f32 %v16494_v11, %v16541_v9 }
 0x9be   : > { %v13380_v35 = vpop.eup %13379  ;;  %v3534_v22 = vmul.f32 1.442695, %v3495_v60  ;;  %v16608_v61 = vadd.f32 %v16505_v5, %v3426_v23  ;;  %v16623_v60 = vmul.f32 %v16494_v11, %v16550_v37 }
 0x9bf   : > { %v13382_v2 = vpop.eup %13381  ;;  %v3585_v30 = vadd.f32 1.0, %v13380_v35  ;;  %v3532_v41 = vmul.f32 1.442695, %v3494_v56  ;;  %v16619_v44 = vadd.f32 %v16505_v5, %v3425_v20  ;;  %v12027_v63 = vpop.f32.mrb[46].mxu0  ;;  %v16629_v35 = vmul.f32 %v16494_v11, %v16593_v34 }
 0x9c0   : > { %v3584_v23 = vadd.f32 1.0, %v13382_v2  ;;  %13391 = vpow2.f32 %v3534_v22  ;;  %v3497_v53 = vsub.f32 0.0, %v16608_v61  ;;  %v3428_v36 = vadd.f32 %v12027_v63, %v3396_v51  ;;  %v3269_v62 = vpop.f32.mrb[47].mxu0  ;;  %v16631_v56 = vpop.xlane.xlu1 %2654 }
 0x9c1   : > { %13393 = vrcp.f32 %v3585_v30  ;;  %v3496_v9 = vsub.f32 0.0, %v16619_v44  ;;  %v3427_v7 = vadd.f32 %v3395_v38, %v3269_v62  ;;  %20130 = vst [vmem:[#allocation179_spill] sm:$0xff] %v16631_v56  ;;  %v16638_v63 = vmul.f32 %v16494_v11, %v16600_v6  ;;  %v16640_v51 = vpop.xlane.xlu0 %2651 }
 0x9c2   : > { %v13384_v20 = vpop.eup %13383  ;;  %13395 = vrcp.f32 %v3584_v23  ;;  %v3538_v37 = vmul.f32 1.442695, %v3497_v53  ;;  %v16634_v2 = vadd.f32 %v16505_v5, %v3428_v36  ;;  %20131 = vst [vmem:[#allocation180_spill] sm:$0xff] %v16640_v51 }
 0x9c3   : > { %v13386_v30 = vpop.eup %13385  ;;  %v3587_v38 = vadd.f32 1.0, %v13384_v20  ;;  %13397 = vpow2.f32 %v3532_v41  ;;  %v3536_v62 = vmul.f32 1.442695, %v3496_v9  ;;  %v16643_v22 = vadd.f32 %v16505_v5, %v3427_v7  ;;  %v12030_v34 = vpop.f32.mrb[48].mxu0 }
 0x9c4   : > { %v3586_v8 = vadd.f32 1.0, %v13386_v30  ;;  %13399 = vpow2.f32 %v3538_v37  ;;  %v3499_v53 = vsub.f32 0.0, %v16634_v2  ;;  %v3430_v36 = vadd.f32 %v12030_v34, %v16559_v54  ;;  %v3279_v23 = vpop.f32.mrb[49].mxu0 }
 0x9c5   : > { %13401 = vrcp.f32 %v3587_v38  ;;  %v3498_v6 = vsub.f32 0.0, %v16643_v22  ;;  %v3429_v12 = vadd.f32 %v16564_v1, %v3279_v23  ;;  %v16651_v41 = vmul.f32 %v16494_v11, %v16631_v56  ;;  %v16663_v23 = vpop.xlane.xlu1 %2660  ;;  %v16667_v13 = vpop.xlane.xlu0 %2657 }
 0x9c6   : > { %v13388_v9 = vpop.eup %13387  ;;  %13403 = vrcp.f32 %v3586_v8  ;;  %v3542_v7 = vmul.f32 1.442695, %v3499_v53  ;;  %v16654_v20 = vadd.f32 %v16505_v5, %v3430_v36  ;;  %v16658_v37 = vmul.f32 %v16494_v11, %v16640_v51  ;;  %20132 = vst [vmem:[#allocation181_spill] sm:$0xff] %v16663_v23  ;;  %20133 = vst [vmem:[#allocation182_spill] sm:$0xff] %v16667_v13 }
 0x9c7   : > { %v13390_v54 = vpop.eup %13389  ;;  %v3589_v34 = vadd.f32 1.0, %v13388_v9  ;;  %13405 = vpow2.f32 %v3536_v62  ;;  %v3540_v30 = vmul.f32 1.442695, %v3498_v6  ;;  %v16661_v1 = vadd.f32 %v16505_v5, %v3429_v12  ;;  %v12033_v38 = vpop.f32.mrb[50].mxu0 }
 0x9c8   : > { %v3588_v56 = vadd.f32 1.0, %v13390_v54  ;;  %13407 = vpow2.f32 %v3542_v7  ;;  %v3501_v8 = vsub.f32 0.0, %v16654_v20  ;;  %v3432_v53 = vadd.f32 %v12033_v38, %v16569_v43  ;;  %v3289_v36 = vpop.f32.mrb[51].mxu0 }
 0x9c9   : > { %13409 = vrcp.f32 %v3589_v34  ;;  %v3500_v9 = vsub.f32 0.0, %v16661_v1  ;;  %v3431_v6 = vadd.f32 %v16576_v49, %v3289_v36  ;;  %v16673_v12 = vmul.f32 %v16494_v11, %v16663_v23 }
 0x9ca   : > { %v13392_v62 = vpop.eup %13391  ;;  %13411 = vrcp.f32 %v3588_v56  ;;  %v3546_v54 = vmul.f32 1.442695, %v3501_v8  ;;  %v16676_v7 = vadd.f32 %v16505_v5, %v3432_v53  ;;  %v16680_v43 = vmul.f32 %v16494_v11, %v16667_v13 }
 0x9cb   : > { %v13394_v38 = vpop.eup %13393  ;;  %v3591_v34 = vadd.f32 1.0, %v13392_v62  ;;  %13413 = vpow2.f32 %v3540_v30  ;;  %v3544_v51 = vmul.f32 1.442695, %v3500_v9  ;;  %v16683_v49 = vadd.f32 %v16505_v5, %v3431_v6  ;;  %v12036_v36 = vpop.f32.mrb[52].mxu0 }
 0x9cc   : > { %v13396_v23 = vpop.eup %13395  ;;  %v3681_v14 = vmul.f32 %v13394_v38, %v16512_v25  ;;  %13415 = vpow2.f32 %v3546_v54  ;;  %v3503_v56 = vsub.f32 0.0, %v16676_v7  ;;  %v3434_v8 = vadd.f32 %v12036_v36, %v16580_v27  ;;  %v3299_v53 = vpop.f32.mrb[53].mxu0 }
 0x9cd   : > { %v13398_v15 = vpop.eup %13397  ;;  %v3680_v13 = vmul.f32 %v13396_v23, %v16515_v57  ;;  %13417 = vrcp.f32 %v3591_v34  ;;  %v3502_v30 = vsub.f32 0.0, %v16683_v49  ;;  %v3433_v9 = vadd.f32 %v16587_v10, %v3299_v53  ;;  %v16691_v62 = vpop.xlane.xlu1 %2666 }
 0x9ce   : > { %v13400_v6 = vpop.eup %13399  ;;  %20134 = vst [vmem:[#allocation183_spill] sm:$0xff] %v16691_v62  ;;  %v3590_v17 = vadd.f32 1.0, %v13398_v15  ;;  %13419 = vpow2.f32 %v3544_v51  ;;  %v3550_v25 = vmul.f32 1.442695, %v3503_v56  ;;  %v16694_v54 = vadd.f32 %v16505_v5, %v3434_v8 }
 0x9cf   : > { %v13402_v38 = vpop.eup %13401  ;;  %v3593_v27 = vadd.f32 1.0, %v13400_v6  ;;  %v3548_v36 = vmul.f32 1.442695, %v3502_v30  ;;  %v16697_v18 = vadd.f32 %v16505_v5, %v3433_v9  ;;  %v12039_v57 = vpop.f32.mrb[54].mxu0  ;;  %12066 = vmatprep.mubr.msk.f32.mxu1 %vm1902_vm1, %v3680_v13  ;;  %v16702_v10 = vmul.f32 %v16494_v11, %v16691_v62 }
 0x9d0   : > { %v13404_v23 = vpop.eup %13403  ;;  %v3683_v15 = vmul.f32 %v13402_v38, %v16528_v48  ;;  %13421 = vrcp.f32 %v3590_v17  ;;  %v3505_v51 = vsub.f32 0.0, %v16694_v54  ;;  %v3436_v34 = vadd.f32 %v12039_v57, %v16591_v59  ;;  %v3309_v56 = vpop.f32.mrb[55].mxu0  ;;  %12067 = vmatmul.mubr.msk.f32.vlgmr.msra.gmra.mrb[40].mxu1 %vm1902_vm1, %v3681_v14 }
 0x9d1   : > { %v13406_v8 = vpop.eup %13405  ;;  %v3682_v53 = vmul.f32 %v13404_v23, %v16531_v26  ;;  %13423 = vrcp.f32 %v3593_v27  ;;  %v3504_v13 = vsub.f32 0.0, %v16697_v18  ;;  %v3435_v30 = vadd.f32 %v16598_v0, %v3309_v56 }
 0x9d2   : > { %v13408_v9 = vpop.eup %13407  ;;  %v3592_v6 = vadd.f32 1.0, %v13406_v8  ;;  %13425 = vpow2.f32 %v3550_v25  ;;  %v3554_v48 = vmul.f32 1.442695, %v3505_v51  ;;  %v16712_v17 = vadd.f32 %v16505_v5, %v3436_v34 }
 0x9d3   : > { %v13410_v38 = vpop.eup %13409  ;;  %v3595_v59 = vadd.f32 1.0, %v13408_v9  ;;  %13427 = vpow2.f32 %v3548_v36  ;;  %v3552_v57 = vmul.f32 1.442695, %v3504_v13  ;;  %v16715_v14 = vadd.f32 %v16505_v5, %v3435_v30  ;;  %v12042_v26 = vpop.f32.mrb[56].mxu0  ;;  %12069 = vmatprep.mubr.msk.f32.mxu1 %vm1902_vm1, %v3682_v53 }
 0x9d4   : > { %v13412_v27 = vpop.eup %13411  ;;  %v3685_v0 = vmul.f32 %v13410_v38, %v16544_v42  ;;  %13429 = vrcp.f32 %v3592_v6  ;;  %v3507_v25 = vsub.f32 0.0, %v16712_v17  ;;  %v3438_v23 = vadd.f32 %v12042_v26, %v16605_v19  ;;  %v3319_v51 = vpop.f32.mrb[57].mxu0  ;;  %12070 = vmatmul.mubr.msk.f32.gmra.mrb[42].mxu1 %vm1902_vm1, %v3683_v15 }
 0x9d5   : > { %v13414_v34 = vpop.eup %13413  ;;  %v3684_v36 = vmul.f32 %v13412_v27, %v16553_v4  ;;  %13431 = vrcp.f32 %v3595_v59  ;;  %v3506_v56 = vsub.f32 0.0, %v16715_v14  ;;  %v3437_v8 = vadd.f32 %v16612_v29, %v3319_v51  ;;  %v16725_v13 = vpop.xlane.xlu0 %2663 }
 0x9d6   : > { %v13416_v53 = vpop.eup %13415  ;;  %20135 = vst [vmem:[#allocation184_spill] sm:$0xff] %v16725_v13  ;;  %v3594_v42 = vadd.f32 1.0, %v13414_v34  ;;  %13433 = vpow2.f32 %v3554_v48  ;;  %v3558_v30 = vmul.f32 1.442695, %v3507_v25  ;;  %v16728_v9 = vadd.f32 %v16505_v5, %v3438_v23 }
 0x9d7   : > { %v13418_v19 = vpop.eup %13417  ;;  %v3597_v6 = vadd.f32 1.0, %v13416_v53  ;;  %13435 = vpow2.f32 %v3552_v57  ;;  %v16731_v15 = vadd.f32 %v16505_v5, %v3437_v8  ;;  %v12045_v4 = vpop.f32.mrb[58].mxu0  ;;  %12072 = vmatprep.mubr.msk.f32.mxu1 %vm1902_vm1, %v3684_v36  ;;  %v16736_v29 = vmul.f32 %v16494_v11, %v16725_v13 }
 0x9d8   : > { %v13420_v38 = vpop.eup %13419  ;;  %13437 = vrcp.f32 %v3594_v42  ;;  %v3556_v48 = vmul.f32 1.442695, %v3506_v56  ;;  %v3509_v59 = vsub.f32 0.0, %v16728_v9  ;;  %v3440_v26 = vadd.f32 %v12045_v4, %v16616_v40  ;;  %v3329_v27 = vpop.f32.mrb[59].mxu0  ;;  %12073 = vmatmul.mubr.msk.f32.gmra.mrb[44].mxu1 %vm1902_vm1, %v3685_v0 }
 0x9d9   : > { %13439 = vrcp.f32 %v3597_v6  ;;  %v3596_v57 = vadd.f32 1.0, %v13420_v38  ;;  %v3508_v25 = vsub.f32 0.0, %v16731_v15  ;;  %v3439_v23 = vadd.f32 %v16623_v60, %v3329_v27 }
 0x9da   : > { %v13422_v51 = vpop.eup %13421  ;;  %v3687_v11 = vmul.f32 %v13418_v19, %v16572_v28  ;;  %13441 = vpow2.f32 %v3558_v30  ;;  %v3562_v34 = vmul.f32 1.442695, %v3509_v59  ;;  %v16745_v36 = vadd.f32 %v16505_v5, %v3440_v26 }
 0x9db   : > { %v13424_v56 = vpop.eup %13423  ;;  %v3686_v40 = vmul.f32 %v13422_v51, %v16583_v24  ;;  %13443 = vrcp.f32 %v3596_v57  ;;  %v3560_v8 = vmul.f32 1.442695, %v3508_v25  ;;  %v16749_v0 = vadd.f32 %v16505_v5, %v3439_v23  ;;  %v12048_v53 = vpop.f32.mrb[60].mxu0 }
 0x9dc   : > { %v13426_v42 = vpop.eup %13425  ;;  %v3689_v60 = vmul.f32 %v13424_v56, %v16608_v61  ;;  %13445 = vpow2.f32 %v3556_v48  ;;  %v3511_v28 = vsub.f32 0.0, %v16745_v36  ;;  %v3442_v30 = vadd.f32 %v12048_v53, %v16629_v35  ;;  %v3339_v19 = vpop.f32.mrb[61].mxu0 }
 0x9dd   : > { %v13428_v6 = vpop.eup %13427  ;;  %v3599_v4 = vadd.f32 1.0, %v13426_v42  ;;  %13447 = vpow2.f32 %v3562_v34  ;;  %v3510_v24 = vsub.f32 0.0, %v16749_v0  ;;  %12075 = vmatprep.mubr.msk.f32.mxu1 %vm1902_vm1, %v3686_v40  ;;  %v3441_v38 = vadd.f32 %v16638_v63, %v3339_v19 }
 0x9de   : > { %v13430_v59 = vpop.eup %13429  ;;  %v3598_v26 = vadd.f32 1.0, %v13428_v6  ;;  %13449 = vpow2.f32 %v3560_v8  ;;  %v3566_v27 = vmul.f32 1.442695, %v3511_v28  ;;  %v16758_v61 = vadd.f32 %v16505_v5, %v3442_v30  ;;  %12076 = vmatmul.mubr.msk.f32.gmra.mrb[46].mxu1 %vm1902_vm1, %v3687_v11 }
 0x9df   : > { %v13432_v35 = vpop.eup %13431  ;;  %v3688_v48 = vmul.f32 %v13430_v59, %v16619_v44  ;;  %13451 = vrcp.f32 %v3599_v4  ;;  %v3564_v57 = vmul.f32 1.442695, %v3510_v24  ;;  %v16763_v25 = vadd.f32 %v16505_v5, %v3441_v38  ;;  %v12051_v23 = vpop.f32.mrb[62].mxu0 }
 0x9e0   : > { %v13434_v51 = vpop.eup %13433  ;;  %v3691_v63 = vmul.f32 %v13432_v35, %v16634_v2  ;;  %13453 = vrcp.f32 %v3598_v26  ;;  %v3513_v34 = vsub.f32 0.0, %v16758_v61  ;;  %v3444_v56 = vadd.f32 %v12051_v23, %v16651_v41  ;;  %v3349_v40 = vpop.f32.mrb[63].mxu0 }
 0x9e1   : > { %v13436_v8 = vpop.eup %13435  ;;  %v3601_v11 = vadd.f32 1.0, %v13434_v51  ;;  %13455 = vpow2.f32 %v3566_v27  ;;  %v3512_v44 = vsub.f32 0.0, %v16763_v25  ;;  %12078 = vmatprep.mubr.msk.f32.mxu1 %vm1902_vm1, %v3688_v48  ;;  %v3443_v53 = vadd.f32 %v16658_v37, %v3349_v40 }
 0x9e2   : > { %v13438_v42 = vpop.eup %13437  ;;  %v3600_v28 = vadd.f32 1.0, %v13436_v8  ;;  %13457 = vpow2.f32 %v3564_v57  ;;  %v3570_v30 = vmul.f32 1.442695, %v3513_v34  ;;  %v16772_v2 = vadd.f32 %v16505_v5, %v3444_v56  ;;  %12079 = vmatmul.mubr.msk.f32.gmra.mrb[48].mxu1 %vm1902_vm1, %v3689_v60 }
 0x9e3   : > { %v13440_v41 = vpop.eup %13439  ;;  %v3690_v19 = vmul.f32 %v13438_v42, %v16643_v22  ;;  %13459 = vrcp.f32 %v3601_v11  ;;  %v3568_v6 = vmul.f32 1.442695, %v3512_v44  ;;  %v16777_v4 = vadd.f32 %v16505_v5, %v3443_v53  ;;  %v12054_v24 = vpop.f32.mrb[64].mxu0 }
 0x9e4   : > { %v13442_v38 = vpop.eup %13441  ;;  %v3693_v37 = vmul.f32 %v13440_v41, %v16654_v20  ;;  %13461 = vrcp.f32 %v3600_v28  ;;  %v3515_v59 = vsub.f32 0.0, %v16772_v2  ;;  %v3446_v26 = vadd.f32 %v12054_v24, %v16673_v12  ;;  %v3359_v27 = vpop.f32.mrb[65].mxu0 }
 0x9e5   : > { %v13444_v35 = vpop.eup %13443  ;;  %v3603_v60 = vadd.f32 1.0, %v13442_v38  ;;  %13463 = vpow2.f32 %v3570_v30  ;;  %v3514_v22 = vsub.f32 0.0, %v16777_v4  ;;  %12081 = vmatprep.mubr.msk.f32.mxu1 %vm1902_vm1, %v3690_v19  ;;  %v3445_v48 = vadd.f32 %v16680_v43, %v3359_v27 }
 0x9e6   : > { %v13446_v57 = vpop.eup %13445  ;;  %v3692_v23 = vmul.f32 %v13444_v35, %v16661_v1  ;;  %13465 = vpow2.f32 %v3568_v6  ;;  %v3574_v20 = vmul.f32 1.442695, %v3515_v59  ;;  %v16787_v51 = vadd.f32 %v16505_v5, %v3446_v26  ;;  %12082 = vmatmul.mubr.msk.f32.gmra.mrb[50].mxu1 %vm1902_vm1, %v3691_v63 }
 0x9e7   : > { %v13448_v12 = vpop.eup %13447  ;;  %13467 = vrcp.f32 %v3603_v60  ;;  %v3602_v34 = vadd.f32 1.0, %v13446_v57  ;;  %v3572_v56 = vmul.f32 1.442695, %v3514_v22  ;;  %v16791_v40 = vadd.f32 %v16505_v5, %v3445_v48  ;;  %v12057_v8 = vpop.f32.mrb[66].mxu0 }
 0x9e8   : > { %v13450_v11 = vpop.eup %13449  ;;  %v3605_v43 = vadd.f32 1.0, %v13448_v12  ;;  %13469 = vpow2.f32 %v3574_v20  ;;  %v3517_v1 = vsub.f32 0.0, %v16787_v51  ;;  %v3448_v44 = vadd.f32 %v12057_v8, %v16702_v10  ;;  %12084 = vmatprep.mubr.msk.f32.mxu1 %vm1902_vm1, %v3692_v23  ;;  %v3369_v53 = vpop.f32.mrb[67].mxu0 }
 0x9e9   : > { %v13452_v42 = vpop.eup %13451  ;;  %13471 = vrcp.f32 %v3602_v34  ;;  %v3604_v63 = vadd.f32 1.0, %v13450_v11  ;;  %v3516_v28 = vsub.f32 0.0, %v16791_v40  ;;  %v3447_v30 = vadd.f32 %v16736_v29, %v3369_v53 }
 0x9ea   : > { %v13454_v41 = vpop.eup %13453  ;;  %13473 = vrcp.f32 %v3605_v43  ;;  %v3578_v19 = vmul.f32 1.442695, %v3517_v1  ;;  %v16799_v6 = vadd.f32 %v16505_v5, %v3448_v44  ;;  %12085 = vmatmul.mubr.msk.f32.gmra.mrb[52].mxu1 %vm1902_vm1, %v3693_v37  ;;  %v3695_v10 = vmul.f32 %v13452_v42, %v16676_v7 }
 0x9eb   : > { %v13456_v24 = vpop.eup %13455  ;;  %v3694_v38 = vmul.f32 %v13454_v41, %v16683_v49  ;;  %13475 = vrcp.f32 %v3604_v63  ;;  %v16805_v59 = vadd.f32 %v16505_v5, %v3447_v30  ;;  %v3576_v29 = vmul.f32 1.442695, %v3516_v28 }
 0x9ec   : > { %v13458_v26 = vpop.eup %13457  ;;  %v3607_v27 = vadd.f32 1.0, %v13456_v24  ;;  %13477 = vpow2.f32 %v3572_v56  ;;  %v3519_v35 = vsub.f32 0.0, %v16799_v6 }
 0x9ed   : > { %v13460_v60 = vpop.eup %13459  ;;  %v3606_v22 = vadd.f32 1.0, %v13458_v26  ;;  %13479 = vpow2.f32 %v3578_v19  ;;  %v3518_v37 = vsub.f32 0.0, %v16805_v59  ;;  %12087 = vmatprep.mubr.msk.f32.mxu1 %vm1902_vm1, %v3694_v38 }
 0x9ee   : > { %v13462_v7 = vpop.eup %13461  ;;  %13481 = vrcp.f32 %v3607_v27  ;;  %v3582_v49 = vmul.f32 1.442695, %v3519_v35  ;;  %12088 = vmatmul.mubr.msk.f32.gmra.mrb[54].mxu1 %vm1902_vm1, %v3695_v10  ;;  %v3697_v23 = vmul.f32 %v13460_v60, %v16694_v54 }
 0x9ef   : > { %v13464_v5 = vpop.eup %13463  ;;  %v3696_v48 = vmul.f32 %v13462_v7, %v16697_v18  ;;  %13483 = vrcp.f32 %v3606_v22  ;;  %v3580_v12 = vmul.f32 1.442695, %v3518_v37 }
 0x9f0   : > { %v13466_v57 = vpop.eup %13465  ;;  %v3609_v20 = vadd.f32 1.0, %v13464_v5  ;;  %13485 = vpow2.f32 %v3576_v29 }
 0x9f1   : > { %v13468_v34 = vpop.eup %13467  ;;  %v3608_v56 = vadd.f32 1.0, %v13466_v57  ;;  %13487 = vpow2.f32 %v3582_v49  ;;  %12090 = vmatprep.mubr.msk.f32.mxu1 %vm1902_vm1, %v3696_v48 }
 0x9f2   : > { %v13470_v8 = vpop.eup %13469  ;;  %13489 = vrcp.f32 %v3609_v20  ;;  %12091 = vmatmul.mubr.msk.f32.gmra.mrb[56].mxu1 %vm1902_vm1, %v3697_v23  ;;  %v3699_v44 = vmul.f32 %v13468_v34, %v16712_v17  ;;  %v14527_v23 = vld [vmem:[#allocation2 + $0x8] sm:$0xff]  ;;  %v16844_v20 = vld [vmem:[%s20136_s10] ss:$0 sm:$0xff] }
 0x9f3   : > { %v13472_v11 = vpop.eup %13471  ;;  %13491 = vrcp.f32 %v3608_v56  ;;  %v3611_v1 = vadd.f32 1.0, %v13470_v8 }
 0x9f4   : > { %v13474_v43 = vpop.eup %13473  ;;  %v3698_v18 = vmul.f32 %v13472_v11, %v16715_v14  ;;  %13493 = vpow2.f32 %v3580_v12 }
 0x9f5   : > { %v13476_v54 = vpop.eup %13475  ;;  %13495 = vrcp.f32 %v3611_v1  ;;  %v3701_v19 = vmul.f32 %v13474_v43, %v16728_v9 }
 0x9f6   : > { %v13478_v53 = vpop.eup %13477  ;;  %v3700_v42 = vmul.f32 %v13476_v54, %v16731_v15  ;;  %12093 = vmatprep.mubr.msk.f32.mxu1 %vm1902_vm1, %v3698_v18 }
 0x9f7   : > { %v13480_v63 = vpop.eup %13479  ;;  %v3610_v28 = vadd.f32 1.0, %v13478_v53  ;;  %12094 = vmatmul.mubr.msk.f32.gmra.mrb[58].mxu1 %vm1902_vm1, %v3699_v44 }
 0x9f8   : > { %v13482_v30 = vpop.eup %13481  ;;  %v3613_v41 = vadd.f32 1.0, %v13480_v63  ;;  %12096 = vmatprep.mubr.msk.f32.mxu1 %vm1902_vm1, %v3700_v42 }
 0x9f9   : > { %v13484_v14 = vpop.eup %13483  ;;  %13497 = vrcp.f32 %v3610_v28  ;;  %v3703_v29 = vmul.f32 %v13482_v30, %v16745_v36 }
 0x9fa   : > { %v13486_v24 = vpop.eup %13485  ;;  %v3702_v17 = vmul.f32 %v13484_v14, %v16749_v0  ;;  %13499 = vrcp.f32 %v3613_v41 }
 0x9fb   : > { %v13488_v10 = vpop.eup %13487  ;;  %v3612_v15 = vadd.f32 1.0, %v13486_v24  ;;  %12097 = vmatmul.mubr.msk.f32.gmra.mrb[60].mxu1 %vm1902_vm1, %v3701_v19 }
 0x9fc   : > { %v13490_v38 = vpop.eup %13489  ;;  %v3615_v26 = vadd.f32 1.0, %v13488_v10  ;;  %12099 = vmatprep.mubr.msk.f32.mxu1 %vm1902_vm1, %v3702_v17 }
 0x9fd   : > { %v13492_v27 = vpop.eup %13491  ;;  %13501 = vrcp.f32 %v3612_v15  ;;  %v3705_v0 = vmul.f32 %v13490_v38, %v16758_v61 }
 0x9fe   : > { %v13494_v35 = vpop.eup %13493  ;;  %v3704_v9 = vmul.f32 %v13492_v27, %v16763_v25  ;;  %13503 = vrcp.f32 %v3615_v26 }
 0x9ff   : > { %v3614_v60 = vadd.f32 1.0, %v13494_v35  ;;  %12100 = vmatmul.mubr.msk.f32.gmra.mrb[62].mxu1 %vm1902_vm1, %v3703_v29  ;;  %v13496_v22 = vpop.eup %13495 }
 0xa00   : > { %12102 = vmatprep.mubr.msk.f32.mxu1 %vm1902_vm1, %v3704_v9  ;;  %v3707_v36 = vmul.f32 %v13496_v22, %v16772_v2 }
 0xa01   : > { %13505 = vrcp.f32 %v3614_v60 }
 0xa03   : > { %v13498_v37 = vpop.eup %13497  ;;  %12103 = vmatmul.mubr.msk.f32.gmra.mrb[64].mxu1 %vm1902_vm1, %v3705_v0 }
 0xa04   : > { %v3706_v7 = vmul.f32 %v13498_v37, %v16777_v4  ;;  %v13500_v49 = vpop.eup %13499 }
 0xa05   : > { %v3709_v61 = vmul.f32 %v13500_v49, %v16787_v51 }
 0xa06   : > { %12105 = vmatprep.mubr.msk.f32.mxu1 %vm1902_vm1, %v3706_v7 }
 0xa07   : > { %v13502_v25 = vpop.eup %13501  ;;  %12106 = vmatmul.mubr.msk.f32.gmra.mrb[66].mxu1 %vm1902_vm1, %v3707_v36 }
 0xa08   : > { %v3708_v5 = vmul.f32 %v13502_v25, %v16791_v40  ;;  %v13504_v48 = vpop.eup %13503 }
 0xa09   : > { %v3711_v2 = vmul.f32 %v13504_v48, %v16799_v6 }
 0xa0a   : > { %12108 = vmatprep.mubr.msk.f32.mxu1 %vm1902_vm1, %v3708_v5 }
 0xa0b   : > { %v13506_v57 = vpop.eup %13505  ;;  %12109 = vmatmul.mubr.msk.f32.gmra.mrb[68].mxu1 %vm1902_vm1, %v3709_v61 }
 0xa0c   : > { %v3710_v4 = vmul.f32 %v13506_v57, %v16805_v59 }
 0xa0e   : > { %12111 = vmatprep.mubr.msk.f32.mxu1 %vm1902_vm1, %v3710_v4 }
 0xa0f   : > { %12112 = vmatmul.mubr.msk.f32.gmra.mrb[70].mxu1 %vm1902_vm1, %v3711_v2 }
 0xa10   : > { %4364 = vmatprep.mubr.f32.mxu1 %v14527_v23 }
 0xaa3   : > { %v12068_v40 = vpop.f32.mrb[40].mxu1 }
 0xaa4   : > { %v16847_v51 = vadd.f32 %v12068_v40, %v16844_v20  ;;  %v3885_v12 = vpop.f32.mrb[41].mxu1 }
 0xaa5   : > { %v16850_v34 = vadd.f32 %v16844_v20, %v3885_v12 }
 0xaa6   : > { %v4045_v59 = vsub.f32 0.0, %v16847_v51 }
 0xaa7   : > { %v4044_v6 = vsub.f32 0.0, %v16850_v34  ;;  %v12071_v56 = vpop.f32.mrb[42].mxu1 }
 0xaa8   : > { %v4078_v8 = vmul.f32 1.442695, %v4045_v59  ;;  %v16855_v11 = vadd.f32 %v12071_v56, %v16844_v20  ;;  %v3895_v43 = vpop.f32.mrb[43].mxu1 }
 0xaa9   : > { %v4076_v18 = vmul.f32 1.442695, %v4044_v6  ;;  %v16858_v1 = vadd.f32 %v16844_v20, %v3895_v43 }
 0xaaa   : > { %13507 = vpow2.f32 %v4078_v8  ;;  %v4047_v54 = vsub.f32 0.0, %v16855_v11 }
 0xaab   : > { %13509 = vpow2.f32 %v4076_v18  ;;  %v4046_v44 = vsub.f32 0.0, %v16858_v1  ;;  %v12074_v53 = vpop.f32.mrb[44].mxu1 }
 0xaac   : > { %v4082_v42 = vmul.f32 1.442695, %v4047_v54  ;;  %v16863_v63 = vadd.f32 %v12074_v53, %v16844_v20  ;;  %v3905_v28 = vpop.f32.mrb[45].mxu1 }
 0xaad   : > { %v4080_v30 = vmul.f32 1.442695, %v4046_v44  ;;  %v16866_v41 = vadd.f32 %v16844_v20, %v3905_v28 }
 0xaae   : > { %13511 = vpow2.f32 %v4082_v42  ;;  %v4049_v14 = vsub.f32 0.0, %v16863_v63 }
 0xaaf   : > { %13513 = vpow2.f32 %v4080_v30  ;;  %v4048_v19 = vsub.f32 0.0, %v16866_v41 }
 0xab0   : > { %v4086_v24 = vmul.f32 1.442695, %v4049_v14 }
 0xab1   : > { %v4084_v17 = vmul.f32 1.442695, %v4048_v19  ;;  %v12077_v10 = vpop.f32.mrb[46].mxu1 }
 0xab2   : > { %13515 = vpow2.f32 %v4086_v24  ;;  %v16871_v15 = vadd.f32 %v12077_v10, %v16844_v20  ;;  %v3915_v38 = vpop.f32.mrb[47].mxu1 }
 0xab3   : > { %13517 = vpow2.f32 %v4084_v17  ;;  %v16874_v26 = vadd.f32 %v16844_v20, %v3915_v38 }
 0xab4   : > { %v13508_v27 = vpop.eup %13507  ;;  %v4051_v29 = vsub.f32 0.0, %v16871_v15 }
 0xab5   : > { %v13510_v35 = vpop.eup %13509  ;;  %v4141_v9 = vadd.f32 1.0, %v13508_v27  ;;  %v4050_v60 = vsub.f32 0.0, %v16874_v26  ;;  %v12080_v0 = vpop.f32.mrb[48].mxu1 }
 0xab6   : > { %v4140_v22 = vadd.f32 1.0, %v13510_v35  ;;  %v4090_v37 = vmul.f32 1.442695, %v4051_v29  ;;  %v16879_v7 = vadd.f32 %v12080_v0, %v16844_v20  ;;  %v3925_v36 = vpop.f32.mrb[49].mxu1 }
 0xab7   : > { %13519 = vrcp.f32 %v4141_v9  ;;  %v4088_v49 = vmul.f32 1.442695, %v4050_v60  ;;  %v16882_v25 = vadd.f32 %v16844_v20, %v3925_v36 }
 0xab8   : > { %v13512_v5 = vpop.eup %13511  ;;  %13521 = vrcp.f32 %v4140_v22  ;;  %v4053_v61 = vsub.f32 0.0, %v16879_v7 }
 0xab9   : > { %v13514_v48 = vpop.eup %13513  ;;  %v4143_v57 = vadd.f32 1.0, %v13512_v5  ;;  %13523 = vpow2.f32 %v4090_v37  ;;  %v4052_v4 = vsub.f32 0.0, %v16882_v25  ;;  %v12083_v2 = vpop.f32.mrb[50].mxu1 }
 0xaba   : > { %v4142_v23 = vadd.f32 1.0, %v13514_v48  ;;  %13525 = vpow2.f32 %v4088_v49  ;;  %v4094_v40 = vmul.f32 1.442695, %v4053_v61  ;;  %v16887_v12 = vadd.f32 %v12083_v2, %v16844_v20  ;;  %v3935_v59 = vpop.f32.mrb[51].mxu1  ;;  %v20137_v61 = vld [vmem:[#allocation83_spill] sm:$0xff]  ;;  %v20138_v2 = vld [vmem:[#allocation84_spill] sm:$0xff] }
 0xabb   : > { %13527 = vrcp.f32 %v4143_v57  ;;  %v4092_v6 = vmul.f32 1.442695, %v4052_v4  ;;  %v16890_v56 = vadd.f32 %v16844_v20, %v3935_v59 }
 0xabc   : > { %v13516_v8 = vpop.eup %13515  ;;  %13529 = vrcp.f32 %v4142_v23  ;;  %v4055_v43 = vsub.f32 0.0, %v16887_v12 }
 0xabd   : > { %v13518_v18 = vpop.eup %13517  ;;  %v4145_v54 = vadd.f32 1.0, %v13516_v8  ;;  %13531 = vpow2.f32 %v4094_v40  ;;  %v4054_v44 = vsub.f32 0.0, %v16890_v56  ;;  %v12086_v53 = vpop.f32.mrb[52].mxu1 }
 0xabe   : > { %v4144_v42 = vadd.f32 1.0, %v13518_v18  ;;  %13533 = vpow2.f32 %v4092_v6  ;;  %v4098_v28 = vmul.f32 1.442695, %v4055_v43  ;;  %v16895_v30 = vadd.f32 %v12086_v53, %v16844_v20  ;;  %v3945_v14 = vpop.f32.mrb[53].mxu1 }
 0xabf   : > { %13535 = vrcp.f32 %v4145_v54  ;;  %v4096_v19 = vmul.f32 1.442695, %v4054_v44  ;;  %v16898_v24 = vadd.f32 %v16844_v20, %v3945_v14 }
 0xac0   : > { %13537 = vrcp.f32 %v4144_v42  ;;  %v4057_v17 = vsub.f32 0.0, %v16895_v30 }
 0xac1   : > { %v13520_v10 = vpop.eup %13519  ;;  %13539 = vpow2.f32 %v4098_v28  ;;  %v4056_v38 = vsub.f32 0.0, %v16898_v24  ;;  %v12089_v27 = vpop.f32.mrb[54].mxu1 }
 0xac2   : > { %v13522_v29 = vpop.eup %13521  ;;  %v4237_v35 = vmul.f32 %v13520_v10, %v16847_v51  ;;  %13541 = vpow2.f32 %v4096_v19  ;;  %v4102_v9 = vmul.f32 1.442695, %v4057_v17  ;;  %v16904_v60 = vadd.f32 %v12089_v27, %v16844_v20  ;;  %v3955_v0 = vpop.f32.mrb[55].mxu1  ;;  %v20139_v19 = vld [vmem:[#allocation86_spill] sm:$0xff]  ;;  %v20140_v27 = vld [vmem:[#allocation85_spill] sm:$0xff] }
 0xac3   : > { %v13524_v22 = vpop.eup %13523  ;;  %v4236_v37 = vmul.f32 %v13522_v29, %v16850_v34  ;;  %v4100_v36 = vmul.f32 1.442695, %v4056_v38  ;;  %v16908_v49 = vadd.f32 %v16844_v20, %v3955_v0 }
 0xac4   : > { %v13526_v5 = vpop.eup %13525  ;;  %v16911_v48 = vmul.f32 %v4237_v35, %v20137_v61  ;;  %v4147_v57 = vadd.f32 1.0, %v13524_v22  ;;  %13543 = vpow2.f32 %v4102_v9  ;;  %v4059_v51 = vsub.f32 0.0, %v16904_v60 }
 0xac5   : > { %v13528_v4 = vpop.eup %13527  ;;  %v16915_v23 = vmul.f32 %v4236_v37, %v20138_v2  ;;  %v4146_v40 = vadd.f32 1.0, %v13526_v5  ;;  %13545 = vpow2.f32 %v4100_v36  ;;  %v4058_v34 = vsub.f32 0.0, %v16908_v49  ;;  %v12092_v59 = vpop.f32.mrb[56].mxu1 }
 0xac6   : > { %v13530_v6 = vpop.eup %13529  ;;  %v4239_v8 = vmul.f32 %v13528_v4, %v16855_v11  ;;  %13547 = vrcp.f32 %v4147_v57  ;;  %v4106_v43 = vmul.f32 1.442695, %v4059_v51  ;;  %v16920_v18 = vadd.f32 %v12092_v59, %v16844_v20  ;;  %v3965_v54 = vpop.f32.mrb[57].mxu1 }
 0xac7   : > { %v13532_v44 = vpop.eup %13531  ;;  %v4238_v42 = vmul.f32 %v13530_v6, %v16858_v1  ;;  %13549 = vrcp.f32 %v4146_v40  ;;  %v4104_v28 = vmul.f32 1.442695, %v4058_v34  ;;  %v16933_v9 = vadd.f32 %v16844_v20, %v3965_v54  ;;  %v20141_v34 = vld [vmem:[#allocation88_spill] sm:$0xff] }
 0xac8   : > { %v13534_v14 = vpop.eup %13533  ;;  %v16926_v17 = vmul.f32 %v4239_v8, %v20139_v19  ;;  %v4149_v10 = vadd.f32 1.0, %v13532_v44  ;;  %13551 = vpow2.f32 %v4106_v43  ;;  %v4061_v11 = vsub.f32 0.0, %v16920_v18  ;;  %v20142_v8 = vld [vmem:[#allocation87_spill] sm:$0xff] }
 0xac9   : > { %v13536_v38 = vpop.eup %13535  ;;  %v16930_v29 = vmul.f32 %v4238_v42, %v20140_v27  ;;  %v4148_v35 = vadd.f32 1.0, %v13534_v14  ;;  %13553 = vpow2.f32 %v4104_v28  ;;  %v4060_v51 = vsub.f32 0.0, %v16933_v9 }
 0xaca   : > { %v13538_v1 = vpop.eup %13537  ;;  %v4241_v0 = vmul.f32 %v13536_v38, %v16863_v63  ;;  %13555 = vrcp.f32 %v4149_v10  ;;  %v4110_v22 = vmul.f32 1.442695, %v4061_v11  ;;  %v12095_v37 = vpop.f32.mrb[58].mxu1 }
 0xacb   : > { %v13540_v36 = vpop.eup %13539  ;;  %v4240_v57 = vmul.f32 %v13538_v1, %v16866_v41  ;;  %13557 = vrcp.f32 %v4148_v35  ;;  %v3975_v4 = vpop.f32.mrb[59].mxu1  ;;  %v16944_v63 = vadd.f32 %v12095_v37, %v16844_v20  ;;  %v4108_v44 = vmul.f32 1.442695, %v4060_v51 }
 0xacc   : > { %v13542_v40 = vpop.eup %13541  ;;  %v16941_v59 = vmul.f32 %v4241_v0, %v20141_v34  ;;  %v4151_v6 = vadd.f32 1.0, %v13540_v36  ;;  %13559 = vpow2.f32 %v4110_v22  ;;  %v16950_v41 = vadd.f32 %v16844_v20, %v3975_v4 }
 0xacd   : > { %v16947_v43 = vmul.f32 %v4240_v57, %v20142_v8  ;;  %v4150_v54 = vadd.f32 1.0, %v13542_v40  ;;  %v4063_v28 = vsub.f32 0.0, %v16944_v63  ;;  %v20147_v8 = vld [vmem:[#allocation94_spill] sm:$0xff] }
 0xace   : > { %v13544_v42 = vpop.eup %13543  ;;  %13561 = vrcp.f32 %v4151_v6  ;;  %v12098_v14 = vpop.f32.mrb[60].mxu1  ;;  %v4062_v35 = vsub.f32 0.0, %v16950_v41 }
 0xacf   : > { %v13546_v10 = vpop.eup %13545  ;;  %13563 = vrcp.f32 %v4150_v54  ;;  %v4153_v38 = vadd.f32 1.0, %v13544_v42  ;;  %v3985_v1 = vpop.f32.mrb[61].mxu1  ;;  %v4114_v37 = vmul.f32 1.442695, %v4063_v28  ;;  %v16957_v36 = vadd.f32 %v12098_v14, %v16844_v20  ;;  %v20143_v28 = vld [vmem:[#allocation90_spill] sm:$0xff] }
 0xad0   : > { %v13548_v0 = vpop.eup %13547  ;;  %v4152_v22 = vadd.f32 1.0, %v13546_v10  ;;  %13565 = vpow2.f32 %v4108_v44  ;;  %v4112_v4 = vmul.f32 1.442695, %v4062_v35  ;;  %v16961_v40 = vadd.f32 %v16844_v20, %v3985_v1 }
 0xad1   : > { %v13550_v57 = vpop.eup %13549  ;;  %v4243_v51 = vmul.f32 %v13548_v0, %v16871_v15  ;;  %13567 = vrcp.f32 %v4153_v38  ;;  %v4065_v42 = vsub.f32 0.0, %v16957_v36  ;;  %v20144_v0 = vld [vmem:[#allocation89_spill] sm:$0xff] }
 0xad2   : > { %v13552_v6 = vpop.eup %13551  ;;  %v4242_v54 = vmul.f32 %v13550_v57, %v16874_v26  ;;  %13569 = vrcp.f32 %v4152_v22  ;;  %v12101_v10 = vpop.f32.mrb[62].mxu1  ;;  %v4064_v15 = vsub.f32 0.0, %v16961_v40 }
 0xad3   : > { %v13554_v44 = vpop.eup %13553  ;;  %v16966_v11 = vmul.f32 %v4243_v51, %v20143_v28  ;;  %v4155_v14 = vadd.f32 1.0, %v13552_v6  ;;  %13571 = vpow2.f32 %v4114_v37  ;;  %v3995_v38 = vpop.f32.mrb[63].mxu1  ;;  %v4118_v26 = vmul.f32 1.442695, %v4065_v42  ;;  %v20145_v42 = vld [vmem:[#allocation92_spill] sm:$0xff] }
 0xad4   : > { %v13556_v35 = vpop.eup %13555  ;;  %v16970_v1 = vmul.f32 %v4242_v54, %v20144_v0  ;;  %v4154_v5 = vadd.f32 1.0, %v13554_v44  ;;  %13573 = vpow2.f32 %v4112_v4  ;;  %v4116_v53 = vmul.f32 1.442695, %v4064_v15 }
 0xad5   : > { %v13558_v22 = vpop.eup %13557  ;;  %v4245_v57 = vmul.f32 %v13556_v35, %v16879_v7  ;;  %13575 = vrcp.f32 %v4155_v14  ;;  %v16974_v51 = vadd.f32 %v12101_v10, %v16844_v20  ;;  %v16980_v54 = vadd.f32 %v16844_v20, %v3995_v38  ;;  %v20146_v35 = vld [vmem:[#allocation91_spill] sm:$0xff] }
 0xad6   : > { %v13560_v6 = vpop.eup %13559  ;;  %v4244_v28 = vmul.f32 %v13558_v22, %v16882_v25  ;;  %13577 = vrcp.f32 %v4154_v5  ;;  %v12104_v4 = vpop.f32.mrb[64].mxu1 }
 0xad7   : > { %v16983_v44 = vmul.f32 %v4245_v57, %v20145_v42  ;;  %v4157_v7 = vadd.f32 1.0, %v13560_v6  ;;  %13579 = vpow2.f32 %v4118_v26  ;;  %v4067_v14 = vsub.f32 0.0, %v16974_v51  ;;  %v4005_v10 = vpop.f32.mrb[65].mxu1 }
 0xad8   : > { %v13562_v15 = vpop.eup %13561  ;;  %v16987_v0 = vmul.f32 %v4244_v28, %v20146_v35  ;;  %13581 = vpow2.f32 %v4116_v53  ;;  %v4066_v25 = vsub.f32 0.0, %v16980_v54  ;;  %v16991_v5 = vadd.f32 %v12104_v4, %v16844_v20 }
 0xad9   : > { %v13564_v38 = vpop.eup %13563  ;;  %v4247_v22 = vmul.f32 %v13562_v15, %v16887_v12  ;;  %13583 = vrcp.f32 %v4157_v7  ;;  %v4122_v57 = vmul.f32 1.442695, %v4067_v14  ;;  %v16995_v26 = vadd.f32 %v16844_v20, %v4005_v10  ;;  %v20148_v15 = vld [vmem:[#allocation93_spill] sm:$0xff] }
 0xada   : > { %v13566_v6 = vpop.eup %13565  ;;  %v4246_v28 = vmul.f32 %v13564_v38, %v16890_v56  ;;  %v4120_v53 = vmul.f32 1.442695, %v4066_v25  ;;  %v4069_v35 = vsub.f32 0.0, %v16991_v5  ;;  %v12107_v42 = vpop.f32.mrb[66].mxu1 }
 0xadb   : > { %v13568_v4 = vpop.eup %13567  ;;  %v17002_v34 = vmul.f32 %v4247_v22, %v20147_v8  ;;  %v4156_v12 = vadd.f32 1.0, %v13566_v6  ;;  %13585 = vpow2.f32 %v4122_v57  ;;  %v4068_v7 = vsub.f32 0.0, %v16995_v26  ;;  %v4015_v14 = vpop.f32.mrb[67].mxu1  ;;  %v20149_v8 = vld [vmem:[#allocation96_spill] sm:$0xff] }
 0xadc   : > { %v13570_v10 = vpop.eup %13569  ;;  %v17006_v27 = vmul.f32 %v4246_v28, %v20148_v15  ;;  %v4249_v37 = vmul.f32 %v13568_v4, %v16895_v30  ;;  %13587 = vpow2.f32 %v4120_v53  ;;  %v4126_v56 = vmul.f32 1.442695, %v4069_v35  ;;  %v20150_v35 = vld [vmem:[#allocation95_spill] sm:$0xff]  ;;  %v20152_v15 = vld [vmem:[#allocation114_spill] sm:$0xff] }
 0xadd   : > { %v13572_v25 = vpop.eup %13571  ;;  %v4248_v38 = vmul.f32 %v13570_v10, %v16898_v24  ;;  %13589 = vrcp.f32 %v4156_v12  ;;  %v4124_v19 = vmul.f32 1.442695, %v4068_v7  ;;  %v17011_v22 = vadd.f32 %v12107_v42, %v16844_v20 }
 0xade   : > { %v13574_v57 = vpop.eup %13573  ;;  %v17016_v2 = vmul.f32 %v4249_v37, %v20149_v8  ;;  %v4159_v28 = vadd.f32 1.0, %v13572_v25  ;;  %13591 = vpow2.f32 %v4126_v56  ;;  %v12110_v30 = vpop.f32.mrb[68].mxu1  ;;  %v17024_v6 = vadd.f32 %v16844_v20, %v4015_v14  ;;  %v20153_v25 = vld [vmem:[#allocation97_spill] sm:$0xff] }
 0xadf   : > { %v13576_v53 = vpop.eup %13575  ;;  %v17019_v4 = vmul.f32 %v4248_v38, %v20150_v35  ;;  %v4158_v24 = vadd.f32 1.0, %v13574_v57  ;;  %13593 = vpow2.f32 %v4124_v19  ;;  %v4071_v12 = vsub.f32 0.0, %v17011_v22  ;;  %v4025_v42 = vpop.f32.mrb[69].mxu1  ;;  %v20151_v35 = vld [vmem:[#allocation113_spill] sm:$0xff] }
 0xae0   : > { %v13578_v7 = vpop.eup %13577  ;;  %v4251_v10 = vmul.f32 %v13576_v53, %v16904_v60  ;;  %13595 = vrcp.f32 %v4159_v28  ;;  %v17027_v37 = vadd.f32 %v12110_v30, %v16844_v20  ;;  %v4070_v28 = vsub.f32 0.0, %v17024_v6 }
 0xae1   : > { %v13580_v56 = vpop.eup %13579  ;;  %v4250_v38 = vmul.f32 %v13578_v7, %v16908_v49  ;;  %13597 = vrcp.f32 %v4158_v24  ;;  %v4130_v19 = vmul.f32 1.442695, %v4071_v12  ;;  %v17041_v49 = vadd.f32 %v16844_v20, %v4025_v42 }
 0xae2   : > { %v13582_v57 = vpop.eup %13581  ;;  %v17033_v8 = vmul.f32 %v4251_v10, %v20151_v35  ;;  %v4161_v60 = vadd.f32 1.0, %v13580_v56  ;;  %v4073_v14 = vsub.f32 0.0, %v17027_v37  ;;  %v12113_v53 = vpop.f32.mrb[70].mxu1  ;;  %v4128_v7 = vmul.f32 1.442695, %v4070_v28 }
 0xae3   : > { %v13584_v30 = vpop.eup %13583  ;;  %v17038_v61 = vmul.f32 %v4250_v38, %v20152_v15  ;;  %v4160_v13 = vadd.f32 1.0, %v13582_v57  ;;  %13599 = vpow2.f32 %v4130_v19  ;;  %v4035_v24 = vpop.f32.mrb[71].mxu1  ;;  %v4072_v35 = vsub.f32 0.0, %v17041_v49 }
 0xae4   : > { %v4253_v12 = vmul.f32 %v13584_v30, %v16920_v18  ;;  %13601 = vrcp.f32 %v4161_v60  ;;  %v4134_v10 = vmul.f32 1.442695, %v4073_v14  ;;  %v17048_v38 = vadd.f32 %v12113_v53, %v16844_v20 }
 0xae5   : > { %v13586_v56 = vpop.eup %13585  ;;  %13603 = vrcp.f32 %v4160_v13  ;;  %v17051_v42 = vadd.f32 %v16844_v20, %v4035_v24  ;;  %v4132_v28 = vmul.f32 1.442695, %v4072_v35  ;;  %v20154_v24 = vld [vmem:[#allocation98_spill] sm:$0xff] }
 0xae6   : > { %v13588_v19 = vpop.eup %13587  ;;  %v4163_v57 = vadd.f32 1.0, %v13586_v56  ;;  %13605 = vpow2.f32 %v4128_v7  ;;  %v4075_v14 = vsub.f32 0.0, %v17048_v38  ;;  %v4285_v13 = vmul.f32 %v4253_v12, %v20153_v25 }
 0xae7   : > { %v13590_v18 = vpop.eup %13589  ;;  %v4162_v60 = vadd.f32 1.0, %v13588_v19  ;;  %13607 = vpow2.f32 %v4134_v10  ;;  %v4074_v53 = vsub.f32 0.0, %v17051_v42 }
 0xae8   : > { %v13592_v30 = vpop.eup %13591  ;;  %v4252_v15 = vmul.f32 %v13590_v18, %v16933_v9  ;;  %13609 = vrcp.f32 %v4163_v57  ;;  %v4138_v56 = vmul.f32 1.442695, %v4075_v14  ;;  %v20155_v18 = vld [vmem:[#allocation99_spill] sm:$0xff]  ;;  %v20156_v14 = vld [vmem:[#allocation100_spill] sm:$0xff] }
 0xae9   : > { %v13594_v62 = vpop.eup %13593  ;;  %13611 = vrcp.f32 %v4162_v60  ;;  %v4165_v7 = vadd.f32 1.0, %v13592_v30  ;;  %v4136_v35 = vmul.f32 1.442695, %v4074_v53 }
 0xaea   : > { %v13596_v20 = vpop.eup %13595  ;;  %v4284_v45 = vmul.f32 %v4252_v15, %v20154_v24  ;;  %v4164_v19 = vadd.f32 1.0, %v13594_v62  ;;  %13613 = vpow2.f32 %v4132_v28 }
 0xaeb   : > { %v13598_v10 = vpop.eup %13597  ;;  %v4255_v16 = vmul.f32 %v13596_v20, %v16944_v63  ;;  %13615 = vrcp.f32 %v4165_v7  ;;  %v20157_v63 = vpack.c.bf16 %v16911_v48, %v16915_v23  ;;  %v20159_v20 = vld [vmem:[#allocation102_spill] sm:$0xff]  ;;  %v20160_v48 = vpack.c.bf16 %v16926_v17, %v16930_v29 }
 0xaec   : > { %v4254_v12 = vmul.f32 %v13598_v10, %v16950_v41  ;;  %13617 = vrcp.f32 %v4164_v19  ;;  %v12780_v9 = vpack.c.bf16 %v4285_v13, %v4284_v45  ;;  %v20158_v13 = vld [vmem:[#allocation101_spill] sm:$0xff]  ;;  %v20163_v17 = vpack.c.bf16 %v16941_v59, %v16947_v43 }
 0xaed   : > { %v13600_v57 = vpop.eup %13599  ;;  %v4287_v25 = vmul.f32 %v4255_v16, %v20155_v18  ;;  %13619 = vpow2.f32 %v4138_v56 }
 0xaee   : > { %v13602_v60 = vpop.eup %13601  ;;  %v4286_v30 = vmul.f32 %v4254_v12, %v20156_v14  ;;  %v4167_v55 = vadd.f32 1.0, %v13600_v57  ;;  %13621 = vpow2.f32 %v4136_v35  ;;  %12781 = vmatprep.subr.bf16.mxu1 %v12780_v9  ;;  %v20161_v12 = vld [vmem:[#allocation103_spill] sm:$0xff] }
 0xaef   : > { %v13604_v62 = vpop.eup %13603  ;;  %v4257_v15 = vmul.f32 %v13602_v60, %v16957_v36  ;;  %12783 = vmatpush3.bf16.msra.mxu1 %v20157_v63 }
 0xaf0   : > { %v13606_v41 = vpop.eup %13605  ;;  %v4256_v45 = vmul.f32 %v13604_v62, %v16961_v40  ;;  %13623 = vrcp.f32 %v4167_v55  ;;  %v12784_v28 = vpack.c.bf16 %v4287_v25, %v4286_v30  ;;  %v20162_v30 = vld [vmem:[#allocation104_spill] sm:$0xff] }
 0xaf1   : > { %v13608_v16 = vpop.eup %13607  ;;  %v4289_v53 = vmul.f32 %v4257_v15, %v20158_v13  ;;  %v4166_v7 = vadd.f32 1.0, %v13606_v41 }
 0xaf2   : > { %v13610_v56 = vpop.eup %13609  ;;  %v4288_v19 = vmul.f32 %v4256_v45, %v20159_v20  ;;  %v4169_v35 = vadd.f32 1.0, %v13608_v16  ;;  %12785 = vmatprep.subr.bf16.mxu1 %v12784_v28  ;;  %v20165_v16 = vld [vmem:[#allocation106_spill] sm:$0xff] }
 0xaf3   : > { %v13612_v10 = vpop.eup %13611  ;;  %v4259_v36 = vmul.f32 %v13610_v56, %v16974_v51  ;;  %13625 = vrcp.f32 %v4166_v7  ;;  %12787 = vmatpush3.bf16.msra.mxu1 %v20160_v48 }
 0xaf4   : > { %v13614_v23 = vpop.eup %13613  ;;  %v4258_v55 = vmul.f32 %v13612_v10, %v16980_v54  ;;  %13627 = vrcp.f32 %v4169_v35  ;;  %v12788_v40 = vpack.c.bf16 %v4289_v53, %v4288_v19  ;;  %v20164_v54 = vld [vmem:[#allocation105_spill] sm:$0xff]  ;;  %v20167_v35 = vld [vmem:[#allocation107_spill] sm:$0xff] }
 0xaf5   : > { %v13616_v25 = vpop.eup %13615  ;;  %v4291_v9 = vmul.f32 %v4259_v36, %v20161_v12  ;;  %v4168_v57 = vadd.f32 1.0, %v13614_v23  ;;  %v20168_v23 = vpack.c.bf16 %v16983_v44, %v16987_v0 }
 0xaf6   : > { %v13618_v60 = vpop.eup %13617  ;;  %v4290_v62 = vmul.f32 %v4258_v55, %v20162_v30  ;;  %v4261_v15 = vmul.f32 %v13616_v25, %v16991_v5  ;;  %12789 = vmatprep.subr.bf16.mxu1 %v12788_v40  ;;  %v20170_v25 = vld [vmem:[#allocation109_spill] sm:$0xff] }
 0xaf7   : > { %v13620_v51 = vpop.eup %13619  ;;  %v4260_v63 = vmul.f32 %v13618_v60, %v16995_v26  ;;  %13629 = vrcp.f32 %v4168_v57  ;;  %12791 = vmatpush3.bf16.msra.mxu1 %v20163_v17  ;;  %v20166_v26 = vpack.c.bf16 %v16966_v11, %v16970_v1  ;;  %v20171_v60 = vld [vmem:[#allocation110_spill] sm:$0xff]  ;;  %v20174_v17 = vld [vmem:[#allocation112_spill] sm:$0xff] }
 0xaf8   : > { %v13622_v29 = vpop.eup %13621  ;;  %v4293_v41 = vmul.f32 %v4261_v15, %v20164_v54  ;;  %v4171_v45 = vadd.f32 1.0, %v13620_v51  ;;  %v12792_v28 = vpack.c.bf16 %v4291_v9, %v4290_v62  ;;  %v20173_v51 = vld [vmem:[#allocation111_spill] sm:$0xff] }
 0xaf9   : > { %v4292_v53 = vmul.f32 %v4260_v63, %v20165_v16  ;;  %v4170_v7 = vadd.f32 1.0, %v13622_v29 }
 0xafa   : > { %v13624_v56 = vpop.eup %13623  ;;  %13631 = vrcp.f32 %v4171_v45  ;;  %12793 = vmatprep.subr.bf16.mxu1 %v12792_v28  ;;  %v4379_v45 = vld [vmem:[#allocation16] sm:$0xff]  ;;  %v4380_v28 = vld [vmem:[#allocation16 + $0x8] sm:$0xff] }
 0xafb   : > { %v4263_v5 = vmul.f32 %v13624_v56, %v17011_v22  ;;  %13633 = vrcp.f32 %v4170_v7  ;;  %12795 = vmatpush3.bf16.msra.mxu1 %v20166_v26  ;;  %v12796_v59 = vpack.c.bf16 %v4293_v41, %v4292_v53  ;;  %v20169_v22 = vld [vmem:[#allocation108_spill] sm:$0xff]  ;;  %v12812_v53 = vpack.c.bf16 %v4380_v28, %v4379_v45 }
 0xafd   : > { %v13626_v43 = vpop.eup %13625  ;;  %12797 = vmatprep.subr.bf16.mxu1 %v12796_v59  ;;  %v4295_v10 = vmul.f32 %v4263_v5, %v20167_v35 }
 0xafe   : > { %v13628_v19 = vpop.eup %13627  ;;  %v4262_v36 = vmul.f32 %v13626_v43, %v17024_v6  ;;  %v4377_v43 = vld [vmem:[%s20177_s11 + $0x10] sm:$0xff] }
 0xaff   : > { %v4265_v48 = vmul.f32 %v13628_v19, %v17027_v37  ;;  %12799 = vmatpush3.bf16.msra.mxu1 %v20168_v23  ;;  %v20172_v37 = vpack.c.bf16 %v17002_v34, %v17006_v27  ;;  %v14528_v27 = vld [vmem:[#allocation2] sm:$0xff]  ;;  %v14529_v34 = vld [vmem:[#allocation2 + $0x18] sm:$0xff] }
 0xb00   : > { %v4294_v55 = vmul.f32 %v4262_v36, %v20169_v22  ;;  %v4378_v19 = vld [vmem:[%s20177_s11 + $0x18] sm:$0xff] }
 0xb01   : > { %v13630_v40 = vpop.eup %13629  ;;  %v4297_v11 = vmul.f32 %v4265_v48, %v20170_v25  ;;  %v12824_v23 = vpack.c.bf16 %v4378_v19, %v4377_v43  ;;  %v10711_v19 = vld [vmem:[%s20180_s2] ss:$0 sm:$0xff]  ;;  %s20236_s2 = sld [smem:[#allocation40_spill]] }
 0xb02   : > { %v4264_v1 = vmul.f32 %v13630_v40, %v17041_v49  ;;  %v12800_v9 = vpack.c.bf16 %v4295_v10, %v4294_v55  ;;  %v20175_v49 = vpack.c.bf16 %v17016_v2, %v17019_v4  ;;  %v4381_v2 = vld [vmem:[#allocation16 + $0x10] sm:$0xff]  ;;  %v4382_v4 = vld [vmem:[#allocation16 + $0x18] sm:$0xff]  ;;  %v4562_v55 = vld [vmem:[#allocation17] sm:$0xff] }
 0xb03   : > { %v12816_v7 = vpack.c.bf16 %v4382_v4, %v4381_v2  ;;  %v4563_v40 = vld [vmem:[#allocation17 + $0x8] sm:$0xff] }
 0xb04   : > { %v13632_v57 = vpop.eup %13631  ;;  %v4296_v62 = vmul.f32 %v4264_v1, %v20171_v60  ;;  %12801 = vmatprep.subr.bf16.mxu1 %v12800_v9  ;;  %v4564_v1 = vld [vmem:[#allocation17 + $0x10] sm:$0xff]  ;;  %v4565_v9 = vld [vmem:[#allocation17 + $0x18] sm:$0xff] }
 0xb05   : > { %v13634_v15 = vpop.eup %13633  ;;  %v4267_v6 = vmul.f32 %v13632_v57, %v17048_v38  ;;  %12803 = vmatpush3.bf16.msra.mxu1 %v20172_v37  ;;  %v20176_v38 = vpack.c.bf16 %v17033_v8, %v17038_v61  ;;  %v4375_v61 = vld [vmem:[%s20177_s11] sm:$0xff]  ;;  %v4376_v8 = vld [vmem:[%s20177_s11 + $0x8] sm:$0xff]  ;;  %v12832_v57 = vpack.c.bf16 %v4565_v9, %v4564_v1 }
 0xb06   : > { %v4266_v0 = vmul.f32 %v13634_v15, %v17051_v42  ;;  %v12804_v44 = vpack.c.bf16 %v4297_v11, %v4296_v62  ;;  %v14530_v42 = vld [vmem:[#allocation2 + $0x10] sm:$0xff]  ;;  %v12820_v56 = vpack.c.bf16 %v4376_v8, %v4375_v61  ;;  %v12828_v11 = vpack.c.bf16 %v4563_v40, %v4562_v55  ;;  %v10714_v62 = vld [vmem:[%s20005_s22 + $0x20] sm:$0xff]  ;;  %v10721_v37 = vld [vmem:[%s20015_s23 + $0x28] sm:$0xff] }
 0xb07   : > { %v4299_v63 = vmul.f32 %v4267_v6, %v20173_v51  ;;  %v10720_v15 = vld [vmem:[%s20015_s23 + $0x20] sm:$0xff]  ;;  %v10716_v8 = vld [vmem:[%s20005_s22 + $0x30] sm:$0xff] }
 0xb08   : > { %v4298_v29 = vmul.f32 %v4266_v0, %v20174_v17  ;;  %12805 = vmatprep.subr.bf16.mxu1 %v12804_v44  ;;  %v12844_v0 = vpack.c.bf16 %v10721_v37, %v10720_v15  ;;  %v14531_v55 = vld [vmem:[%s15121_s21] sm:$0xff]  ;;  %v14533_v15 = vld [vmem:[%s15121_s21 + $0x10] sm:$0xff] }
 0xb09   : > { %12807 = vmatpush3.bf16.msra.mxu1 %v20175_v49  ;;  %v14535_v37 = vld [vmem:[%s15121_s21 + $0x20] sm:$0xff] }
 0xb0a   : > { %v12808_v41 = vpack.c.bf16 %v4299_v63, %v4298_v29 }
 0xb0c   : > { %12809 = vmatprep.subr.bf16.mxu1 %v12808_v41 }
 0xb0d   : > { %12811 = vmatpush3.bf16.msra.mxu1 %v20176_v38 }
 0xb0e   : > { %12813 = vmatprep.subr.bf16.mxu1 %v12812_v53 }
 0xb10   : > { %4365 = vmatmul.mubr.f32.vlgmr.msra.gmra.mrb[72].mxu1 %v14528_v27 }
 0xb11   : > { %4369 = vmatprep.mubr.f32.mxu1 %v14529_v34  ;;  %12815 = vmatpush3.bf16.msra.mxu1 %v12812_v53 }
 0xb12   : > { %12817 = vmatprep.subr.bf16.mxu1 %v12816_v7 }
 0xb14   : > { %4370 = vmatmul.mubr.f32.gmra.mrb[74].mxu1 %v14530_v42 }
 0xb15   : > { %12819 = vmatpush3.bf16.msra.mxu1 %v12816_v7 }
 0xb16   : > { %12821 = vmatprep.subr.bf16.mxu1 %v12820_v56 }
 0xbe3   : > { %v11328_v5 = vpop.f32.mrb[72].mxu1 }
 0xbe4   : > { %v11329_v26 = vpop.f32.mrb[73].mxu1 }
 0xbe5   : > { %v11330_v59 = vadd.f32 %v11329_v26, %v11328_v5  ;;  %v10722_v5 = vld [vmem:[%s20015_s23 + $0x30] sm:$0xff] }
 0xbe7   : > { %v11331_v10 = vpop.f32.mrb[74].mxu1  ;;  %12122 = vmatprep.mubr.msk.f32.mxu1 %vm1902_vm1, %v11330_v59  ;;  %v10723_v59 = vld [vmem:[%s20015_s23 + $0x38] sm:$0xff] }
 0xbe8   : > { %v11332_v36 = vpop.f32.mrb[75].mxu1  ;;  %v12848_v43 = vpack.c.bf16 %v10723_v59, %v10722_v5  ;;  %v14556_v5 = vld [vmem:[%s15121_s21 + $0xc8] sm:$0xff]  ;;  %v14558_v59 = vld [vmem:[%s15121_s21 + $0xd8] sm:$0xff] }
 0xbe9   : > { %v11333_v48 = vadd.f32 %v11332_v36, %v11331_v10 }
 0xbeb   : > { %12123 = vmatmul.mubr.msk.f32.vlgmr.msra.gmra.mrb[76].mxu1 %vm1902_vm1, %v11333_v48 }
 0xbec   : > { %12823 = vmatpush3.bf16.msra.mxu1 %v12820_v56  ;;  %12133 = vmatprep.mubr.msk.f32.mxu1 %vm1902_vm1, %v16152_v46  ;;  %v10715_v46 = vld [vmem:[%s20005_s22 + $0x28] sm:$0xff]  ;;  %v10717_v56 = vld [vmem:[%s20005_s22 + $0x38] sm:$0xff] }
 0xbed   : > { %12825 = vmatprep.subr.bf16.mxu1 %v12824_v23  ;;  %v12836_v6 = vpack.c.bf16 %v10715_v46, %v10714_v62  ;;  %v12840_v26 = vpack.c.bf16 %v10717_v56, %v10716_v8  ;;  %v14532_v46 = vld [vmem:[%s15121_s21 + $0x8] sm:$0xff]  ;;  %v14554_v8 = vld [vmem:[%s15121_s21 + $0xb8] sm:$0xff]  ;;  %v14555_v56 = vld [vmem:[%s15121_s21 + $0xc0] sm:$0xff] }
 0xbef   : > { %12837 = vmatprep.subr.bf16.mxu0 %v12836_v6 }
 0xbf0   : > { %12827 = vmatpush3.bf16.msra.mxu1 %v12824_v23  ;;  %12839 = vmatpush3.bf16.msra.mxu0 %v12836_v6  ;;  %v14534_v6 = vld [vmem:[%s15121_s21 + $0x18] sm:$0xff] }
 0xbf1   : > { %12829 = vmatprep.subr.bf16.mxu1 %v12828_v11  ;;  %12841 = vmatprep.subr.bf16.mxu0 %v12840_v26 }
 0xbf3   : > { %12134 = vmatmul.mubr.msk.f32.vlgmr.msra.gmra.mrb[76].mxu1 %vm1902_vm1, %v16154_v32  ;;  %v10710_v32 = vld [vmem:[%s20178_s7] ss:$0 sm:$0xff]  ;;  %s20235_s7 = sld [smem:[#allocation39_spill]] }
 0xbf4   : > { %12831 = vmatpush3.bf16.msra.mxu1 %v12828_v11  ;;  %12843 = vmatpush3.bf16.msra.mxu0 %v12840_v26  ;;  %v14557_v26 = vld [vmem:[%s15121_s21 + $0xd0] sm:$0xff] }
 0xbf5   : > { %12833 = vmatprep.subr.bf16.mxu1 %v12832_v57 }
 0xbf8   : > { %12835 = vmatpush3.bf16.msra.mxu1 %v12832_v57 }
 0xbf9   : > { %12845 = vmatprep.subr.bf16.mxu1 %v12844_v0 }
 0xcc6   : > { %v12135_v44 = vpop.f32.mrb[76].mxu1 }
 0xcc7   : > { %v4547_v63 = vadd.f32 %v12135_v44, %v10710_v32  ;;  %v4530_v29 = vpop.f32.mrb[77].mxu1  ;;  %v14538_v44 = vld [vmem:[%s15121_s21 + $0x38] sm:$0xff] }
 0xcc8   : > { %v4546_v49 = vadd.f32 %v10710_v32, %v4530_v29  ;;  %v14537_v32 = vld [vmem:[%s15121_s21 + $0x30] sm:$0xff]  ;;  %v14540_v29 = vld [vmem:[%s15121_s21 + $0x48] sm:$0xff] }
 0xcc9   : > { %v4549_v41 = vsub.f32 0.0, %v4547_v63 }
 0xcca   : > { %v4548_v38 = vsub.f32 0.0, %v4546_v49 }
 0xccb   : > { %v4552_v27 = vmul.f32 1.442695, %v4549_v41  ;;  %v14542_v41 = vld [vmem:[%s15121_s21 + $0x58] sm:$0xff] }
 0xccc   : > { %v4550_v34 = vmul.f32 1.442695, %v4548_v38  ;;  %v14543_v38 = vld [vmem:[%s15121_s21 + $0x60] sm:$0xff] }
 0xccd   : > { %13635 = vpow2.f32 %v4552_v27  ;;  %v14544_v27 = vld [vmem:[%s15121_s21 + $0x68] sm:$0xff] }
 0xcce   : > { %13637 = vpow2.f32 %v4550_v34  ;;  %v14545_v34 = vld [vmem:[%s15121_s21 + $0x70] sm:$0xff] }
 0xcd7   : > { %v13636_v42 = vpop.eup %13635 }
 0xcd8   : > { %v13638_v45 = vpop.eup %13637  ;;  %v4555_v28 = vadd.f32 1.0, %v13636_v42  ;;  %v14546_v42 = vld [vmem:[%s15121_s21 + $0x78] sm:$0xff] }
 0xcd9   : > { %v4554_v53 = vadd.f32 1.0, %v13638_v45  ;;  %v14547_v45 = vld [vmem:[%s15121_s21 + $0x80] sm:$0xff] }
 0xcda   : > { %13639 = vrcp.f32 %v4555_v28  ;;  %v14548_v28 = vld [vmem:[%s15121_s21 + $0x88] sm:$0xff] }
 0xcdb   : > { %13641 = vrcp.f32 %v4554_v53  ;;  %v14549_v53 = vld [vmem:[%s15121_s21 + $0x90] sm:$0xff] }
 0xce4   : > { %v13640_v2 = vpop.eup %13639 }
 0xce5   : > { %v13642_v4 = vpop.eup %13641  ;;  %v4561_v61 = vmul.f32 %v13640_v2, %v4547_v63  ;;  %v14539_v63 = vld [vmem:[%s15121_s21 + $0x40] sm:$0xff]  ;;  %v14550_v2 = vld [vmem:[%s15121_s21 + $0x98] sm:$0xff] }
 0xce6   : > { %v4560_v7 = vmul.f32 %v13642_v4, %v4546_v49  ;;  %v14541_v49 = vld [vmem:[%s15121_s21 + $0x50] sm:$0xff]  ;;  %v14551_v4 = vld [vmem:[%s15121_s21 + $0xa0] sm:$0xff] }
 0xce8   : > { %12144 = vmatprep.mubr.msk.f32.mxu1 %vm1902_vm1, %v4560_v7  ;;  %v14552_v7 = vld [vmem:[%s15121_s21 + $0xa8] sm:$0xff] }
 0xce9   : > { %12145 = vmatmul.mubr.msk.f32.vlgmr.msra.gmra.mrb[78].mxu1 %vm1902_vm1, %v4561_v61  ;;  %v14553_v61 = vld [vmem:[%s15121_s21 + $0xb0] sm:$0xff] }
 0xcea   : > { %12847 = vmatpush3.bf16.msra.mxu1 %v12844_v0  ;;  %v14536_v0 = vld [vmem:[%s15121_s21 + $0x28] sm:$0xff] }
 0xceb   : > { %12849 = vmatprep.subr.bf16.mxu1 %v12848_v43 }
 0xcee   : > { %12851 = vmatpush3.bf16.msra.mxu1 %v12848_v43  ;;  %v14559_v43 = vld [vmem:[%s15121_s21 + $0xe0] sm:$0xff] }
 0xdbc   : > { %v12146_v10 = vpop.f32.mrb[78].mxu1 }
 0xdbd   : > { %v4645_v36 = vpop.f32.mrb[79].mxu1  ;;  %v17134_v23 = vadd.f32 %v12146_v10, %v10711_v19  ;;  %v14561_v10 = vld [vmem:[%s15121_s21 + $0xf0] sm:$0xff] }
 0xdbe   : > { %v17132_v48 = vadd.f32 %v10711_v19, %v4645_v36  ;;  %v14560_v19 = vld [vmem:[%s15121_s21 + $0xe8] sm:$0xff]  ;;  %v14562_v36 = vld [vmem:[%s15121_s21 + $0xf8] sm:$0xff] }
 0xdbf   : > { %20183 = vst [vmem:[#allocation99_spill] sm:$0xff] %v17134_v23 }
 0xdc0   : > { %20182 = vst [vmem:[#allocation98_spill] sm:$0xff] %v17132_v48  ;;  %12155 = vmatprep.mubr.msk.f32.mxu0 %vm1902_vm1, %v17132_v48  ;;  %12166 = vmatprep.mubr.msk.f32.mxu1 %vm1902_vm1, %v17132_v48 }
 0xdc1   : > { %12156 = vmatmul.mubr.msk.f32.vlgmr.msra.gmra.mrb[68].mxu0 %vm1902_vm1, %v17134_v23  ;;  %12167 = vmatmul.mubr.msk.f32.vlgmr.msra.gmra.mrb[80].mxu1 %vm1902_vm1, %v17134_v23 }
 0xdc2   : > { %12173 = vmatprep.mubr.msk.f32.mxu0 %vm1267_vm0, %v14531_v55  ;;  %v14563_v55 = vld [vmem:[%s15116_s17] sm:$0xff] }
 0xe94   : > { %v12157_v40 = vpop.f32.mrb[68].mxu0  ;;  %v12168_v11 = vpop.f32.mrb[80].mxu1 }
 0xe95   : > { %v5051_v1 = vpop.f32.mrb[69].mxu0  ;;  %v5131_v9 = vpop.f32.mrb[81].mxu1 }
 0xe96   : > { %v12856_v57 = vpack.c.bf16 %v12157_v40, %v5051_v1  ;;  %v12852_v62 = vpack.c.bf16 %v12168_v11, %v5131_v9  ;;  %v14564_v40 = vld [vmem:[%s15116_s17 + $0x8] sm:$0xff]  ;;  %v14565_v11 = vld [vmem:[%s15116_s17 + $0x10] sm:$0xff]  ;;  %v14566_v1 = vld [vmem:[%s15116_s17 + $0x18] sm:$0xff] }
 0xe97   : > { %v14567_v9 = vld [vmem:[%s15116_s17 + $0x20] sm:$0xff] }
 0xe98   : > { %12853 = vmatprep.subr.bf16.mxu0 %v12852_v62 }
 0xe99   : > { %12855 = vmatpush3.bf16.msra.mxu0 %v12852_v62  ;;  %v14569_v62 = vld [vmem:[%s15116_s17 + $0x30] sm:$0xff] }
 0xe9a   : > { %12857 = vmatprep.subr.bf16.mxu0 %v12856_v57 }
 0xe9c   : > { %12174 = vmatmul.mubr.msk.f32.vlgmr.msra.gmra.mrb[70].mxu0 %vm1267_vm0, %v14532_v46  ;;  %v14570_v46 = vld [vmem:[%s15116_s17 + $0x38] sm:$0xff] }
 0xe9d   : > { %12859 = vmatpush3.bf16.msra.mxu0 %v12856_v57  ;;  %12176 = vmatprep.mubr.msk.f32.mxu0 %vm1267_vm0, %v14533_v15  ;;  %v14568_v57 = vld [vmem:[%s15116_s17 + $0x28] sm:$0xff]  ;;  %v14571_v15 = vld [vmem:[%s15116_s17 + $0x40] sm:$0xff] }
 0xea0   : > { %12177 = vmatmul.mubr.msk.f32.gmra.mrb[72].mxu0 %vm1267_vm0, %v14534_v6  ;;  %v14572_v6 = vld [vmem:[%s15116_s17 + $0x48] sm:$0xff] }
 0xea1   : > { %12179 = vmatprep.mubr.msk.f32.mxu0 %vm1267_vm0, %v14535_v37  ;;  %v14573_v37 = vld [vmem:[%s15116_s17 + $0x50] sm:$0xff] }
 0xea4   : > { %12180 = vmatmul.mubr.msk.f32.gmra.mrb[74].mxu0 %vm1267_vm0, %v14536_v0  ;;  %v14574_v0 = vld [vmem:[%s15116_s17 + $0x58] sm:$0xff] }
 0xea5   : > { %12182 = vmatprep.mubr.msk.f32.mxu0 %vm1267_vm0, %v14537_v32  ;;  %v14575_v32 = vld [vmem:[%s15116_s17 + $0x60] sm:$0xff] }
 0xea8   : > { %12183 = vmatmul.mubr.msk.f32.gmra.mrb[76].mxu0 %vm1267_vm0, %v14538_v44  ;;  %v14576_v44 = vld [vmem:[%s15116_s17 + $0x68] sm:$0xff] }
 0xea9   : > { %12185 = vmatprep.mubr.msk.f32.mxu0 %vm1267_vm0, %v14539_v63  ;;  %v14577_v63 = vld [vmem:[%s15116_s17 + $0x70] sm:$0xff] }
 0xeac   : > { %12186 = vmatmul.mubr.msk.f32.gmra.mrb[78].mxu0 %vm1267_vm0, %v14540_v29  ;;  %v14578_v29 = vld [vmem:[%s15116_s17 + $0x78] sm:$0xff] }
 0xead   : > { %12188 = vmatprep.mubr.msk.f32.mxu0 %vm1267_vm0, %v14541_v49  ;;  %v14579_v49 = vld [vmem:[%s15116_s17 + $0x80] sm:$0xff] }
 0xeb0   : > { %12189 = vmatmul.mubr.msk.f32.gmra.mrb[80].mxu0 %vm1267_vm0, %v14542_v41  ;;  %v14580_v41 = vld [vmem:[%s15116_s17 + $0x88] sm:$0xff] }
 0xeb1   : > { %12191 = vmatprep.mubr.msk.f32.mxu0 %vm1267_vm0, %v14543_v38  ;;  %v14581_v38 = vld [vmem:[%s15116_s17 + $0x90] sm:$0xff] }
 0xeb4   : > { %12192 = vmatmul.mubr.msk.f32.gmra.mrb[82].mxu0 %vm1267_vm0, %v14544_v27  ;;  %v14582_v27 = vld [vmem:[%s15116_s17 + $0x98] sm:$0xff] }
 0xeb5   : > { %12194 = vmatprep.mubr.msk.f32.mxu0 %vm1267_vm0, %v14545_v34  ;;  %v14583_v34 = vld [vmem:[%s15116_s17 + $0xa0] sm:$0xff] }
 0xeb8   : > { %12195 = vmatmul.mubr.msk.f32.gmra.mrb[84].mxu0 %vm1267_vm0, %v14546_v42  ;;  %v14584_v42 = vld [vmem:[%s15116_s17 + $0xa8] sm:$0xff] }
 0xeb9   : > { %12197 = vmatprep.mubr.msk.f32.mxu0 %vm1267_vm0, %v14547_v45  ;;  %v14585_v45 = vld [vmem:[%s15116_s17 + $0xb0] sm:$0xff] }
 0xebc   : > { %12198 = vmatmul.mubr.msk.f32.gmra.mrb[86].mxu0 %vm1267_vm0, %v14548_v28  ;;  %v14586_v28 = vld [vmem:[%s15116_s17 + $0xb8] sm:$0xff] }
 0xebd   : > { %12200 = vmatprep.mubr.msk.f32.mxu0 %vm1267_vm0, %v14549_v53  ;;  %v14587_v53 = vld [vmem:[%s15116_s17 + $0xc0] sm:$0xff] }
 0xec0   : > { %12201 = vmatmul.mubr.msk.f32.gmra.mrb[88].mxu0 %vm1267_vm0, %v14550_v2  ;;  %v14588_v2 = vld [vmem:[%s15116_s17 + $0xc8] sm:$0xff] }
 0xec1   : > { %12203 = vmatprep.mubr.msk.f32.mxu0 %vm1267_vm0, %v14551_v4  ;;  %v14589_v4 = vld [vmem:[%s15116_s17 + $0xd0] sm:$0xff] }
 0xec4   : > { %12204 = vmatmul.mubr.msk.f32.gmra.mrb[90].mxu0 %vm1267_vm0, %v14552_v7  ;;  %v14590_v7 = vld [vmem:[%s15116_s17 + $0xd8] sm:$0xff] }
 0xec5   : > { %12206 = vmatprep.mubr.msk.f32.mxu0 %vm1267_vm0, %v14553_v61  ;;  %v14591_v61 = vld [vmem:[%s15116_s17 + $0xe0] sm:$0xff] }
 0xec8   : > { %12207 = vmatmul.mubr.msk.f32.gmra.mrb[92].mxu0 %vm1267_vm0, %v14554_v8  ;;  %v14592_v8 = vld [vmem:[%s15116_s17 + $0xe8] sm:$0xff] }
 0xec9   : > { %12209 = vmatprep.mubr.msk.f32.mxu0 %vm1267_vm0, %v14555_v56  ;;  %v14593_v56 = vld [vmem:[%s15116_s17 + $0xf0] sm:$0xff] }
 0xecc   : > { %12210 = vmatmul.mubr.msk.f32.gmra.mrb[94].mxu0 %vm1267_vm0, %v14556_v5  ;;  %v14594_v5 = vld [vmem:[%s15116_s17 + $0xf8] sm:$0xff] }
 0xecd   : > { %12212 = vmatprep.mubr.msk.f32.mxu0 %vm1267_vm0, %v14557_v26  ;;  %v14595_v26 = vld [vmem:[#allocation2 + $0x8] sm:$0xff] }
 0xed0   : > { %12213 = vmatmul.mubr.msk.f32.gmra.mrb[96].mxu0 %vm1267_vm0, %v14558_v59  ;;  %v10794_v59 = vld [vmem:[%s20099_s6 + $0x20] sm:$0xff] }
 0xed1   : > { %12215 = vmatprep.mubr.msk.f32.mxu0 %vm1267_vm0, %v14559_v43  ;;  %v10795_v43 = vld [vmem:[%s20099_s6 + $0x28] sm:$0xff] }
 0xed4   : > { %12216 = vmatmul.mubr.msk.f32.gmra.mrb[98].mxu0 %vm1267_vm0, %v14560_v19  ;;  %v12860_v19 = vpack.c.bf16 %v10795_v43, %v10794_v59 }
 0xed5   : > { %12218 = vmatprep.mubr.msk.f32.mxu0 %vm1267_vm0, %v14561_v10  ;;  %v10796_v10 = vld [vmem:[%s20099_s6 + $0x30] sm:$0xff] }
 0xed6   : > { %12861 = vmatprep.subr.bf16.mxu1 %v12860_v19 }
 0xed7   : > { %12863 = vmatpush3.bf16.msra.mxu1 %v12860_v19 }
 0xed8   : > { %12219 = vmatmul.mubr.msk.f32.gmra.mrb[100].mxu0 %vm1267_vm0, %v14562_v36  ;;  %v10797_v36 = vld [vmem:[%s20099_s6 + $0x38] sm:$0xff] }
 0xed9   : > { %12225 = vmatprep.mubr.msk.f32.mxu0 %vm1267_vm0, %v14563_v55  ;;  %v12864_v55 = vpack.c.bf16 %v10797_v36, %v10796_v10  ;;  %v20184_v10 = vld [vmem:[#allocation162_spill] sm:$0xff] }
 0xedb   : > { %12865 = vmatprep.subr.bf16.mxu1 %v12864_v55 }
 0xedc   : > { %12226 = vmatmul.mubr.msk.f32.vlgmr.msra.gmra.mrb[70].mxu0 %vm1267_vm0, %v14564_v40  ;;  %12867 = vmatpush3.bf16.msra.mxu1 %v12864_v55  ;;  %v17277_v40 = vld [vmem:[%s20104_s26 + $0x1] ss:$0 sm:$0xff] }
 0xedd   : > { %12228 = vmatprep.mubr.msk.f32.mxu0 %vm1267_vm0, %v14565_v11  ;;  %v5599_v11 = vmul.f32 %v17277_v40, %v16457_v33  ;;  %v5607_v59 = vmul.f32 %v17277_v40, %v16473_v31  ;;  %v5606_v36 = vmul.f32 %v17277_v40, %v20184_v10  ;;  %v20185_v55 = vld [vmem:[#allocation163_spill] sm:$0xff]  ;;  %v20198_v10 = vld [vmem:[#allocation176_spill] sm:$0xff] }
 0xee0   : > { %12229 = vmatmul.mubr.msk.f32.gmra.mrb[72].mxu0 %vm1267_vm0, %v14566_v1 }
 0xee1   : > { %12231 = vmatprep.mubr.msk.f32.mxu0 %vm1267_vm0, %v14567_v9  ;;  %v17282_v9 = vld [vmem:[%s20112_s16 + $0x1] ss:$0 sm:$0xff] }
 0xee4   : > { %12232 = vmatmul.mubr.msk.f32.gmra.mrb[74].mxu0 %vm1267_vm0, %v14568_v57  ;;  %v5598_v57 = vmul.f32 %v17277_v40, %v16459_v58  ;;  %v20203_v58 = vld [vmem:[#allocation181_spill] sm:$0xff] }
 0xee5   : > { %12234 = vmatprep.mubr.msk.f32.mxu0 %vm1267_vm0, %v14569_v62 }
 0xee8   : > { %12235 = vmatmul.mubr.msk.f32.gmra.mrb[76].mxu0 %vm1267_vm0, %v14570_v46 }
 0xee9   : > { %12237 = vmatprep.mubr.msk.f32.mxu0 %vm1267_vm0, %v14571_v15 }
 0xeec   : > { %12238 = vmatmul.mubr.msk.f32.gmra.mrb[78].mxu0 %vm1267_vm0, %v14572_v6 }
 0xeed   : > { %12240 = vmatprep.mubr.msk.f32.mxu0 %vm1267_vm0, %v14573_v37  ;;  %v5601_v37 = vmul.f32 %v17277_v40, %v16461_v21 }
 0xef0   : > { %12241 = vmatmul.mubr.msk.f32.gmra.mrb[80].mxu0 %vm1267_vm0, %v14574_v0 }
 0xef1   : > { %12243 = vmatprep.mubr.msk.f32.mxu0 %vm1267_vm0, %v14575_v32 }
 0xef4   : > { %12244 = vmatmul.mubr.msk.f32.gmra.mrb[82].mxu0 %vm1267_vm0, %v14576_v44  ;;  %v5600_v44 = vmul.f32 %v17277_v40, %v16463_v52 }
 0xef5   : > { %12246 = vmatprep.mubr.msk.f32.mxu0 %vm1267_vm0, %v14577_v63 }
 0xef8   : > { %12247 = vmatmul.mubr.msk.f32.gmra.mrb[84].mxu0 %vm1267_vm0, %v14578_v29 }
 0xef9   : > { %12249 = vmatprep.mubr.msk.f32.mxu0 %vm1267_vm0, %v14579_v49 }
 0xefc   : > { %12250 = vmatmul.mubr.msk.f32.gmra.mrb[86].mxu0 %vm1267_vm0, %v14580_v41 }
 0xefd   : > { %12252 = vmatprep.mubr.msk.f32.mxu0 %vm1267_vm0, %v14581_v38 }
 0xf00   : > { %12253 = vmatmul.mubr.msk.f32.gmra.mrb[88].mxu0 %vm1267_vm0, %v14582_v27 }
 0xf01   : > { %12255 = vmatprep.mubr.msk.f32.mxu0 %vm1267_vm0, %v14583_v34 }
 0xf04   : > { %12256 = vmatmul.mubr.msk.f32.gmra.mrb[90].mxu0 %vm1267_vm0, %v14584_v42  ;;  %v5603_v42 = vmul.f32 %v17277_v40, %v16465_v47 }
 0xf05   : > { %12258 = vmatprep.mubr.msk.f32.mxu0 %vm1267_vm0, %v14585_v45 }
 0xf08   : > { %12259 = vmatmul.mubr.msk.f32.gmra.mrb[92].mxu0 %vm1267_vm0, %v14586_v28 }
 0xf09   : > { %12261 = vmatprep.mubr.msk.f32.mxu0 %vm1267_vm0, %v14587_v53 }
 0xf0c   : > { %12262 = vmatmul.mubr.msk.f32.gmra.mrb[94].mxu0 %vm1267_vm0, %v14588_v2  ;;  %v5602_v2 = vmul.f32 %v17277_v40, %v16467_v50 }
 0xf0d   : > { %12264 = vmatprep.mubr.msk.f32.mxu0 %vm1267_vm0, %v14589_v4  ;;  %v5605_v4 = vmul.f32 %v17277_v40, %v16469_v39 }
 0xf10   : > { %12265 = vmatmul.mubr.msk.f32.gmra.mrb[96].mxu0 %vm1267_vm0, %v14590_v7 }
 0xf11   : > { %12267 = vmatprep.mubr.msk.f32.mxu0 %vm1267_vm0, %v14591_v61 }
 0xf14   : > { %12268 = vmatmul.mubr.msk.f32.gmra.mrb[98].mxu0 %vm1267_vm0, %v14592_v8 }
 0xf15   : > { %12270 = vmatprep.mubr.msk.f32.mxu0 %vm1267_vm0, %v14593_v56  ;;  %v5604_v56 = vmul.f32 %v17277_v40, %v16471_v3 }
 0xf18   : > { %12271 = vmatmul.mubr.msk.f32.gmra.mrb[100].mxu0 %vm1267_vm0, %v14594_v5 }
 0xf19   : > { %7274 = vmatprep.mubr.f32.mxu0 %v14595_v26 }
 0xfaf   : > { %v12227_v1 = vpop.f32.mrb[70].mxu0 }
 0xfb0   : > { %v5631_v62 = vadd.f32 %v12227_v1, %v5599_v11  ;;  %v5431_v46 = vpop.f32.mrb[71].mxu0  ;;  %v5609_v11 = vmul.f32 %v17277_v40, %v20185_v55  ;;  %v20196_v55 = vld [vmem:[#allocation174_spill] sm:$0xff] }
 0xfb1   : > { %v5630_v15 = vadd.f32 %v5598_v57, %v5431_v46  ;;  %v20186_v46 = vld [vmem:[#allocation164_spill] sm:$0xff] }
 0xfb2   : > { %v17287_v6 = vadd.f32 %v17282_v9, %v5631_v62 }
 0xfb3   : > { %v17292_v0 = vadd.f32 %v17282_v9, %v5630_v15  ;;  %v12230_v32 = vpop.f32.mrb[72].mxu0  ;;  %v5608_v15 = vmul.f32 %v17277_v40, %v20186_v46 }
 0xfb4   : > { %v5703_v63 = vsub.f32 0.0, %v17287_v6  ;;  %v5633_v29 = vadd.f32 %v12230_v32, %v5601_v37  ;;  %v5441_v49 = vpop.f32.mrb[73].mxu0  ;;  %v20187_v37 = vld [vmem:[#allocation165_spill] sm:$0xff] }
 0xfb5   : > { %v5702_v41 = vsub.f32 0.0, %v17292_v0  ;;  %v5632_v38 = vadd.f32 %v5600_v44, %v5441_v49  ;;  %v5611_v32 = vmul.f32 %v17277_v40, %v20187_v37  ;;  %v20188_v49 = vld [vmem:[#allocation166_spill] sm:$0xff] }
 0xfb6   : > { %v5736_v27 = vmul.f32 1.442695, %v5703_v63  ;;  %v17299_v34 = vadd.f32 %v17282_v9, %v5633_v29 }
 0xfb7   : > { %v5734_v45 = vmul.f32 1.442695, %v5702_v41  ;;  %v17304_v28 = vadd.f32 %v17282_v9, %v5632_v38  ;;  %v12233_v53 = vpop.f32.mrb[74].mxu0  ;;  %v5610_v41 = vmul.f32 %v17277_v40, %v20188_v49 }
 0xfb8   : > { %13643 = vpow2.f32 %v5736_v27  ;;  %v5705_v7 = vsub.f32 0.0, %v17299_v34  ;;  %v5635_v61 = vadd.f32 %v12233_v53, %v5603_v42  ;;  %v5451_v8 = vpop.f32.mrb[75].mxu0  ;;  %v20189_v42 = vld [vmem:[#allocation167_spill] sm:$0xff] }
 0xfb9   : > { %13645 = vpow2.f32 %v5734_v45  ;;  %v5704_v5 = vsub.f32 0.0, %v17304_v28  ;;  %v5634_v26 = vadd.f32 %v5602_v2, %v5451_v8  ;;  %v17336_v45 = vmul.f32 %v17277_v40, %v20189_v42  ;;  %v20195_v42 = vld [vmem:[#allocation173_spill] sm:$0xff] }
 0xfba   : > { %v5740_v43 = vmul.f32 1.442695, %v5705_v7  ;;  %v17317_v19 = vadd.f32 %v17282_v9, %v5635_v61  ;;  %v20190_v7 = vld [vmem:[#allocation168_spill] sm:$0xff] }
 0xfbb   : > { %v5738_v1 = vmul.f32 1.442695, %v5704_v5  ;;  %v17324_v57 = vadd.f32 %v17282_v9, %v5634_v26  ;;  %v12236_v62 = vpop.f32.mrb[76].mxu0  ;;  %v17343_v61 = vmul.f32 %v17277_v40, %v20190_v7 }
 0xfbc   : > { %13647 = vpow2.f32 %v5740_v43  ;;  %v5707_v44 = vsub.f32 0.0, %v17317_v19  ;;  %v5637_v63 = vadd.f32 %v12236_v62, %v5605_v4  ;;  %v5461_v29 = vpop.f32.mrb[77].mxu0  ;;  %v20191_v4 = vld [vmem:[#allocation169_spill] sm:$0xff]  ;;  %v20192_v43 = vld [vmem:[#allocation170_spill] sm:$0xff]  ;;  %v20193_v62 = vld [vmem:[#allocation171_spill] sm:$0xff] }
 0xfbd   : > { %13649 = vpow2.f32 %v5738_v1  ;;  %v5706_v38 = vsub.f32 0.0, %v17324_v57  ;;  %v5636_v27 = vadd.f32 %v5604_v56, %v5461_v29  ;;  %v17347_v8 = vmul.f32 %v17277_v40, %v20191_v4  ;;  %v20194_v4 = vld [vmem:[#allocation172_spill] sm:$0xff] }
 0xfbe   : > { %v5744_v53 = vmul.f32 1.442695, %v5707_v44  ;;  %v17339_v2 = vadd.f32 %v17282_v9, %v5637_v63  ;;  %v17354_v1 = vmul.f32 %v17277_v40, %v20192_v43  ;;  %v17358_v44 = vmul.f32 %v17277_v40, %v20193_v62 }
 0xfbf   : > { %v5742_v5 = vmul.f32 1.442695, %v5706_v38  ;;  %v17350_v26 = vadd.f32 %v17282_v9, %v5636_v27  ;;  %v12239_v56 = vpop.f32.mrb[78].mxu0  ;;  %v17363_v38 = vmul.f32 %v17277_v40, %v20194_v4  ;;  %v17368_v43 = vmul.f32 %v17277_v40, %v20195_v42 }
 0xfc0   : > { %13651 = vpow2.f32 %v5744_v53  ;;  %v5709_v63 = vsub.f32 0.0, %v17339_v2  ;;  %v5639_v29 = vadd.f32 %v12239_v56, %v5607_v59  ;;  %v5471_v37 = vpop.f32.mrb[79].mxu0  ;;  %v17375_v59 = vmul.f32 %v17277_v40, %v20196_v55  ;;  %v20197_v56 = vld [vmem:[#allocation175_spill] sm:$0xff] }
 0xfc1   : > { %13653 = vpow2.f32 %v5742_v5  ;;  %v5708_v27 = vsub.f32 0.0, %v17350_v26  ;;  %v5638_v7 = vadd.f32 %v5606_v36, %v5471_v37  ;;  %v17379_v4 = vmul.f32 %v17277_v40, %v20197_v56 }
 0xfc2   : > { %v13644_v49 = vpop.eup %13643  ;;  %v5748_v62 = vmul.f32 1.442695, %v5709_v63  ;;  %v17371_v53 = vadd.f32 %v17282_v9, %v5639_v29  ;;  %v17386_v63 = vmul.f32 %v17277_v40, %v20198_v10 }
 0xfc3   : > { %v13646_v5 = vpop.eup %13645  ;;  %v5799_v46 = vadd.f32 1.0, %v13644_v49  ;;  %v5746_v36 = vmul.f32 1.442695, %v5708_v27  ;;  %v17382_v37 = vadd.f32 %v17282_v9, %v5638_v7  ;;  %v12242_v42 = vpop.f32.mrb[80].mxu0  ;;  %v20199_v49 = vld [vmem:[#allocation177_spill] sm:$0xff] }
 0xfc4   : > { %v5798_v29 = vadd.f32 1.0, %v13646_v5  ;;  %13655 = vpow2.f32 %v5748_v62  ;;  %v5711_v55 = vsub.f32 0.0, %v17371_v53  ;;  %v5641_v31 = vadd.f32 %v12242_v42, %v5609_v11  ;;  %v5481_v3 = vpop.f32.mrb[81].mxu0  ;;  %v20200_v5 = vld [vmem:[#allocation178_spill] sm:$0xff] }
 0xfc5   : > { %13657 = vrcp.f32 %v5799_v46  ;;  %v5710_v56 = vsub.f32 0.0, %v17382_v37  ;;  %v5640_v39 = vadd.f32 %v5608_v15, %v5481_v3  ;;  %v17392_v27 = vmul.f32 %v17277_v40, %v20199_v49 }
 0xfc6   : > { %v13648_v7 = vpop.eup %13647  ;;  %13659 = vrcp.f32 %v5798_v29  ;;  %v5752_v50 = vmul.f32 1.442695, %v5711_v55  ;;  %v17395_v10 = vadd.f32 %v17282_v9, %v5641_v31  ;;  %v17399_v62 = vmul.f32 %v17277_v40, %v20200_v5  ;;  %v20201_v5 = vld [vmem:[#allocation179_spill] sm:$0xff] }
 0xfc7   : > { %v13650_v11 = vpop.eup %13649  ;;  %v5801_v42 = vadd.f32 1.0, %v13648_v7  ;;  %13661 = vpow2.f32 %v5746_v36  ;;  %v5750_v46 = vmul.f32 1.442695, %v5710_v56  ;;  %v17402_v3 = vadd.f32 %v17282_v9, %v5640_v39  ;;  %v12245_v15 = vpop.f32.mrb[82].mxu0  ;;  %v20202_v7 = vld [vmem:[#allocation180_spill] sm:$0xff] }
 0xfc8   : > { %v5800_v49 = vadd.f32 1.0, %v13650_v11  ;;  %13663 = vpow2.f32 %v5752_v50  ;;  %v5713_v29 = vsub.f32 0.0, %v17395_v10  ;;  %v5643_v55 = vadd.f32 %v12245_v15, %v5611_v32  ;;  %v5491_v47 = vpop.f32.mrb[83].mxu0 }
 0xfc9   : > { %13665 = vrcp.f32 %v5801_v42  ;;  %v5712_v31 = vsub.f32 0.0, %v17402_v3  ;;  %v5642_v52 = vadd.f32 %v5610_v41, %v5491_v47  ;;  %v17408_v21 = vmul.f32 %v17277_v40, %v20201_v5 }
 0xfca   : > { %v13652_v36 = vpop.eup %13651  ;;  %13667 = vrcp.f32 %v5800_v49  ;;  %v5756_v56 = vmul.f32 1.442695, %v5713_v29  ;;  %v17411_v39 = vadd.f32 %v17282_v9, %v5643_v55  ;;  %v17415_v50 = vmul.f32 %v17277_v40, %v20202_v7 }
 0xfcb   : > { %v13654_v32 = vpop.eup %13653  ;;  %v5803_v11 = vadd.f32 1.0, %v13652_v36  ;;  %13669 = vpow2.f32 %v5750_v46  ;;  %v5754_v42 = vmul.f32 1.442695, %v5712_v31  ;;  %v17418_v47 = vadd.f32 %v17282_v9, %v5642_v52  ;;  %v12248_v41 = vpop.f32.mrb[84].mxu0 }
 0xfcc   : > { %v5802_v15 = vadd.f32 1.0, %v13654_v32  ;;  %13671 = vpow2.f32 %v5756_v56  ;;  %v5715_v49 = vsub.f32 0.0, %v17411_v39  ;;  %v5645_v29 = vadd.f32 %v12248_v41, %v17336_v45  ;;  %v5501_v55 = vpop.f32.mrb[85].mxu0  ;;  %v20204_v56 = vld [vmem:[#allocation182_spill] sm:$0xff] }
 0xfcd   : > { %13673 = vrcp.f32 %v5803_v11  ;;  %v5714_v5 = vsub.f32 0.0, %v17418_v47  ;;  %v5644_v7 = vadd.f32 %v17343_v61, %v5501_v55  ;;  %v17426_v46 = vmul.f32 %v17277_v40, %v20203_v58 }
 0xfce   : > { %v13656_v31 = vpop.eup %13655  ;;  %13675 = vrcp.f32 %v5802_v15  ;;  %v5760_v52 = vmul.f32 1.442695, %v5715_v49  ;;  %v17429_v36 = vadd.f32 %v17282_v9, %v5645_v29  ;;  %v17433_v32 = vmul.f32 %v17277_v40, %v20204_v56 }
 0xfcf   : > { %v13658_v45 = vpop.eup %13657  ;;  %v5805_v11 = vadd.f32 1.0, %v13656_v31  ;;  %13677 = vpow2.f32 %v5754_v42  ;;  %v5758_v41 = vmul.f32 1.442695, %v5714_v5  ;;  %v17436_v61 = vadd.f32 %v17282_v9, %v5644_v7  ;;  %v12251_v55 = vpop.f32.mrb[86].mxu0 }
 0xfd0   : > { %v13660_v58 = vpop.eup %13659  ;;  %v5895_v33 = vmul.f32 %v13658_v45, %v17287_v6  ;;  %13679 = vpow2.f32 %v5760_v52  ;;  %v5717_v15 = vsub.f32 0.0, %v17429_v36  ;;  %v5647_v49 = vadd.f32 %v12251_v55, %v17347_v8  ;;  %v5511_v29 = vpop.f32.mrb[87].mxu0 }
 0xfd1   : > { %v13662_v23 = vpop.eup %13661  ;;  %v5894_v56 = vmul.f32 %v13660_v58, %v17292_v0  ;;  %13681 = vrcp.f32 %v5805_v11  ;;  %v5716_v42 = vsub.f32 0.0, %v17436_v61  ;;  %v5646_v5 = vadd.f32 %v17354_v1, %v5511_v29  ;;  %v20205_v58 = vld [vmem:[#allocation183_spill] sm:$0xff] }
 0xfd2   : > { %v13664_v7 = vpop.eup %13663  ;;  %v5804_v31 = vadd.f32 1.0, %v13662_v23  ;;  %13683 = vpow2.f32 %v5758_v41  ;;  %v5764_v48 = vmul.f32 1.442695, %v5717_v15  ;;  %v17445_v6 = vadd.f32 %v17282_v9, %v5647_v49 }
 0xfd3   : > { %v13666_v52 = vpop.eup %13665  ;;  %v5807_v45 = vadd.f32 1.0, %v13664_v7  ;;  %v5762_v17 = vmul.f32 1.442695, %v5716_v42  ;;  %v17448_v8 = vadd.f32 %v17282_v9, %v5646_v5  ;;  %v12254_v55 = vpop.f32.mrb[88].mxu0  ;;  %12281 = vmatprep.mubr.msk.f32.mxu1 %vm1902_vm1, %v5894_v56  ;;  %v17453_v0 = vmul.f32 %v17277_v40, %v20205_v58  ;;  %v20219_v58 = vld [vmem:[#allocation94_spill] sm:$0xff] }
 0xfd4   : > { %v13668_v1 = vpop.eup %13667  ;;  %v5897_v23 = vmul.f32 %v13666_v52, %v17299_v34  ;;  %13685 = vrcp.f32 %v5804_v31  ;;  %v5719_v11 = vsub.f32 0.0, %v17445_v6  ;;  %v5649_v41 = vadd.f32 %v12254_v55, %v17358_v44  ;;  %v5521_v15 = vpop.f32.mrb[89].mxu0  ;;  %12282 = vmatmul.mubr.msk.f32.vlgmr.msra.gmra.mrb[82].mxu1 %vm1902_vm1, %v5895_v33 }
 0xfd5   : > { %v13670_v49 = vpop.eup %13669  ;;  %v5896_v29 = vmul.f32 %v13668_v1, %v17304_v28  ;;  %13687 = vrcp.f32 %v5807_v45  ;;  %v5718_v56 = vsub.f32 0.0, %v17448_v8  ;;  %v5648_v42 = vadd.f32 %v17363_v38, %v5521_v15 }
 0xfd6   : > { %v13672_v5 = vpop.eup %13671  ;;  %v5806_v7 = vadd.f32 1.0, %v13670_v49  ;;  %13689 = vpow2.f32 %v5764_v48  ;;  %v5768_v34 = vmul.f32 1.442695, %v5719_v11  ;;  %v17463_v31 = vadd.f32 %v17282_v9, %v5649_v41 }
 0xfd7   : > { %v13674_v52 = vpop.eup %13673  ;;  %v5809_v44 = vadd.f32 1.0, %v13672_v5  ;;  %13691 = vpow2.f32 %v5762_v17  ;;  %v5766_v55 = vmul.f32 1.442695, %v5718_v56  ;;  %v17466_v33 = vadd.f32 %v17282_v9, %v5648_v42  ;;  %v12257_v28 = vpop.f32.mrb[90].mxu0  ;;  %12284 = vmatprep.mubr.msk.f32.mxu1 %vm1902_vm1, %v5896_v29 }
 0xfd8   : > { %v13676_v45 = vpop.eup %13675  ;;  %v5899_v38 = vmul.f32 %v13674_v52, %v17317_v19  ;;  %13693 = vrcp.f32 %v5806_v7  ;;  %v5721_v48 = vsub.f32 0.0, %v17463_v31  ;;  %v5651_v1 = vadd.f32 %v12257_v28, %v17368_v43  ;;  %v5531_v11 = vpop.f32.mrb[91].mxu0  ;;  %12285 = vmatmul.mubr.msk.f32.gmra.mrb[84].mxu1 %vm1902_vm1, %v5897_v23 }
 0xfd9   : > { %v13678_v41 = vpop.eup %13677  ;;  %v5898_v17 = vmul.f32 %v13676_v45, %v17324_v57  ;;  %13695 = vrcp.f32 %v5809_v44  ;;  %v5720_v15 = vsub.f32 0.0, %v17466_v33  ;;  %v5650_v49 = vadd.f32 %v17375_v59, %v5531_v11  ;;  %v20206_v57 = vld [vmem:[#allocation184_spill] sm:$0xff] }
 0xfda   : > { %v13680_v29 = vpop.eup %13679  ;;  %v5808_v56 = vadd.f32 1.0, %v13678_v41  ;;  %13697 = vpow2.f32 %v5768_v34  ;;  %v5772_v19 = vmul.f32 1.442695, %v5721_v48  ;;  %v17477_v42 = vadd.f32 %v17282_v9, %v5651_v1 }
 0xfdb   : > { %v13682_v5 = vpop.eup %13681  ;;  %v5811_v43 = vadd.f32 1.0, %v13680_v29  ;;  %13699 = vpow2.f32 %v5766_v55  ;;  %v17480_v23 = vadd.f32 %v17282_v9, %v5650_v49  ;;  %v12260_v7 = vpop.f32.mrb[92].mxu0  ;;  %12287 = vmatprep.mubr.msk.f32.mxu1 %vm1902_vm1, %v5898_v17  ;;  %v17485_v52 = vmul.f32 %v17277_v40, %v20206_v57 }
 0xfdc   : > { %v13684_v59 = vpop.eup %13683  ;;  %13701 = vrcp.f32 %v5808_v56  ;;  %v5770_v34 = vmul.f32 1.442695, %v5720_v15  ;;  %v5723_v44 = vsub.f32 0.0, %v17477_v42  ;;  %v5653_v28 = vadd.f32 %v12260_v7, %v17379_v4  ;;  %v5541_v45 = vpop.f32.mrb[93].mxu0  ;;  %12288 = vmatmul.mubr.msk.f32.gmra.mrb[86].mxu1 %vm1902_vm1, %v5899_v38 }
 0xfdd   : > { %13703 = vrcp.f32 %v5811_v43  ;;  %v5810_v55 = vadd.f32 1.0, %v13684_v59  ;;  %v5722_v48 = vsub.f32 0.0, %v17480_v23  ;;  %v5652_v1 = vadd.f32 %v17386_v63, %v5541_v45 }
 0xfde   : > { %v13686_v11 = vpop.eup %13685  ;;  %v5901_v40 = vmul.f32 %v13682_v5, %v17339_v2  ;;  %13705 = vpow2.f32 %v5772_v19  ;;  %v5776_v41 = vmul.f32 1.442695, %v5723_v44  ;;  %v17494_v17 = vadd.f32 %v17282_v9, %v5653_v28 }
 0xfdf   : > { %v13688_v15 = vpop.eup %13687  ;;  %v5900_v4 = vmul.f32 %v13686_v11, %v17350_v26  ;;  %13707 = vrcp.f32 %v5810_v55  ;;  %v5774_v49 = vmul.f32 1.442695, %v5722_v48  ;;  %v17498_v38 = vadd.f32 %v17282_v9, %v5652_v1  ;;  %v12263_v29 = vpop.f32.mrb[94].mxu0 }
 0xfe0   : > { %v13690_v56 = vpop.eup %13689  ;;  %v5903_v63 = vmul.f32 %v13688_v15, %v17371_v53  ;;  %13709 = vpow2.f32 %v5770_v34  ;;  %v5725_v2 = vsub.f32 0.0, %v17494_v17  ;;  %v5655_v19 = vadd.f32 %v12263_v29, %v17392_v27  ;;  %v5551_v5 = vpop.f32.mrb[95].mxu0 }
 0xfe1   : > { %v13692_v43 = vpop.eup %13691  ;;  %v5813_v7 = vadd.f32 1.0, %v13690_v56  ;;  %13711 = vpow2.f32 %v5776_v41  ;;  %v5724_v26 = vsub.f32 0.0, %v17498_v38  ;;  %12290 = vmatprep.mubr.msk.f32.mxu1 %vm1902_vm1, %v5900_v4  ;;  %v5654_v59 = vadd.f32 %v17399_v62, %v5551_v5 }
 0xfe2   : > { %v13694_v44 = vpop.eup %13693  ;;  %v5812_v28 = vadd.f32 1.0, %v13692_v43  ;;  %13713 = vpow2.f32 %v5774_v49  ;;  %v5780_v45 = vmul.f32 1.442695, %v5725_v2  ;;  %v17507_v53 = vadd.f32 %v17282_v9, %v5655_v19  ;;  %12291 = vmatmul.mubr.msk.f32.gmra.mrb[88].mxu1 %vm1902_vm1, %v5901_v40 }
 0xfe3   : > { %v13696_v27 = vpop.eup %13695  ;;  %v5902_v34 = vmul.f32 %v13694_v44, %v17382_v37  ;;  %13715 = vrcp.f32 %v5813_v7  ;;  %v5778_v55 = vmul.f32 1.442695, %v5724_v26  ;;  %v17512_v48 = vadd.f32 %v17282_v9, %v5654_v59  ;;  %v12266_v1 = vpop.f32.mrb[96].mxu0 }
 0xfe4   : > { %v13698_v11 = vpop.eup %13697  ;;  %v5905_v62 = vmul.f32 %v13696_v27, %v17395_v10  ;;  %13717 = vrcp.f32 %v5812_v28  ;;  %v5727_v41 = vsub.f32 0.0, %v17507_v53  ;;  %v5657_v15 = vadd.f32 %v12266_v1, %v17408_v21  ;;  %v5561_v4 = vpop.f32.mrb[97].mxu0 }
 0xfe5   : > { %v13700_v49 = vpop.eup %13699  ;;  %v5815_v40 = vadd.f32 1.0, %v13698_v11  ;;  %13719 = vpow2.f32 %v5780_v45  ;;  %v5726_v37 = vsub.f32 0.0, %v17512_v48  ;;  %12293 = vmatprep.mubr.msk.f32.mxu1 %vm1902_vm1, %v5902_v34  ;;  %v5656_v29 = vadd.f32 %v17415_v50, %v5561_v4 }
 0xfe6   : > { %v13702_v56 = vpop.eup %13701  ;;  %v5814_v2 = vadd.f32 1.0, %v13700_v49  ;;  %13721 = vpow2.f32 %v5778_v55  ;;  %v5784_v19 = vmul.f32 1.442695, %v5727_v41  ;;  %v17521_v10 = vadd.f32 %v17282_v9, %v5657_v15  ;;  %12294 = vmatmul.mubr.msk.f32.gmra.mrb[90].mxu1 %vm1902_vm1, %v5903_v63 }
 0xfe7   : > { %v13704_v21 = vpop.eup %13703  ;;  %v5904_v5 = vmul.f32 %v13702_v56, %v17402_v3  ;;  %13723 = vrcp.f32 %v5815_v40  ;;  %v5782_v43 = vmul.f32 1.442695, %v5726_v37  ;;  %v17526_v7 = vadd.f32 %v17282_v9, %v5656_v29  ;;  %v12269_v26 = vpop.f32.mrb[98].mxu0 }
 0xfe8   : > { %v13706_v59 = vpop.eup %13705  ;;  %v5907_v50 = vmul.f32 %v13704_v21, %v17411_v39  ;;  %13725 = vrcp.f32 %v5814_v2  ;;  %v5729_v44 = vsub.f32 0.0, %v17521_v10  ;;  %v5659_v28 = vadd.f32 %v12269_v26, %v17426_v46  ;;  %v5571_v45 = vpop.f32.mrb[99].mxu0 }
 0xfe9   : > { %v13708_v27 = vpop.eup %13707  ;;  %v5817_v63 = vadd.f32 1.0, %v13706_v59  ;;  %13727 = vpow2.f32 %v5784_v19  ;;  %v5728_v3 = vsub.f32 0.0, %v17526_v7  ;;  %12296 = vmatprep.mubr.msk.f32.mxu1 %vm1902_vm1, %v5904_v5  ;;  %v5658_v34 = vadd.f32 %v17433_v32, %v5571_v45 }
 0xfea   : > { %v13710_v55 = vpop.eup %13709  ;;  %v5906_v1 = vmul.f32 %v13708_v27, %v17418_v47  ;;  %13729 = vpow2.f32 %v5782_v43  ;;  %v5788_v39 = vmul.f32 1.442695, %v5729_v44  ;;  %v17536_v11 = vadd.f32 %v17282_v9, %v5659_v28  ;;  %12297 = vmatmul.mubr.msk.f32.gmra.mrb[92].mxu1 %vm1902_vm1, %v5905_v62 }
 0xfeb   : > { %v13712_v46 = vpop.eup %13711  ;;  %13731 = vrcp.f32 %v5817_v63  ;;  %v5816_v41 = vadd.f32 1.0, %v13710_v55  ;;  %v5786_v15 = vmul.f32 1.442695, %v5728_v3  ;;  %v17540_v4 = vadd.f32 %v17282_v9, %v5658_v34  ;;  %v12272_v49 = vpop.f32.mrb[100].mxu0 }
 0xfec   : > { %v13714_v40 = vpop.eup %13713  ;;  %v5819_v32 = vadd.f32 1.0, %v13712_v46  ;;  %13733 = vpow2.f32 %v5788_v39  ;;  %v5731_v47 = vsub.f32 0.0, %v17536_v11  ;;  %v5661_v37 = vadd.f32 %v12272_v49, %v17453_v0  ;;  %12299 = vmatprep.mubr.msk.f32.mxu1 %vm1902_vm1, %v5906_v1  ;;  %v5581_v29 = vpop.f32.mrb[101].mxu0 }
 0xfed   : > { %v13716_v56 = vpop.eup %13715  ;;  %13735 = vrcp.f32 %v5816_v41  ;;  %v5818_v62 = vadd.f32 1.0, %v13714_v40  ;;  %v5730_v2 = vsub.f32 0.0, %v17540_v4  ;;  %v5660_v19 = vadd.f32 %v17485_v52, %v5581_v29 }
 0xfee   : > { %v13718_v21 = vpop.eup %13717  ;;  %13737 = vrcp.f32 %v5819_v32  ;;  %v5792_v5 = vmul.f32 1.442695, %v5731_v47  ;;  %v17548_v43 = vadd.f32 %v17282_v9, %v5661_v37  ;;  %12300 = vmatmul.mubr.msk.f32.gmra.mrb[94].mxu1 %vm1902_vm1, %v5907_v50  ;;  %v5909_v0 = vmul.f32 %v13716_v56, %v17429_v36 }
 0xfef   : > { %v13720_v26 = vpop.eup %13719  ;;  %v5908_v59 = vmul.f32 %v13718_v21, %v17436_v61  ;;  %13739 = vrcp.f32 %v5818_v62  ;;  %v17554_v44 = vadd.f32 %v17282_v9, %v5660_v19  ;;  %v5790_v52 = vmul.f32 1.442695, %v5730_v2 }
 0xff0   : > { %v13722_v28 = vpop.eup %13721  ;;  %v5821_v45 = vadd.f32 1.0, %v13720_v26  ;;  %13741 = vpow2.f32 %v5786_v15  ;;  %v5733_v27 = vsub.f32 0.0, %v17548_v43 }
 0xff1   : > { %v13724_v63 = vpop.eup %13723  ;;  %v5820_v3 = vadd.f32 1.0, %v13722_v28  ;;  %13743 = vpow2.f32 %v5792_v5  ;;  %v5732_v50 = vsub.f32 0.0, %v17554_v44  ;;  %12302 = vmatprep.mubr.msk.f32.mxu1 %vm1902_vm1, %v5908_v59 }
 0xff2   : > { %v13726_v36 = vpop.eup %13725  ;;  %13745 = vrcp.f32 %v5821_v45  ;;  %v5796_v61 = vmul.f32 1.442695, %v5733_v27  ;;  %12303 = vmatmul.mubr.msk.f32.gmra.mrb[96].mxu1 %vm1902_vm1, %v5909_v0  ;;  %v5911_v1 = vmul.f32 %v13724_v63, %v17445_v6 }
 0xff3   : > { %v13728_v9 = vpop.eup %13727  ;;  %v5910_v34 = vmul.f32 %v13726_v36, %v17448_v8  ;;  %13747 = vrcp.f32 %v5820_v3  ;;  %v5794_v46 = vmul.f32 1.442695, %v5732_v50 }
 0xff4   : > { %v13730_v55 = vpop.eup %13729  ;;  %v5823_v39 = vadd.f32 1.0, %v13728_v9  ;;  %13749 = vpow2.f32 %v5790_v52 }
 0xff5   : > { %v13732_v41 = vpop.eup %13731  ;;  %v5822_v15 = vadd.f32 1.0, %v13730_v55  ;;  %13751 = vpow2.f32 %v5796_v61  ;;  %12305 = vmatprep.mubr.msk.f32.mxu1 %vm1902_vm1, %v5910_v34 }
 0xff6   : > { %v13734_v49 = vpop.eup %13733  ;;  %13753 = vrcp.f32 %v5823_v39  ;;  %12306 = vmatmul.mubr.msk.f32.gmra.mrb[98].mxu1 %vm1902_vm1, %v5911_v1  ;;  %v5913_v37 = vmul.f32 %v13732_v41, %v17463_v31  ;;  %v10832_v1 = vld [vmem:[%s20207_s28 + $0x20] sm:$0xff]  ;;  %s1143_s28 = sand.u32 1, %s15033_s1  }
 0xff7   : > { %v13736_v40 = vpop.eup %13735  ;;  %13755 = vrcp.f32 %v5822_v15  ;;  %v5825_v47 = vadd.f32 1.0, %v13734_v49  ;;  %v17597_v15 = vld [vmem:[%s20136_s10 + $0x1] ss:$0 sm:$0xff] }
 0xff8   : > { %v13738_v32 = vpop.eup %13737  ;;  %v5912_v8 = vmul.f32 %v13736_v40, %v17466_v33  ;;  %13757 = vpow2.f32 %v5794_v46  ;;  %v10835_v46 = vld [vmem:[%s20208_s8 + $0x38] sm:$0xff] }
 0xff9   : > { %v13740_v6 = vpop.eup %13739  ;;  %13759 = vrcp.f32 %v5825_v47  ;;  %v5915_v5 = vmul.f32 %v13738_v32, %v17477_v42 }
 0xffa   : > { %v13742_v29 = vpop.eup %13741  ;;  %v5914_v56 = vmul.f32 %v13740_v6, %v17480_v23  ;;  %12308 = vmatprep.mubr.msk.f32.mxu1 %vm1902_vm1, %v5912_v8 }
 0xffb   : > { %v13744_v62 = vpop.eup %13743  ;;  %v5824_v2 = vadd.f32 1.0, %v13742_v29  ;;  %12309 = vmatmul.mubr.msk.f32.gmra.mrb[100].mxu1 %vm1902_vm1, %v5913_v37 }
 0xffc   : > { %v13746_v19 = vpop.eup %13745  ;;  %v5827_v21 = vadd.f32 1.0, %v13744_v62  ;;  %12311 = vmatprep.mubr.msk.f32.mxu1 %vm1902_vm1, %v5914_v56 }
 0xffd   : > { %v13748_v33 = vpop.eup %13747  ;;  %13761 = vrcp.f32 %v5824_v2  ;;  %v5917_v52 = vmul.f32 %v13746_v19, %v17494_v17 }
 0xffe   : > { %v13750_v26 = vpop.eup %13749  ;;  %v5916_v31 = vmul.f32 %v13748_v33, %v17498_v38  ;;  %13763 = vrcp.f32 %v5827_v21 }
 0xfff   : > { %v13752_v0 = vpop.eup %13751  ;;  %v5826_v23 = vadd.f32 1.0, %v13750_v26  ;;  %12312 = vmatmul.mubr.msk.f32.gmra.mrb[102].mxu1 %vm1902_vm1, %v5915_v5 }
0x1000   : > { %v13754_v59 = vpop.eup %13753  ;;  %v5829_v28 = vadd.f32 1.0, %v13752_v0  ;;  %12314 = vmatprep.mubr.msk.f32.mxu1 %vm1902_vm1, %v5916_v31 }
0x1001   : > { %v13756_v45 = vpop.eup %13755  ;;  %13765 = vrcp.f32 %v5826_v23  ;;  %v5919_v38 = vmul.f32 %v13754_v59, %v17507_v53 }
0x1002   : > { %v13758_v27 = vpop.eup %13757  ;;  %v5918_v42 = vmul.f32 %v13756_v45, %v17512_v48  ;;  %13767 = vrcp.f32 %v5829_v28 }
0x1003   : > { %v5828_v63 = vadd.f32 1.0, %v13758_v27  ;;  %12315 = vmatmul.mubr.msk.f32.gmra.mrb[104].mxu1 %vm1902_vm1, %v5917_v52  ;;  %v13760_v3 = vpop.eup %13759 }
0x1004   : > { %12317 = vmatprep.mubr.msk.f32.mxu1 %vm1902_vm1, %v5918_v42  ;;  %v5921_v17 = vmul.f32 %v13760_v3, %v17521_v10 }
0x1005   : > { %13769 = vrcp.f32 %v5828_v63 }
0x1007   : > { %v13762_v50 = vpop.eup %13761  ;;  %12318 = vmatmul.mubr.msk.f32.gmra.mrb[106].mxu1 %vm1902_vm1, %v5919_v38 }
0x1008   : > { %v5920_v36 = vmul.f32 %v13762_v50, %v17526_v7  ;;  %v13764_v48 = vpop.eup %13763 }
0x1009   : > { %v5923_v9 = vmul.f32 %v13764_v48, %v17536_v11  ;;  %v10834_v11 = vld [vmem:[%s20208_s8 + $0x30] sm:$0xff] }
0x100a   : > { %12320 = vmatprep.mubr.msk.f32.mxu1 %vm1902_vm1, %v5920_v36  ;;  %v12872_v41 = vpack.c.bf16 %v10835_v46, %v10834_v11 }
0x100b   : > { %v13766_v61 = vpop.eup %13765  ;;  %12321 = vmatmul.mubr.msk.f32.gmra.mrb[108].mxu1 %vm1902_vm1, %v5921_v17 }
0x100c   : > { %v5922_v53 = vmul.f32 %v13766_v61, %v17540_v4  ;;  %v13768_v34 = vpop.eup %13767  ;;  %v10833_v4 = vld [vmem:[%s20208_s8 + $0x28] sm:$0xff]  ;;  %s19582_s8 = scalar_lea.sflag [#allocation4], %s1143_s28 }
0x100d   : > { %v5925_v55 = vmul.f32 %v13768_v34, %v17548_v43  ;;  %v12868_v39 = vpack.c.bf16 %v10833_v4, %v10832_v1 }
0x100e   : > { %12323 = vmatprep.mubr.msk.f32.mxu1 %vm1902_vm1, %v5922_v53 }
0x100f   : > { %v13770_v7 = vpop.eup %13769  ;;  %12324 = vmatmul.mubr.msk.f32.gmra.mrb[110].mxu1 %vm1902_vm1, %v5923_v9  ;;  %12869 = vmatprep.subr.bf16.mxu1 %v12868_v39 }
0x1010   : > { %v5924_v10 = vmul.f32 %v13770_v7, %v17554_v44  ;;  %12871 = vmatpush3.bf16.msra.mxu1 %v12868_v39 }
0x1011   : > { %12873 = vmatprep.subr.bf16.mxu1 %v12872_v41 }
0x1012   : > { %12326 = vmatprep.mubr.msk.f32.mxu1 %vm1902_vm1, %v5924_v10 }
0x1013   : > { %12327 = vmatmul.mubr.msk.f32.gmra.mrb[112].mxu1 %vm1902_vm1, %v5925_v55 }
0x1014   : > { %12875 = vmatpush3.bf16.msra.mxu1 %v12872_v41 }
0x10a7   : > { %v12283_v49 = vpop.f32.mrb[82].mxu1 }
0x10a8   : > { %v17600_v44 = vadd.f32 %v12283_v49, %v17597_v15  ;;  %v6101_v43 = vpop.f32.mrb[83].mxu1 }
0x10a9   : > { %v17603_v40 = vadd.f32 %v17597_v15, %v6101_v43 }
0x10aa   : > { %v6261_v32 = vsub.f32 0.0, %v17600_v44 }
0x10ab   : > { %v6260_v8 = vsub.f32 0.0, %v17603_v40  ;;  %v12286_v47 = vpop.f32.mrb[84].mxu1 }
0x10ac   : > { %v6294_v6 = vmul.f32 1.442695, %v6261_v32  ;;  %v17608_v37 = vadd.f32 %v12286_v47, %v17597_v15  ;;  %v6111_v29 = vpop.f32.mrb[85].mxu1 }
0x10ad   : > { %v6292_v56 = vmul.f32 1.442695, %v6260_v8  ;;  %v17611_v62 = vadd.f32 %v17597_v15, %v6111_v29 }
0x10ae   : > { %13771 = vpow2.f32 %v6294_v6  ;;  %v6263_v2 = vsub.f32 0.0, %v17608_v37 }
0x10af   : > { %13773 = vpow2.f32 %v6292_v56  ;;  %v6262_v19 = vsub.f32 0.0, %v17611_v62  ;;  %v12289_v21 = vpop.f32.mrb[86].mxu1 }
0x10b0   : > { %v6298_v33 = vmul.f32 1.442695, %v6263_v2  ;;  %v17616_v5 = vadd.f32 %v12289_v21, %v17597_v15  ;;  %v6121_v26 = vpop.f32.mrb[87].mxu1 }
0x10b1   : > { %v6296_v31 = vmul.f32 1.442695, %v6262_v19  ;;  %v17619_v0 = vadd.f32 %v17597_v15, %v6121_v26 }
0x10b2   : > { %13775 = vpow2.f32 %v6298_v33  ;;  %v6265_v23 = vsub.f32 0.0, %v17616_v5 }
0x10b3   : > { %13777 = vpow2.f32 %v6296_v31  ;;  %v6264_v59 = vsub.f32 0.0, %v17619_v0 }
0x10b4   : > { %v6302_v28 = vmul.f32 1.442695, %v6265_v23 }
0x10b5   : > { %v6300_v45 = vmul.f32 1.442695, %v6264_v59  ;;  %v12292_v52 = vpop.f32.mrb[88].mxu1 }
0x10b6   : > { %13779 = vpow2.f32 %v6302_v28  ;;  %v17624_v27 = vadd.f32 %v12292_v52, %v17597_v15  ;;  %v6131_v42 = vpop.f32.mrb[89].mxu1 }
0x10b7   : > { %13781 = vpow2.f32 %v6300_v45  ;;  %v17627_v63 = vadd.f32 %v17597_v15, %v6131_v42 }
0x10b8   : > { %v13772_v38 = vpop.eup %13771  ;;  %v6267_v3 = vsub.f32 0.0, %v17624_v27 }
0x10b9   : > { %v13774_v50 = vpop.eup %13773  ;;  %v6357_v36 = vadd.f32 1.0, %v13772_v38  ;;  %v6266_v17 = vsub.f32 0.0, %v17627_v63  ;;  %v12295_v48 = vpop.f32.mrb[90].mxu1 }
0x10ba   : > { %v6356_v61 = vadd.f32 1.0, %v13774_v50  ;;  %v6306_v53 = vmul.f32 1.442695, %v6267_v3  ;;  %v17632_v9 = vadd.f32 %v12295_v48, %v17597_v15  ;;  %v6141_v34 = vpop.f32.mrb[91].mxu1 }
0x10bb   : > { %13783 = vrcp.f32 %v6357_v36  ;;  %v6304_v7 = vmul.f32 1.442695, %v6266_v17  ;;  %v17635_v10 = vadd.f32 %v17597_v15, %v6141_v34 }
0x10bc   : > { %v13776_v55 = vpop.eup %13775  ;;  %13785 = vrcp.f32 %v6356_v61  ;;  %v6269_v1 = vsub.f32 0.0, %v17632_v9 }
0x10bd   : > { %v13778_v4 = vpop.eup %13777  ;;  %v6359_v39 = vadd.f32 1.0, %v13776_v55  ;;  %13787 = vpow2.f32 %v6306_v53  ;;  %v6268_v11 = vsub.f32 0.0, %v17635_v10  ;;  %v12298_v46 = vpop.f32.mrb[92].mxu1 }
0x10be   : > { %v6358_v41 = vadd.f32 1.0, %v13778_v4  ;;  %13789 = vpow2.f32 %v6304_v7  ;;  %v6310_v49 = vmul.f32 1.442695, %v6269_v1  ;;  %v17640_v43 = vadd.f32 %v12298_v46, %v17597_v15  ;;  %v6151_v32 = vpop.f32.mrb[93].mxu1  ;;  %v20209_v1 = vld [vmem:[#allocation83_spill] sm:$0xff]  ;;  %v20210_v46 = vld [vmem:[#allocation84_spill] sm:$0xff] }
0x10bf   : > { %13791 = vrcp.f32 %v6359_v39  ;;  %v6308_v8 = vmul.f32 1.442695, %v6268_v11  ;;  %v17643_v47 = vadd.f32 %v17597_v15, %v6151_v32 }
0x10c0   : > { %v13780_v6 = vpop.eup %13779  ;;  %13793 = vrcp.f32 %v6358_v41  ;;  %v6271_v29 = vsub.f32 0.0, %v17640_v43 }
0x10c1   : > { %v13782_v56 = vpop.eup %13781  ;;  %v6361_v2 = vadd.f32 1.0, %v13780_v6  ;;  %13795 = vpow2.f32 %v6310_v49  ;;  %v6270_v19 = vsub.f32 0.0, %v17643_v47  ;;  %v12301_v21 = vpop.f32.mrb[94].mxu1 }
0x10c2   : > { %v6360_v33 = vadd.f32 1.0, %v13782_v56  ;;  %13797 = vpow2.f32 %v6308_v8  ;;  %v6314_v26 = vmul.f32 1.442695, %v6271_v29  ;;  %v17648_v31 = vadd.f32 %v12301_v21, %v17597_v15  ;;  %v6161_v23 = vpop.f32.mrb[95].mxu1 }
0x10c3   : > { %13799 = vrcp.f32 %v6361_v2  ;;  %v6312_v59 = vmul.f32 1.442695, %v6270_v19  ;;  %v17651_v28 = vadd.f32 %v17597_v15, %v6161_v23 }
0x10c4   : > { %13801 = vrcp.f32 %v6360_v33  ;;  %v6273_v45 = vsub.f32 0.0, %v17648_v31 }
0x10c5   : > { %v13784_v52 = vpop.eup %13783  ;;  %13803 = vpow2.f32 %v6314_v26  ;;  %v6272_v42 = vsub.f32 0.0, %v17651_v28  ;;  %v12304_v38 = vpop.f32.mrb[96].mxu1 }
0x10c6   : > { %v13786_v3 = vpop.eup %13785  ;;  %v6453_v50 = vmul.f32 %v13784_v52, %v17600_v44  ;;  %13805 = vpow2.f32 %v6312_v59  ;;  %v6318_v36 = vmul.f32 1.442695, %v6273_v45  ;;  %v17657_v17 = vadd.f32 %v12304_v38, %v17597_v15  ;;  %v6171_v48 = vpop.f32.mrb[97].mxu1  ;;  %v20211_v59 = vld [vmem:[#allocation86_spill] sm:$0xff]  ;;  %v20212_v38 = vld [vmem:[#allocation85_spill] sm:$0xff] }
0x10c7   : > { %v13788_v61 = vpop.eup %13787  ;;  %v6452_v53 = vmul.f32 %v13786_v3, %v17603_v40  ;;  %v6316_v34 = vmul.f32 1.442695, %v6272_v42  ;;  %v17661_v7 = vadd.f32 %v17597_v15, %v6171_v48 }
0x10c8   : > { %v13790_v55 = vpop.eup %13789  ;;  %v17664_v4 = vmul.f32 %v6453_v50, %v20209_v1  ;;  %v6363_v39 = vadd.f32 1.0, %v13788_v61  ;;  %13807 = vpow2.f32 %v6318_v36  ;;  %v6275_v44 = vsub.f32 0.0, %v17657_v17 }
0x10c9   : > { %v13792_v11 = vpop.eup %13791  ;;  %v17668_v41 = vmul.f32 %v6452_v53, %v20210_v46  ;;  %v6362_v49 = vadd.f32 1.0, %v13790_v55  ;;  %13809 = vpow2.f32 %v6316_v34  ;;  %v6274_v40 = vsub.f32 0.0, %v17661_v7  ;;  %v12307_v32 = vpop.f32.mrb[98].mxu1  ;;  %12337 = vmatprep.mubr.msk.f32.mxu1 %vm1902_vm1, %v6452_v53 }
0x10ca   : > { %v13794_v8 = vpop.eup %13793  ;;  %v6455_v6 = vmul.f32 %v13792_v11, %v17608_v37  ;;  %13811 = vrcp.f32 %v6363_v39  ;;  %v6322_v29 = vmul.f32 1.442695, %v6275_v44  ;;  %v17674_v56 = vadd.f32 %v12307_v32, %v17597_v15  ;;  %v6181_v2 = vpop.f32.mrb[99].mxu1  ;;  %12338 = vmatmul.mubr.msk.f32.vlgmr.msra.gmra.mrb[114].mxu1 %vm1902_vm1, %v6453_v50 }
0x10cb   : > { %v13796_v19 = vpop.eup %13795  ;;  %v6454_v33 = vmul.f32 %v13794_v8, %v17611_v62  ;;  %13813 = vrcp.f32 %v6362_v49  ;;  %v6320_v26 = vmul.f32 1.442695, %v6274_v40  ;;  %v17688_v36 = vadd.f32 %v17597_v15, %v6181_v2  ;;  %v20213_v40 = vld [vmem:[#allocation88_spill] sm:$0xff] }
0x10cc   : > { %v13798_v23 = vpop.eup %13797  ;;  %v17681_v45 = vmul.f32 %v6455_v6, %v20211_v59  ;;  %v6365_v37 = vadd.f32 1.0, %v13796_v19  ;;  %13815 = vpow2.f32 %v6322_v29  ;;  %v6277_v52 = vsub.f32 0.0, %v17674_v56  ;;  %v20224_v59 = vld [vmem:[#allocation114_spill] sm:$0xff] }
0x10cd   : > { %v13800_v42 = vpop.eup %13799  ;;  %v17685_v3 = vmul.f32 %v6454_v33, %v20212_v38  ;;  %v6364_v50 = vadd.f32 1.0, %v13798_v23  ;;  %13817 = vpow2.f32 %v6320_v26  ;;  %12340 = vmatprep.mubr.msk.f32.mxu1 %vm1902_vm1, %v6454_v33  ;;  %v6276_v44 = vsub.f32 0.0, %v17688_v36 }
0x10ce   : > { %v13802_v62 = vpop.eup %13801  ;;  %v6457_v48 = vmul.f32 %v13800_v42, %v17616_v5  ;;  %13819 = vrcp.f32 %v6365_v37  ;;  %v6326_v61 = vmul.f32 1.442695, %v6277_v52  ;;  %v12310_v53 = vpop.f32.mrb[100].mxu1  ;;  %12341 = vmatmul.mubr.msk.f32.gmra.mrb[116].mxu1 %vm1902_vm1, %v6455_v6  ;;  %v20214_v6 = vld [vmem:[#allocation87_spill] sm:$0xff] }
0x10cf   : > { %v13804_v34 = vpop.eup %13803  ;;  %v6456_v39 = vmul.f32 %v13802_v62, %v17619_v0  ;;  %13821 = vrcp.f32 %v6364_v50  ;;  %v6191_v11 = vpop.f32.mrb[101].mxu1  ;;  %v17701_v8 = vadd.f32 %v12310_v53, %v17597_v15  ;;  %v6324_v19 = vmul.f32 1.442695, %v6276_v44 }
0x10d0   : > { %v13806_v49 = vpop.eup %13805  ;;  %v17698_v32 = vmul.f32 %v6457_v48, %v20213_v40  ;;  %v6367_v5 = vadd.f32 1.0, %v13804_v34  ;;  %13823 = vpow2.f32 %v6326_v61  ;;  %v17707_v0 = vadd.f32 %v17597_v15, %v6191_v11  ;;  %v20221_v40 = vld [vmem:[#allocation96_spill] sm:$0xff] }
0x10d1   : > { %v17704_v29 = vmul.f32 %v6456_v39, %v20214_v6  ;;  %v6366_v2 = vadd.f32 1.0, %v13806_v49  ;;  %12343 = vmatprep.mubr.msk.f32.mxu1 %vm1902_vm1, %v6456_v39  ;;  %v6279_v26 = vsub.f32 0.0, %v17701_v8 }
0x10d2   : > { %v13808_v33 = vpop.eup %13807  ;;  %13825 = vrcp.f32 %v6367_v5  ;;  %v12313_v23 = vpop.f32.mrb[102].mxu1  ;;  %12344 = vmatmul.mubr.msk.f32.gmra.mrb[118].mxu1 %vm1902_vm1, %v6457_v48  ;;  %v6278_v50 = vsub.f32 0.0, %v17707_v0 }
0x10d3   : > { %v13810_v37 = vpop.eup %13809  ;;  %13827 = vrcp.f32 %v6366_v2  ;;  %v6369_v42 = vadd.f32 1.0, %v13808_v33  ;;  %v6201_v62 = vpop.f32.mrb[103].mxu1  ;;  %v6330_v34 = vmul.f32 1.442695, %v6279_v26  ;;  %v17716_v39 = vadd.f32 %v12313_v23, %v17597_v15  ;;  %v20215_v26 = vld [vmem:[#allocation90_spill] sm:$0xff] }
0x10d4   : > { %v13812_v61 = vpop.eup %13811  ;;  %v6368_v53 = vadd.f32 1.0, %v13810_v37  ;;  %13829 = vpow2.f32 %v6324_v19  ;;  %v6328_v48 = vmul.f32 1.442695, %v6278_v50  ;;  %v17720_v49 = vadd.f32 %v17597_v15, %v6201_v62 }
0x10d5   : > { %v13814_v44 = vpop.eup %13813  ;;  %v6459_v11 = vmul.f32 %v13812_v61, %v17624_v27  ;;  %13831 = vrcp.f32 %v6369_v42  ;;  %v6281_v33 = vsub.f32 0.0, %v17716_v39  ;;  %v20216_v61 = vld [vmem:[#allocation89_spill] sm:$0xff] }
0x10d6   : > { %v13816_v5 = vpop.eup %13815  ;;  %v6458_v2 = vmul.f32 %v13814_v44, %v17627_v63  ;;  %13833 = vrcp.f32 %v6368_v53  ;;  %v12316_v37 = vpop.f32.mrb[104].mxu1  ;;  %v6280_v27 = vsub.f32 0.0, %v17720_v49 }
0x10d7   : > { %v13818_v19 = vpop.eup %13817  ;;  %v17725_v52 = vmul.f32 %v6459_v11, %v20215_v26  ;;  %v6371_v23 = vadd.f32 1.0, %v13816_v5  ;;  %13835 = vpow2.f32 %v6330_v34  ;;  %v6211_v42 = vpop.f32.mrb[105].mxu1  ;;  %v6334_v63 = vmul.f32 1.442695, %v6281_v33  ;;  %v20217_v33 = vld [vmem:[#allocation92_spill] sm:$0xff] }
0x10d8   : > { %v13820_v50 = vpop.eup %13819  ;;  %v17729_v62 = vmul.f32 %v6458_v2, %v20216_v61  ;;  %v6370_v55 = vadd.f32 1.0, %v13818_v19  ;;  %13837 = vpow2.f32 %v6328_v48  ;;  %12346 = vmatprep.mubr.msk.f32.mxu1 %vm1902_vm1, %v6458_v2  ;;  %v6332_v21 = vmul.f32 1.442695, %v6280_v27 }
0x10d9   : > { %v13822_v53 = vpop.eup %13821  ;;  %v6461_v44 = vmul.f32 %v13820_v50, %v17632_v9  ;;  %13839 = vrcp.f32 %v6371_v23  ;;  %v17734_v5 = vadd.f32 %v12316_v37, %v17597_v15  ;;  %12347 = vmatmul.mubr.msk.f32.gmra.mrb[120].mxu1 %vm1902_vm1, %v6459_v11  ;;  %v17741_v48 = vadd.f32 %v17597_v15, %v6211_v42  ;;  %v20218_v50 = vld [vmem:[#allocation91_spill] sm:$0xff] }
0x10da   : > { %v13824_v34 = vpop.eup %13823  ;;  %v6460_v19 = vmul.f32 %v13822_v53, %v17635_v10  ;;  %13841 = vrcp.f32 %v6370_v55  ;;  %v12319_v2 = vpop.f32.mrb[106].mxu1 }
0x10db   : > { %v17744_v9 = vmul.f32 %v6461_v44, %v20217_v33  ;;  %v6373_v23 = vadd.f32 1.0, %v13824_v34  ;;  %13843 = vpow2.f32 %v6334_v63  ;;  %v6283_v37 = vsub.f32 0.0, %v17734_v5  ;;  %v6221_v27 = vpop.f32.mrb[107].mxu1 }
0x10dc   : > { %v13826_v11 = vpop.eup %13825  ;;  %v17748_v26 = vmul.f32 %v6460_v19, %v20218_v50  ;;  %13845 = vpow2.f32 %v6332_v21  ;;  %v6282_v10 = vsub.f32 0.0, %v17741_v48  ;;  %v17752_v55 = vadd.f32 %v12319_v2, %v17597_v15  ;;  %12349 = vmatprep.mubr.msk.f32.mxu1 %vm1902_vm1, %v6460_v19 }
0x10dd   : > { %v13828_v42 = vpop.eup %13827  ;;  %v6463_v53 = vmul.f32 %v13826_v11, %v17640_v43  ;;  %13847 = vrcp.f32 %v6373_v23  ;;  %v6338_v63 = vmul.f32 1.442695, %v6283_v37  ;;  %v17757_v34 = vadd.f32 %v17597_v15, %v6221_v27  ;;  %12350 = vmatmul.mubr.msk.f32.gmra.mrb[122].mxu1 %vm1902_vm1, %v6461_v44  ;;  %v20220_v11 = vld [vmem:[#allocation93_spill] sm:$0xff] }
0x10de   : > { %v13830_v61 = vpop.eup %13829  ;;  %v6462_v50 = vmul.f32 %v13828_v42, %v17643_v47  ;;  %v6336_v2 = vmul.f32 1.442695, %v6282_v10  ;;  %v6285_v33 = vsub.f32 0.0, %v17752_v55  ;;  %v12322_v19 = vpop.f32.mrb[108].mxu1 }
0x10df   : > { %v13832_v57 = vpop.eup %13831  ;;  %v17765_v43 = vmul.f32 %v6463_v53, %v20219_v58  ;;  %v6372_v23 = vadd.f32 1.0, %v13830_v61  ;;  %13849 = vpow2.f32 %v6338_v63  ;;  %v6284_v37 = vsub.f32 0.0, %v17757_v34  ;;  %v6231_v27 = vpop.f32.mrb[109].mxu1 }
0x10e0   : > { %v13834_v44 = vpop.eup %13833  ;;  %v17769_v6 = vmul.f32 %v6462_v50, %v20220_v11  ;;  %v6465_v21 = vmul.f32 %v13832_v57, %v17648_v31  ;;  %13851 = vpow2.f32 %v6336_v2  ;;  %v6342_v47 = vmul.f32 1.442695, %v6285_v33  ;;  %12352 = vmatprep.mubr.msk.f32.mxu1 %vm1902_vm1, %v6462_v50  ;;  %v20222_v2 = vld [vmem:[#allocation95_spill] sm:$0xff] }
0x10e1   : > { %v13836_v10 = vpop.eup %13835  ;;  %v6464_v42 = vmul.f32 %v13834_v44, %v17651_v28  ;;  %13853 = vrcp.f32 %v6372_v23  ;;  %v6340_v58 = vmul.f32 1.442695, %v6284_v37  ;;  %v17775_v61 = vadd.f32 %v12322_v19, %v17597_v15  ;;  %12353 = vmatmul.mubr.msk.f32.gmra.mrb[124].mxu1 %vm1902_vm1, %v6463_v53 }
0x10e2   : > { %v13838_v63 = vpop.eup %13837  ;;  %v17781_v57 = vmul.f32 %v6465_v21, %v20221_v40  ;;  %v6375_v31 = vadd.f32 1.0, %v13836_v10  ;;  %13855 = vpow2.f32 %v6342_v47  ;;  %v12325_v33 = vpop.f32.mrb[110].mxu1  ;;  %v17790_v11 = vadd.f32 %v17597_v15, %v6231_v27  ;;  %v20223_v40 = vld [vmem:[#allocation113_spill] sm:$0xff] }
0x10e3   : > { %v13840_v50 = vpop.eup %13839  ;;  %v17784_v28 = vmul.f32 %v6464_v42, %v20222_v2  ;;  %v6374_v23 = vadd.f32 1.0, %v13838_v63  ;;  %13857 = vpow2.f32 %v6340_v58  ;;  %v6287_v19 = vsub.f32 0.0, %v17775_v61  ;;  %v6241_v37 = vpop.f32.mrb[111].mxu1  ;;  %12355 = vmatprep.mubr.msk.f32.mxu1 %vm1902_vm1, %v6464_v42 }
0x10e4   : > { %v13842_v53 = vpop.eup %13841  ;;  %v6467_v44 = vmul.f32 %v13840_v50, %v17657_v17  ;;  %13859 = vrcp.f32 %v6375_v31  ;;  %v17793_v47 = vadd.f32 %v12325_v33, %v17597_v15  ;;  %v6286_v27 = vsub.f32 0.0, %v17790_v11 }
0x10e5   : > { %v13844_v10 = vpop.eup %13843  ;;  %v6466_v58 = vmul.f32 %v13842_v53, %v17661_v7  ;;  %13861 = vrcp.f32 %v6374_v23  ;;  %v6346_v2 = vmul.f32 1.442695, %v6287_v19  ;;  %12356 = vmatmul.mubr.msk.f32.gmra.mrb[126].mxu1 %vm1902_vm1, %v6465_v21  ;;  %v17808_v7 = vadd.f32 %v17597_v15, %v6241_v37 }
0x10e6   : > { %v13846_v42 = vpop.eup %13845  ;;  %v17800_v17 = vmul.f32 %v6467_v44, %v20223_v40  ;;  %v6377_v31 = vadd.f32 1.0, %v13844_v10  ;;  %v6289_v33 = vsub.f32 0.0, %v17793_v47  ;;  %v12328_v50 = vpop.f32.mrb[112].mxu1  ;;  %v6344_v19 = vmul.f32 1.442695, %v6286_v27 }
0x10e7   : > { %v13848_v38 = vpop.eup %13847  ;;  %v17805_v46 = vmul.f32 %v6466_v58, %v20224_v59  ;;  %v6376_v63 = vadd.f32 1.0, %v13846_v42  ;;  %13863 = vpow2.f32 %v6346_v2  ;;  %v6251_v21 = vpop.f32.mrb[113].mxu1  ;;  %12358 = vmatprep.mubr.msk.f32.mxu1 %vm1902_vm1, %v6466_v58  ;;  %v6288_v59 = vsub.f32 0.0, %v17808_v7 }
0x10e8   : > { %v6469_v23 = vmul.f32 %v13848_v38, %v17674_v56  ;;  %13865 = vrcp.f32 %v6377_v31  ;;  %v6350_v53 = vmul.f32 1.442695, %v6289_v33  ;;  %v17816_v2 = vadd.f32 %v12328_v50, %v17597_v15  ;;  %v20225_v33 = vld [vmem:[#allocation97_spill] sm:$0xff] }
0x10e9   : > { %v13850_v10 = vpop.eup %13849  ;;  %13867 = vrcp.f32 %v6376_v63  ;;  %12359 = vmatmul.mubr.msk.f32.gmra.mrb[128].mxu1 %vm1902_vm1, %v6467_v44  ;;  %v17820_v56 = vadd.f32 %v17597_v15, %v6251_v21  ;;  %v6348_v31 = vmul.f32 1.442695, %v6288_v59 }
0x10ea   : > { %v13852_v37 = vpop.eup %13851  ;;  %v6379_v42 = vadd.f32 1.0, %v13850_v10  ;;  %13869 = vpow2.f32 %v6344_v19  ;;  %v6291_v27 = vsub.f32 0.0, %v17816_v2  ;;  %v7195_v40 = vmul.f32 %v6469_v23, %v20225_v33 }
0x10eb   : > { %v13854_v38 = vpop.eup %13853  ;;  %v6378_v58 = vadd.f32 1.0, %v13852_v37  ;;  %13871 = vpow2.f32 %v6350_v53  ;;  %v6290_v44 = vsub.f32 0.0, %v17820_v56 }
0x10ec   : > { %v13856_v63 = vpop.eup %13855  ;;  %v6468_v50 = vmul.f32 %v13854_v38, %v17688_v36  ;;  %13873 = vrcp.f32 %v6379_v42  ;;  %v6354_v10 = vmul.f32 1.442695, %v6291_v27 }
0x10ed   : > { %v13858_v1 = vpop.eup %13857  ;;  %13875 = vrcp.f32 %v6378_v58  ;;  %v6381_v19 = vadd.f32 1.0, %v13856_v63  ;;  %v6352_v59 = vmul.f32 1.442695, %v6290_v44 }
0x10ee   : > { %v13860_v15 = vpop.eup %13859  ;;  %v7194_v21 = vmul.f32 %v6468_v50, %v20154_v24  ;;  %v6380_v37 = vadd.f32 1.0, %v13858_v1  ;;  %13877 = vpow2.f32 %v6348_v31  ;;  %12361 = vmatprep.mubr.msk.f32.mxu1 %vm1902_vm1, %v6468_v50 }
0x10ef   : > { %v13862_v53 = vpop.eup %13861  ;;  %v6471_v33 = vmul.f32 %v13860_v15, %v17701_v8  ;;  %13879 = vrcp.f32 %v6381_v19  ;;  %12362 = vmatmul.mubr.msk.f32.gmra.mrb[130].mxu1 %vm1902_vm1, %v6469_v23 }
0x10f0   : > { %v6470_v36 = vmul.f32 %v13862_v53, %v17707_v0  ;;  %13881 = vrcp.f32 %v6380_v37  ;;  %v12876_v42 = vpack.c.bf16 %v7195_v40, %v7194_v21  ;;  %v20226_v40 = vpack.c.bf16 %v17664_v4, %v17668_v41 }
0x10f1   : > { %v13864_v38 = vpop.eup %13863  ;;  %v7197_v58 = vmul.f32 %v6471_v33, %v20155_v18  ;;  %13883 = vpow2.f32 %v6354_v10  ;;  %v20227_v41 = vpack.c.bf16 %v17681_v45, %v17685_v3  ;;  %v20228_v3 = vpack.c.bf16 %v17698_v32, %v17704_v29 }
0x10f2   : > { %v13866_v27 = vpop.eup %13865  ;;  %v7196_v1 = vmul.f32 %v6470_v36, %v20156_v14  ;;  %v6383_v31 = vadd.f32 1.0, %v13864_v38  ;;  %13885 = vpow2.f32 %v6352_v59  ;;  %12364 = vmatprep.mubr.msk.f32.mxu1 %vm1902_vm1, %v6470_v36  ;;  %12877 = vmatprep.subr.bf16.mxu0 %v12876_v42  ;;  %v20229_v32 = vpack.c.bf16 %v17725_v52, %v17729_v62 }
0x10f3   : > { %v13868_v8 = vpop.eup %13867  ;;  %v6473_v63 = vmul.f32 %v13866_v27, %v17716_v39  ;;  %12365 = vmatmul.mubr.msk.f32.gmra.mrb[132].mxu1 %vm1902_vm1, %v6471_v33  ;;  %12879 = vmatpush3.bf16.msra.mxu0 %v20226_v40 }
0x10f4   : > { %v13870_v0 = vpop.eup %13869  ;;  %v6472_v23 = vmul.f32 %v13868_v8, %v17720_v49  ;;  %13887 = vrcp.f32 %v6383_v31  ;;  %v12880_v50 = vpack.c.bf16 %v7197_v58, %v7196_v1 }
0x10f5   : > { %v13872_v44 = vpop.eup %13871  ;;  %v7199_v19 = vmul.f32 %v6473_v63, %v20158_v13  ;;  %v6382_v10 = vadd.f32 1.0, %v13870_v0 }
0x10f6   : > { %v13874_v15 = vpop.eup %13873  ;;  %v7198_v21 = vmul.f32 %v6472_v23, %v20159_v20  ;;  %v6385_v37 = vadd.f32 1.0, %v13872_v44  ;;  %12367 = vmatprep.mubr.msk.f32.mxu1 %vm1902_vm1, %v6472_v23  ;;  %12881 = vmatprep.subr.bf16.mxu0 %v12880_v50 }
0x10f7   : > { %v13876_v39 = vpop.eup %13875  ;;  %v6475_v4 = vmul.f32 %v13874_v15, %v17734_v5  ;;  %13889 = vrcp.f32 %v6382_v10  ;;  %12368 = vmatmul.mubr.msk.f32.gmra.mrb[134].mxu1 %vm1902_vm1, %v6473_v63  ;;  %12883 = vmatpush3.bf16.msra.mxu0 %v20227_v41  ;;  %v20232_v41 = vld [vmem:[#allocation112_spill] sm:$0xff] }
0x10f8   : > { %v13878_v49 = vpop.eup %13877  ;;  %v6474_v33 = vmul.f32 %v13876_v39, %v17741_v48  ;;  %13891 = vrcp.f32 %v6385_v37  ;;  %v12884_v59 = vpack.c.bf16 %v7199_v19, %v7198_v21 }
0x10f9   : > { %v13880_v53 = vpop.eup %13879  ;;  %v7201_v36 = vmul.f32 %v6475_v4, %v20161_v12  ;;  %v6384_v42 = vadd.f32 1.0, %v13878_v49 }
0x10fa   : > { %v13882_v38 = vpop.eup %13881  ;;  %v7200_v58 = vmul.f32 %v6474_v33, %v20162_v30  ;;  %v6477_v5 = vmul.f32 %v13880_v53, %v17752_v55  ;;  %12370 = vmatprep.mubr.msk.f32.mxu1 %vm1902_vm1, %v6474_v33  ;;  %12885 = vmatprep.subr.bf16.mxu0 %v12884_v59  ;;  %v14598_v59 = vld [vmem:[#allocation2 + $0x10] sm:$0xff]  ;;  %v7430_v53 = vld [vmem:[#allocation16 + $0x20] sm:$0xff] }
0x10fb   : > { %v13884_v27 = vpop.eup %13883  ;;  %v6476_v45 = vmul.f32 %v13882_v38, %v17757_v34  ;;  %13893 = vrcp.f32 %v6384_v42  ;;  %12371 = vmatmul.mubr.msk.f32.gmra.mrb[136].mxu1 %vm1902_vm1, %v6475_v4  ;;  %12887 = vmatpush3.bf16.msra.mxu0 %v20228_v3 }
0x10fc   : > { %v13886_v48 = vpop.eup %13885  ;;  %v7203_v1 = vmul.f32 %v6477_v5, %v20164_v54  ;;  %v6387_v31 = vadd.f32 1.0, %v13884_v27  ;;  %v12888_v8 = vpack.c.bf16 %v7201_v36, %v7200_v58  ;;  %v7431_v36 = vld [vmem:[#allocation16 + $0x28] sm:$0xff]  ;;  %v17901_v27 = vld [vmem:[%s20235_s7 + $0x1] ss:$0 sm:$0xff]  ;;  %s10522_s7 = sshll.u32 %s1143_s28, 4 }
0x10fd   : > { %v7202_v55 = vmul.f32 %v6476_v45, %v20165_v16  ;;  %v6386_v63 = vadd.f32 1.0, %v13886_v48  ;;  %12373 = vmatprep.mubr.msk.f32.mxu1 %vm1902_vm1, %v6476_v45  ;;  %v12940_v42 = vpack.c.bf16 %v7431_v36, %v7430_v53 }
0x10fe   : > { %v13888_v40 = vpop.eup %13887  ;;  %13895 = vrcp.f32 %v6387_v31  ;;  %12889 = vmatprep.subr.bf16.mxu0 %v12888_v8 }
0x10ff   : > { %v6479_v34 = vmul.f32 %v13888_v40, %v17775_v61  ;;  %13897 = vrcp.f32 %v6386_v63  ;;  %12374 = vmatmul.mubr.msk.f32.gmra.mrb[138].mxu1 %vm1902_vm1, %v6477_v5  ;;  %12891 = vmatpush3.bf16.msra.mxu0 %v20229_v32  ;;  %v12892_v29 = vpack.c.bf16 %v7203_v1, %v7202_v55  ;;  %v20230_v61 = vpack.c.bf16 %v17744_v9, %v17748_v26 }
0x1100   : > { %v15089_v5 = vmov 0  }
0x1101   : > { %v13890_v0 = vpop.eup %13889  ;;  %12893 = vmatprep.subr.bf16.mxu0 %v12892_v29  ;;  %v7205_v50 = vmul.f32 %v6479_v34, %v20167_v35  ;;  %13346 = vset.pattern.permute.xlu1 %v15089_v5 }
0x1102   : > { %v13892_v23 = vpop.eup %13891  ;;  %v6478_v44 = vmul.f32 %v13890_v0, %v17790_v11  ;;  %13345 = vset.pattern.permute.xlu0 %v15089_v5 }
0x1103   : > { %v6481_v19 = vmul.f32 %v13892_v23, %v17793_v47  ;;  %12895 = vmatpush3.bf16.msra.mxu0 %v20230_v61  ;;  %v20231_v47 = vpack.c.bf16 %v17765_v43, %v17769_v6  ;;  %v20234_v6 = vpack.c.bf16 %v17800_v17, %v17805_v46  ;;  %v14596_v43 = vld [vmem:[#allocation2] sm:$0xff]  ;;  %v10873_v17 = vld [vmem:[%s20177_s11 + $0x28] sm:$0xff] }
0x1104   : > { %v7204_v10 = vmul.f32 %v6478_v44, %v20169_v22  ;;  %12376 = vmatprep.mubr.msk.f32.mxu1 %vm1902_vm1, %v6478_v44  ;;  %v10872_v46 = vld [vmem:[%s20177_s11 + $0x20] sm:$0xff] }
0x1105   : > { %v13894_v52 = vpop.eup %13893  ;;  %12377 = vmatmul.mubr.msk.f32.gmra.mrb[140].mxu1 %vm1902_vm1, %v6479_v34  ;;  %v7207_v62 = vmul.f32 %v6481_v19, %v20170_v25  ;;  %v17897_v58 = vpack.c.bf16 %v10873_v17, %v10872_v46  ;;  %v20278_v25 = vld [vmem:[#allocation63_spill] sm:$0xff] }
0x1106   : > { %v6480_v15 = vmul.f32 %v13894_v52, %v17808_v7  ;;  %v12896_v21 = vpack.c.bf16 %v7205_v50, %v7204_v10 }
0x1108   : > { %v13896_v37 = vpop.eup %13895  ;;  %v7206_v11 = vmul.f32 %v6480_v15, %v20171_v60  ;;  %12379 = vmatprep.mubr.msk.f32.mxu1 %vm1902_vm1, %v6480_v15  ;;  %12897 = vmatprep.subr.bf16.mxu0 %v12896_v21 }
0x1109   : > { %v13898_v26 = vpop.eup %13897  ;;  %v6483_v9 = vmul.f32 %v13896_v37, %v17816_v2  ;;  %12380 = vmatmul.mubr.msk.f32.gmra.mrb[142].mxu1 %vm1902_vm1, %v6481_v19  ;;  %12899 = vmatpush3.bf16.msra.mxu0 %v20231_v47  ;;  %v20233_v2 = vpack.c.bf16 %v17781_v57, %v17784_v28  ;;  %v7432_v57 = vld [vmem:[#allocation16 + $0x30] sm:$0xff]  ;;  %v7433_v28 = vld [vmem:[#allocation16 + $0x38] sm:$0xff] }
0x110a   : > { %v6482_v39 = vmul.f32 %v13898_v26, %v17820_v56  ;;  %v12900_v4 = vpack.c.bf16 %v7207_v62, %v7206_v11  ;;  %v14597_v56 = vld [vmem:[#allocation2 + $0x18] sm:$0xff]  ;;  %v12944_v38 = vpack.c.bf16 %v7433_v28, %v7432_v57 }
0x110b   : > { %v7209_v7 = vmul.f32 %v6483_v9, %v20173_v51 }
0x110c   : > { %v7208_v49 = vmul.f32 %v6482_v39, %v20232_v41  ;;  %12382 = vmatprep.mubr.msk.f32.mxu1 %vm1902_vm1, %v6482_v39  ;;  %12901 = vmatprep.subr.bf16.mxu0 %v12900_v4 }
0x110d   : > { %12383 = vmatmul.mubr.msk.f32.gmra.mrb[144].mxu1 %vm1902_vm1, %v6483_v9  ;;  %12903 = vmatpush3.bf16.msra.mxu0 %v20233_v2 }
0x110e   : > { %v12904_v33 = vpack.c.bf16 %v7209_v7, %v7208_v49 }
0x1110   : > { %12905 = vmatprep.subr.bf16.mxu0 %v12904_v33 }
0x1111   : > { %12907 = vmatpush3.bf16.msra.mxu0 %v20234_v6 }
0x1112   : > { %12941 = vmatprep.subr.bf16.mxu0 %v12940_v42 }
0x1114   : > { %7275 = vmatmul.mubr.f32.vlgmr.msra.gmra.mrb[102].mxu0 %v14596_v43 }
0x1115   : > { %7279 = vmatprep.mubr.f32.mxu0 %v14597_v56  ;;  %12943 = vmatpush3.bf16.msra.mxu0 %v12940_v42 }
0x1116   : > { %12945 = vmatprep.subr.bf16.mxu0 %v12944_v38 }
0x1118   : > { %7280 = vmatmul.mubr.f32.gmra.mrb[104].mxu0 %v14598_v59 }
0x1119   : > { %12947 = vmatpush3.bf16.msra.mxu0 %v12944_v38 }
0x111a   : > { %12949 = vmatprep.subr.bf16.mxu0 %v17897_v58 }
0x119d   : > { %v12339_v45 = vpop.f32.mrb[114].mxu1 }
0x119e   : > { %v17904_v3 = vadd.f32 %v12339_v45, %v17901_v27  ;;  %v6659_v48 = vpop.f32.mrb[115].mxu1 }
0x119f   : > { %v17907_v1 = vadd.f32 %v17901_v27, %v6659_v48 }
0x11a0   : > { %v6819_v31 = vsub.f32 0.0, %v17904_v3 }
0x11a1   : > { %v6818_v8 = vsub.f32 0.0, %v17907_v1  ;;  %v12342_v55 = vpop.f32.mrb[116].mxu1 }
0x11a2   : > { %v6852_v63 = vmul.f32 1.442695, %v6819_v31  ;;  %v17912_v40 = vadd.f32 %v12342_v55, %v17901_v27  ;;  %v6669_v34 = vpop.f32.mrb[117].mxu1 }
0x11a3   : > { %v6850_v32 = vmul.f32 1.442695, %v6818_v8  ;;  %v17915_v29 = vadd.f32 %v17901_v27, %v6669_v34 }
0x11a4   : > { %13899 = vpow2.f32 %v6852_v63  ;;  %v6821_v0 = vsub.f32 0.0, %v17912_v40 }
0x11a5   : > { %13901 = vpow2.f32 %v6850_v32  ;;  %v6820_v23 = vsub.f32 0.0, %v17915_v29  ;;  %v12345_v50 = vpop.f32.mrb[118].mxu1 }
0x11a6   : > { %v6856_v44 = vmul.f32 1.442695, %v6821_v0  ;;  %v17920_v19 = vadd.f32 %v12345_v50, %v17901_v27  ;;  %v6679_v61 = vpop.f32.mrb[119].mxu1 }
0x11a7   : > { %v6854_v10 = vmul.f32 1.442695, %v6820_v23  ;;  %v17923_v52 = vadd.f32 %v17901_v27, %v6679_v61 }
0x11a8   : > { %13903 = vpow2.f32 %v6856_v44  ;;  %v6823_v62 = vsub.f32 0.0, %v17920_v19 }
0x11a9   : > { %13905 = vpow2.f32 %v6854_v10  ;;  %v6822_v15 = vsub.f32 0.0, %v17923_v52 }
0x11aa   : > { %v6860_v21 = vmul.f32 1.442695, %v6823_v62 }
0x11ab   : > { %v6858_v37 = vmul.f32 1.442695, %v6822_v15 }
0x11ac   : > { %13907 = vpow2.f32 %v6860_v21  ;;  %v12348_v11 = vpop.f32.mrb[120].mxu1 }
0x11ad   : > { %13909 = vpow2.f32 %v6858_v37  ;;  %v17928_v26 = vadd.f32 %v12348_v11, %v17901_v27  ;;  %v6689_v9 = vpop.f32.mrb[121].mxu1 }
0x11ae   : > { %v13900_v47 = vpop.eup %13899  ;;  %v17931_v39 = vadd.f32 %v17901_v27, %v6689_v9  ;;  %v17959_v9 = vld [vmem:[%s20236_s2 + $0x1] ss:$0 sm:$0xff]  ;;  %s20414_s2 = sld [smem:[#allocation53_spill]] }
0x11af   : > { %v13902_v4 = vpop.eup %13901  ;;  %v6915_v7 = vadd.f32 1.0, %v13900_v47  ;;  %v6825_v49 = vsub.f32 0.0, %v17928_v26 }
0x11b0   : > { %v6914_v2 = vadd.f32 1.0, %v13902_v4  ;;  %v6824_v33 = vsub.f32 0.0, %v17931_v39  ;;  %v12351_v6 = vpop.f32.mrb[122].mxu1 }
0x11b1   : > { %13911 = vrcp.f32 %v6915_v7  ;;  %v6864_v43 = vmul.f32 1.442695, %v6825_v49  ;;  %v17936_v56 = vadd.f32 %v12351_v6, %v17901_v27  ;;  %v6699_v59 = vpop.f32.mrb[123].mxu1 }
0x11b2   : > { %v13904_v53 = vpop.eup %13903  ;;  %13913 = vrcp.f32 %v6914_v2  ;;  %v6862_v36 = vmul.f32 1.442695, %v6824_v33  ;;  %v17939_v42 = vadd.f32 %v17901_v27, %v6699_v59 }
0x11b3   : > { %v13906_v57 = vpop.eup %13905  ;;  %v6917_v28 = vadd.f32 1.0, %v13904_v53  ;;  %13915 = vpow2.f32 %v6864_v43  ;;  %v6827_v38 = vsub.f32 0.0, %v17936_v56 }
0x11b4   : > { %v6916_v46 = vadd.f32 1.0, %v13906_v57  ;;  %13917 = vpow2.f32 %v6862_v36  ;;  %v6826_v17 = vsub.f32 0.0, %v17939_v42  ;;  %v12354_v5 = vpop.f32.mrb[124].mxu1  ;;  %p20415_p6 = scmp.ne.s32.totalorder %s20414_s2, 0 }
0x11b5   : > { %13919 = vrcp.f32 %v6917_v28  ;;  %v6868_v45 = vmul.f32 1.442695, %v6827_v38  ;;  %v17944_v48 = vadd.f32 %v12354_v5, %v17901_v27  ;;  %v6709_v31 = vpop.f32.mrb[125].mxu1 }
0x11b6   : > { %v13908_v8 = vpop.eup %13907  ;;  %13921 = vrcp.f32 %v6916_v46  ;;  %v6866_v55 = vmul.f32 1.442695, %v6826_v17  ;;  %v17947_v63 = vadd.f32 %v17901_v27, %v6709_v31 }
0x11b7   : > { %v13910_v34 = vpop.eup %13909  ;;  %v6919_v32 = vadd.f32 1.0, %v13908_v8  ;;  %13923 = vpow2.f32 %v6868_v45  ;;  %v6829_v0 = vsub.f32 0.0, %v17944_v48 }
0x11b8   : > { %v6918_v23 = vadd.f32 1.0, %v13910_v34  ;;  %13925 = vpow2.f32 %v6866_v55  ;;  %v6828_v50 = vsub.f32 0.0, %v17947_v63  ;;  %v12357_v44 = vpop.f32.mrb[126].mxu1 }
0x11b9   : > { %13927 = vrcp.f32 %v6919_v32  ;;  %v6872_v61 = vmul.f32 1.442695, %v6829_v0  ;;  %v17952_v10 = vadd.f32 %v12357_v44, %v17901_v27  ;;  %v6719_v62 = vpop.f32.mrb[127].mxu1 }
0x11ba   : > { %13929 = vrcp.f32 %v6918_v23  ;;  %v6870_v15 = vmul.f32 1.442695, %v6828_v50  ;;  %v17955_v21 = vadd.f32 %v17901_v27, %v6719_v62 }
0x11bb   : > { %v13912_v37 = vpop.eup %13911  ;;  %13931 = vpow2.f32 %v6872_v61  ;;  %v6831_v11 = vsub.f32 0.0, %v17952_v10 }
0x11bc   : > { %v13914_v47 = vpop.eup %13913  ;;  %v7011_v4 = vmul.f32 %v13912_v37, %v17904_v3  ;;  %13933 = vpow2.f32 %v6870_v15  ;;  %v6830_v7 = vsub.f32 0.0, %v17955_v21  ;;  %v12360_v49 = vpop.f32.mrb[128].mxu1 }
0x11bd   : > { %v13916_v2 = vpop.eup %13915  ;;  %v7010_v33 = vmul.f32 %v13914_v47, %v17907_v1  ;;  %v6876_v6 = vmul.f32 1.442695, %v6831_v11  ;;  %v17965_v43 = vadd.f32 %v12360_v49, %v17901_v27  ;;  %v6729_v59 = vpop.f32.mrb[129].mxu1 }
0x11be   : > { %v13918_v53 = vpop.eup %13917  ;;  %v6921_v36 = vadd.f32 1.0, %v13916_v2  ;;  %v6874_v57 = vmul.f32 1.442695, %v6830_v7  ;;  %v17968_v28 = vadd.f32 %v17901_v27, %v6729_v59  ;;  %v7051_v3 = vmul.f32 %v17959_v9, %v7011_v4 }
0x11bf   : > { %v13920_v38 = vpop.eup %13919  ;;  %v6920_v46 = vadd.f32 1.0, %v13918_v53  ;;  %13935 = vpow2.f32 %v6876_v6  ;;  %v6833_v17 = vsub.f32 0.0, %v17965_v43  ;;  %v7050_v1 = vmul.f32 %v17959_v9, %v7010_v33 }
0x11c0   : > { %v13922_v5 = vpop.eup %13921  ;;  %v7013_v45 = vmul.f32 %v13920_v38, %v17912_v40  ;;  %13937 = vrcp.f32 %v6921_v36  ;;  %v6832_v31 = vsub.f32 0.0, %v17968_v28  ;;  %v7085_v8 = vsel %vm1902_vm1, %v7051_v3, 0.0 }
0x11c1   : > { %v13924_v55 = vpop.eup %13923  ;;  %v7012_v34 = vmul.f32 %v13922_v5, %v17915_v29  ;;  %13939 = vrcp.f32 %v6920_v46  ;;  %v6880_v32 = vmul.f32 1.442695, %v6833_v17  ;;  %7086 = vadd.xlane.f32.xlu1 %v7085_v8  ;;  %v7082_v0 = vsel %vm1902_vm1, %v7050_v1, 0.0 }
0x11c2   : > { %v13926_v23 = vpop.eup %13925  ;;  %v6923_v50 = vadd.f32 1.0, %v13924_v55  ;;  %13941 = vpow2.f32 %v6874_v57  ;;  %v6878_v44 = vmul.f32 1.442695, %v6832_v31  ;;  %v12363_v61 = vpop.f32.mrb[130].mxu1  ;;  %7083 = vadd.xlane.f32.xlu0 %v7082_v0  ;;  %v7053_v40 = vmul.f32 %v17959_v9, %v7013_v45 }
0x11c3   : > { %v13928_v62 = vpop.eup %13927  ;;  %v6922_v15 = vadd.f32 1.0, %v13926_v23  ;;  %13943 = vpow2.f32 %v6880_v32  ;;  %v17980_v37 = vadd.f32 %v12363_v61, %v17901_v27  ;;  %v6739_v29 = vpop.f32.mrb[131].mxu1  ;;  %v7052_v11 = vmul.f32 %v17959_v9, %v7012_v34 }
0x11c4   : > { %v13930_v47 = vpop.eup %13929  ;;  %v7015_v4 = vmul.f32 %v13928_v62, %v17920_v19  ;;  %13945 = vrcp.f32 %v6923_v50  ;;  %v17985_v7 = vadd.f32 %v17901_v27, %v6739_v29  ;;  %v7091_v49 = vsel %vm1902_vm1, %v7053_v40, 0.0 }
0x11c5   : > { %v13932_v2 = vpop.eup %13931  ;;  %v7014_v33 = vmul.f32 %v13930_v47, %v17923_v52  ;;  %13947 = vrcp.f32 %v6922_v15  ;;  %v6835_v6 = vsub.f32 0.0, %v17980_v37  ;;  %7092 = vadd.xlane.f32.xlu1 %v7091_v49  ;;  %v7088_v59 = vsel %vm1902_vm1, %v7052_v11, 0.0 }
0x11c6   : > { %v13934_v53 = vpop.eup %13933  ;;  %v6925_v36 = vadd.f32 1.0, %v13932_v2  ;;  %13949 = vpow2.f32 %v6878_v44  ;;  %v6834_v19 = vsub.f32 0.0, %v17985_v7  ;;  %v12366_v57 = vpop.f32.mrb[132].mxu1  ;;  %7089 = vadd.xlane.f32.xlu0 %v7088_v59  ;;  %v7055_v3 = vmul.f32 %v17959_v9, %v7015_v4 }
0x11c7   : > { %v6924_v38 = vadd.f32 1.0, %v13934_v53  ;;  %v6884_v46 = vmul.f32 1.442695, %v6835_v6  ;;  %v17994_v17 = vadd.f32 %v12366_v57, %v17901_v27  ;;  %v6749_v52 = vpop.f32.mrb[133].mxu1  ;;  %v7054_v1 = vmul.f32 %v17959_v9, %v7014_v33 }
0x11c8   : > { %13951 = vrcp.f32 %v6925_v36  ;;  %v6882_v5 = vmul.f32 1.442695, %v6834_v19  ;;  %v17998_v45 = vadd.f32 %v17901_v27, %v6749_v52  ;;  %v7097_v31 = vsel %vm1902_vm1, %v7055_v3, 0.0 }
0x11c9   : > { %v13936_v8 = vpop.eup %13935  ;;  %13953 = vrcp.f32 %v6924_v38  ;;  %v6837_v55 = vsub.f32 0.0, %v17994_v17  ;;  %7098 = vadd.xlane.f32.xlu1 %v7097_v31  ;;  %v7094_v34 = vsel %vm1902_vm1, %v7054_v1, 0.0 }
0x11ca   : > { %v13938_v32 = vpop.eup %13937  ;;  %v6927_v0 = vadd.f32 1.0, %v13936_v8  ;;  %13955 = vpow2.f32 %v6884_v46  ;;  %v6836_v23 = vsub.f32 0.0, %v17998_v45  ;;  %v12369_v50 = vpop.f32.mrb[134].mxu1  ;;  %7095 = vadd.xlane.f32.xlu0 %v7094_v34 }
0x11cb   : > { %v13940_v44 = vpop.eup %13939  ;;  %v7017_v61 = vmul.f32 %v13938_v32, %v17928_v26  ;;  %13957 = vpow2.f32 %v6882_v5  ;;  %v6888_v40 = vmul.f32 1.442695, %v6837_v55  ;;  %v18006_v62 = vadd.f32 %v12369_v50, %v17901_v27  ;;  %v6759_v15 = vpop.f32.mrb[135].mxu1 }
0x11cc   : > { %v13942_v29 = vpop.eup %13941  ;;  %v7016_v11 = vmul.f32 %v13940_v44, %v17931_v39  ;;  %13959 = vrcp.f32 %v6927_v0  ;;  %v6886_v47 = vmul.f32 1.442695, %v6836_v23  ;;  %v18010_v4 = vadd.f32 %v17901_v27, %v6759_v15 }
0x11cd   : > { %v13944_v49 = vpop.eup %13943  ;;  %v6926_v2 = vadd.f32 1.0, %v13942_v29  ;;  %13961 = vpow2.f32 %v6888_v40  ;;  %v6839_v33 = vsub.f32 0.0, %v18006_v62  ;;  %v7057_v26 = vmul.f32 %v17959_v9, %v7017_v61 }
0x11ce   : > { %v13946_v6 = vpop.eup %13945  ;;  %v6929_v59 = vadd.f32 1.0, %v13944_v49  ;;  %13963 = vpow2.f32 %v6886_v47  ;;  %v6838_v53 = vsub.f32 0.0, %v18010_v4  ;;  %v12372_v36 = vpop.f32.mrb[136].mxu1  ;;  %v7056_v39 = vmul.f32 %v17959_v9, %v7016_v11 }
0x11cf   : > { %v13948_v19 = vpop.eup %13947  ;;  %v7019_v57 = vmul.f32 %v13946_v6, %v17936_v56  ;;  %13965 = vrcp.f32 %v6926_v2  ;;  %v6892_v3 = vmul.f32 1.442695, %v6839_v33  ;;  %v18018_v38 = vadd.f32 %v12372_v36, %v17901_v27  ;;  %v6769_v46 = vpop.f32.mrb[137].mxu1 }
0x11d0   : > { %v13950_v52 = vpop.eup %13949  ;;  %v7018_v1 = vmul.f32 %v13948_v19, %v17939_v42  ;;  %13967 = vrcp.f32 %v6929_v59  ;;  %v6890_v5 = vmul.f32 1.442695, %v6838_v53  ;;  %v18022_v31 = vadd.f32 %v17901_v27, %v6769_v46 }
0x11d1   : > { %v6928_v8 = vadd.f32 1.0, %v13950_v52  ;;  %13969 = vpow2.f32 %v6892_v3  ;;  %v6841_v55 = vsub.f32 0.0, %v18018_v38  ;;  %v7103_v56 = vsel %vm1902_vm1, %v7057_v26, 0.0 }
0x11d2   : > { %v13952_v34 = vpop.eup %13951  ;;  %13971 = vpow2.f32 %v6890_v5  ;;  %v6840_v32 = vsub.f32 0.0, %v18022_v31  ;;  %7104 = vadd.xlane.f32.xlu1 %v7103_v56  ;;  %v12375_v0 = vpop.f32.mrb[138].mxu1  ;;  %v7100_v23 = vsel %vm1902_vm1, %v7056_v39, 0.0  ;;  %v7059_v42 = vmul.f32 %v17959_v9, %v7019_v57 }
0x11d3   : > { %v13954_v50 = vpop.eup %13953  ;;  %v7021_v44 = vmul.f32 %v13952_v34, %v17944_v48  ;;  %13973 = vrcp.f32 %v6928_v8  ;;  %v6896_v61 = vmul.f32 1.442695, %v6841_v55  ;;  %v18031_v40 = vadd.f32 %v12375_v0, %v17901_v27  ;;  %v6779_v15 = vpop.f32.mrb[139].mxu1  ;;  %7101 = vadd.xlane.f32.xlu0 %v7100_v23 }
0x11d4   : > { %v13956_v29 = vpop.eup %13955  ;;  %v7020_v11 = vmul.f32 %v13954_v50, %v17947_v63  ;;  %v6894_v47 = vmul.f32 1.442695, %v6840_v32  ;;  %v18035_v49 = vadd.f32 %v17901_v27, %v6779_v15  ;;  %v7109_v2 = vsel %vm1902_vm1, %v7059_v42, 0.0 }
0x11d5   : > { %v13958_v33 = vpop.eup %13957  ;;  %v6931_v26 = vadd.f32 1.0, %v13956_v29  ;;  %13975 = vpow2.f32 %v6896_v61  ;;  %v6843_v48 = vsub.f32 0.0, %v18031_v40  ;;  %v7058_v6 = vmul.f32 %v17959_v9, %v7018_v1 }
0x11d6   : > { %v13960_v59 = vpop.eup %13959  ;;  %v6930_v53 = vadd.f32 1.0, %v13958_v33  ;;  %13977 = vpow2.f32 %v6894_v47  ;;  %v6842_v36 = vsub.f32 0.0, %v18035_v49  ;;  %7110 = vadd.xlane.f32.xlu1 %v7109_v2  ;;  %v7061_v63 = vmul.f32 %v17959_v9, %v7021_v44 }
0x11d7   : > { %v13962_v39 = vpop.eup %13961  ;;  %v7023_v19 = vmul.f32 %v13960_v59, %v17952_v10  ;;  %13979 = vrcp.f32 %v6931_v26  ;;  %v6900_v57 = vmul.f32 1.442695, %v6843_v48  ;;  %v7106_v3 = vsel %vm1902_vm1, %v7058_v6, 0.0 }
0x11d8   : > { %v13964_v46 = vpop.eup %13963  ;;  %13981 = vrcp.f32 %v6930_v53  ;;  %v6933_v52 = vadd.f32 1.0, %v13962_v39  ;;  %v6898_v5 = vmul.f32 1.442695, %v6842_v36  ;;  %v12378_v1 = vpop.f32.mrb[140].mxu1  ;;  %7107 = vadd.xlane.f32.xlu0 %v7106_v3  ;;  %v7115_v8 = vsel %vm1902_vm1, %v7061_v63, 0.0 }
0x11d9   : > { %v13966_v55 = vpop.eup %13965  ;;  %v6932_v56 = vadd.f32 1.0, %v13964_v46  ;;  %13983 = vpow2.f32 %v6900_v57  ;;  %v18046_v34 = vadd.f32 %v12378_v1, %v17901_v27  ;;  %v6789_v32 = vpop.f32.mrb[141].mxu1  ;;  %v7060_v10 = vmul.f32 %v17959_v9, %v7020_v11 }
0x11da   : > { %v13968_v0 = vpop.eup %13967  ;;  %v7022_v23 = vmul.f32 %v13966_v55, %v17955_v21  ;;  %13985 = vrcp.f32 %v6933_v52  ;;  %v18051_v42 = vadd.f32 %v17901_v27, %v6789_v32  ;;  %7116 = vadd.xlane.f32.xlu1 %v7115_v8  ;;  %v7063_v50 = vmul.f32 %v17959_v9, %v7023_v19 }
0x11db   : > { %v13970_v44 = vpop.eup %13969  ;;  %v7025_v61 = vmul.f32 %v13968_v0, %v17965_v43  ;;  %13987 = vrcp.f32 %v6932_v56  ;;  %v6845_v15 = vsub.f32 0.0, %v18046_v34  ;;  %v7112_v29 = vsel %vm1902_vm1, %v7060_v10, 0.0 }
0x11dc   : > { %v13972_v47 = vpop.eup %13971  ;;  %v6935_v11 = vadd.f32 1.0, %v13970_v44  ;;  %13989 = vpow2.f32 %v6898_v5  ;;  %v6844_v21 = vsub.f32 0.0, %v18051_v42  ;;  %v12381_v2 = vpop.f32.mrb[142].mxu1  ;;  %7113 = vadd.xlane.f32.xlu0 %v7112_v29  ;;  %v7121_v33 = vsel %vm1902_vm1, %v7063_v50, 0.0 }
0x11dd   : > { %v13974_v26 = vpop.eup %13973  ;;  %v6934_v48 = vadd.f32 1.0, %v13972_v47  ;;  %v6904_v6 = vmul.f32 1.442695, %v6845_v15  ;;  %v18060_v59 = vadd.f32 %v12381_v2, %v17901_v27  ;;  %v6799_v43 = vpop.f32.mrb[143].mxu1  ;;  %v7062_v53 = vmul.f32 %v17959_v9, %v7022_v23 }
0x11de   : > { %v7024_v36 = vmul.f32 %v13974_v26, %v17968_v28  ;;  %13991 = vrcp.f32 %v6935_v11  ;;  %v6902_v63 = vmul.f32 1.442695, %v6844_v21  ;;  %v18065_v39 = vadd.f32 %v17901_v27, %v6799_v43  ;;  %7122 = vadd.xlane.f32.xlu1 %v7121_v33 }
0x11df   : > { %v13976_v19 = vpop.eup %13975  ;;  %13993 = vrcp.f32 %v6934_v48  ;;  %v6847_v57 = vsub.f32 0.0, %v18060_v59  ;;  %v7118_v3 = vsel %vm1902_vm1, %v7062_v53, 0.0  ;;  %v7065_v46 = vmul.f32 %v17959_v9, %v7025_v61 }
0x11e0   : > { %v13978_v52 = vpop.eup %13977  ;;  %v6937_v5 = vadd.f32 1.0, %v13976_v19  ;;  %13995 = vpow2.f32 %v6904_v6  ;;  %v6846_v1 = vsub.f32 0.0, %v18065_v39  ;;  %v12384_v28 = vpop.f32.mrb[144].mxu1  ;;  %7119 = vadd.xlane.f32.xlu0 %v7118_v3  ;;  %v7064_v8 = vmul.f32 %v17959_v9, %v7024_v36 }
0x11e1   : > { %v13980_v55 = vpop.eup %13979  ;;  %v6936_v56 = vadd.f32 1.0, %v13978_v52  ;;  %13997 = vpow2.f32 %v6902_v63  ;;  %v6908_v32 = vmul.f32 1.442695, %v6847_v57  ;;  %v18073_v10 = vadd.f32 %v12384_v28, %v17901_v27  ;;  %v6809_v0 = vpop.f32.mrb[145].mxu1 }
0x11e2   : > { %v13982_v23 = vpop.eup %13981  ;;  %v7027_v50 = vmul.f32 %v13980_v55, %v17980_v37  ;;  %13999 = vrcp.f32 %v6937_v5  ;;  %v6906_v44 = vmul.f32 1.442695, %v6846_v1  ;;  %v18077_v61 = vadd.f32 %v17901_v27, %v6809_v0 }
0x11e3   : > { %v13984_v15 = vpop.eup %13983  ;;  %v7026_v29 = vmul.f32 %v13982_v23, %v17985_v7  ;;  %14001 = vrcp.f32 %v6936_v56  ;;  %v6849_v47 = vsub.f32 0.0, %v18073_v10  ;;  %v7127_v11 = vsel %vm1902_vm1, %v7065_v46, 0.0 }
0x11e4   : > { %v13986_v21 = vpop.eup %13985  ;;  %v6939_v2 = vadd.f32 1.0, %v13984_v15  ;;  %14003 = vpow2.f32 %v6908_v32  ;;  %v6848_v33 = vsub.f32 0.0, %v18077_v61  ;;  %7128 = vadd.xlane.f32.xlu1 %v7127_v11  ;;  %v7124_v37 = vsel %vm1902_vm1, %v7064_v8, 0.0  ;;  %v10874_v15 = vld [vmem:[%s20177_s11 + $0x30] sm:$0xff] }
0x11e5   : > { %v13988_v26 = vpop.eup %13987  ;;  %v7029_v27 = vmul.f32 %v13986_v21, %v17994_v17  ;;  %14005 = vpow2.f32 %v6906_v44  ;;  %v6912_v48 = vmul.f32 1.442695, %v6849_v47  ;;  %7125 = vadd.xlane.f32.xlu0 %v7124_v37  ;;  %v7067_v7 = vmul.f32 %v17959_v9, %v7027_v50 }
0x11e6   : > { %v13990_v6 = vpop.eup %13989  ;;  %v7028_v43 = vmul.f32 %v13988_v26, %v17998_v45  ;;  %14007 = vrcp.f32 %v6939_v2  ;;  %v6910_v53 = vmul.f32 1.442695, %v6848_v33  ;;  %v7066_v36 = vmul.f32 %v17959_v9, %v7026_v29  ;;  %v10875_v29 = vld [vmem:[%s20177_s11 + $0x38] sm:$0xff] }
0x11e7   : > { %v6938_v63 = vadd.f32 1.0, %v13990_v6  ;;  %14009 = vpow2.f32 %v6912_v48  ;;  %v11536_v19 = vpop.f32.mrb[102].mxu0  ;;  %v7133_v57 = vsel %vm1902_vm1, %v7067_v7, 0.0  ;;  %v7069_v3 = vmul.f32 %v17959_v9, %v7029_v27 }
0x11e8   : > { %v13992_v17 = vpop.eup %13991  ;;  %14011 = vpow2.f32 %v6910_v53  ;;  %7134 = vadd.xlane.f32.xlu1 %v7133_v57  ;;  %v11537_v46 = vpop.f32.mrb[103].mxu0  ;;  %v7130_v52 = vsel %vm1902_vm1, %v7066_v36, 0.0  ;;  %v7068_v45 = vmul.f32 %v17959_v9, %v7028_v43  ;;  %v12952_v7 = vpack.c.bf16 %v10875_v29, %v10874_v15  ;;  %v20237_v57 = vld [vmem:[#allocation98_spill] sm:$0xff] }
0x11e9   : > { %v13994_v5 = vpop.eup %13993  ;;  %v7031_v1 = vmul.f32 %v13992_v17, %v18006_v62  ;;  %14013 = vrcp.f32 %v6938_v63  ;;  %v11538_v28 = vadd.f32 %v11537_v46, %v11536_v19  ;;  %7131 = vadd.xlane.f32.xlu0 %v7130_v52  ;;  %v7139_v8 = vsel %vm1902_vm1, %v7069_v3, 0.0 }
0x11ea   : > { %v13996_v55 = vpop.eup %13995  ;;  %v7030_v56 = vmul.f32 %v13994_v5, %v18010_v4  ;;  %v7136_v32 = vsel %vm1902_vm1, %v7068_v45, 0.0 }
0x11eb   : > { %v13998_v0 = vpop.eup %13997  ;;  %v6941_v23 = vadd.f32 1.0, %v13996_v55  ;;  %v11539_v50 = vpop.f32.mrb[104].mxu0  ;;  %12393 = vmatprep.mubr.msk.f32.mxu0 %vm1902_vm1, %v11538_v28  ;;  %v7071_v44 = vmul.f32 %v17959_v9, %v7031_v1  ;;  %v20238_v55 = vld [vmem:[#allocation99_spill] sm:$0xff] }
0x11ec   : > { %v14000_v62 = vpop.eup %13999  ;;  %v6940_v47 = vadd.f32 1.0, %v13998_v0  ;;  %7140 = vadd.xlane.f32.xlu1 %v7139_v8  ;;  %v11540_v11 = vpop.f32.mrb[105].mxu0  ;;  %v7070_v21 = vmul.f32 %v17959_v9, %v7030_v56 }
0x11ed   : > { %v14002_v2 = vpop.eup %14001  ;;  %v7033_v4 = vmul.f32 %v14000_v62, %v18018_v38  ;;  %14015 = vrcp.f32 %v6941_v23  ;;  %v11541_v33 = vadd.f32 %v11540_v11, %v11539_v50  ;;  %7137 = vadd.xlane.f32.xlu0 %v7136_v32  ;;  %v7145_v37 = vsel %vm1902_vm1, %v7071_v44, 0.0 }
0x11ee   : > { %v14004_v26 = vpop.eup %14003  ;;  %v7032_v27 = vmul.f32 %v14002_v2, %v18022_v31  ;;  %14017 = vrcp.f32 %v6940_v47  ;;  %v7142_v48 = vsel %vm1902_vm1, %v7070_v21, 0.0 }
0x11ef   : > { %v14006_v6 = vpop.eup %14005  ;;  %v6943_v43 = vadd.f32 1.0, %v14004_v26  ;;  %12394 = vmatmul.mubr.msk.f32.vlgmr.msra.gmra.mrb[106].mxu0 %vm1902_vm1, %v11541_v33  ;;  %v7073_v53 = vmul.f32 %v17959_v9, %v7033_v4 }
0x11f0   : > { %v14008_v36 = vpop.eup %14007  ;;  %v6942_v38 = vadd.f32 1.0, %v14006_v6  ;;  %7146 = vadd.xlane.f32.xlu1 %v7145_v37  ;;  %12951 = vmatpush3.bf16.msra.mxu0 %v17897_v58  ;;  %v7072_v63 = vmul.f32 %v17959_v9, %v7032_v27 }
0x11f1   : > { %v14010_v19 = vpop.eup %14009  ;;  %v7035_v31 = vmul.f32 %v14008_v36, %v18031_v40  ;;  %14019 = vrcp.f32 %v6943_v43  ;;  %12404 = vmatprep.mubr.msk.f32.mxu0 %vm1902_vm1, %v20237_v57  ;;  %7143 = vadd.xlane.f32.xlu0 %v7142_v48  ;;  %v7151_v3 = vsel %vm1902_vm1, %v7073_v53, 0.0  ;;  %v20242_v53 = vld [vmem:[#allocation153_spill] sm:$0xff]  ;;  %v20243_v36 = vld [vmem:[#allocation154_spill] sm:$0xff] }
0x11f2   : > { %v14012_v17 = vpop.eup %14011  ;;  %14021 = vrcp.f32 %v6942_v38  ;;  %v6945_v46 = vadd.f32 1.0, %v14010_v19  ;;  %12953 = vmatprep.subr.bf16.mxu0 %v12952_v7  ;;  %v7148_v52 = vsel %vm1902_vm1, %v7072_v63, 0.0  ;;  %v20244_v38 = vld [vmem:[#allocation155_spill] sm:$0xff]  ;;  %vm4663_vm15 = vcmp.eq.f32.partialorder %v20242_v53, inf }
0x11f3   : > { %v14014_v45 = vpop.eup %14013  ;;  %v6944_v58 = vadd.f32 1.0, %v14012_v17  ;;  %v7075_v5 = vmul.f32 %v17959_v9, %v7035_v31  ;;  %v20246_v31 = vld [vmem:[#allocation157_spill] sm:$0xff]  ;;  %v20248_v17 = vld [vmem:[#allocation159_spill] sm:$0xff]  ;;  %vm4665_vm2 = vcmp.eq.f32.partialorder %v20242_v53, 0.0  ;;  %vm4656_vm3 = vcmp.eq.f32.partialorder %v20243_v36, inf }
0x11f4   : > { %v7034_v1 = vmul.f32 %v14014_v45, %v18035_v49  ;;  %14023 = vrcp.f32 %v6945_v46  ;;  %7152 = vadd.xlane.f32.xlu1 %v7151_v3  ;;  %12955 = vmatpush3.bf16.msra.mxu0 %v12952_v7  ;;  %v20239_v49 = vld [vmem:[#allocation117_spill] sm:$0xff]  ;;  %v20247_v3 = vld [vmem:[#allocation158_spill] sm:$0xff]  ;;  %v20249_v46 = vld [vmem:[#allocation160_spill] sm:$0xff]  ;;  %vm4658_vm4 = vcmp.eq.f32.partialorder %v20243_v36, 0.0  ;;  %vm4677_vm6 = vcmp.eq.f32.partialorder %v20244_v38, inf }
0x11f5   : > { %14025 = vrcp.f32 %v6944_v58  ;;  %7149 = vadd.xlane.f32.xlu0 %v7148_v52  ;;  %v7157_v40 = vsel %vm1902_vm1, %v7075_v5, 0.0  ;;  %v4666_v52 = vand.u32 2147483648, %v20242_v53  ;;  %v20250_v58 = vld [vmem:[#allocation161_spill] sm:$0xff]  ;;  %vm4684_vm7 = vcmp.eq.f32.partialorder %v20247_v3, inf }
0x11f6   : > { %v7074_v28 = vmul.f32 %v17959_v9, %v7034_v1  ;;  %14027 = vrsqrt.f32 %v20242_v53  ;;  %vm4679_vm8 = vcmp.eq.f32.partialorder %v20244_v38, 0.0  ;;  %vm4691_vm10 = vcmp.eq.f32.partialorder %v20246_v31, inf }
0x11f7   : > { %v14016_v8 = vpop.eup %14015  ;;  %12405 = vmatmul.mubr.msk.f32.vlgmr.msra.gmra.mrb[106].mxu0 %vm1902_vm1, %v20238_v55  ;;  %14029 = vrsqrt.f32 %v20243_v36  ;;  %vm4698_vm11 = vcmp.eq.f32.partialorder %v20249_v46, inf  ;;  %vm4693_vm12 = vcmp.eq.f32.partialorder %v20246_v31, 0.0  ;;  %vm4686_vm13 = vcmp.eq.f32.partialorder %v20247_v3, 0.0 }
0x11f8   : > { %v14018_v56 = vpop.eup %14017  ;;  %v7037_v32 = vmul.f32 %v14016_v8, %v18046_v34  ;;  %7158 = vadd.xlane.f32.xlu1 %v7157_v40  ;;  %v7154_v0 = vsel %vm1902_vm1, %v7074_v28, 0.0  ;;  %12422 = vmatprep.mubr.msk.f32.mxu0 %vm1267_vm0, %v20239_v49  ;;  %14031 = vrsqrt.f32 %v20244_v38  ;;  %v20251_v40 = vld [vmem:[#allocation162_spill] sm:$0xff]  ;;  %v20252_v28 = vld [vmem:[#allocation164_spill] sm:$0xff]  ;;  %v4659_v8 = vand.u32 2147483648, %v20243_v36 }
0x11f9   : > { %v7036_v23 = vmul.f32 %v14018_v56, %v18051_v42  ;;  %7155 = vadd.xlane.f32.xlu0 %v7154_v0  ;;  %v20253_v56 = vld [vmem:[#allocation163_spill] sm:$0xff]  ;;  %v20254_v49 = vld [vmem:[#allocation166_spill] sm:$0xff]  ;;  %v20275_v51 = vand.u32 2147483648, %v20252_v28 }
0x11fa   : > { %v7077_v50 = vmul.f32 %v17959_v9, %v7037_v32 }
0x11fb   : > { %v14020_v44 = vpop.eup %14019  ;;  %v7076_v15 = vmul.f32 %v17959_v9, %v7036_v23 }
0x11fc   : > { %v14022_v29 = vpop.eup %14021  ;;  %v7039_v62 = vmul.f32 %v14020_v44, %v18060_v59  ;;  %v7163_v47 = vsel %vm1902_vm1, %v7077_v50, 0.0  ;;  %v20255_v44 = vld [vmem:[#allocation167_spill] sm:$0xff] }
0x11fd   : > { %v7038_v34 = vmul.f32 %v14022_v29, %v18065_v39  ;;  %7164 = vadd.xlane.f32.xlu1 %v7163_v47  ;;  %v7160_v11 = vsel %vm1902_vm1, %v7076_v15, 0.0 }
0x11fe   : > { %v14024_v21 = vpop.eup %14023  ;;  %7161 = vadd.xlane.f32.xlu0 %v7160_v11  ;;  %v7079_v42 = vmul.f32 %v17959_v9, %v7039_v62  ;;  %v20256_v62 = vld [vmem:[#allocation168_spill] sm:$0xff] }
0x11ff   : > { %v14026_v2 = vpop.eup %14025  ;;  %v7041_v4 = vmul.f32 %v14024_v21, %v18073_v10  ;;  %v7078_v33 = vmul.f32 %v17959_v9, %v7038_v34  ;;  %v20240_v10 = vld [vmem:[#allocation116_spill] sm:$0xff]  ;;  %v4687_v21 = vand.u32 2147483648, %v20247_v3 }
0x1200   : > { %v7040_v37 = vmul.f32 %v14026_v2, %v18077_v61  ;;  %v7169_v59 = vsel %vm1902_vm1, %v7079_v42, 0.0  ;;  %v1793_v6 = vmax.f32 %v20240_v10, 1.0  ;;  %v20241_v61 = vld [vmem:[#allocation115_spill] sm:$0xff]  ;;  %v14028_v63 = vpop.eup %14027  ;;  %v20257_v42 = vld [vmem:[#allocation169_spill] sm:$0xff]  ;;  %v4680_v2 = vand.u32 2147483648, %v20244_v38 }
0x1201   : > { %7170 = vadd.xlane.f32.xlu1 %v7169_v59  ;;  %v7166_v26 = vsel %vm1902_vm1, %v7078_v33, 0.0  ;;  %v7081_v39 = vmul.f32 %v17959_v9, %v7041_v4  ;;  %v1792_v43 = vmax.f32 %v20241_v61, 1.0  ;;  %v14030_v19 = vpop.eup %14029  ;;  %v4662_v57 = vmul.f32 %v14028_v63, %v20242_v53 }
0x1202   : > { %7167 = vadd.xlane.f32.xlu0 %v7166_v26  ;;  %v7080_v27 = vmul.f32 %v17959_v9, %v7040_v37  ;;  %v20245_v9 = vld [vmem:[#allocation156_spill] sm:$0xff]  ;;  %v4655_v45 = vmul.f32 %v14030_v19, %v20243_v36  ;;  %v14032_v1 = vpop.eup %14031  ;;  %v4701_v33 = vand.u32 2147483648, %v20249_v46  ;;  %v20258_v37 = vld [vmem:[#allocation170_spill] sm:$0xff] }
0x1203   : > { %v7175_v48 = vsel %vm1902_vm1, %v7081_v39, 0.0  ;;  %14033 = vrsqrt.f32 %v20245_v9  ;;  %v4664_v5 = vsel %vm4663_vm15, %v20242_v53, %v4662_v57  ;;  %v4676_v23 = vmul.f32 %v14032_v1, %v20244_v38 }
0x1204   : > { %v7172_v7 = vsel %vm1902_vm1, %v7080_v27, 0.0  ;;  %14035 = vrsqrt.f32 %v20246_v31  ;;  %v4667_v32 = vsel %vm4665_vm2, %v4666_v52, %v4664_v5  ;;  %v4657_v0 = vsel %vm4656_vm3, %v20243_v36, %v4655_v45  ;;  %v20259_v27 = vld [vmem:[#allocation165_spill] sm:$0xff]  ;;  %v20260_v36 = vld [vmem:[#allocation171_spill] sm:$0xff]  ;;  %v20261_v52 = vld [vmem:[#allocation172_spill] sm:$0xff] }
0x1205   : > { %7176 = vadd.xlane.f32.xlu1 %v7175_v48  ;;  %14037 = vrsqrt.f32 %v20247_v3  ;;  %vm4670_vm5 = vcmp.eq.f32.partialorder %v20245_v9, inf  ;;  %v4673_v50 = vand.u32 2147483648, %v20245_v9  ;;  %v4879_v47 = vadd.f32 1e-30, %v4667_v32 }
0x1206   : > { %7173 = vadd.xlane.f32.xlu0 %v7172_v7  ;;  %14039 = vrsqrt.f32 %v20248_v17  ;;  %v4660_v34 = vsel %vm4658_vm4, %v4659_v8, %v4657_v0  ;;  %v4678_v59 = vsel %vm4677_vm6, %v20244_v38, %v4676_v23  ;;  %vm4672_vm9 = vcmp.eq.f32.partialorder %v20245_v9, 0.0  ;;  %v20262_v0 = vld [vmem:[#allocation173_spill] sm:$0xff] }
0x1207   : > { %14041 = vrsqrt.f32 %v20249_v46  ;;  %v4878_v48 = vadd.f32 1e-30, %v4660_v34  ;;  %v4681_v38 = vsel %vm4679_vm8, %v4680_v2, %v4678_v59  ;;  %v20263_v34 = vld [vmem:[#allocation174_spill] sm:$0xff]  ;;  %vm4712_vm15 = vcmp.eq.f32.partialorder %v20251_v40, inf }
0x1208   : > { %14043 = vrsqrt.f32 %v20250_v58  ;;  %v4881_v23 = vadd.f32 1e-30, %v4681_v38  ;;  %vm4705_vm2 = vcmp.eq.f32.partialorder %v20248_v17, inf  ;;  %vm4726_vm3 = vcmp.eq.f32.partialorder %v20252_v28, inf }
0x1209   : > { %14045 = vrsqrt.f32 %v20251_v40  ;;  %vm4707_vm4 = vcmp.eq.f32.partialorder %v20248_v17, 0.0  ;;  %vm4700_vm6 = vcmp.eq.f32.partialorder %v20249_v46, 0.0  ;;  %vm4740_vm8 = vcmp.eq.f32.partialorder %v20254_v49, inf }
0x120a   : > { %14047 = vrsqrt.f32 %v20252_v28  ;;  %v20297_v16 = vand.u32 2147483648, %v20260_v36 }
0x120b   : > { %14049 = vrsqrt.f32 %v20253_v56 }
0x120c   : > { %14051 = vrsqrt.f32 %v20254_v49 }
0x120d   : > { %v14034_v55 = vpop.eup %14033  ;;  %14053 = vrsqrt.f32 %v20255_v44 }
0x120e   : > { %v14036_v15 = vpop.eup %14035  ;;  %v4669_v29 = vmul.f32 %v14034_v55, %v20245_v9  ;;  %14055 = vrsqrt.f32 %v20256_v62 }
0x120f   : > { %v14038_v11 = vpop.eup %14037  ;;  %14057 = vrsqrt.f32 %v20257_v42  ;;  %v4690_v7 = vmul.f32 %v14036_v15, %v20246_v31 }
0x1210   : > { %v14040_v4 = vpop.eup %14039  ;;  %14059 = vrsqrt.f32 %v20258_v37 }
0x1211   : > { %v14042_v26 = vpop.eup %14041  ;;  %14061 = vrsqrt.f32 %v20259_v27  ;;  %v4692_v1 = vsel %vm4691_vm10, %v20246_v31, %v4690_v7  ;;  %vm4714_vm10 = vcmp.eq.f32.partialorder %v20251_v40, 0.0 }
0x1212   : > { %v18184_v10 = vpop.eup %14043  ;;  %14063 = vrcp.f32 %v4879_v47  ;;  %v18195_v19 = vmul.f32 %v14042_v26, %v20249_v46 }
0x1213   : > { %v14046_v61 = vpop.eup %14045  ;;  %14065 = vrsqrt.f32 %v20260_v36 }
0x1214   : > { %v14048_v63 = vpop.eup %14047  ;;  %14067 = vrsqrt.f32 %v20261_v52  ;;  %v18206_v55 = vmul.f32 %v14046_v61, %v20251_v40  ;;  %v4704_v61 = vmul.f32 %v14040_v4, %v20248_v17  ;;  %v20264_v4 = vld [vmem:[#allocation175_spill] sm:$0xff] }
0x1215   : > { %v18200_v45 = vpop.eup %14049  ;;  %14069 = vrcp.f32 %v4878_v48 }
0x1216   : > { %1801 = vperm.xlu1 %13346, %v1793_v6   ;;  %v4671_v6 = vsel %vm4670_vm5, %v20245_v9, %v4669_v29  ;;  %v4694_v9 = vand.u32 2147483648, %v20246_v31  ;;  %v14052_v8 = vpop.eup %14051  ;;  %14071 = vrsqrt.f32 %v20262_v0  ;;  %v18211_v29 = vmul.f32 %v14048_v63, %v20252_v28 }
0x1217   : > { %v4674_v5 = vsel %vm4672_vm9, %v4673_v50, %v4671_v6  ;;  %v14054_v15 = vpop.eup %14053  ;;  %14073 = vrsqrt.f32 %v20263_v34  ;;  %v18221_v48 = vmul.f32 %v14052_v8, %v20254_v49  ;;  %v4708_v6 = vand.u32 2147483648, %v20248_v17 }
0x1218   : > { %v14056_v31 = vpop.eup %14055  ;;  %v4695_v2 = vsel %vm4693_vm12, %v4694_v9, %v4692_v1  ;;  %v18228_v63 = vmul.f32 %v14054_v15, %v20255_v44  ;;  %14075 = vrcp.f32 %v4881_v23  ;;  %vm4719_vm5 = vcmp.eq.f32.partialorder %v20250_v58, inf }
0x1219   : > { %v14058_v26 = vpop.eup %14057  ;;  %v4883_v1 = vadd.f32 1e-30, %v4695_v2  ;;  %v4706_v2 = vsel %vm4705_vm2, %v20248_v17, %v4704_v61  ;;  %vm4761_vm9 = vcmp.eq.f32.partialorder %v20255_v44, inf  ;;  %vm4728_vm12 = vcmp.eq.f32.partialorder %v20252_v28, 0.0 }
0x121a   : > { %v14060_v38 = vpop.eup %14059  ;;  %v18244_v23 = vmul.f32 %v14058_v26, %v20257_v42  ;;  %v4709_v32 = vsel %vm4707_vm4, %v4708_v6, %v4706_v2  ;;  %v20273_v2 = vand.u32 2147483648, %v20251_v40  ;;  %vm4735_vm2 = vcmp.eq.f32.partialorder %v20253_v56, 0.0 }
0x121b   : > { %v18232_v9 = vpop.eup %14061  ;;  %v4885_v57 = vadd.f32 1e-30, %v4709_v32  ;;  %v4713_v32 = vsel %vm4712_vm15, %v20251_v40, %v18206_v55  ;;  %vm4775_vm15 = vcmp.eq.f32.partialorder %v20257_v42, inf  ;;  %v4736_v55 = vand.u32 2147483648, %v20253_v56 }
0x121c   : > { %1796 = vperm.xlu0 %13345, %v1792_v43   ;;  %v4683_v43 = vmul.f32 %v14038_v11, %v20247_v3  ;;  %v4880_v11 = vadd.f32 1e-30, %v4674_v5  ;;  %v18236_v5 = vmul.f32 %v14056_v31, %v20256_v62  ;;  %v14064_v15 = vpop.eup %14063  ;;  %v18249_v31 = vmul.f32 %v14060_v38, %v20258_v37  ;;  %v20266_v38 = vld [vmem:[#allocation75_spill] sm:$0xff] }
0x121d   : > { %v14066_v7 = vpop.eup %14065  ;;  %v18260_v47 = vmul.f32 %v14064_v15, %v20266_v38  ;;  %v20268_v15 = vld [vmem:[#allocation178_spill] sm:$0xff]  ;;  %v4746_v40 = vmul.f32 %v18232_v9, %v20259_v27  ;;  %vm4768_vm4 = vcmp.eq.f32.partialorder %v20258_v37, inf }
0x121e   : > { %v4685_v59 = vsel %vm4684_vm7, %v20247_v3, %v4683_v43  ;;  %14077 = vrcp.f32 %v4880_v11  ;;  %v14068_v3 = vpop.eup %14067  ;;  %v4718_v11 = vmul.f32 %v18184_v10, %v20250_v58  ;;  %v18264_v17 = vmul.f32 %v14066_v7, %v20260_v36  ;;  %v20270_v7 = vld [vmem:[#allocation179_spill] sm:$0xff] }
0x121f   : > { %v4688_v8 = vsel %vm4686_vm13, %v4687_v21, %v4685_v59  ;;  %14079 = vrsqrt.f32 %v20264_v4  ;;  %v20265_v59 = vld [vmem:[#allocation176_spill] sm:$0xff]  ;;  %v14070_v43 = vpop.eup %14069  ;;  %v20267_v21 = vld [vmem:[#allocation177_spill] sm:$0xff]  ;;  %v4699_v10 = vsel %vm4698_vm11, %v20249_v46, %v18195_v19  ;;  %v18272_v50 = vmul.f32 %v14068_v3, %v20261_v52  ;;  %v20269_v3 = vld [vmem:[#allocation62_spill] sm:$0xff] }
0x1220   : > { %14081 = vrsqrt.f32 %v20265_v59  ;;  %v4882_v26 = vadd.f32 1e-30, %v4688_v8  ;;  %v14072_v61 = vpop.eup %14071  ;;  %v4720_v6 = vsel %vm4719_vm5, %v20250_v58, %v4718_v11  ;;  %vm4721_vm7 = vcmp.eq.f32.partialorder %v20250_v58, 0.0  ;;  %v20271_v46 = vld [vmem:[#allocation180_spill] sm:$0xff] }
0x1221   : > { %14083 = vrcp.f32 %v4883_v1  ;;  %v14074_v8 = vpop.eup %14073  ;;  %v4722_v1 = vand.u32 2147483648, %v20250_v58  ;;  %v18282_v19 = vmul.f32 %v14072_v61, %v20262_v0  ;;  %v4911_v38 = vmul.f32 %v14070_v43, %v20269_v3 }
0x1222   : > { %14085 = vrsqrt.f32 %v20267_v21  ;;  %v14076_v53 = vpop.eup %14075  ;;  %v18287_v39 = vmul.f32 %v14074_v8, %v20263_v34  ;;  %v4732_v58 = vmul.f32 %v18200_v45, %v20253_v56  ;;  %vm4733_vm11 = vcmp.eq.f32.partialorder %v20253_v56, inf }
0x1223   : > { %14087 = vrsqrt.f32 %v20268_v15  ;;  %v4723_v11 = vsel %vm4721_vm7, %v4722_v1, %v4720_v6  ;;  %vm4754_vm13 = vcmp.eq.f32.partialorder %v20256_v62, inf  ;;  %vm4789_vm5 = vcmp.eq.f32.partialorder %v20260_v36, inf }
0x1224   : > { %14089 = vrcp.f32 %v4882_v26  ;;  %v4702_v26 = vsel %vm4700_vm6, %v4701_v33, %v4699_v10  ;;  %v4727_v33 = vsel %vm4726_vm3, %v20252_v28, %v18211_v29  ;;  %v20272_v10 = vld [vmem:[#allocation78_spill] sm:$0xff]  ;;  %v4887_v61 = vadd.f32 1e-30, %v4723_v11 }
0x1225   : > { %14091 = vrsqrt.f32 %v20270_v7  ;;  %v4917_v8 = vmul.f32 %v14076_v53, %v20272_v10  ;;  %v4884_v1 = vadd.f32 1e-30, %v4702_v26  ;;  %v4716_v29 = vsel %vm4714_vm10, %v20273_v2, %v4713_v32  ;;  %v20276_v32 = vld [vmem:[#allocation181_spill] sm:$0xff] }
0x1226   : > { %14093 = vrsqrt.f32 %v20271_v46  ;;  %v4734_v41 = vsel %vm4733_vm11, %v20253_v56, %v4732_v58  ;;  %v4730_v11 = vsel %vm4728_vm12, %v20275_v51, %v4727_v33  ;;  %v20277_v58 = vld [vmem:[#allocation84_spill] sm:$0xff]  ;;  %vm4747_vm3 = vcmp.eq.f32.partialorder %v20259_v27, inf }
0x1227   : > { %14095 = vrcp.f32 %v4885_v57  ;;  %v20274_v57 = vld [vmem:[#allocation83_spill] sm:$0xff]  ;;  %v4886_v28 = vadd.f32 1e-30, %v4716_v29  ;;  %vm4749_vm6 = vcmp.eq.f32.partialorder %v20259_v27, 0.0  ;;  %vm4742_vm7 = vcmp.eq.f32.partialorder %v20254_v49, 0.0  ;;  %v20281_v29 = vld [vmem:[#allocation77_spill] sm:$0xff] }
0x1228   : > { %v14078_v43 = vpop.eup %14077  ;;  %14097 = vrsqrt.f32 %v20276_v32  ;;  %vm4782_vm10 = vcmp.eq.f32.partialorder %v20261_v52, inf  ;;  %vm4803_vm11 = vcmp.eq.f32.partialorder %v20262_v0, inf  ;;  %vm4777_vm12 = vcmp.eq.f32.partialorder %v20257_v42, 0.0 }
0x1229   : > { %v14080_v45 = vpop.eup %14079  ;;  %v4915_v22 = vmul.f32 %v14078_v43, %v20278_v25  ;;  %14099 = vrcp.f32 %v4884_v1  ;;  %v4737_v25 = vsel %vm4735_vm2, %v4736_v55, %v4734_v41  ;;  %v4888_v43 = vadd.f32 1e-30, %v4730_v11  ;;  %v20280_v41 = vld [vmem:[#allocation85_spill] sm:$0xff]  ;;  %v20282_v11 = vld [vmem:[#allocation64_spill] sm:$0xff] }
0x122a   : > { %v18311_v6 = vpop.eup %14081  ;;  %14101 = vrcp.f32 %v4887_v61  ;;  %v4741_v55 = vsel %vm4740_vm8, %v20254_v49, %v18221_v48  ;;  %v4762_v48 = vsel %vm4761_vm9, %v20255_v44, %v18228_v63  ;;  %vm4763_vm8 = vcmp.eq.f32.partialorder %v20255_v44, 0.0 }
0x122b   : > { %v14084_v53 = vpop.eup %14083  ;;  %14103 = vrcp.f32 %v4886_v28  ;;  %vm4756_vm9 = vcmp.eq.f32.partialorder %v20256_v62, 0.0  ;;  %vm4796_vm2 = vcmp.eq.f32.partialorder %v20263_v34, inf }
0x122c   : > { %v18330_v2 = vpop.eup %14085  ;;  %14105 = vrcp.f32 %v4888_v43  ;;  %v4755_v43 = vsel %vm4754_vm13, %v20256_v62, %v18236_v5  ;;  %v18410_v5 = vmul.f32 %v18311_v6, %v20265_v59  ;;  %vm4817_vm13 = vcmp.eq.f32.partialorder %v20264_v4, inf  ;;  %v20289_v6 = vld [vmem:[#allocation183_spill] sm:$0xff] }
0x124e   : > { %v7087_v3 = vpop.xlane.xlu1 %7086 }
0x124f   : > { %v7286_v26 = vmul.f32 %v7087_v3, %v20274_v57  ;;  %v7084_v10 = vpop.xlane.xlu0 %7083  ;;  %v18336_v3 = vpop.eup %14087  ;;  %v18339_v57 = vmul.f32 %v14080_v45, %v20264_v4  ;;  %v20279_v45 = vld [vmem:[#allocation86_spill] sm:$0xff] }
0x1250   : > { %v7285_v60 = vmul.f32 %v7084_v10, %v20277_v58  ;;  %v14090_v9 = vpop.eup %14089 }
0x1251   : > { %v18342_v51 = vmul.f32 %v7286_v26, %v18260_v47  ;;  %v4748_v47 = vsel %vm4747_vm3, %v20259_v27, %v4746_v40  ;;  %v4921_v26 = vmul.f32 %v14084_v53, %v20281_v29  ;;  %v4919_v40 = vmul.f32 %v14090_v9, %v20282_v11  ;;  %v20283_v53 = vld [vmem:[#allocation88_spill] sm:$0xff] }
0x1252   : > { %v18345_v33 = vmul.f32 %v7285_v60, %v4911_v38  ;;  %v7093_v10 = vpop.xlane.xlu1 %7092  ;;  %v4750_v60 = vand.u32 2147483648, %v20259_v27  ;;  %v18356_v38 = vpop.eup %14091  ;;  %vm4810_vm3 = vcmp.eq.f32.partialorder %v20265_v59, inf }
0x1253   : > { %v7288_v58 = vmul.f32 %v7093_v10, %v20279_v45  ;;  %v7090_v35 = vpop.xlane.xlu0 %7089  ;;  %v18370_v10 = vpop.eup %14093  ;;  %v20296_v45 = vld [vmem:[#allocation89_spill] sm:$0xff] }
0x1254   : > { %v7287_v61 = vmul.f32 %v7090_v35, %v20280_v41  ;;  %v4889_v41 = vadd.f32 1e-30, %v4737_v25  ;;  %v4751_v28 = vsel %vm4749_vm6, %v4750_v60, %v4748_v47  ;;  %v20286_v47 = vand.u32 2147483648, %v20255_v44 }
0x1255   : > { %v18366_v1 = vmul.f32 %v7288_v58, %v4917_v8  ;;  %v14096_v8 = vpop.eup %14095  ;;  %v4776_v60 = vsel %vm4775_vm15, %v20257_v42, %v18244_v23  ;;  %v4891_v44 = vadd.f32 1e-30, %v4751_v28  ;;  %v20287_v23 = vld [vmem:[#allocation182_spill] sm:$0xff]  ;;  %v20290_v28 = vand.u32 2147483648, %v20257_v42 }
0x1256   : > { %v18373_v56 = vmul.f32 %v7287_v61, %v4915_v22  ;;  %v7099_v35 = vpop.xlane.xlu1 %7098  ;;  %v20284_v22 = vand.u32 2147483648, %v20254_v49  ;;  %v20285_v61 = vld [vmem:[#allocation87_spill] sm:$0xff]  ;;  %v4765_v49 = vsel %vm4763_vm8, %v20286_v47, %v4762_v48  ;;  %14107 = vrcp.f32 %v4889_v41  ;;  %v20291_v47 = vld [vmem:[#allocation184_spill] sm:$0xff]  ;;  %v20293_v41 = vld [vmem:[#allocation90_spill] sm:$0xff] }
0x1257   : > { %v7290_v58 = vmul.f32 %v7099_v35, %v20283_v53  ;;  %v7096_v9 = vpop.xlane.xlu0 %7095  ;;  %14109 = vrsqrt.f32 %v20287_v23  ;;  %vm4770_vm15 = vcmp.eq.f32.partialorder %v20258_v37, 0.0  ;;  %vm4831_vm6 = vcmp.eq.f32.partialorder %v20267_v21, inf }
0x1258   : > { %v4744_v25 = vsel %vm4742_vm7, %v20284_v22, %v4741_v55  ;;  %v7289_v29 = vmul.f32 %v7096_v9, %v20285_v61  ;;  %v18405_v55 = vpop.eup %14097  ;;  %14111 = vrsqrt.f32 %v20289_v6  ;;  %vm4791_vm7 = vcmp.eq.f32.partialorder %v20260_v36, 0.0 }
0x1259   : > { %v18396_v27 = vmul.f32 %v7290_v58, %v4921_v26  ;;  %v14100_v11 = vpop.eup %14099  ;;  %v4890_v48 = vadd.f32 1e-30, %v4744_v25  ;;  %v20288_v58 = vand.u32 2147483648, %v20256_v62  ;;  %v18430_v25 = vmul.f32 %v18330_v2, %v20267_v21 }
0x125a   : > { %v18412_v26 = vmul.f32 %v7289_v29, %v4919_v40  ;;  %v14102_v22 = vpop.eup %14101  ;;  %v4893_v40 = vadd.f32 1e-30, %v4765_v49  ;;  %v4779_v29 = vsel %vm4777_vm12, %v20290_v28, %v4776_v60  ;;  %14113 = vrsqrt.f32 %v20291_v47 }
0x125b   : > { %v4758_v9 = vsel %vm4756_vm9, %v20288_v58, %v4755_v43  ;;  %v4769_v62 = vsel %vm4768_vm4, %v20258_v37, %v18249_v31  ;;  %14115 = vrcp.f32 %v4891_v44  ;;  %v4790_v2 = vsel %vm4789_vm5, %v20260_v36, %v18264_v17  ;;  %v14104_v43 = vpop.eup %14103  ;;  %v20292_v31 = vld [vmem:[#allocation80_spill] sm:$0xff] }
0x125c   : > { %v4892_v42 = vadd.f32 1e-30, %v4758_v9  ;;  %v18447_v49 = vmul.f32 %v18336_v3, %v20268_v15  ;;  %v4925_v60 = vmul.f32 %v14096_v8, %v20292_v31  ;;  %14117 = vrcp.f32 %v4890_v48  ;;  %v20294_v9 = vld [vmem:[#allocation65_spill] sm:$0xff]  ;;  %v14106_v53 = vpop.eup %14105  ;;  %v20300_v31 = vld [vmem:[#allocation92_spill] sm:$0xff] }
0x125d   : > { %v4895_v28 = vadd.f32 1e-30, %v4779_v29  ;;  %v4923_v63 = vmul.f32 %v14100_v11, %v20294_v9  ;;  %14119 = vrcp.f32 %v4893_v40  ;;  %v20295_v17 = vand.u32 2147483648, %v20258_v37  ;;  %v20298_v40 = vld [vmem:[#allocation79_spill] sm:$0xff]  ;;  %v20299_v29 = vld [vmem:[#allocation66_spill] sm:$0xff] }
0x125e   : > { %v4793_v8 = vsel %vm4791_vm7, %v20297_v16, %v4790_v2  ;;  %v4783_v48 = vsel %vm4782_vm10, %v20261_v52, %v18272_v50  ;;  %vm4784_vm4 = vcmp.eq.f32.partialorder %v20261_v52, 0.0  ;;  %vm4824_vm5 = vcmp.eq.f32.partialorder %v20268_v15, inf }
0x125f   : > { %v7105_v58 = vpop.xlane.xlu1 %7104  ;;  %v4772_v61 = vsel %vm4770_vm15, %v20295_v17, %v4769_v62  ;;  %v4929_v37 = vmul.f32 %v14102_v22, %v20298_v40  ;;  %v4927_v62 = vmul.f32 %v14104_v43, %v20299_v29  ;;  %14121 = vrcp.f32 %v4892_v42  ;;  %v20302_v43 = vld [vmem:[#allocation67_spill] sm:$0xff] }
0x1260   : > { %v7292_v44 = vmul.f32 %v7105_v58, %v20293_v41  ;;  %v7102_v35 = vpop.xlane.xlu0 %7101  ;;  %14123 = vrcp.f32 %v4895_v28  ;;  %v4894_v16 = vadd.f32 1e-30, %v4772_v61  ;;  %v4804_v50 = vsel %vm4803_vm11, %v20262_v0, %v18282_v19  ;;  %v14108_v2 = vpop.eup %14107  ;;  %v20303_v17 = vld [vmem:[#allocation91_spill] sm:$0xff] }
0x1261   : > { %v7291_v3 = vmul.f32 %v7102_v35, %v20296_v45  ;;  %vm4805_vm10 = vcmp.eq.f32.partialorder %v20262_v0, 0.0  ;;  %v18479_v42 = vpop.eup %14109  ;;  %v4931_v28 = vmul.f32 %v14106_v53, %v20302_v43  ;;  %v4797_v19 = vsel %vm4796_vm2, %v20263_v34, %v18287_v39  ;;  %v20304_v39 = vld [vmem:[#allocation82_spill] sm:$0xff] }
0x1262   : > { %v18465_v11 = vmul.f32 %v7292_v44, %v4925_v60  ;;  %v4897_v60 = vadd.f32 1e-30, %v4793_v8  ;;  %v20301_v44 = vand.u32 2147483648, %v20261_v52  ;;  %vm4798_vm8 = vcmp.eq.f32.partialorder %v20263_v34, 0.0  ;;  %v18489_v9 = vpop.eup %14111 }
0x1263   : > { %v18469_v35 = vmul.f32 %v7291_v3, %v4923_v63  ;;  %v7111_v36 = vpop.xlane.xlu1 %7110  ;;  %v4818_v8 = vsel %vm4817_vm13, %v20264_v4, %v18339_v57  ;;  %vm4819_vm11 = vcmp.eq.f32.partialorder %v20264_v4, 0.0  ;;  %vm4845_vm9 = vcmp.eq.f32.partialorder %v20270_v7, inf  ;;  %v20312_v63 = vld [vmem:[#allocation68_spill] sm:$0xff] }
0x1264   : > { %v7294_v58 = vmul.f32 %v7111_v36, %v20300_v31  ;;  %v4786_v22 = vsel %vm4784_vm4, %v20301_v44, %v4783_v48  ;;  %v18499_v53 = vpop.eup %14113  ;;  %v4933_v48 = vmul.f32 %v14108_v2, %v20304_v39  ;;  %14125 = vrcp.f32 %v4894_v16  ;;  %v20306_v44 = vld [vmem:[#allocation94_spill] sm:$0xff] }
0x1265   : > { %v7108_v61 = vpop.xlane.xlu0 %7107  ;;  %v4896_v29 = vadd.f32 1e-30, %v4786_v22  ;;  %vm4838_vm12 = vcmp.eq.f32.partialorder %v20271_v46, inf  ;;  %14127 = vrcp.f32 %v4897_v60  ;;  %v20307_v43 = vand.u32 2147483648, %v20263_v34 }
0x1266   : > { %v18491_v52 = vmul.f32 %v7294_v58, %v4929_v37  ;;  %v7293_v3 = vmul.f32 %v7108_v61, %v20303_v17  ;;  %v20305_v37 = vand.u32 2147483648, %v20262_v0  ;;  %v14116_v58 = vpop.eup %14115  ;;  %v20308_v39 = vand.u32 2147483648, %v20264_v4  ;;  %v20309_v4 = vld [vmem:[#allocation93_spill] sm:$0xff] }
0x1267   : > { %v7117_v40 = vpop.xlane.xlu1 %7116  ;;  %v4800_v2 = vsel %vm4798_vm8, %v20307_v43, %v4797_v19  ;;  %v14118_v16 = vpop.eup %14117  ;;  %vm4812_vm2 = vcmp.eq.f32.partialorder %v20265_v59, 0.0  ;;  %v4832_v34 = vsel %vm4831_vm6, %v20267_v21, %v18430_v25  ;;  %vm4833_vm13 = vcmp.eq.f32.partialorder %v20267_v21, 0.0 }
0x1268   : > { %v4807_v36 = vsel %vm4805_vm10, %v20305_v37, %v4804_v50  ;;  %v18508_v57 = vmul.f32 %v7293_v3, %v4927_v62  ;;  %v7296_v61 = vmul.f32 %v7117_v40, %v20306_v44  ;;  %v4821_v0 = vsel %vm4819_vm11, %v20308_v39, %v4818_v8  ;;  %v14120_v50 = vpop.eup %14119  ;;  %v20310_v39 = vld [vmem:[#allocation81_spill] sm:$0xff] }
0x1269   : > { %v7114_v22 = vpop.xlane.xlu0 %7113  ;;  %v4811_v62 = vsel %vm4810_vm3, %v20265_v59, %v18410_v5  ;;  %v4844_v5 = vmul.f32 %v18356_v38, %v20270_v7  ;;  %14129 = vrcp.f32 %v4896_v29  ;;  %v4899_v40 = vadd.f32 1e-30, %v4807_v36  ;;  %v14122_v43 = vpop.eup %14121 }
0x126a   : > { %v18530_v19 = vmul.f32 %v7296_v61, %v4933_v48  ;;  %v7295_v3 = vmul.f32 %v7114_v22, %v20309_v4  ;;  %v4898_v37 = vadd.f32 1e-30, %v4800_v2  ;;  %vm4859_vm15 = vcmp.eq.f32.partialorder %v20276_v32, inf  ;;  %v20311_v48 = vld [vmem:[#allocation96_spill] sm:$0xff]  ;;  %v14124_v4 = vpop.eup %14123 }
0x126b   : > { %v7123_v8 = vpop.xlane.xlu1 %7122  ;;  %v4937_v60 = vmul.f32 %v14116_v58, %v20310_v39  ;;  %v4935_v22 = vmul.f32 %v14118_v16, %v20312_v63  ;;  %vm4852_vm3 = vcmp.eq.f32.partialorder %v20287_v23, inf  ;;  %v4901_v38 = vadd.f32 1e-30, %v4821_v0  ;;  %v20315_v0 = vld [vmem:[#allocation95_spill] sm:$0xff] }
0x126c   : > { %v18537_v25 = vmul.f32 %v7295_v3, %v4931_v28  ;;  %v7298_v61 = vmul.f32 %v7123_v8, %v20311_v48  ;;  %v20313_v29 = vand.u32 2147483648, %v20265_v59  ;;  %v20314_v2 = vand.u32 2147483648, %v20267_v21  ;;  %v20323_v21 = vld [vmem:[#allocation97_spill] sm:$0xff] }
0x126d   : > { %v7120_v44 = vpop.xlane.xlu0 %7119  ;;  %v4825_v63 = vsel %vm4824_vm5, %v20268_v15, %v18447_v49  ;;  %vm4826_vm6 = vcmp.eq.f32.partialorder %v20268_v15, 0.0  ;;  %v4837_v59 = vmul.f32 %v18370_v10, %v20271_v46  ;;  %14131 = vrcp.f32 %v4899_v40  ;;  %v20318_v40 = vld [vmem:[#allocation113_spill] sm:$0xff] }
0x126e   : > { %v4814_v36 = vsel %vm4812_vm2, %v20313_v29, %v4811_v62  ;;  %v4835_v28 = vsel %vm4833_vm13, %v20314_v2, %v4832_v34  ;;  %v18557_v16 = vmul.f32 %v7298_v61, %v4937_v60  ;;  %v7297_v3 = vmul.f32 %v7120_v44, %v20315_v0  ;;  %v14126_v8 = vpop.eup %14125  ;;  %v20316_v44 = vld [vmem:[#allocation135_spill] sm:$0xff] }
0x126f   : > { %v4858_v49 = vmul.f32 %v18405_v55, %v20276_v32  ;;  %14133 = vrcp.f32 %v4898_v37  ;;  %v4900_v60 = vadd.f32 1e-30, %v4814_v36  ;;  %vm4873_vm7 = vcmp.eq.f32.partialorder %v20289_v6, inf  ;;  %v14128_v58 = vpop.eup %14127 }
0x1270   : > { %v18567_v34 = vmul.f32 %v7297_v3, %v4935_v22  ;;  %v4941_v39 = vmul.f32 %v14120_v50, %v20316_v44  ;;  %14135 = vrcp.f32 %v4901_v38  ;;  %v4903_v10 = vadd.f32 1e-30, %v4835_v28  ;;  %v20319_v50 = vld [vmem:[#allocation136_spill] sm:$0xff]  ;;  %v20320_v28 = vld [vmem:[#allocation114_spill] sm:$0xff] }
0x1271   : > { %v7129_v61 = vpop.xlane.xlu1 %7128  ;;  %v20317_v29 = vand.u32 2147483648, %v20268_v15  ;;  %vm4866_vm4 = vcmp.eq.f32.partialorder %v20291_v47, inf  ;;  %v4846_v36 = vsel %vm4845_vm9, %v20270_v7, %v4844_v5  ;;  %vm4847_vm5 = vcmp.eq.f32.partialorder %v20270_v7, 0.0 }
0x1272   : > { %v7300_v37 = vmul.f32 %v7129_v61, %v20318_v40  ;;  %v7126_v22 = vpop.xlane.xlu0 %7125  ;;  %v4939_v38 = vmul.f32 %v14122_v43, %v20319_v50  ;;  %vm4840_vm10 = vcmp.eq.f32.partialorder %v20271_v46, 0.0  ;;  %v4851_v3 = vmul.f32 %v18479_v42, %v20287_v23  ;;  %v20321_v43 = vld [vmem:[#allocation137_spill] sm:$0xff]  ;;  %v20324_v40 = vld [vmem:[#allocation138_spill] sm:$0xff] }
0x1273   : > { %v4828_v2 = vsel %vm4826_vm6, %v20317_v29, %v4825_v63  ;;  %v7299_v15 = vmul.f32 %v7126_v22, %v20320_v28  ;;  %v4839_v63 = vsel %vm4838_vm12, %v20271_v46, %v4837_v59  ;;  %v4872_v44 = vmul.f32 %v18489_v9, %v20289_v6  ;;  %v14130_v5 = vpop.eup %14129 }
0x1274   : > { %v18591_v61 = vmul.f32 %v7300_v37, %v4941_v39  ;;  %14137 = vrcp.f32 %v4900_v60  ;;  %v4945_v22 = vmul.f32 %v14124_v4, %v20321_v43  ;;  %v4902_v55 = vadd.f32 1e-30, %v4828_v2 }
0x1275   : > { %v18593_v29 = vmul.f32 %v7299_v15, %v4939_v38  ;;  %v7135_v50 = vpop.xlane.xlu1 %7134  ;;  %v20322_v59 = vand.u32 2147483648, %v20270_v7  ;;  %v4943_v42 = vmul.f32 %v14126_v8, %v20324_v40  ;;  %14139 = vrcp.f32 %v4903_v10  ;;  %v20326_v38 = vld [vmem:[#allocation139_spill] sm:$0xff] }
0x1276   : > { %v7302_v28 = vmul.f32 %v7135_v50, %v20323_v21  ;;  %v7132_v0 = vpop.xlane.xlu0 %7131  ;;  %v20325_v9 = vand.u32 2147483648, %v20271_v46  ;;  %v4860_v4 = vsel %vm4859_vm15, %v20276_v32, %v4858_v49  ;;  %vm4861_vm8 = vcmp.eq.f32.partialorder %v20276_v32, 0.0  ;;  %v20328_v50 = vld [vmem:[#allocation140_spill] sm:$0xff] }
0x1277   : > { %v4849_v62 = vsel %vm4847_vm5, %v20322_v59, %v4846_v36  ;;  %v12938_v60 = vpack.c.bf16 %v18591_v61, %v18593_v29  ;;  %v7301_v37 = vmul.f32 %v7132_v0, %v20154_v24  ;;  %v4853_v8 = vsel %vm4852_vm3, %v20287_v23, %v4851_v3  ;;  %v14132_v46 = vpop.eup %14131  ;;  %v14602_v61 = vld [vmem:[#allocation2 + $0x10] sm:$0xff] }
0x1278   : > { %v4842_v39 = vsel %vm4840_vm10, %v20325_v9, %v4839_v63  ;;  %v7334_v7 = vmul.f32 %v7302_v28, %v4945_v22  ;;  %v4905_v2 = vadd.f32 1e-30, %v4849_v62  ;;  %vm4854_vm11 = vcmp.eq.f32.partialorder %v20287_v23, 0.0 }
0x1279   : > { %v4865_v10 = vmul.f32 %v18499_v53, %v20291_v47  ;;  %v4869_v0 = vand.u32 2147483648, %v20291_v47  ;;  %v7333_v40 = vmul.f32 %v7301_v37, %v4943_v42  ;;  %v7141_v36 = vpop.xlane.xlu1 %7140  ;;  %14141 = vrcp.f32 %v4902_v55  ;;  %v14134_v49 = vpop.eup %14133 }
0x127a   : > { %v4949_v15 = vmul.f32 %v14128_v58, %v20326_v38  ;;  %v7304_v62 = vmul.f32 %v7141_v36, %v20155_v18  ;;  %v7138_v28 = vpop.xlane.xlu0 %7137  ;;  %v4904_v63 = vadd.f32 1e-30, %v4842_v39  ;;  %v20327_v3 = vand.u32 2147483648, %v20276_v32  ;;  %v14136_v22 = vpop.eup %14135  ;;  %v20332_v38 = vld [vmem:[#allocation142_spill] sm:$0xff] }
0x127b   : > { %v4947_v53 = vmul.f32 %v14130_v5, %v20328_v50  ;;  %v7303_v59 = vmul.f32 %v7138_v28, %v20156_v14  ;;  %v12908_v42 = vpack.c.bf16 %v7334_v7, %v7333_v40  ;;  %v20329_v55 = vand.u32 2147483648, %v20287_v23  ;;  %v20330_v7 = vld [vmem:[#allocation141_spill] sm:$0xff] }
0x127c   : > { %v4863_v43 = vsel %vm4861_vm8, %v20327_v3, %v4860_v4  ;;  %v7336_v9 = vmul.f32 %v7304_v62, %v4949_v15  ;;  %14143 = vrcp.f32 %v4905_v2  ;;  %v4874_v39 = vsel %vm4873_vm7, %v20289_v6, %v4872_v44 }
0x127d   : > { %v4856_v58 = vsel %vm4854_vm11, %v20329_v55, %v4853_v8  ;;  %vm4875_vm9 = vcmp.eq.f32.partialorder %v20289_v6, 0.0  ;;  %v7335_v32 = vmul.f32 %v7303_v59, %v4947_v53  ;;  %v7147_v37 = vpop.xlane.xlu1 %7146  ;;  %12909 = vmatprep.subr.bf16.mxu1 %v12908_v42  ;;  %v4907_v5 = vadd.f32 1e-30, %v4863_v43  ;;  %v20336_v55 = vld [vmem:[#allocation144_spill] sm:$0xff] }
0x127e   : > { %v4867_v4 = vsel %vm4866_vm4, %v20291_v47, %v4865_v10  ;;  %vm4868_vm12 = vcmp.eq.f32.partialorder %v20291_v47, 0.0  ;;  %v14138_v23 = vpop.eup %14137  ;;  %v4953_v8 = vmul.f32 %v14132_v46, %v20330_v7  ;;  %v7306_v2 = vmul.f32 %v7147_v37, %v20158_v13  ;;  %v7144_v40 = vpop.xlane.xlu0 %7143 }
0x127f   : > { %v20331_v44 = vpack.c.bf16 %v18342_v51, %v18345_v33  ;;  %14145 = vrcp.f32 %v4904_v63  ;;  %v4906_v36 = vadd.f32 1e-30, %v4856_v58  ;;  %v4951_v15 = vmul.f32 %v14134_v49, %v20332_v38  ;;  %v14140_v46 = vpop.eup %14139  ;;  %v20334_v51 = vld [vmem:[#allocation143_spill] sm:$0xff] }
0x1280   : > { %v7305_v62 = vmul.f32 %v7144_v40, %v20159_v20  ;;  %v12912_v28 = vpack.c.bf16 %v7336_v9, %v7335_v32  ;;  %v20333_v10 = vand.u32 2147483648, %v20289_v6  ;;  %v7338_v3 = vmul.f32 %v7306_v2, %v4953_v8 }
0x1281   : > { %12911 = vmatpush3.bf16.msra.mxu1 %v20331_v44  ;;  %v4870_v43 = vsel %vm4868_vm12, %v4869_v0, %v4867_v4  ;;  %v7153_v53 = vpop.xlane.xlu1 %7152  ;;  %14147 = vrcp.f32 %v4907_v5  ;;  %v4957_v33 = vmul.f32 %v14136_v22, %v20334_v51  ;;  %v20335_v49 = vpack.c.bf16 %v18366_v1, %v18373_v56  ;;  %v20337_v4 = vld [vmem:[#allocation145_spill] sm:$0xff]  ;;  %v20340_v44 = vld [vmem:[#allocation106_spill] sm:$0xff]  ;;  %v20344_v51 = vld [vmem:[#allocation148_spill] sm:$0xff] }
0x1282   : > { %v4877_v47 = vsel %vm4875_vm9, %v20333_v10, %v4874_v39  ;;  %v7337_v50 = vmul.f32 %v7305_v62, %v4951_v15  ;;  %12913 = vmatprep.subr.bf16.mxu1 %v12912_v28  ;;  %v7308_v63 = vmul.f32 %v7153_v53, %v20161_v12  ;;  %v7150_v59 = vpop.xlane.xlu0 %7149  ;;  %14149 = vrcp.f32 %v4906_v36 }
0x1283   : > { %v4909_v42 = vadd.f32 1e-30, %v4877_v47  ;;  %v14142_v6 = vpop.eup %14141  ;;  %v4955_v58 = vmul.f32 %v14138_v23, %v20336_v55  ;;  %v7307_v0 = vmul.f32 %v7150_v59, %v20162_v30  ;;  %v4908_v39 = vadd.f32 1e-30, %v4870_v43  ;;  %v20339_v23 = vld [vmem:[#allocation146_spill] sm:$0xff] }
0x1284   : > { %v12916_v9 = vpack.c.bf16 %v7338_v3, %v7337_v50  ;;  %v7340_v32 = vmul.f32 %v7308_v63, %v4957_v33  ;;  %v4961_v7 = vmul.f32 %v14140_v46, %v20337_v4  ;;  %v20338_v1 = vpack.c.bf16 %v18396_v27, %v18412_v26  ;;  %v20342_v27 = vld [vmem:[#allocation147_spill] sm:$0xff]  ;;  %v20345_v63 = vld [vmem:[#allocation108_spill] sm:$0xff] }
0x1285   : > { %12915 = vmatpush3.bf16.msra.mxu1 %v20335_v49  ;;  %v7339_v37 = vmul.f32 %v7307_v0, %v4955_v58  ;;  %v7159_v5 = vpop.xlane.xlu1 %7158  ;;  %14151 = vrcp.f32 %v4909_v42  ;;  %v4959_v2 = vmul.f32 %v14142_v6, %v20339_v23  ;;  %v20341_v10 = vpack.c.bf16 %v18465_v11, %v18469_v35  ;;  %v20343_v46 = vld [vmem:[#allocation107_spill] sm:$0xff]  ;;  %v20347_v35 = vld [vmem:[#allocation149_spill] sm:$0xff] }
0x1286   : > { %12917 = vmatprep.subr.bf16.mxu1 %v12916_v9  ;;  %v14144_v22 = vpop.eup %14143  ;;  %v7310_v56 = vmul.f32 %v7159_v5, %v20164_v54  ;;  %v7156_v8 = vpop.xlane.xlu0 %7155  ;;  %14153 = vrcp.f32 %v4908_v39  ;;  %v20346_v11 = vpack.c.bf16 %v18491_v52, %v18508_v57  ;;  %v20348_v58 = vld [vmem:[#allocation109_spill] sm:$0xff]  ;;  %v20350_v5 = vld [vmem:[#allocation110_spill] sm:$0xff]  ;;  %v20351_v23 = vld [vmem:[#allocation151_spill] sm:$0xff] }
0x1287   : > { %v7309_v40 = vmul.f32 %v7156_v8, %v20340_v44  ;;  %v12920_v36 = vpack.c.bf16 %v7340_v32, %v7339_v37  ;;  %v4965_v26 = vmul.f32 %v14144_v22, %v20342_v27  ;;  %v20349_v32 = vld [vmem:[#allocation150_spill] sm:$0xff]  ;;  %v20352_v52 = vld [vmem:[#allocation111_spill] sm:$0xff] }
0x1288   : > { %v7342_v15 = vmul.f32 %v7310_v56, %v4961_v7  ;;  %v7615_v27 = vld [vmem:[#allocation17 + $0x20] sm:$0xff] }
0x1289   : > { %12919 = vmatpush3.bf16.msra.mxu1 %v20338_v1  ;;  %v14146_v38 = vpop.eup %14145  ;;  %v7341_v62 = vmul.f32 %v7309_v40, %v4959_v2  ;;  %v20353_v40 = vpack.c.bf16 %v18530_v19, %v18537_v25 }
0x128a   : > { %12921 = vmatprep.subr.bf16.mxu1 %v12920_v36  ;;  %v7165_v28 = vpop.xlane.xlu1 %7164  ;;  %v4963_v33 = vmul.f32 %v14146_v38, %v20344_v51  ;;  %v20354_v38 = vld [vmem:[#allocation152_spill] sm:$0xff] }
0x128b   : > { %v14148_v47 = vpop.eup %14147  ;;  %v7312_v3 = vmul.f32 %v7165_v28, %v20343_v46  ;;  %v7162_v43 = vpop.xlane.xlu0 %7161  ;;  %v12924_v50 = vpack.c.bf16 %v7342_v15, %v7341_v62  ;;  %v20355_v62 = vld [vmem:[#allocation112_spill] sm:$0xff] }
0x128c   : > { %v14150_v53 = vpop.eup %14149  ;;  %v7311_v49 = vmul.f32 %v7162_v43, %v20345_v63  ;;  %v4969_v55 = vmul.f32 %v14148_v47, %v20347_v35  ;;  %v20356_v43 = vpack.c.bf16 %v18557_v16, %v18567_v34  ;;  %v14600_v34 = vld [vmem:[#allocation2 + $0x8] sm:$0xff]  ;;  %v14601_v35 = vld [vmem:[#allocation2 + $0x18] sm:$0xff] }
0x128d   : > { %12923 = vmatpush3.bf16.msra.mxu1 %v20341_v10  ;;  %v7344_v59 = vmul.f32 %v7312_v3, %v4965_v26  ;;  %v4967_v37 = vmul.f32 %v14150_v53, %v20349_v32  ;;  %v7616_v26 = vld [vmem:[#allocation17 + $0x28] sm:$0xff] }
0x128e   : > { %12925 = vmatprep.subr.bf16.mxu1 %v12924_v50  ;;  %v7343_v42 = vmul.f32 %v7311_v49, %v4963_v33  ;;  %v7171_v6 = vpop.xlane.xlu1 %7170  ;;  %v12956_v51 = vpack.c.bf16 %v7616_v26, %v7615_v27  ;;  %v7617_v33 = vld [vmem:[#allocation17 + $0x30] sm:$0xff]  ;;  %v7618_v49 = vld [vmem:[#allocation17 + $0x38] sm:$0xff]  ;;  %v14603_v26 = vld [vmem:[%s15943_s15] sm:$0xff] }
0x128f   : > { %v7314_v0 = vmul.f32 %v7171_v6, %v20348_v58  ;;  %v7168_v9 = vpop.xlane.xlu0 %7167  ;;  %v14152_v39 = vpop.eup %14151 }
0x1290   : > { %v7313_v22 = vmul.f32 %v7168_v9, %v20350_v5  ;;  %v12928_v4 = vpack.c.bf16 %v7344_v59, %v7343_v42  ;;  %v14154_v7 = vpop.eup %14153  ;;  %v4973_v2 = vmul.f32 %v14152_v39, %v20351_v23  ;;  %v14599_v42 = vld [vmem:[#allocation2] sm:$0xff] }
0x1291   : > { %12927 = vmatpush3.bf16.msra.mxu1 %v20346_v11  ;;  %v7346_v56 = vmul.f32 %v7314_v0, %v4969_v55  ;;  %v4971_v15 = vmul.f32 %v14154_v7, %v20354_v38  ;;  %v12960_v11 = vpack.c.bf16 %v7618_v49, %v7617_v33  ;;  %v20360_v33 = vld [vmem:[#allocation121_spill] sm:$0xff]  ;;  %v20361_v49 = vld [vmem:[#allocation122_spill] sm:$0xff] }
0x1292   : > { %v7345_v1 = vmul.f32 %v7313_v22, %v4967_v37  ;;  %12929 = vmatprep.subr.bf16.mxu1 %v12928_v4  ;;  %v7177_v8 = vpop.xlane.xlu1 %7176 }
0x1293   : > { %v7316_v57 = vmul.f32 %v7177_v8, %v20352_v52  ;;  %v7174_v36 = vpop.xlane.xlu0 %7173 }
0x1294   : > { %v7315_v28 = vmul.f32 %v7174_v36, %v20355_v62  ;;  %v12932_v10 = vpack.c.bf16 %v7346_v56, %v7345_v1 }
0x1295   : > { %12931 = vmatpush3.bf16.msra.mxu1 %v20353_v40  ;;  %v7348_v47 = vmul.f32 %v7316_v57, %v4973_v2 }
0x1296   : > { %v7347_v3 = vmul.f32 %v7315_v28, %v4971_v15  ;;  %12933 = vmatprep.subr.bf16.mxu1 %v12932_v10  ;;  %v1802_v50 = vpop.permute.xlu1 %1801 }
0x1297   : > { %14155 = vrcp.f32 %v1802_v50 }
0x1298   : > { %v12936_v53 = vpack.c.bf16 %v7348_v47, %v7347_v3 }
0x1299   : > { %12935 = vmatpush3.bf16.msra.mxu1 %v20356_v43  ;;  %v14604_v43 = vld [vmem:[%s15943_s15 + $0x8] sm:$0xff]  ;;  %s20388_s15 = sld [smem:[#allocation44_spill]] }
0x129a   : > { %12937 = vmatprep.subr.bf16.mxu1 %v12936_v53 }
0x129b   : > { %v1797_v19 = vpop.permute.xlu0 %1796 }
0x129c   : > { %14157 = vrcp.f32 %v1797_v19  ;;  %v20358_v19 = vld [vmem:[#allocation119_spill] sm:$0xff] }
0x129d   : > { %12939 = vmatpush3.bf16.msra.mxu1 %v12938_v60  ;;  %v10881_v60 = vld [vmem:[%s20179_s18 + $0x1] ss:$0 sm:$0xff] }
0x129e   : > { %12957 = vmatprep.subr.bf16.mxu1 %v12956_v51 }
0x12a1   : > { %v14156_v25 = vpop.eup %14155 }
0x12a2   : > { %v1809_v55 = vmul.f32 %v14601_v35, %v14156_v25  ;;  %v1808_v29 = vmul.f32 %v14602_v61, %v14156_v25  ;;  %v20359_v25 = vld [vmem:[#allocation120_spill] sm:$0xff]  ;;  %v20368_v35 = vld [vmem:[#allocation129_spill] sm:$0xff]  ;;  %v20370_v61 = vld [vmem:[#allocation131_spill] sm:$0xff] }
0x12a6   : > { %v14158_v59 = vpop.eup %14157 }
0x12a7   : > { %v1805_v16 = vmul.f32 %v14599_v42, %v14158_v59  ;;  %v1806_v6 = vmul.f32 %v14600_v34, %v14158_v59  ;;  %v20362_v59 = vld [vmem:[#allocation123_spill] sm:$0xff]  ;;  %v20363_v42 = vld [vmem:[#allocation124_spill] sm:$0xff]  ;;  %v20365_v34 = vld [vmem:[#allocation126_spill] sm:$0xff] }
0x12a9   : > { %7413 = vmatprep.mubr.f32.mxu1 %v1806_v6  ;;  %v20366_v6 = vld [vmem:[#allocation127_spill] sm:$0xff] }
0x12aa   : > { %7414 = vmatmul.mubr.f32.vlgmr.msra.gmra.mrb[146].mxu1 %v1805_v16  ;;  %v20364_v16 = vld [vmem:[#allocation125_spill] sm:$0xff] }
0x12ab   : > { %7418 = vmatprep.mubr.f32.mxu1 %v1809_v55  ;;  %12959 = vmatpush3.bf16.msra.mxu1 %v12956_v51  ;;  %v20357_v51 = vld [vmem:[#allocation118_spill] sm:$0xff] }
0x12ac   : > { %12961 = vmatprep.subr.bf16.mxu1 %v12960_v11  ;;  %v20369_v55 = vld [vmem:[#allocation130_spill] sm:$0xff] }
0x12ae   : > { %7419 = vmatmul.mubr.f32.gmra.mrb[148].mxu1 %v1808_v29  ;;  %v20371_v29 = vld [vmem:[#allocation132_spill] sm:$0xff] }
0x12af   : > { %12963 = vmatpush3.bf16.msra.mxu1 %v12960_v11  ;;  %v20367_v11 = vld [vmem:[#allocation128_spill] sm:$0xff] }
0x12ca   : > { %v12406_v0 = vpop.f32.mrb[106].mxu0 }
0x12cb   : > { %v7599_v9 = vadd.f32 %v12406_v0, %v10881_v60  ;;  %v7581_v39 = vpop.f32.mrb[107].mxu0  ;;  %v20373_v0 = vld [vmem:[#allocation134_spill] sm:$0xff] }
0x12cc   : > { %v7598_v32 = vadd.f32 %v10881_v60, %v7581_v39  ;;  %v20372_v60 = vld [vmem:[#allocation133_spill] sm:$0xff]  ;;  %v20375_v39 = vld [vmem:[#allocation55_spill] sm:$0xff] }
0x12cd   : > { %v7601_v37 = vsub.f32 0.0, %v7599_v9 }
0x12ce   : > { %v7600_v22 = vsub.f32 0.0, %v7598_v32 }
0x12cf   : > { %v7604_v4 = vmul.f32 1.442695, %v7601_v37  ;;  %v20377_v37 = vld [vmem:[#allocation56_spill] sm:$0xff] }
0x12d0   : > { %v7602_v7 = vmul.f32 1.442695, %v7600_v22  ;;  %v20378_v22 = vld [vmem:[#allocation72_spill] sm:$0xff] }
0x12d1   : > { %14159 = vpow2.f32 %v7604_v4  ;;  %v20379_v4 = vld [vmem:[#allocation57_spill] sm:$0xff] }
0x12d2   : > { %14161 = vpow2.f32 %v7602_v7  ;;  %v20380_v7 = vld [vmem:[#allocation71_spill] sm:$0xff] }
0x12db   : > { %v14160_v56 = vpop.eup %14159 }
0x12dc   : > { %v14162_v1 = vpop.eup %14161  ;;  %v7607_v8 = vadd.f32 1.0, %v14160_v56  ;;  %v20381_v56 = vld [vmem:[#allocation58_spill] sm:$0xff] }
0x12dd   : > { %v7606_v23 = vadd.f32 1.0, %v14162_v1  ;;  %v10883_v1 = vld [vmem:[%s20181_s5 + $0x1] ss:$0 sm:$0xff] }
0x12de   : > { %14163 = vrcp.f32 %v7607_v8  ;;  %v20382_v8 = vld [vmem:[#allocation74_spill] sm:$0xff] }
0x12df   : > { %14165 = vrcp.f32 %v7606_v23 }
0x12e8   : > { %v14164_v2 = vpop.eup %14163 }
0x12e9   : > { %v14166_v57 = vpop.eup %14165  ;;  %v7613_v36 = vmul.f32 %v14164_v2, %v7599_v9  ;;  %v20374_v9 = vld [vmem:[#allocation70_spill] sm:$0xff] }
0x12ea   : > { %v7612_v40 = vmul.f32 %v14166_v57, %v7598_v32  ;;  %v20376_v32 = vld [vmem:[#allocation69_spill] sm:$0xff] }
0x12ec   : > { %12415 = vmatprep.mubr.msk.f32.mxu1 %vm1902_vm1, %v7612_v40  ;;  %v20383_v40 = vld [vmem:[#allocation59_spill] sm:$0xff] }
0x12ed   : > { %12416 = vmatmul.mubr.msk.f32.vlgmr.msra.gmra.mrb[150].mxu1 %vm1902_vm1, %v7613_v36 }
0x137d   : > { %v11574_v38 = vpop.f32.mrb[146].mxu1 }
0x137e   : > { %v11575_v15 = vpop.f32.mrb[147].mxu1 }
0x137f   : > { %v11576_v28 = vadd.f32 %v11575_v15, %v11574_v38  ;;  %v20384_v38 = vld [vmem:[#allocation73_spill] sm:$0xff] }
0x1381   : > { %v11577_v10 = vpop.f32.mrb[148].mxu1  ;;  %v7708_v3 = vadd.f32 %v14603_v26, %v11576_v28  ;;  %v20386_v26 = vld [vmem:[#allocation76_spill] sm:$0xff] }
0x1382   : > { %v11578_v47 = vpop.f32.mrb[149].mxu1 }
0x1383   : > { %v11579_v27 = vadd.f32 %v11578_v47, %v11577_v10  ;;  %v20385_v47 = vld [vmem:[#allocation60_spill] sm:$0xff] }
0x1385   : > { %v7709_v50 = vadd.f32 %v14604_v43, %v11579_v27 }
0x1387   : > { %v12964_v53 = vpack.c.bf16 %v7709_v50, %v7708_v3 }
0x1389   : > { %12965 = vmatprep.subr.bf16.mxu0 %v12964_v53 }
0x138a   : > { %12967 = vmatpush3.bf16.msra.mxu0 %v12964_v53  ;;  %v20387_v53 = vld [vmem:[#allocation61_spill] sm:$0xff] }
0x138d   : > { %12423 = vmatmul.mubr.msk.f32.vlgmr.msra.gmra.mrb[108].mxu0 %vm1267_vm0, %v20357_v51 }
0x138e   : > { %12425 = vmatprep.mubr.msk.f32.mxu0 %vm1267_vm0, %v20358_v19 }
0x1391   : > { %12426 = vmatmul.mubr.msk.f32.gmra.mrb[110].mxu0 %vm1267_vm0, %v20359_v25 }
0x1392   : > { %12428 = vmatprep.mubr.msk.f32.mxu0 %vm1267_vm0, %v20360_v33 }
0x1395   : > { %12429 = vmatmul.mubr.msk.f32.gmra.mrb[112].mxu0 %vm1267_vm0, %v20361_v49 }
0x1396   : > { %12431 = vmatprep.mubr.msk.f32.mxu0 %vm1267_vm0, %v20362_v59 }
0x1399   : > { %12432 = vmatmul.mubr.msk.f32.gmra.mrb[114].mxu0 %vm1267_vm0, %v20363_v42 }
0x139a   : > { %12434 = vmatprep.mubr.msk.f32.mxu0 %vm1267_vm0, %v20364_v16 }
0x139d   : > { %12435 = vmatmul.mubr.msk.f32.gmra.mrb[116].mxu0 %vm1267_vm0, %v20365_v34 }
0x139e   : > { %12437 = vmatprep.mubr.msk.f32.mxu0 %vm1267_vm0, %v20366_v6 }
0x13a1   : > { %12438 = vmatmul.mubr.msk.f32.gmra.mrb[118].mxu0 %vm1267_vm0, %v20367_v11 }
0x13a2   : > { %12440 = vmatprep.mubr.msk.f32.mxu0 %vm1267_vm0, %v20368_v35 }
0x13a5   : > { %12441 = vmatmul.mubr.msk.f32.gmra.mrb[120].mxu0 %vm1267_vm0, %v20369_v55 }
0x13a6   : > { %12443 = vmatprep.mubr.msk.f32.mxu0 %vm1267_vm0, %v20370_v61 }
0x13a9   : > { %12444 = vmatmul.mubr.msk.f32.gmra.mrb[122].mxu0 %vm1267_vm0, %v20371_v29 }
0x13aa   : > { %12446 = vmatprep.mubr.msk.f32.mxu0 %vm1267_vm0, %v20372_v60 }
0x13ad   : > { %12447 = vmatmul.mubr.msk.f32.gmra.mrb[124].mxu0 %vm1267_vm0, %v20373_v0 }
0x13ae   : > { %12449 = vmatprep.mubr.msk.f32.mxu0 %vm1267_vm0, %v20374_v9 }
0x13b1   : > { %12450 = vmatmul.mubr.msk.f32.gmra.mrb[126].mxu0 %vm1267_vm0, %v20375_v39 }
0x13b2   : > { %12452 = vmatprep.mubr.msk.f32.mxu0 %vm1267_vm0, %v20376_v32 }
0x13b5   : > { %12453 = vmatmul.mubr.msk.f32.gmra.mrb[128].mxu0 %vm1267_vm0, %v20377_v37 }
0x13b6   : > { %12455 = vmatprep.mubr.msk.f32.mxu0 %vm1267_vm0, %v20378_v22 }
0x13b9   : > { %12456 = vmatmul.mubr.msk.f32.gmra.mrb[130].mxu0 %vm1267_vm0, %v20379_v4 }
0x13ba   : > { %12458 = vmatprep.mubr.msk.f32.mxu0 %vm1267_vm0, %v20380_v7 }
0x13bd   : > { %12459 = vmatmul.mubr.msk.f32.gmra.mrb[132].mxu0 %vm1267_vm0, %v20381_v56 }
0x13be   : > { %12461 = vmatprep.mubr.msk.f32.mxu0 %vm1267_vm0, %v20382_v8 }
0x13c0   : > { %v12417_v23 = vpop.f32.mrb[150].mxu1 }
0x13c1   : > { %v7705_v2 = vadd.f32 %v12417_v23, %v10883_v1  ;;  %v7699_v57 = vpop.f32.mrb[151].mxu1  ;;  %12462 = vmatmul.mubr.msk.f32.gmra.mrb[134].mxu0 %vm1267_vm0, %v20383_v40 }
0x13c2   : > { %v7700_v36 = vadd.f32 %v10883_v1, %v7699_v57  ;;  %12464 = vmatprep.mubr.msk.f32.mxu0 %vm1267_vm0, %v20384_v38 }
0x13c3   : > { %v7713_v15 = vmul.f32 0.70710677, %v7705_v2 }
0x13c4   : > { %v7712_v28 = vmul.f32 0.70710677, %v7700_v36 }
0x13c5   : > { %v7715_v10 = vand.u32 2147483647, %v7713_v15  ;;  %12465 = vmatmul.mubr.msk.f32.gmra.mrb[136].mxu0 %vm1267_vm0, %v20385_v47  ;;  %vm7755_vm2 = vcmp.lt.f32.partialorder %v7713_v15, 0.0 }
0x13c6   : > { %v7714_v27 = vand.u32 2147483647, %v7712_v28  ;;  %12467 = vmatprep.mubr.msk.f32.mxu0 %vm1267_vm0, %v20386_v26  ;;  %vm7754_vm13 = vcmp.lt.f32.partialorder %v7712_v28, 0.0 }
0x13c7   : > { %v7717_v3 = vmul.f32 0.3275911, %v7715_v10  ;;  %v7743_v19 = vmul.f32 %v7715_v10, %v7715_v10 }
0x13c8   : > { %v7716_v43 = vmul.f32 0.3275911, %v7714_v27  ;;  %v7742_v25 = vmul.f32 %v7714_v27, %v7714_v27 }
0x13c9   : > { %v7719_v50 = vadd.f32 1.0, %v7717_v3  ;;  %12468 = vmatmul.mubr.msk.f32.gmra.mrb[138].mxu0 %vm1267_vm0, %v20387_v53  ;;  %v7745_v49 = vsub.f32 0.0, %v7743_v19 }
0x13ca   : > { %v7718_v51 = vadd.f32 1.0, %v7716_v43  ;;  %v7744_v42 = vsub.f32 0.0, %v7742_v25  ;;  %v7711_v43 = vmul.f32 0.5, %v7705_v2 }
0x13cb   : > { %14167 = vrcp.f32 %v7719_v50  ;;  %v7748_v11 = vmul.f32 1.442695, %v7745_v49 }
0x13cc   : > { %14169 = vrcp.f32 %v7718_v51  ;;  %v7746_v55 = vmul.f32 1.442695, %v7744_v42  ;;  %v7710_v51 = vmul.f32 0.5, %v7700_v36 }
0x13cd   : > { %14171 = vpow2.f32 %v7748_v11 }
0x13ce   : > { %14173 = vpow2.f32 %v7746_v55  ;;  %v10920_v55 = vld [vmem:[%s20005_s22 + $0x40] sm:$0xff] }
0x13d5   : > { %v14168_v33 = vpop.eup %14167 }
0x13d6   : > { %v14170_v59 = vpop.eup %14169  ;;  %v7725_v16 = vmul.f32 1.0614054, %v14168_v33 }
0x13d7   : > { %v7724_v34 = vmul.f32 1.0614054, %v14170_v59  ;;  %v14172_v8 = vpop.eup %14171 }
0x13d8   : > { %v7727_v6 = vadd.f32 -1.4531521, %v7725_v16  ;;  %v14174_v57 = vpop.eup %14173 }
0x13d9   : > { %v7726_v35 = vadd.f32 -1.4531521, %v7724_v34 }
0x13da   : > { %v7729_v61 = vmul.f32 %v14168_v33, %v7727_v6 }
0x13db   : > { %v7728_v29 = vmul.f32 %v14170_v59, %v7726_v35 }
0x13dc   : > { %v7731_v60 = vadd.f32 1.4214138, %v7729_v61  ;;  %v10921_v61 = vld [vmem:[%s20005_s22 + $0x48] sm:$0xff] }
0x13dd   : > { %v7730_v0 = vadd.f32 1.4214138, %v7728_v29  ;;  %v10922_v29 = vld [vmem:[%s20005_s22 + $0x50] sm:$0xff] }
0x13de   : > { %v7733_v9 = vmul.f32 %v14168_v33, %v7731_v60  ;;  %v12968_v60 = vpack.c.bf16 %v10921_v61, %v10920_v55 }
0x13df   : > { %v7732_v39 = vmul.f32 %v14170_v59, %v7730_v0  ;;  %v10923_v0 = vld [vmem:[%s20005_s22 + $0x58] sm:$0xff] }
0x13e0   : > { %v7735_v32 = vadd.f32 -0.28449672, %v7733_v9  ;;  %v12972_v9 = vpack.c.bf16 %v10923_v0, %v10922_v29  ;;  %12969 = vmatprep.subr.bf16.mxu1 %v12968_v60 }
0x13e1   : > { %v7734_v37 = vadd.f32 -0.28449672, %v7732_v39  ;;  %12971 = vmatpush3.bf16.msra.mxu1 %v12968_v60  ;;  %v10926_v39 = vld [vmem:[%s20015_s23 + $0x40] sm:$0xff] }
0x13e2   : > { %v7737_v22 = vmul.f32 %v14168_v33, %v7735_v32  ;;  %12973 = vmatprep.subr.bf16.mxu1 %v12972_v9  ;;  %v10927_v32 = vld [vmem:[%s20015_s23 + $0x48] sm:$0xff] }
0x13e3   : > { %v7736_v4 = vmul.f32 %v14170_v59, %v7734_v37  ;;  %v12976_v37 = vpack.c.bf16 %v10927_v32, %v10926_v39 }
0x13e4   : > { %v7739_v7 = vadd.f32 0.2548296, %v7737_v22 }
0x13e5   : > { %v7738_v56 = vadd.f32 0.2548296, %v7736_v4  ;;  %12975 = vmatpush3.bf16.msra.mxu1 %v12972_v9 }
0x13e6   : > { %v7741_v1 = vmul.f32 %v14168_v33, %v7739_v7  ;;  %12977 = vmatprep.subr.bf16.mxu1 %v12976_v37 }
0x13e7   : > { %v7740_v23 = vmul.f32 %v14170_v59, %v7738_v56 }
0x13e8   : > { %v7751_v40 = vmul.f32 %v14172_v8, %v7741_v1 }
0x13e9   : > { %v7750_v38 = vmul.f32 %v14174_v57, %v7740_v23 }
0x13ea   : > { %v7753_v10 = vsub.f32 1.0, %v7751_v40 }
0x13eb   : > { %v7752_v47 = vsub.f32 1.0, %v7750_v38 }
0x13ec   : > { %v7757_v27 = vsub.f32 0.0, %v7753_v10 }
0x13ed   : > { %v7756_v26 = vsub.f32 0.0, %v7752_v47 }
0x13ee   : > { %v7759_v3 = vsel %vm7755_vm2, %v7757_v27, %v7753_v10 }
0x13ef   : > { %v7761_v50 = vadd.f32 1.0, %v7759_v3  ;;  %v7758_v53 = vsel %vm7754_vm13, %v7756_v26, %v7752_v47 }
0x13f0   : > { %v7760_v19 = vadd.f32 1.0, %v7758_v53  ;;  %v10886_v53 = vld [vmem:[%s20388_s15] ss:$0 sm:$0xff] }
0x13f1   : > { %v7763_v25 = vmul.f32 %v7761_v50, %v7711_v43 }
0x13f2   : > { %v7762_v49 = vmul.f32 %v7760_v19, %v7710_v51  ;;  %v10887_v19 = vld [vmem:[%s19909_s4] ss:$0 sm:$0xff] }
0x13f3   : > { %v7769_v33 = vsel %vm1902_vm1, %v7763_v25, 0.0 }
0x13f4   : > { %7770 = vadd.xlane.f32.xlu0 %v7769_v33  ;;  %v7766_v59 = vsel %vm1902_vm1, %v7762_v49, 0.0 }
0x13f5   : > { %7767 = vadd.xlane.f32.xlu1 %v7766_v59 }
0x1481   : > { %v7771_v15 = vpop.xlane.xlu0 %7770 }
0x1482   : > { %v7773_v28 = vmul.f32 0.03125, %v7771_v15  ;;  %v7768_v42 = vpop.xlane.xlu1 %7767  ;;  %v10928_v15 = vld [vmem:[%s20015_s23 + $0x50] sm:$0xff] }
0x1483   : > { %v7772_v2 = vmul.f32 0.03125, %v7768_v42 }
0x1484   : > { %v7775_v16 = vsub.f32 %v7763_v25, %v7773_v28  ;;  %v10929_v28 = vld [vmem:[%s20015_s23 + $0x58] sm:$0xff] }
0x1485   : > { %v7774_v34 = vsub.f32 %v7762_v49, %v7772_v2 }
0x1486   : > { %v7777_v11 = vmul.f32 %v7775_v16, %v7775_v16 }
0x1487   : > { %v7776_v36 = vmul.f32 %v7774_v34, %v7774_v34 }
0x1488   : > { %v7781_v35 = vsel %vm1902_vm1, %v7777_v11, 0.0  ;;  %v12424_v11 = vpop.f32.mrb[108].mxu0 }
0x1489   : > { %v7778_v6 = vsel %vm1902_vm1, %v7776_v36, 0.0  ;;  %v12980_v36 = vpack.c.bf16 %v10929_v28, %v10928_v15  ;;  %v7888_v55 = vpop.f32.mrb[109].mxu0  ;;  %v8048_v60 = vmul.f32 %v12424_v11, %v12424_v11  ;;  %v14610_v11 = vld [vmem:[%s15121_s21 + $0x28] sm:$0xff] }
0x148a   : > { %7779 = vadd.xlane.f32.xlu1 %v7778_v6  ;;  %v8047_v61 = vmul.f32 %v7888_v55, %v7888_v55  ;;  %v12427_v39 = vpop.f32.mrb[110].mxu0  ;;  %v14611_v55 = vld [vmem:[%s15121_s21 + $0x30] sm:$0xff] }
0x148c   : > { %v8079_v0 = vsel %vm2571_vm14, %v8047_v61, 0.0 }
0x148e   : > { %7782 = vadd.xlane.f32.xlu1 %v7781_v35 }
0x1492   : > { %8080 = vadd.xlane.f32.xlu1 %v8079_v0 }
0x1517   : > { %v7780_v22 = vpop.xlane.xlu1 %7779 }
0x1518   : > { %v7784_v4 = vmul.f32 0.03125, %v7780_v22  ;;  %v7898_v22 = vpop.f32.mrb[111].mxu0 }
0x151a   : > { %v7786_v7 = vadd.f32 1e-05, %v7784_v4  ;;  %v8049_v4 = vmul.f32 %v7898_v22, %v7898_v22 }
0x151b   : > { %v7783_v56 = vpop.xlane.xlu1 %7782 }
0x151c   : > { %14175 = vrsqrt.f32 %v7786_v7  ;;  %v7785_v1 = vmul.f32 0.03125, %v7783_v56  ;;  %vm7790_vm15 = vcmp.eq.f32.partialorder %v7786_v7, inf  ;;  %v7793_v40 = vand.u32 2147483648, %v7786_v7 }
0x151d   : > { %vm7792_vm3 = vcmp.eq.f32.partialorder %v7786_v7, 0.0 }
0x151e   : > { %v7787_v8 = vadd.f32 1e-05, %v7785_v1  ;;  %v8050_v1 = vmul.f32 %v12427_v39, %v12427_v39 }
0x1520   : > { %14177 = vrsqrt.f32 %v7787_v8  ;;  %vm7797_vm6 = vcmp.eq.f32.partialorder %v7787_v8, inf  ;;  %v7800_v26 = vand.u32 2147483648, %v7787_v8  ;;  %vm7799_vm7 = vcmp.eq.f32.partialorder %v7787_v8, 0.0 }
0x1526   : > { %v14176_v23 = vpop.eup %14175 }
0x1527   : > { %v7789_v57 = vmul.f32 %v14176_v23, %v7786_v7 }
0x1529   : > { %v7791_v38 = vsel %vm7790_vm15, %v7786_v7, %v7789_v57  ;;  %v12430_v7 = vpop.f32.mrb[112].mxu0 }
0x152a   : > { %v7794_v10 = vsel %vm7792_vm3, %v7793_v40, %v7791_v38  ;;  %v14178_v47 = vpop.eup %14177  ;;  %v7908_v56 = vpop.f32.mrb[113].mxu0  ;;  %v14606_v40 = vld [vmem:[%s15121_s21 + $0x8] sm:$0xff] }
0x152b   : > { %14179 = vrcp.f32 %v7794_v10  ;;  %v7796_v27 = vmul.f32 %v14178_v47, %v7787_v8  ;;  %v8051_v23 = vmul.f32 %v7908_v56, %v7908_v56  ;;  %v12433_v57 = vpop.f32.mrb[114].mxu0  ;;  %v14607_v10 = vld [vmem:[%s15121_s21 + $0x10] sm:$0xff] }
0x152c   : > { %v7918_v38 = vpop.f32.mrb[115].mxu0 }
0x152d   : > { %v7798_v3 = vsel %vm7797_vm6, %v7787_v8, %v7796_v27  ;;  %v8085_v8 = vsel %vm2571_vm14, %v8049_v4, 0.0  ;;  %v8091_v47 = vsel %vm2571_vm14, %v8051_v23, 0.0  ;;  %v8053_v27 = vmul.f32 %v7918_v38, %v7918_v38  ;;  %v14613_v4 = vld [vmem:[%s15121_s21 + $0x40] sm:$0xff]  ;;  %v14614_v38 = vld [vmem:[%s15121_s21 + $0x48] sm:$0xff] }
0x152e   : > { %v7801_v43 = vsel %vm7799_vm7, %v7800_v26, %v7798_v3  ;;  %v12436_v26 = vpop.f32.mrb[116].mxu0  ;;  %8092 = vadd.xlane.f32.xlu0 %v8091_v47  ;;  %v14615_v47 = vld [vmem:[%s15121_s21 + $0x50] sm:$0xff] }
0x152f   : > { %14181 = vrcp.f32 %v7801_v43  ;;  %v7928_v3 = vpop.f32.mrb[117].mxu0  ;;  %v8088_v43 = vsel %vm2571_vm14, %v8050_v1, 0.0 }
0x1535   : > { %v14180_v50 = vpop.eup %14179 }
0x1536   : > { %v7803_v51 = vmul.f32 %v14180_v50, %v7774_v34  ;;  %v8052_v50 = vmul.f32 %v12430_v7, %v12430_v7 }
0x1538   : > { %v7812_v25 = vmul.f32 %v10886_v53, %v7803_v51  ;;  %v8055_v51 = vmul.f32 %v7928_v3, %v7928_v3 }
0x1539   : > { %v14182_v49 = vpop.eup %14181 }
0x153a   : > { %v18768_v33 = vadd.f32 %v10887_v19, %v7812_v25  ;;  %v7805_v59 = vmul.f32 %v14182_v49, %v7775_v16  ;;  %v14605_v16 = vld [vmem:[%s15121_s21] sm:$0xff]  ;;  %v14608_v25 = vld [vmem:[%s15121_s21 + $0x18] sm:$0xff] }
0x153c   : > { %20389 = vst [vmem:[#allocation100_spill] sm:$0xff] %v18768_v33  ;;  %12478 = vmatprep.mubr.msk.f32.mxu1 %vm1902_vm1, %v18768_v33  ;;  %v7813_v42 = vmul.f32 %v10886_v53, %v7805_v59  ;;  %v8097_v53 = vsel %vm2571_vm14, %v8053_v27, 0.0  ;;  %v14609_v59 = vld [vmem:[%s15121_s21 + $0x20] sm:$0xff] }
0x153d   : > { %8098 = vadd.xlane.f32.xlu0 %v8097_v53 }
0x153e   : > { %v18774_v2 = vadd.f32 %v10887_v19, %v7813_v42  ;;  %v12439_v19 = vpop.f32.mrb[118].mxu0  ;;  %v8054_v42 = vmul.f32 %v12433_v57, %v12433_v57 }
0x153f   : > { %v7938_v49 = vpop.f32.mrb[119].mxu0  ;;  %v8058_v1 = vmul.f32 %v12439_v19, %v12439_v19  ;;  %v14616_v19 = vld [vmem:[%s15121_s21 + $0x58] sm:$0xff] }
0x1540   : > { %20390 = vst [vmem:[#allocation101_spill] sm:$0xff] %v18774_v2  ;;  %12479 = vmatmul.mubr.msk.f32.vlgmr.msra.gmra.mrb[152].mxu1 %vm1902_vm1, %v18774_v2  ;;  %v12442_v15 = vpop.f32.mrb[120].mxu0  ;;  %v8100_v0 = vsel %vm2571_vm14, %v8054_v42, 0.0 }
0x1541   : > { %12979 = vmatpush3.bf16.msra.mxu1 %v12976_v37  ;;  %12489 = vmatprep.mubr.msk.f32.mxu1 %vm1902_vm1, %v18768_v33  ;;  %v8082_v37 = vsel %vm2571_vm14, %v8048_v60, 0.0  ;;  %v7948_v28 = vpop.f32.mrb[121].mxu0  ;;  %v8056_v60 = vmul.f32 %v12436_v26, %v12436_v26  ;;  %v8060_v3 = vmul.f32 %v12442_v15, %v12442_v15 }
0x1542   : > { %12981 = vmatprep.subr.bf16.mxu1 %v12980_v36  ;;  %8083 = vadd.xlane.f32.xlu1 %v8082_v37  ;;  %v8059_v39 = vmul.f32 %v7948_v28, %v7948_v28  ;;  %v14612_v37 = vld [vmem:[%s15121_s21 + $0x38] sm:$0xff] }
0x1543   : > { %v8118_v42 = vsel %vm2571_vm14, %v8060_v3, 0.0 }
0x1544   : > { %v8115_v23 = vsel %vm2571_vm14, %v8059_v39, 0.0  ;;  %v14621_v39 = vld [vmem:[%s15121_s21 + $0x80] sm:$0xff] }
0x1545   : > { %12983 = vmatpush3.bf16.msra.mxu1 %v12980_v36  ;;  %v8094_v36 = vsel %vm2571_vm14, %v8052_v50, 0.0 }
0x1546   : > { %8086 = vadd.xlane.f32.xlu1 %v8085_v8  ;;  %v8106_v8 = vsel %vm2571_vm14, %v8056_v60, 0.0 }
0x1548   : > { %12490 = vmatmul.mubr.msk.f32.vlgmr.msra.gmra.mrb[154].mxu1 %vm1902_vm1, %v18774_v2 }
0x1549   : > { %12496 = vmatprep.mubr.msk.f32.mxu1 %vm1267_vm0, %v14605_v16  ;;  %v8103_v16 = vsel %vm2571_vm14, %v8055_v51, 0.0 }
0x154a   : > { %8089 = vadd.xlane.f32.xlu1 %v8088_v43  ;;  %8104 = vadd.xlane.f32.xlu0 %v8103_v16  ;;  %v8112_v43 = vsel %vm2571_vm14, %v8058_v1, 0.0  ;;  %v14622_v1 = vld [vmem:[%s15121_s21 + $0x88] sm:$0xff] }
0x154e   : > { %8095 = vadd.xlane.f32.xlu1 %v8094_v36 }
0x1552   : > { %8101 = vadd.xlane.f32.xlu1 %v8100_v0 }
0x1556   : > { %8107 = vadd.xlane.f32.xlu1 %v8106_v8 }
0x155a   : > { %8113 = vadd.xlane.f32.xlu1 %v8112_v43 }
0x155e   : > { %8119 = vadd.xlane.f32.xlu1 %v8118_v42 }
0x1613   : > { %v12480_v34 = vpop.f32.mrb[152].mxu1 }
0x1614   : > { %v8252_v6 = vpop.f32.mrb[153].mxu1 }
0x1615   : > { %v12988_v35 = vpack.c.bf16 %v12480_v34, %v8252_v6  ;;  %v8057_v34 = vmul.f32 %v7938_v49, %v7938_v49  ;;  %v12445_v6 = vpop.f32.mrb[122].mxu0  ;;  %v14617_v49 = vld [vmem:[%s15121_s21 + $0x60] sm:$0xff] }
0x1616   : > { %v8062_v28 = vmul.f32 %v12445_v6, %v12445_v6 }
0x161b   : > { %v12491_v29 = vpop.f32.mrb[154].mxu1 }
0x161c   : > { %v8332_v9 = vpop.f32.mrb[155].mxu1 }
0x161d   : > { %v12984_v32 = vpack.c.bf16 %v12491_v29, %v8332_v9  ;;  %v8109_v9 = vsel %vm2571_vm14, %v8057_v34, 0.0 }
0x161e   : > { %8110 = vadd.xlane.f32.xlu0 %v8109_v9  ;;  %v14620_v9 = vld [vmem:[%s15121_s21 + $0x78] sm:$0xff] }
0x161f   : > { %12985 = vmatprep.subr.bf16.mxu1 %v12984_v32 }
0x1620   : > { %12987 = vmatpush3.bf16.msra.mxu1 %v12984_v32 }
0x1621   : > { %12989 = vmatprep.subr.bf16.mxu1 %v12988_v35 }
0x1622   : > { %8116 = vadd.xlane.f32.xlu0 %v8115_v23 }
0x1623   : > { %12497 = vmatmul.mubr.msk.f32.vlgmr.msra.gmra.mrb[156].mxu1 %vm1267_vm0, %v14606_v40 }
0x1624   : > { %12991 = vmatpush3.bf16.msra.mxu1 %v12988_v35  ;;  %12499 = vmatprep.mubr.msk.f32.mxu1 %vm1267_vm0, %v14607_v10  ;;  %v7958_v35 = vpop.f32.mrb[123].mxu0 }
0x1625   : > { %v12448_v61 = vpop.f32.mrb[124].mxu0  ;;  %v8061_v57 = vmul.f32 %v7958_v35, %v7958_v35 }
0x1626   : > { %v7968_v29 = vpop.f32.mrb[125].mxu0  ;;  %v8064_v6 = vmul.f32 %v12448_v61, %v12448_v61 }
0x1627   : > { %12500 = vmatmul.mubr.msk.f32.gmra.mrb[158].mxu1 %vm1267_vm0, %v14608_v25  ;;  %v12451_v32 = vpop.f32.mrb[126].mxu0  ;;  %v8121_v50 = vsel %vm2571_vm14, %v8061_v57, 0.0  ;;  %v8063_v53 = vmul.f32 %v7968_v29, %v7968_v29  ;;  %v8124_v29 = vsel %vm2571_vm14, %v8062_v28, 0.0  ;;  %v14628_v28 = vld [vmem:[%s15121_s21 + $0xb8] sm:$0xff] }
0x1628   : > { %12502 = vmatprep.mubr.msk.f32.mxu1 %vm1267_vm0, %v14609_v59  ;;  %v7978_v22 = vpop.f32.mrb[127].mxu0  ;;  %8122 = vadd.xlane.f32.xlu0 %v8121_v50  ;;  %v14626_v50 = vld [vmem:[%s15121_s21 + $0xa8] sm:$0xff] }
0x1629   : > { %v18810_v7 = vpop.f32.mrb[128].mxu0  ;;  %v8127_v36 = vsel %vm2571_vm14, %v8063_v53, 0.0  ;;  %v8065_v16 = vmul.f32 %v7978_v22, %v7978_v22  ;;  %8125 = vadd.xlane.f32.xlu1 %v8124_v29  ;;  %v8066_v22 = vmul.f32 %v12451_v32, %v12451_v32  ;;  %v14632_v29 = vld [vmem:[%s15121_s21 + $0xd8] sm:$0xff] }
0x162a   : > { %v7988_v56 = vpop.f32.mrb[129].mxu0  ;;  %v8068_v23 = vmul.f32 %v18810_v7, %v18810_v7 }
0x162b   : > { %12503 = vmatmul.mubr.msk.f32.gmra.mrb[160].mxu1 %vm1267_vm0, %v14610_v11  ;;  %v18814_v40 = vpop.f32.mrb[130].mxu0  ;;  %v14618_v11 = vld [vmem:[%s15121_s21 + $0x68] sm:$0xff]  ;;  %v8133_v60 = vsel %vm2571_vm14, %v8065_v16, 0.0  ;;  %v8067_v0 = vmul.f32 %v7988_v56, %v7988_v56  ;;  %v14623_v56 = vld [vmem:[%s15121_s21 + $0x90] sm:$0xff]  ;;  %v8136_v8 = vsel %vm2571_vm14, %v8066_v22, 0.0  ;;  %v14637_v22 = vld [vmem:[%s15116_s17] sm:$0xff] }
0x162c   : > { %12505 = vmatprep.mubr.msk.f32.mxu1 %vm1267_vm0, %v14611_v55  ;;  %v7998_v10 = vpop.f32.mrb[131].mxu0  ;;  %v14619_v55 = vld [vmem:[%s15121_s21 + $0x70] sm:$0xff]  ;;  %8128 = vadd.xlane.f32.xlu0 %v8127_v36  ;;  %v8070_v3 = vmul.f32 %v18814_v40, %v18814_v40 }
0x162d   : > { %v18820_v27 = vpop.f32.mrb[132].mxu0  ;;  %v8139_v61 = vsel %vm2571_vm14, %v8067_v0, 0.0 }
0x162e   : > { %v8008_v26 = vpop.f32.mrb[133].mxu0  ;;  %v8148_v53 = vsel %vm2571_vm14, %v8070_v3, 0.0  ;;  %v14650_v3 = vld [vmem:[%s15116_s17 + $0x68] sm:$0xff] }
0x162f   : > { %12506 = vmatmul.mubr.msk.f32.gmra.mrb[162].mxu1 %vm1267_vm0, %v14612_v37  ;;  %v18824_v51 = vpop.f32.mrb[134].mxu0  ;;  %v8130_v37 = vsel %vm2571_vm14, %v8064_v6, 0.0  ;;  %v8071_v57 = vmul.f32 %v8008_v26, %v8008_v26  ;;  %v14627_v26 = vld [vmem:[%s15121_s21 + $0xb0] sm:$0xff] }
0x1630   : > { %12508 = vmatprep.mubr.msk.f32.mxu1 %vm1267_vm0, %v14613_v4  ;;  %v8018_v25 = vpop.f32.mrb[135].mxu0  ;;  %8134 = vadd.xlane.f32.xlu0 %v8133_v60  ;;  %v8069_v4 = vmul.f32 %v7998_v10, %v7998_v10  ;;  %v14625_v10 = vld [vmem:[%s15121_s21 + $0xa0] sm:$0xff]  ;;  %v8074_v36 = vmul.f32 %v18824_v51, %v18824_v51 }
0x1631   : > { %v18830_v59 = vpop.f32.mrb[136].mxu0  ;;  %8131 = vadd.xlane.f32.xlu1 %v8130_v37  ;;  %v8151_v7 = vsel %vm2571_vm14, %v8071_v57, 0.0  ;;  %v8073_v43 = vmul.f32 %v8018_v25, %v8018_v25  ;;  %v14629_v25 = vld [vmem:[%s15121_s21 + $0xc0] sm:$0xff]  ;;  %v14636_v37 = vld [vmem:[%s15121_s21 + $0xf8] sm:$0xff]  ;;  %v14646_v57 = vld [vmem:[%s15116_s17 + $0x48] sm:$0xff] }
0x1632   : > { %v8028_v15 = vpop.f32.mrb[137].mxu0  ;;  %v8145_v32 = vsel %vm2571_vm14, %v8069_v4, 0.0  ;;  %v8076_v6 = vmul.f32 %v18830_v59, %v18830_v59  ;;  %v14634_v59 = vld [vmem:[%s15121_s21 + $0xe8] sm:$0xff]  ;;  %v14640_v4 = vld [vmem:[%s15116_s17 + $0x18] sm:$0xff] }
0x1633   : > { %12509 = vmatmul.mubr.msk.f32.gmra.mrb[164].mxu1 %vm1267_vm0, %v14614_v38  ;;  %v18834_v34 = vpop.f32.mrb[138].mxu0  ;;  %v14624_v38 = vld [vmem:[%s15121_s21 + $0x98] sm:$0xff]  ;;  %v8157_v40 = vsel %vm2571_vm14, %v8073_v43, 0.0 }
0x1634   : > { %12511 = vmatprep.mubr.msk.f32.mxu1 %vm1267_vm0, %v14615_v47  ;;  %v8038_v35 = vpop.f32.mrb[139].mxu0  ;;  %8140 = vadd.xlane.f32.xlu0 %v8139_v61  ;;  %v8142_v47 = vsel %vm2571_vm14, %v8068_v23, 0.0  ;;  %v8166_v60 = vsel %vm2571_vm14, %v8076_v6, 0.0  ;;  %v8078_v0 = vmul.f32 %v18834_v34, %v18834_v34  ;;  %v14638_v34 = vld [vmem:[%s15116_s17 + $0x8] sm:$0xff]  ;;  %v14639_v61 = vld [vmem:[%s15116_s17 + $0x10] sm:$0xff]  ;;  %v14644_v23 = vld [vmem:[%s15116_s17 + $0x38] sm:$0xff] }
0x1635   : > { %8137 = vadd.xlane.f32.xlu1 %v8136_v8  ;;  %v8077_v16 = vmul.f32 %v8038_v35, %v8038_v35  ;;  %v14633_v35 = vld [vmem:[%s15121_s21 + $0xe0] sm:$0xff]  ;;  %v14643_v8 = vld [vmem:[%s15116_s17 + $0x30] sm:$0xff]  ;;  %v14652_v43 = vld [vmem:[%s15116_s17 + $0x78] sm:$0xff] }
0x1636   : > { %v14668_v6 = vld [vmem:[%s15116_s17 + $0xf8] sm:$0xff] }
0x1637   : > { %12512 = vmatmul.mubr.msk.f32.gmra.mrb[166].mxu1 %vm1267_vm0, %v14616_v19  ;;  %v8072_v19 = vmul.f32 %v18820_v27, %v18820_v27  ;;  %v8169_v51 = vsel %vm2571_vm14, %v8077_v16, 0.0  ;;  %v14664_v16 = vld [vmem:[%s15116_s17 + $0xd8] sm:$0xff] }
0x1638   : > { %12514 = vmatprep.mubr.msk.f32.mxu1 %vm1267_vm0, %v14617_v49  ;;  %8146 = vadd.xlane.f32.xlu0 %v8145_v32  ;;  %v8075_v49 = vmul.f32 %v8028_v15, %v8028_v15  ;;  %v14631_v15 = vld [vmem:[%s15121_s21 + $0xd0] sm:$0xff]  ;;  %v14645_v32 = vld [vmem:[%s15116_s17 + $0x40] sm:$0xff] }
0x1639   : > { %8143 = vadd.xlane.f32.xlu1 %v8142_v47  ;;  %v8154_v42 = vsel %vm2571_vm14, %v8072_v19, 0.0  ;;  %v14649_v47 = vld [vmem:[%s15116_s17 + $0x60] sm:$0xff]  ;;  %v14656_v19 = vld [vmem:[%s15116_s17 + $0x98] sm:$0xff] }
0x163a   : > { %v8163_v27 = vsel %vm2571_vm14, %v8075_v49, 0.0  ;;  %v14658_v49 = vld [vmem:[%s15116_s17 + $0xa8] sm:$0xff] }
0x163b   : > { %12515 = vmatmul.mubr.msk.f32.gmra.mrb[168].mxu1 %vm1267_vm0, %v14618_v11  ;;  %v14630_v11 = vld [vmem:[%s15121_s21 + $0xc8] sm:$0xff] }
0x163c   : > { %12517 = vmatprep.mubr.msk.f32.mxu1 %vm1267_vm0, %v14619_v55  ;;  %8152 = vadd.xlane.f32.xlu0 %v8151_v7  ;;  %v8160_v55 = vsel %vm2571_vm14, %v8074_v36, 0.0  ;;  %v14651_v7 = vld [vmem:[%s15116_s17 + $0x70] sm:$0xff]  ;;  %v14662_v36 = vld [vmem:[%s15116_s17 + $0xc8] sm:$0xff] }
0x163d   : > { %8149 = vadd.xlane.f32.xlu1 %v8148_v53  ;;  %v14655_v53 = vld [vmem:[%s15116_s17 + $0x90] sm:$0xff] }
0x163f   : > { %12518 = vmatmul.mubr.msk.f32.gmra.mrb[170].mxu1 %vm1267_vm0, %v14620_v9  ;;  %v14635_v9 = vld [vmem:[%s15121_s21 + $0xf0] sm:$0xff] }
0x1640   : > { %12520 = vmatprep.mubr.msk.f32.mxu1 %vm1267_vm0, %v14621_v39  ;;  %8158 = vadd.xlane.f32.xlu0 %v8157_v40  ;;  %v8172_v39 = vsel %vm2571_vm14, %v8078_v0, 0.0  ;;  %v14657_v40 = vld [vmem:[%s15116_s17 + $0xa0] sm:$0xff]  ;;  %v11003_v0 = vld [vmem:[%s20099_s6 + $0x58] sm:$0xff] }
0x1641   : > { %8155 = vadd.xlane.f32.xlu1 %v8154_v42  ;;  %v14661_v42 = vld [vmem:[%s15116_s17 + $0xc0] sm:$0xff] }
0x1643   : > { %12521 = vmatmul.mubr.msk.f32.gmra.mrb[172].mxu1 %vm1267_vm0, %v14622_v1  ;;  %v14641_v1 = vld [vmem:[%s15116_s17 + $0x20] sm:$0xff] }
0x1644   : > { %12523 = vmatprep.mubr.msk.f32.mxu1 %vm1267_vm0, %v14623_v56  ;;  %8164 = vadd.xlane.f32.xlu0 %v8163_v27  ;;  %v14642_v56 = vld [vmem:[%s15116_s17 + $0x28] sm:$0xff]  ;;  %v14663_v27 = vld [vmem:[%s15116_s17 + $0xd0] sm:$0xff] }
0x1645   : > { %8161 = vadd.xlane.f32.xlu1 %v8160_v55  ;;  %v14667_v55 = vld [vmem:[%s15116_s17 + $0xf0] sm:$0xff] }
0x1647   : > { %12524 = vmatmul.mubr.msk.f32.gmra.mrb[174].mxu1 %vm1267_vm0, %v14624_v38  ;;  %v14647_v38 = vld [vmem:[%s15116_s17 + $0x50] sm:$0xff] }
0x1648   : > { %12526 = vmatprep.mubr.msk.f32.mxu1 %vm1267_vm0, %v14625_v10  ;;  %8170 = vadd.xlane.f32.xlu0 %v8169_v51  ;;  %v14648_v10 = vld [vmem:[%s15116_s17 + $0x58] sm:$0xff]  ;;  %v11000_v51 = vld [vmem:[%s20099_s6 + $0x40] sm:$0xff] }
0x1649   : > { %8167 = vadd.xlane.f32.xlu1 %v8166_v60  ;;  %v11002_v60 = vld [vmem:[%s20099_s6 + $0x50] sm:$0xff] }
0x164b   : > { %12527 = vmatmul.mubr.msk.f32.gmra.mrb[176].mxu1 %vm1267_vm0, %v14626_v50  ;;  %v14653_v50 = vld [vmem:[%s15116_s17 + $0x80] sm:$0xff] }
0x164c   : > { %12529 = vmatprep.mubr.msk.f32.mxu1 %vm1267_vm0, %v14627_v26  ;;  %v14654_v26 = vld [vmem:[%s15116_s17 + $0x88] sm:$0xff] }
0x164d   : > { %8173 = vadd.xlane.f32.xlu1 %v8172_v39 }
0x164f   : > { %12530 = vmatmul.mubr.msk.f32.gmra.mrb[178].mxu1 %vm1267_vm0, %v14628_v28  ;;  %v14659_v28 = vld [vmem:[%s15116_s17 + $0xb0] sm:$0xff] }
0x1650   : > { %12532 = vmatprep.mubr.msk.f32.mxu1 %vm1267_vm0, %v14629_v25  ;;  %v14660_v25 = vld [vmem:[%s15116_s17 + $0xb8] sm:$0xff] }
0x1653   : > { %12533 = vmatmul.mubr.msk.f32.gmra.mrb[180].mxu1 %vm1267_vm0, %v14630_v11  ;;  %v14665_v11 = vld [vmem:[%s15116_s17 + $0xe0] sm:$0xff] }
0x1654   : > { %12535 = vmatprep.mubr.msk.f32.mxu1 %vm1267_vm0, %v14631_v15  ;;  %v14666_v15 = vld [vmem:[%s15116_s17 + $0xe8] sm:$0xff] }
0x1657   : > { %12536 = vmatmul.mubr.msk.f32.gmra.mrb[182].mxu1 %vm1267_vm0, %v14632_v29  ;;  %v11001_v29 = vld [vmem:[%s20099_s6 + $0x48] sm:$0xff]  ;;  %s11063_s6 = sshll.u32 %s15284_s0, 8  ;;  %s15090_s0 = smov [#allocation19]  }
0x1658   : > { %12538 = vmatprep.mubr.msk.f32.mxu1 %vm1267_vm0, %v14633_v35  ;;  %v12992_v35 = vpack.c.bf16 %v11001_v29, %v11000_v51 }
0x165a   : > { %12993 = vmatprep.subr.bf16.mxu0 %v12992_v35 }
0x165b   : > { %12539 = vmatmul.mubr.msk.f32.gmra.mrb[184].mxu1 %vm1267_vm0, %v14634_v59  ;;  %12995 = vmatpush3.bf16.msra.mxu0 %v12992_v35  ;;  %v12996_v59 = vpack.c.bf16 %v11003_v0, %v11002_v60 }
0x165c   : > { %12541 = vmatprep.mubr.msk.f32.mxu1 %vm1267_vm0, %v14635_v9  ;;  %v8081_v9 = vpop.xlane.xlu1 %8080 }
0x165d   : > { %12997 = vmatprep.subr.bf16.mxu0 %v12996_v59 }
0x165f   : > { %12542 = vmatmul.mubr.msk.f32.gmra.mrb[186].mxu1 %vm1267_vm0, %v14636_v37  ;;  %12999 = vmatpush3.bf16.msra.mxu0 %v12996_v59 }
0x1660   : > { %12548 = vmatprep.mubr.msk.f32.mxu1 %vm1267_vm0, %v14637_v22  ;;  %v8084_v39 = vpop.xlane.xlu1 %8083 }
0x1663   : > { %12549 = vmatmul.mubr.msk.f32.vlgmr.msra.gmra.mrb[156].mxu1 %vm1267_vm0, %v14638_v34 }
0x1664   : > { %12551 = vmatprep.mubr.msk.f32.mxu1 %vm1267_vm0, %v14639_v61  ;;  %v8087_v37 = vpop.xlane.xlu1 %8086  ;;  %v8093_v61 = vpop.xlane.xlu0 %8092 }
0x1667   : > { %12552 = vmatmul.mubr.msk.f32.gmra.mrb[158].mxu1 %vm1267_vm0, %v14640_v4 }
0x1668   : > { %12554 = vmatprep.mubr.msk.f32.mxu1 %vm1267_vm0, %v14641_v1  ;;  %v8090_v22 = vpop.xlane.xlu1 %8089  ;;  %v8099_v1 = vpop.xlane.xlu0 %8098 }
0x166b   : > { %12555 = vmatmul.mubr.msk.f32.gmra.mrb[160].mxu1 %vm1267_vm0, %v14642_v56 }
0x166c   : > { %12557 = vmatprep.mubr.msk.f32.mxu1 %vm1267_vm0, %v14643_v8  ;;  %v8096_v34 = vpop.xlane.xlu1 %8095  ;;  %v8105_v8 = vpop.xlane.xlu0 %8104 }
0x166f   : > { %12558 = vmatmul.mubr.msk.f32.gmra.mrb[162].mxu1 %vm1267_vm0, %v14644_v23 }
0x1670   : > { %12560 = vmatprep.mubr.msk.f32.mxu1 %vm1267_vm0, %v14645_v32  ;;  %v8102_v4 = vpop.xlane.xlu1 %8101 }
0x1673   : > { %12561 = vmatmul.mubr.msk.f32.gmra.mrb[164].mxu1 %vm1267_vm0, %v14646_v57 }
0x1674   : > { %12563 = vmatprep.mubr.msk.f32.mxu1 %vm1267_vm0, %v14647_v38  ;;  %v8108_v56 = vpop.xlane.xlu1 %8107 }
0x1677   : > { %12564 = vmatmul.mubr.msk.f32.gmra.mrb[166].mxu1 %vm1267_vm0, %v14648_v10 }
0x1678   : > { %12566 = vmatprep.mubr.msk.f32.mxu1 %vm1267_vm0, %v14649_v47  ;;  %v8114_v23 = vpop.xlane.xlu1 %8113 }
0x167b   : > { %12567 = vmatmul.mubr.msk.f32.gmra.mrb[168].mxu1 %vm1267_vm0, %v14650_v3 }
0x167c   : > { %12569 = vmatprep.mubr.msk.f32.mxu1 %vm1267_vm0, %v14651_v7  ;;  %v8120_v57 = vpop.xlane.xlu1 %8119 }
0x167f   : > { %12570 = vmatmul.mubr.msk.f32.gmra.mrb[170].mxu1 %vm1267_vm0, %v14652_v43  ;;  %v18977_v43 = vld [vmem:[%s20104_s26 + $0x2] ss:$0 sm:$0xff] }
0x1680   : > { %12572 = vmatprep.mubr.msk.f32.mxu1 %vm1267_vm0, %v14653_v50  ;;  %v8804_v60 = vmul.f32 %v18977_v43, %v8096_v34 }
0x1683   : > { %12573 = vmatmul.mubr.msk.f32.gmra.mrb[172].mxu1 %vm1267_vm0, %v14654_v26 }
0x1684   : > { %12575 = vmatprep.mubr.msk.f32.mxu1 %vm1267_vm0, %v14655_v53  ;;  %v8800_v53 = vmul.f32 %v18977_v43, %v8084_v39 }
0x1687   : > { %12576 = vmatmul.mubr.msk.f32.gmra.mrb[174].mxu1 %vm1267_vm0, %v14656_v19  ;;  %v8799_v19 = vmul.f32 %v18977_v43, %v8081_v9  ;;  %v8803_v9 = vmul.f32 %v18977_v43, %v8093_v61 }
0x1688   : > { %12578 = vmatprep.mubr.msk.f32.mxu1 %vm1267_vm0, %v14657_v40 }
0x168b   : > { %12579 = vmatmul.mubr.msk.f32.gmra.mrb[176].mxu1 %vm1267_vm0, %v14658_v49  ;;  %v18986_v49 = vld [vmem:[%s20112_s16 + $0x2] ss:$0 sm:$0xff] }
0x168c   : > { %12581 = vmatprep.mubr.msk.f32.mxu1 %vm1267_vm0, %v14659_v28 }
0x168f   : > { %12582 = vmatmul.mubr.msk.f32.gmra.mrb[178].mxu1 %vm1267_vm0, %v14660_v25 }
0x1690   : > { %12584 = vmatprep.mubr.msk.f32.mxu1 %vm1267_vm0, %v14661_v42 }
0x1693   : > { %12585 = vmatmul.mubr.msk.f32.gmra.mrb[180].mxu1 %vm1267_vm0, %v14662_v36  ;;  %v8802_v36 = vmul.f32 %v18977_v43, %v8090_v22 }
0x1694   : > { %12587 = vmatprep.mubr.msk.f32.mxu1 %vm1267_vm0, %v14663_v27 }
0x1697   : > { %12588 = vmatmul.mubr.msk.f32.gmra.mrb[182].mxu1 %vm1267_vm0, %v14664_v16 }
0x1698   : > { %12590 = vmatprep.mubr.msk.f32.mxu1 %vm1267_vm0, %v14665_v11  ;;  %v8801_v11 = vmul.f32 %v18977_v43, %v8087_v37 }
0x169b   : > { %12591 = vmatmul.mubr.msk.f32.gmra.mrb[184].mxu1 %vm1267_vm0, %v14666_v15 }
0x169c   : > { %12593 = vmatprep.mubr.msk.f32.mxu1 %vm1267_vm0, %v14667_v55 }
0x169f   : > { %12594 = vmatmul.mubr.msk.f32.gmra.mrb[186].mxu1 %vm1267_vm0, %v14668_v6 }
0x16ab   : > { %v8111_v32 = vpop.xlane.xlu0 %8110 }
0x16af   : > { %v8117_v38 = vpop.xlane.xlu0 %8116 }
0x16b5   : > { %v18970_v47 = vpop.xlane.xlu0 %8122 }
0x16b6   : > { %v8126_v10 = vpop.xlane.xlu1 %8125 }
0x16b9   : > { %v18974_v7 = vpop.xlane.xlu0 %8128 }
0x16bd   : > { %v18981_v26 = vpop.xlane.xlu0 %8134 }
0x16be   : > { %v18972_v3 = vpop.xlane.xlu1 %8131 }
0x16c1   : > { %v18998_v6 = vpop.xlane.xlu0 %8140 }
0x16c2   : > { %v18979_v50 = vpop.xlane.xlu1 %8137 }
0x16c6   : > { %v18992_v16 = vpop.xlane.xlu1 %8143 }
0x1736   : > { %v12550_v40 = vpop.f32.mrb[156].mxu1 }
0x1737   : > { %v8832_v28 = vadd.f32 %v12550_v40, %v8800_v53  ;;  %v8632_v25 = vpop.f32.mrb[157].mxu1  ;;  %v8806_v40 = vmul.f32 %v18977_v43, %v8102_v4  ;;  %v8807_v4 = vmul.f32 %v18977_v43, %v8105_v8 }
0x1738   : > { %v8831_v42 = vadd.f32 %v8799_v19, %v8632_v25 }
0x1739   : > { %v18990_v27 = vadd.f32 %v18986_v49, %v8832_v28 }
0x173a   : > { %v18996_v15 = vadd.f32 %v18986_v49, %v8831_v42  ;;  %v12553_v55 = vpop.f32.mrb[158].mxu1  ;;  %v8805_v42 = vmul.f32 %v18977_v43, %v8099_v1 }
0x173b   : > { %v8904_v51 = vsub.f32 0.0, %v18990_v27  ;;  %v8834_v29 = vadd.f32 %v12553_v55, %v8802_v36  ;;  %v8642_v35 = vpop.f32.mrb[159].mxu1  ;;  %v8150_v36 = vpop.xlane.xlu1 %8149  ;;  %v8808_v55 = vmul.f32 %v18977_v43, %v8108_v56 }
0x173c   : > { %v8903_v0 = vsub.f32 0.0, %v18996_v15  ;;  %v8833_v59 = vadd.f32 %v8801_v11, %v8642_v35 }
0x173d   : > { %v8937_v39 = vmul.f32 1.442695, %v8904_v51  ;;  %v19005_v37 = vadd.f32 %v18986_v49, %v8834_v29  ;;  %v8147_v51 = vpop.xlane.xlu0 %8146 }
0x173e   : > { %v8935_v22 = vmul.f32 1.442695, %v8903_v0  ;;  %v19008_v53 = vadd.f32 %v18986_v49, %v8833_v59  ;;  %v12556_v19 = vpop.f32.mrb[160].mxu1  ;;  %v8810_v0 = vmul.f32 %v18977_v43, %v8114_v23 }
0x173f   : > { %14183 = vpow2.f32 %v8937_v39  ;;  %v8906_v28 = vsub.f32 0.0, %v19005_v37  ;;  %v8836_v34 = vadd.f32 %v12556_v19, %v8804_v60  ;;  %v8652_v25 = vpop.f32.mrb[161].mxu1  ;;  %v8809_v39 = vmul.f32 %v18977_v43, %v8111_v32 }
0x1740   : > { %14185 = vpow2.f32 %v8935_v22  ;;  %v8905_v61 = vsub.f32 0.0, %v19008_v53  ;;  %v8835_v11 = vadd.f32 %v8803_v9, %v8652_v25  ;;  %v19025_v9 = vmul.f32 %v18977_v43, %v8120_v57 }
0x1741   : > { %v8941_v29 = vmul.f32 1.442695, %v8906_v28  ;;  %v19016_v35 = vadd.f32 %v18986_v49, %v8836_v34  ;;  %v19029_v28 = vmul.f32 %v18977_v43, %v8117_v38  ;;  %v19033_v34 = vmul.f32 %v18977_v43, %v8126_v10  ;;  %v8156_v38 = vpop.xlane.xlu1 %8155 }
0x1742   : > { %v8939_v60 = vmul.f32 1.442695, %v8905_v61  ;;  %v19021_v59 = vadd.f32 %v18986_v49, %v8835_v11  ;;  %v12559_v1 = vpop.f32.mrb[162].mxu1  ;;  %v19040_v57 = vmul.f32 %v18977_v43, %v18970_v47  ;;  %v19051_v10 = vmul.f32 %v18977_v43, %v18974_v7  ;;  %v8153_v47 = vpop.xlane.xlu0 %8152 }
0x1743   : > { %14187 = vpow2.f32 %v8941_v29  ;;  %v8908_v56 = vsub.f32 0.0, %v19016_v35  ;;  %v8838_v22 = vadd.f32 %v12559_v1, %v8806_v40  ;;  %v8662_v19 = vpop.f32.mrb[163].mxu1  ;;  %v19044_v40 = vmul.f32 %v18977_v43, %v18972_v3 }
0x1744   : > { %14189 = vpow2.f32 %v8939_v60  ;;  %v8907_v8 = vsub.f32 0.0, %v19021_v59  ;;  %v8837_v23 = vadd.f32 %v8805_v42, %v8662_v19  ;;  %v19055_v29 = vmul.f32 %v18977_v43, %v18979_v50 }
0x1745   : > { %v8945_v25 = vmul.f32 1.442695, %v8908_v56  ;;  %v19036_v32 = vadd.f32 %v18986_v49, %v8838_v22  ;;  %v19060_v56 = vmul.f32 %v18977_v43, %v18981_v26  ;;  %v19065_v7 = vmul.f32 %v18977_v43, %v18992_v16  ;;  %v8162_v33 = vpop.xlane.xlu1 %8161 }
0x1746   : > { %v8943_v61 = vmul.f32 1.442695, %v8907_v8  ;;  %v19047_v11 = vadd.f32 %v18986_v49, %v8837_v23  ;;  %v12562_v42 = vpop.f32.mrb[164].mxu1  ;;  %v19075_v26 = vmul.f32 %v18977_v43, %v8150_v36 }
0x1747   : > { %14191 = vpow2.f32 %v8945_v25  ;;  %v8910_v60 = vsub.f32 0.0, %v19036_v32  ;;  %v8840_v3 = vadd.f32 %v12562_v42, %v8808_v55  ;;  %v8672_v1 = vpop.f32.mrb[165].mxu1  ;;  %v19072_v55 = vmul.f32 %v18977_v43, %v18998_v6 }
0x1748   : > { %14193 = vpow2.f32 %v8943_v61  ;;  %v8909_v22 = vsub.f32 0.0, %v19047_v11  ;;  %v8839_v19 = vadd.f32 %v8807_v4, %v8672_v1  ;;  %v19081_v1 = vmul.f32 %v18977_v43, %v8147_v51 }
0x1749   : > { %v14184_v50 = vpop.eup %14183  ;;  %v8949_v8 = vmul.f32 1.442695, %v8910_v60  ;;  %v19068_v23 = vadd.f32 %v18986_v49, %v8840_v3 }
0x174a   : > { %v14186_v25 = vpop.eup %14185  ;;  %v9000_v61 = vadd.f32 1.0, %v14184_v50  ;;  %v8947_v42 = vmul.f32 1.442695, %v8909_v22  ;;  %v19078_v4 = vadd.f32 %v18986_v49, %v8839_v19  ;;  %v12565_v16 = vpop.f32.mrb[166].mxu1  ;;  %v19086_v22 = vmul.f32 %v18977_v43, %v8156_v38 }
0x174b   : > { %v8999_v60 = vadd.f32 1.0, %v14186_v25  ;;  %14195 = vpow2.f32 %v8949_v8  ;;  %v8912_v3 = vsub.f32 0.0, %v19068_v23  ;;  %v8842_v2 = vadd.f32 %v12565_v16, %v8810_v0  ;;  %v8682_v6 = vpop.f32.mrb[167].mxu1  ;;  %v8159_v19 = vpop.xlane.xlu0 %8158 }
0x174c   : > { %14197 = vrcp.f32 %v9000_v61  ;;  %v8911_v36 = vsub.f32 0.0, %v19078_v4  ;;  %v8841_v62 = vadd.f32 %v8809_v39, %v8682_v6  ;;  %v19092_v8 = vmul.f32 %v18977_v43, %v8153_v47 }
0x174d   : > { %v14188_v50 = vpop.eup %14187  ;;  %14199 = vrcp.f32 %v8999_v60  ;;  %v8953_v52 = vmul.f32 1.442695, %v8912_v3  ;;  %v19089_v51 = vadd.f32 %v18986_v49, %v8842_v2 }
0x174e   : > { %v14190_v0 = vpop.eup %14189  ;;  %v9002_v25 = vadd.f32 1.0, %v14188_v50  ;;  %14201 = vpow2.f32 %v8947_v42  ;;  %v8951_v61 = vmul.f32 1.442695, %v8911_v36  ;;  %v19095_v16 = vadd.f32 %v18986_v49, %v8841_v62  ;;  %v12568_v39 = vpop.f32.mrb[168].mxu1 }
0x174f   : > { %v9001_v38 = vadd.f32 1.0, %v14190_v0  ;;  %14203 = vpow2.f32 %v8953_v52  ;;  %v8914_v6 = vsub.f32 0.0, %v19089_v51  ;;  %v8844_v60 = vadd.f32 %v12568_v39, %v19025_v9  ;;  %v8692_v3 = vpop.f32.mrb[169].mxu1  ;;  %v8168_v0 = vpop.xlane.xlu1 %8167 }
0x1750   : > { %14205 = vrcp.f32 %v9002_v25  ;;  %v8913_v2 = vsub.f32 0.0, %v19095_v16  ;;  %v8843_v47 = vadd.f32 %v19029_v28, %v8692_v3  ;;  %v19102_v50 = vmul.f32 %v18977_v43, %v8162_v33  ;;  %v8165_v33 = vpop.xlane.xlu0 %8164 }
0x1751   : > { %v14192_v42 = vpop.eup %14191  ;;  %14207 = vrcp.f32 %v9001_v38  ;;  %v8957_v62 = vmul.f32 1.442695, %v8914_v6  ;;  %v19105_v36 = vadd.f32 %v18986_v49, %v8844_v60  ;;  %v19108_v52 = vmul.f32 %v18977_v43, %v8159_v19 }
0x1752   : > { %v14194_v9 = vpop.eup %14193  ;;  %v9004_v39 = vadd.f32 1.0, %v14192_v42  ;;  %14209 = vpow2.f32 %v8951_v61  ;;  %v8955_v25 = vmul.f32 1.442695, %v8913_v2  ;;  %v19111_v5 = vadd.f32 %v18986_v49, %v8843_v47  ;;  %v12571_v28 = vpop.f32.mrb[170].mxu1 }
0x1753   : > { %v9003_v3 = vadd.f32 1.0, %v14194_v9  ;;  %14211 = vpow2.f32 %v8957_v62  ;;  %v8916_v38 = vsub.f32 0.0, %v19105_v36  ;;  %v8846_v6 = vadd.f32 %v12571_v28, %v19033_v34  ;;  %v8702_v60 = vpop.f32.mrb[171].mxu1  ;;  %v8174_v63 = vpop.xlane.xlu1 %8173 }
0x1754   : > { %14213 = vrcp.f32 %v9004_v39  ;;  %v8915_v19 = vsub.f32 0.0, %v19111_v5  ;;  %v8845_v58 = vadd.f32 %v19040_v57, %v8702_v60  ;;  %v19118_v61 = vmul.f32 %v18977_v43, %v8168_v0 }
0x1755   : > { %v14196_v2 = vpop.eup %14195  ;;  %14215 = vrcp.f32 %v9003_v3  ;;  %v8961_v47 = vmul.f32 1.442695, %v8916_v38  ;;  %v19121_v42 = vadd.f32 %v18986_v49, %v8846_v6  ;;  %v19124_v62 = vmul.f32 %v18977_v43, %v8165_v33 }
0x1756   : > { %v14198_v9 = vpop.eup %14197  ;;  %v9006_v34 = vadd.f32 1.0, %v14196_v2  ;;  %14217 = vpow2.f32 %v8955_v25  ;;  %v8959_v39 = vmul.f32 1.442695, %v8915_v19  ;;  %v19127_v28 = vadd.f32 %v18986_v49, %v8845_v58  ;;  %v12574_v57 = vpop.f32.mrb[172].mxu1 }
0x1757   : > { %v14200_v60 = vpop.eup %14199  ;;  %v9096_v0 = vmul.f32 %v14198_v9, %v18990_v27  ;;  %14219 = vpow2.f32 %v8961_v47  ;;  %v8918_v3 = vsub.f32 0.0, %v19121_v42  ;;  %v8848_v38 = vadd.f32 %v12574_v57, %v19044_v40  ;;  %v8712_v6 = vpop.f32.mrb[173].mxu1 }
0x1758   : > { %v14202_v33 = vpop.eup %14201  ;;  %v9095_v46 = vmul.f32 %v14200_v60, %v18996_v15  ;;  %14221 = vrcp.f32 %v9006_v34  ;;  %v8917_v25 = vsub.f32 0.0, %v19127_v28  ;;  %v8847_v58 = vadd.f32 %v19051_v10, %v8712_v6 }
0x1759   : > { %v14204_v19 = vpop.eup %14203  ;;  %v9005_v2 = vadd.f32 1.0, %v14202_v33  ;;  %14223 = vpow2.f32 %v8959_v39  ;;  %v8965_v44 = vmul.f32 1.442695, %v8918_v3  ;;  %v19136_v27 = vadd.f32 %v18986_v49, %v8848_v38 }
0x175a   : > { %v14206_v47 = vpop.eup %14205  ;;  %v9008_v9 = vadd.f32 1.0, %v14204_v19  ;;  %v8963_v40 = vmul.f32 1.442695, %v8917_v25  ;;  %v19139_v57 = vadd.f32 %v18986_v49, %v8847_v58  ;;  %v12577_v54 = vpop.f32.mrb[174].mxu1  ;;  %12604 = vmatprep.mubr.msk.f32.mxu0 %vm1902_vm1, %v9095_v46  ;;  %v19143_v15 = vmul.f32 %v18977_v43, %v8174_v63 }
0x175b   : > { %v14208_v10 = vpop.eup %14207  ;;  %v9098_v34 = vmul.f32 %v14206_v47, %v19005_v37  ;;  %14225 = vrcp.f32 %v9005_v2  ;;  %v8920_v39 = vsub.f32 0.0, %v19136_v27  ;;  %v8850_v60 = vadd.f32 %v12577_v54, %v19055_v29  ;;  %v8722_v3 = vpop.f32.mrb[175].mxu1  ;;  %12605 = vmatmul.mubr.msk.f32.vlgmr.msra.gmra.mrb[140].mxu0 %vm1902_vm1, %v9096_v0 }
0x175c   : > { %v14210_v38 = vpop.eup %14209  ;;  %v9097_v6 = vmul.f32 %v14208_v10, %v19008_v53  ;;  %14227 = vrcp.f32 %v9008_v9  ;;  %v8919_v46 = vsub.f32 0.0, %v19139_v57  ;;  %v8849_v63 = vadd.f32 %v19060_v56, %v8722_v3  ;;  %v8171_v10 = vpop.xlane.xlu0 %8170 }
0x175d   : > { %v14212_v33 = vpop.eup %14211  ;;  %v9007_v25 = vadd.f32 1.0, %v14210_v38  ;;  %14229 = vpow2.f32 %v8965_v44  ;;  %v8969_v37 = vmul.f32 1.442695, %v8920_v39  ;;  %v19153_v58 = vadd.f32 %v18986_v49, %v8850_v60 }
0x175e   : > { %v14214_v19 = vpop.eup %14213  ;;  %v9010_v54 = vadd.f32 1.0, %v14212_v33  ;;  %14231 = vpow2.f32 %v8963_v40  ;;  %v8967_v29 = vmul.f32 1.442695, %v8919_v46  ;;  %v19156_v0 = vadd.f32 %v18986_v49, %v8849_v63  ;;  %v12580_v53 = vpop.f32.mrb[176].mxu1  ;;  %12607 = vmatprep.mubr.msk.f32.mxu0 %vm1902_vm1, %v9097_v6 }
0x175f   : > { %v14216_v2 = vpop.eup %14215  ;;  %v9100_v56 = vmul.f32 %v14214_v19, %v19016_v35  ;;  %14233 = vrcp.f32 %v9007_v25  ;;  %v8922_v44 = vsub.f32 0.0, %v19153_v58  ;;  %v8852_v47 = vadd.f32 %v12580_v53, %v19065_v7  ;;  %v8732_v9 = vpop.f32.mrb[177].mxu1  ;;  %12608 = vmatmul.mubr.msk.f32.gmra.mrb[142].mxu0 %vm1902_vm1, %v9098_v34 }
0x1760   : > { %v14218_v40 = vpop.eup %14217  ;;  %v9099_v39 = vmul.f32 %v14216_v2, %v19021_v59  ;;  %14235 = vrcp.f32 %v9010_v54  ;;  %v8921_v60 = vsub.f32 0.0, %v19156_v0  ;;  %v8851_v3 = vadd.f32 %v19072_v55, %v8732_v9 }
0x1761   : > { %v14220_v38 = vpop.eup %14219  ;;  %v9009_v6 = vadd.f32 1.0, %v14218_v40  ;;  %14237 = vpow2.f32 %v8969_v37  ;;  %v8973_v35 = vmul.f32 1.442695, %v8922_v44  ;;  %v19167_v46 = vadd.f32 %v18986_v49, %v8852_v47 }
0x1762   : > { %v14222_v7 = vpop.eup %14221  ;;  %v9012_v63 = vadd.f32 1.0, %v14220_v38  ;;  %14239 = vpow2.f32 %v8967_v29  ;;  %v19170_v34 = vadd.f32 %v18986_v49, %v8851_v3  ;;  %v12583_v33 = vpop.f32.mrb[178].mxu1  ;;  %12610 = vmatprep.mubr.msk.f32.mxu0 %vm1902_vm1, %v9099_v39  ;;  %v19174_v59 = vmul.f32 %v18977_v43, %v8171_v10 }
0x1763   : > { %v14224_v55 = vpop.eup %14223  ;;  %14241 = vrcp.f32 %v9009_v6  ;;  %v8971_v25 = vmul.f32 1.442695, %v8921_v60  ;;  %v8924_v37 = vsub.f32 0.0, %v19167_v46  ;;  %v8854_v19 = vadd.f32 %v12583_v33, %v19075_v26  ;;  %v8742_v54 = vpop.f32.mrb[179].mxu1  ;;  %12611 = vmatmul.mubr.msk.f32.gmra.mrb[144].mxu0 %vm1902_vm1, %v9100_v56 }
0x1764   : > { %14243 = vrcp.f32 %v9012_v63  ;;  %v9011_v29 = vadd.f32 1.0, %v14224_v55  ;;  %v8923_v53 = vsub.f32 0.0, %v19170_v34  ;;  %v8853_v2 = vadd.f32 %v19081_v1, %v8742_v54 }
0x1765   : > { %v14226_v44 = vpop.eup %14225  ;;  %v9102_v43 = vmul.f32 %v14222_v7, %v19036_v32  ;;  %14245 = vpow2.f32 %v8973_v35  ;;  %v8977_v47 = vmul.f32 1.442695, %v8924_v37  ;;  %v19183_v9 = vadd.f32 %v18986_v49, %v8854_v19 }
0x1766   : > { %v14228_v10 = vpop.eup %14227  ;;  %v9101_v26 = vmul.f32 %v14226_v44, %v19047_v11  ;;  %14247 = vrcp.f32 %v9011_v29  ;;  %v8975_v40 = vmul.f32 1.442695, %v8923_v53  ;;  %v19187_v56 = vadd.f32 %v18986_v49, %v8853_v2  ;;  %v12586_v39 = vpop.f32.mrb[180].mxu1 }
0x1767   : > { %v14230_v60 = vpop.eup %14229  ;;  %v9104_v1 = vmul.f32 %v14228_v10, %v19068_v23  ;;  %14249 = vpow2.f32 %v8971_v25  ;;  %v8926_v32 = vsub.f32 0.0, %v19183_v9  ;;  %v8856_v3 = vadd.f32 %v12586_v39, %v19086_v22  ;;  %v8752_v38 = vpop.f32.mrb[181].mxu1 }
0x1768   : > { %v14232_v6 = vpop.eup %14231  ;;  %v9014_v35 = vadd.f32 1.0, %v14230_v60  ;;  %14251 = vpow2.f32 %v8977_v47  ;;  %v8925_v11 = vsub.f32 0.0, %v19187_v56  ;;  %12613 = vmatprep.mubr.msk.f32.mxu0 %vm1902_vm1, %v9101_v26  ;;  %v8855_v7 = vadd.f32 %v19092_v8, %v8752_v38 }
0x1769   : > { %v14234_v63 = vpop.eup %14233  ;;  %v9013_v33 = vadd.f32 1.0, %v14232_v6  ;;  %14253 = vpow2.f32 %v8975_v40  ;;  %v8981_v55 = vmul.f32 1.442695, %v8926_v32  ;;  %v19196_v23 = vadd.f32 %v18986_v49, %v8856_v3  ;;  %12614 = vmatmul.mubr.msk.f32.gmra.mrb[146].mxu0 %vm1902_vm1, %v9102_v43 }
0x176a   : > { %v14236_v22 = vpop.eup %14235  ;;  %v9103_v25 = vmul.f32 %v14234_v63, %v19078_v4  ;;  %14255 = vrcp.f32 %v9014_v35  ;;  %v8979_v37 = vmul.f32 1.442695, %v8925_v11  ;;  %v19201_v19 = vadd.f32 %v18986_v49, %v8855_v7  ;;  %v12589_v54 = vpop.f32.mrb[182].mxu1 }
0x176b   : > { %v14238_v29 = vpop.eup %14237  ;;  %v9106_v8 = vmul.f32 %v14236_v22, %v19089_v51  ;;  %14257 = vrcp.f32 %v9013_v33  ;;  %v8928_v53 = vsub.f32 0.0, %v19196_v23  ;;  %v8858_v2 = vadd.f32 %v12589_v54, %v19102_v50  ;;  %v8762_v44 = vpop.f32.mrb[183].mxu1 }
0x176c   : > { %v14240_v47 = vpop.eup %14239  ;;  %v9016_v43 = vadd.f32 1.0, %v14238_v29  ;;  %14259 = vpow2.f32 %v8981_v55  ;;  %v8927_v4 = vsub.f32 0.0, %v19201_v19  ;;  %12616 = vmatprep.mubr.msk.f32.mxu0 %vm1902_vm1, %v9103_v25  ;;  %v8857_v10 = vadd.f32 %v19108_v52, %v8762_v44 }
0x176d   : > { %v14242_v26 = vpop.eup %14241  ;;  %v9015_v40 = vadd.f32 1.0, %v14240_v47  ;;  %14261 = vpow2.f32 %v8979_v37  ;;  %v8985_v39 = vmul.f32 1.442695, %v8928_v53  ;;  %v19210_v51 = vadd.f32 %v18986_v49, %v8858_v2  ;;  %12617 = vmatmul.mubr.msk.f32.gmra.mrb[148].mxu0 %vm1902_vm1, %v9104_v1 }
0x176e   : > { %v14244_v50 = vpop.eup %14243  ;;  %v9105_v60 = vmul.f32 %v14242_v26, %v19095_v16  ;;  %14263 = vrcp.f32 %v9016_v43  ;;  %v8983_v32 = vmul.f32 1.442695, %v8927_v4  ;;  %v19215_v3 = vadd.f32 %v18986_v49, %v8857_v10  ;;  %v12592_v38 = vpop.f32.mrb[184].mxu1 }
0x176f   : > { %v14246_v6 = vpop.eup %14245  ;;  %v9108_v52 = vmul.f32 %v14244_v50, %v19105_v36  ;;  %14265 = vrcp.f32 %v9015_v40  ;;  %v8930_v35 = vsub.f32 0.0, %v19210_v51  ;;  %v8860_v11 = vadd.f32 %v12592_v38, %v19118_v61  ;;  %v8772_v7 = vpop.f32.mrb[185].mxu1 }
0x1770   : > { %v14248_v63 = vpop.eup %14247  ;;  %v9018_v1 = vadd.f32 1.0, %v14246_v6  ;;  %14267 = vpow2.f32 %v8985_v39  ;;  %v8929_v16 = vsub.f32 0.0, %v19215_v3  ;;  %12619 = vmatprep.mubr.msk.f32.mxu0 %vm1902_vm1, %v9105_v60  ;;  %v8859_v33 = vadd.f32 %v19124_v62, %v8772_v7 }
0x1771   : > { %v14250_v55 = vpop.eup %14249  ;;  %v9107_v22 = vmul.f32 %v14248_v63, %v19111_v5  ;;  %14269 = vpow2.f32 %v8983_v32  ;;  %v8989_v36 = vmul.f32 1.442695, %v8930_v35  ;;  %v19225_v25 = vadd.f32 %v18986_v49, %v8860_v11  ;;  %12620 = vmatmul.mubr.msk.f32.gmra.mrb[150].mxu0 %vm1902_vm1, %v9106_v8 }
0x1772   : > { %v14252_v61 = vpop.eup %14251  ;;  %14271 = vrcp.f32 %v9018_v1  ;;  %v9017_v37 = vadd.f32 1.0, %v14250_v55  ;;  %v8987_v54 = vmul.f32 1.442695, %v8929_v16  ;;  %v19229_v29 = vadd.f32 %v18986_v49, %v8859_v33  ;;  %v12595_v53 = vpop.f32.mrb[186].mxu1 }
0x1773   : > { %v14254_v2 = vpop.eup %14253  ;;  %v9020_v62 = vadd.f32 1.0, %v14252_v61  ;;  %14273 = vpow2.f32 %v8989_v36  ;;  %v8932_v5 = vsub.f32 0.0, %v19225_v25  ;;  %v8862_v44 = vadd.f32 %v12595_v53, %v19143_v15  ;;  %12622 = vmatprep.mubr.msk.f32.mxu0 %vm1902_vm1, %v9107_v22  ;;  %v8782_v47 = vpop.f32.mrb[187].mxu1 }
0x1774   : > { %v14256_v43 = vpop.eup %14255  ;;  %14275 = vrcp.f32 %v9017_v37  ;;  %v9019_v8 = vadd.f32 1.0, %v14254_v2  ;;  %v8931_v4 = vsub.f32 0.0, %v19229_v29  ;;  %v8861_v10 = vadd.f32 %v19174_v59, %v8782_v47 }
0x1775   : > { %v14258_v26 = vpop.eup %14257  ;;  %14277 = vrcp.f32 %v9020_v62  ;;  %v8993_v40 = vmul.f32 1.442695, %v8932_v5  ;;  %v19237_v39 = vadd.f32 %v18986_v49, %v8862_v44  ;;  %12623 = vmatmul.mubr.msk.f32.gmra.mrb[152].mxu0 %vm1902_vm1, %v9108_v52  ;;  %v9110_v15 = vmul.f32 %v14256_v43, %v19121_v42 }
0x1776   : > { %v14260_v50 = vpop.eup %14259  ;;  %v9109_v60 = vmul.f32 %v14258_v26, %v19127_v28  ;;  %14279 = vrcp.f32 %v9019_v8  ;;  %v19243_v32 = vadd.f32 %v18986_v49, %v8861_v10  ;;  %v8991_v59 = vmul.f32 1.442695, %v8931_v4 }
0x1777   : > { %v14262_v38 = vpop.eup %14261  ;;  %v9022_v6 = vadd.f32 1.0, %v14260_v50  ;;  %14281 = vpow2.f32 %v8987_v54  ;;  %v8934_v35 = vsub.f32 0.0, %v19237_v39 }
0x1778   : > { %v14264_v11 = vpop.eup %14263  ;;  %v9021_v7 = vadd.f32 1.0, %v14262_v38  ;;  %14283 = vpow2.f32 %v8993_v40  ;;  %v8933_v52 = vsub.f32 0.0, %v19243_v32  ;;  %12625 = vmatprep.mubr.msk.f32.mxu0 %vm1902_vm1, %v9109_v60 }
0x1779   : > { %v14266_v42 = vpop.eup %14265  ;;  %14285 = vrcp.f32 %v9022_v6  ;;  %v8997_v28 = vmul.f32 1.442695, %v8934_v35  ;;  %12626 = vmatmul.mubr.msk.f32.gmra.mrb[154].mxu0 %vm1902_vm1, %v9110_v15  ;;  %v9112_v16 = vmul.f32 %v14264_v11, %v19136_v27 }
0x177a   : > { %v14268_v49 = vpop.eup %14267  ;;  %v9111_v63 = vmul.f32 %v14266_v42, %v19139_v57  ;;  %14287 = vrcp.f32 %v9021_v7  ;;  %v8995_v55 = vmul.f32 1.442695, %v8933_v52 }
0x177b   : > { %v14270_v1 = vpop.eup %14269  ;;  %v9024_v33 = vadd.f32 1.0, %v14268_v49  ;;  %14289 = vpow2.f32 %v8991_v59  ;;  %v14669_v49 = vld [vmem:[#allocation2 + $0x8] sm:$0xff] }
0x177c   : > { %v14272_v22 = vpop.eup %14271  ;;  %v9023_v36 = vadd.f32 1.0, %v14270_v1  ;;  %14291 = vpow2.f32 %v8997_v28  ;;  %12628 = vmatprep.mubr.msk.f32.mxu0 %vm1902_vm1, %v9111_v63  ;;  %v19282_v63 = vld [vmem:[%s20136_s10 + $0x2] ss:$0 sm:$0xff] }
0x177d   : > { %v14274_v61 = vpop.eup %14273  ;;  %14293 = vrcp.f32 %v9024_v33  ;;  %12629 = vmatmul.mubr.msk.f32.gmra.mrb[156].mxu0 %vm1902_vm1, %v9112_v16  ;;  %v9114_v2 = vmul.f32 %v14272_v22, %v19153_v58 }
0x177e   : > { %v14276_v37 = vpop.eup %14275  ;;  %14295 = vrcp.f32 %v9023_v36  ;;  %v9026_v53 = vadd.f32 1.0, %v14274_v61 }
0x177f   : > { %v14278_v54 = vpop.eup %14277  ;;  %v9113_v57 = vmul.f32 %v14276_v37, %v19156_v0  ;;  %14297 = vpow2.f32 %v8995_v55 }
0x1780   : > { %v14280_v27 = vpop.eup %14279  ;;  %14299 = vrcp.f32 %v9026_v53  ;;  %v9116_v4 = vmul.f32 %v14278_v54, %v19167_v46 }
0x1781   : > { %v14282_v62 = vpop.eup %14281  ;;  %v9115_v5 = vmul.f32 %v14280_v27, %v19170_v34  ;;  %12631 = vmatprep.mubr.msk.f32.mxu0 %vm1902_vm1, %v9113_v57 }
0x1782   : > { %v14284_v44 = vpop.eup %14283  ;;  %v9025_v47 = vadd.f32 1.0, %v14282_v62  ;;  %12632 = vmatmul.mubr.msk.f32.gmra.mrb[158].mxu0 %vm1902_vm1, %v9114_v2 }
0x1783   : > { %v14286_v43 = vpop.eup %14285  ;;  %v9028_v8 = vadd.f32 1.0, %v14284_v44  ;;  %12634 = vmatprep.mubr.msk.f32.mxu0 %vm1902_vm1, %v9115_v5 }
0x1784   : > { %v14288_v0 = vpop.eup %14287  ;;  %14301 = vrcp.f32 %v9025_v47  ;;  %v9118_v60 = vmul.f32 %v14286_v43, %v19183_v9 }
0x1785   : > { %v14290_v10 = vpop.eup %14289  ;;  %v9117_v58 = vmul.f32 %v14288_v0, %v19187_v56  ;;  %14303 = vrcp.f32 %v9028_v8 }
0x1786   : > { %v14292_v26 = vpop.eup %14291  ;;  %v9027_v34 = vadd.f32 1.0, %v14290_v10  ;;  %12635 = vmatmul.mubr.msk.f32.gmra.mrb[160].mxu0 %vm1902_vm1, %v9116_v4 }
0x1787   : > { %v14294_v40 = vpop.eup %14293  ;;  %v9030_v50 = vadd.f32 1.0, %v14292_v26  ;;  %12637 = vmatprep.mubr.msk.f32.mxu0 %vm1902_vm1, %v9117_v58 }
0x1788   : > { %v14296_v15 = vpop.eup %14295  ;;  %14305 = vrcp.f32 %v9027_v34  ;;  %v9120_v56 = vmul.f32 %v14294_v40, %v19196_v23 }
0x1789   : > { %v14298_v38 = vpop.eup %14297  ;;  %v9119_v46 = vmul.f32 %v14296_v15, %v19201_v19  ;;  %14307 = vrcp.f32 %v9030_v50 }
0x178a   : > { %v9029_v6 = vadd.f32 1.0, %v14298_v38  ;;  %12638 = vmatmul.mubr.msk.f32.gmra.mrb[162].mxu0 %vm1902_vm1, %v9118_v60  ;;  %v14300_v59 = vpop.eup %14299 }
0x178b   : > { %12640 = vmatprep.mubr.msk.f32.mxu0 %vm1902_vm1, %v9119_v46  ;;  %v9122_v9 = vmul.f32 %v14300_v59, %v19210_v51 }
0x178c   : > { %14309 = vrcp.f32 %v9029_v6 }
0x178e   : > { %v14302_v35 = vpop.eup %14301  ;;  %12641 = vmatmul.mubr.msk.f32.gmra.mrb[164].mxu0 %vm1902_vm1, %v9120_v56 }
0x178f   : > { %v9121_v11 = vmul.f32 %v14302_v35, %v19215_v3  ;;  %v14304_v7 = vpop.eup %14303 }
0x1790   : > { %v9124_v23 = vmul.f32 %v14304_v7, %v19225_v25 }
0x1791   : > { %12643 = vmatprep.mubr.msk.f32.mxu0 %vm1902_vm1, %v9121_v11 }
0x1792   : > { %v14306_v19 = vpop.eup %14305  ;;  %12644 = vmatmul.mubr.msk.f32.gmra.mrb[166].mxu0 %vm1902_vm1, %v9122_v9 }
0x1793   : > { %v9123_v52 = vmul.f32 %v14306_v19, %v19229_v29  ;;  %v14308_v42 = vpop.eup %14307 }
0x1794   : > { %v9126_v51 = vmul.f32 %v14308_v42, %v19237_v39 }
0x1795   : > { %12646 = vmatprep.mubr.msk.f32.mxu0 %vm1902_vm1, %v9123_v52 }
0x1796   : > { %v14310_v28 = vpop.eup %14309  ;;  %12647 = vmatmul.mubr.msk.f32.gmra.mrb[168].mxu0 %vm1902_vm1, %v9124_v23 }
0x1797   : > { %v9125_v3 = vmul.f32 %v14310_v28, %v19243_v32 }
0x1799   : > { %12649 = vmatprep.mubr.msk.f32.mxu0 %vm1902_vm1, %v9125_v3 }
0x179a   : > { %12650 = vmatmul.mubr.msk.f32.gmra.mrb[170].mxu0 %vm1902_vm1, %v9126_v51 }
0x179b   : > { %9781 = vmatprep.mubr.f32.mxu0 %v14669_v49 }
0x182e   : > { %v12606_v29 = vpop.f32.mrb[140].mxu0 }
0x182f   : > { %v19285_v25 = vadd.f32 %v12606_v29, %v19282_v63  ;;  %v9302_v1 = vpop.f32.mrb[141].mxu0 }
0x1830   : > { %v19288_v16 = vadd.f32 %v19282_v63, %v9302_v1 }
0x1831   : > { %v9462_v32 = vsub.f32 0.0, %v19285_v25 }
0x1832   : > { %v9461_v39 = vsub.f32 0.0, %v19288_v16  ;;  %v12609_v33 = vpop.f32.mrb[142].mxu0 }
0x1833   : > { %v9495_v55 = vmul.f32 1.442695, %v9462_v32  ;;  %v19293_v22 = vadd.f32 %v12609_v33, %v19282_v63  ;;  %v9312_v36 = vpop.f32.mrb[143].mxu0 }
0x1834   : > { %v9493_v61 = vmul.f32 1.442695, %v9461_v39  ;;  %v19296_v37 = vadd.f32 %v19282_v63, %v9312_v36 }
0x1835   : > { %14311 = vpow2.f32 %v9495_v55  ;;  %v9464_v54 = vsub.f32 0.0, %v19293_v22 }
0x1836   : > { %14313 = vpow2.f32 %v9493_v61  ;;  %v9463_v57 = vsub.f32 0.0, %v19296_v37  ;;  %v12612_v53 = vpop.f32.mrb[144].mxu0 }
0x1837   : > { %v9499_v27 = vmul.f32 1.442695, %v9464_v54  ;;  %v19301_v2 = vadd.f32 %v12612_v53, %v19282_v63  ;;  %v9322_v62 = vpop.f32.mrb[145].mxu0 }
0x1838   : > { %v9497_v5 = vmul.f32 1.442695, %v9463_v57  ;;  %v19304_v44 = vadd.f32 %v19282_v63, %v9322_v62 }
0x1839   : > { %14315 = vpow2.f32 %v9499_v27  ;;  %v9466_v47 = vsub.f32 0.0, %v19301_v2 }
0x183a   : > { %14317 = vpow2.f32 %v9497_v5  ;;  %v9465_v43 = vsub.f32 0.0, %v19304_v44 }
0x183b   : > { %v9503_v8 = vmul.f32 1.442695, %v9466_v47 }
0x183c   : > { %v9501_v0 = vmul.f32 1.442695, %v9465_v43  ;;  %v12615_v4 = vpop.f32.mrb[146].mxu0 }
0x183d   : > { %14319 = vpow2.f32 %v9503_v8  ;;  %v19309_v10 = vadd.f32 %v12615_v4, %v19282_v63  ;;  %v9332_v58 = vpop.f32.mrb[147].mxu0 }
0x183e   : > { %14321 = vpow2.f32 %v9501_v0  ;;  %v19312_v26 = vadd.f32 %v19282_v63, %v9332_v58 }
0x183f   : > { %v14312_v34 = vpop.eup %14311  ;;  %v9468_v40 = vsub.f32 0.0, %v19309_v10 }
0x1840   : > { %v14314_v50 = vpop.eup %14313  ;;  %v9558_v15 = vadd.f32 1.0, %v14312_v34  ;;  %v9467_v60 = vsub.f32 0.0, %v19312_v26  ;;  %v12618_v38 = vpop.f32.mrb[148].mxu0 }
0x1841   : > { %v9557_v46 = vadd.f32 1.0, %v14314_v50  ;;  %v9507_v6 = vmul.f32 1.442695, %v9468_v40  ;;  %v19317_v56 = vadd.f32 %v12618_v38, %v19282_v63  ;;  %v9342_v59 = vpop.f32.mrb[149].mxu0 }
0x1842   : > { %14323 = vrcp.f32 %v9558_v15  ;;  %v9505_v35 = vmul.f32 1.442695, %v9467_v60  ;;  %v19320_v11 = vadd.f32 %v19282_v63, %v9342_v59  ;;  %v20391_v59 = vld [vmem:[#allocation83_spill] sm:$0xff] }
0x1843   : > { %v14316_v9 = vpop.eup %14315  ;;  %14325 = vrcp.f32 %v9557_v46  ;;  %v9470_v7 = vsub.f32 0.0, %v19317_v56 }
0x1844   : > { %v14318_v19 = vpop.eup %14317  ;;  %v9560_v52 = vadd.f32 1.0, %v14316_v9  ;;  %14327 = vpow2.f32 %v9507_v6  ;;  %v9469_v23 = vsub.f32 0.0, %v19320_v11  ;;  %v12621_v42 = vpop.f32.mrb[150].mxu0 }
0x1845   : > { %v9559_v28 = vadd.f32 1.0, %v14318_v19  ;;  %14329 = vpow2.f32 %v9505_v35  ;;  %v9511_v3 = vmul.f32 1.442695, %v9470_v7  ;;  %v19325_v51 = vadd.f32 %v12621_v42, %v19282_v63  ;;  %v9352_v49 = vpop.f32.mrb[151].mxu0  ;;  %v20392_v19 = vld [vmem:[#allocation84_spill] sm:$0xff] }
0x1846   : > { %14331 = vrcp.f32 %v9560_v52  ;;  %v9509_v29 = vmul.f32 1.442695, %v9469_v23  ;;  %v19328_v1 = vadd.f32 %v19282_v63, %v9352_v49 }
0x1847   : > { %v14320_v32 = vpop.eup %14319  ;;  %14333 = vrcp.f32 %v9559_v28  ;;  %v9472_v39 = vsub.f32 0.0, %v19325_v51 }
0x1848   : > { %v14322_v33 = vpop.eup %14321  ;;  %v9562_v55 = vadd.f32 1.0, %v14320_v32  ;;  %14335 = vpow2.f32 %v9511_v3  ;;  %v9471_v36 = vsub.f32 0.0, %v19328_v1  ;;  %v12624_v61 = vpop.f32.mrb[152].mxu0 }
0x1849   : > { %v9561_v54 = vadd.f32 1.0, %v14322_v33  ;;  %14337 = vpow2.f32 %v9509_v29  ;;  %v9515_v57 = vmul.f32 1.442695, %v9472_v39  ;;  %v19333_v53 = vadd.f32 %v12624_v61, %v19282_v63  ;;  %v9362_v27 = vpop.f32.mrb[153].mxu0 }
0x184a   : > { %14339 = vrcp.f32 %v9562_v55  ;;  %v9513_v62 = vmul.f32 1.442695, %v9471_v36  ;;  %v19336_v5 = vadd.f32 %v19282_v63, %v9362_v27 }
0x184b   : > { %14341 = vrcp.f32 %v9561_v54  ;;  %v9474_v47 = vsub.f32 0.0, %v19333_v53  ;;  %v20393_v54 = vld [vmem:[#allocation86_spill] sm:$0xff] }
0x184c   : > { %v14324_v43 = vpop.eup %14323  ;;  %14343 = vpow2.f32 %v9515_v57  ;;  %v9473_v8 = vsub.f32 0.0, %v19336_v5  ;;  %v12627_v0 = vpop.f32.mrb[154].mxu0 }
0x184d   : > { %v14326_v4 = vpop.eup %14325  ;;  %v9654_v58 = vmul.f32 %v14324_v43, %v19285_v25  ;;  %14345 = vpow2.f32 %v9513_v62  ;;  %v9519_v34 = vmul.f32 1.442695, %v9474_v47  ;;  %v19342_v40 = vadd.f32 %v12627_v0, %v19282_v63  ;;  %v9372_v50 = vpop.f32.mrb[155].mxu0  ;;  %v20394_v47 = vld [vmem:[#allocation85_spill] sm:$0xff] }
0x184e   : > { %v14328_v15 = vpop.eup %14327  ;;  %v9653_v60 = vmul.f32 %v14326_v4, %v19288_v16  ;;  %v9517_v38 = vmul.f32 1.442695, %v9473_v8  ;;  %v19346_v46 = vadd.f32 %v19282_v63, %v9372_v50 }
0x184f   : > { %v14330_v6 = vpop.eup %14329  ;;  %v19349_v35 = vmul.f32 %v9654_v58, %v20391_v59  ;;  %v9564_v9 = vadd.f32 1.0, %v14328_v15  ;;  %14347 = vpow2.f32 %v9519_v34  ;;  %v9476_v25 = vsub.f32 0.0, %v19342_v40 }
0x1850   : > { %v14332_v7 = vpop.eup %14331  ;;  %v19353_v52 = vmul.f32 %v9653_v60, %v20392_v19  ;;  %v9563_v23 = vadd.f32 1.0, %v14330_v6  ;;  %14349 = vpow2.f32 %v9517_v38  ;;  %v9475_v16 = vsub.f32 0.0, %v19346_v46  ;;  %v12630_v42 = vpop.f32.mrb[156].mxu0  ;;  %v20396_v19 = vld [vmem:[#allocation87_spill] sm:$0xff] }
0x1851   : > { %v14334_v28 = vpop.eup %14333  ;;  %v9656_v3 = vmul.f32 %v14332_v7, %v19293_v22  ;;  %14351 = vrcp.f32 %v9564_v9  ;;  %v9523_v49 = vmul.f32 1.442695, %v9476_v25  ;;  %v19358_v29 = vadd.f32 %v12630_v42, %v19282_v63  ;;  %v9382_v32 = vpop.f32.mrb[157].mxu0  ;;  %v20395_v9 = vld [vmem:[#allocation88_spill] sm:$0xff] }
0x1852   : > { %v14336_v39 = vpop.eup %14335  ;;  %v13002_v33 = vpack.c.bf16 %v19349_v35, %v19353_v52  ;;  %v9655_v55 = vmul.f32 %v14334_v28, %v19296_v37  ;;  %14353 = vrcp.f32 %v9563_v23  ;;  %v9521_v36 = vmul.f32 1.442695, %v9475_v16 }
0x1853   : > { %v14338_v61 = vpop.eup %14337  ;;  %v19364_v57 = vmul.f32 %v9656_v3, %v20393_v54  ;;  %v9566_v27 = vadd.f32 1.0, %v14336_v39  ;;  %14355 = vpow2.f32 %v9523_v49  ;;  %v9478_v22 = vsub.f32 0.0, %v19358_v29 }
0x1854   : > { %v14340_v62 = vpop.eup %14339  ;;  %v19368_v43 = vmul.f32 %v9655_v55, %v20394_v47  ;;  %v9565_v8 = vadd.f32 1.0, %v14338_v61  ;;  %14357 = vpow2.f32 %v9521_v36  ;;  %v19371_v0 = vadd.f32 %v19282_v63, %v9382_v32 }
0x1855   : > { %v14342_v37 = vpop.eup %14341  ;;  %v9658_v4 = vmul.f32 %v14340_v62, %v19301_v2  ;;  %14359 = vrcp.f32 %v9566_v27  ;;  %v9527_v58 = vmul.f32 1.442695, %v9478_v22  ;;  %v12633_v34 = vpop.f32.mrb[158].mxu0 }
0x1856   : > { %v14344_v50 = vpop.eup %14343  ;;  %v13006_v15 = vpack.c.bf16 %v19364_v57, %v19368_v43  ;;  %v9657_v60 = vmul.f32 %v14342_v37, %v19304_v44  ;;  %14361 = vrcp.f32 %v9565_v8  ;;  %v9477_v38 = vsub.f32 0.0, %v19371_v0  ;;  %v9392_v6 = vpop.f32.mrb[159].mxu0  ;;  %v20402_v43 = vld [vmem:[#allocation105_spill] sm:$0xff] }
0x1857   : > { %v14346_v59 = vpop.eup %14345  ;;  %v19379_v25 = vmul.f32 %v9658_v4, %v20395_v9  ;;  %v9568_v7 = vadd.f32 1.0, %v14344_v50  ;;  %14363 = vpow2.f32 %v9527_v58  ;;  %v19382_v2 = vadd.f32 %v12633_v34, %v19282_v63 }
0x1858   : > { %v19385_v23 = vmul.f32 %v9657_v60, %v20396_v19  ;;  %v9567_v16 = vadd.f32 1.0, %v14346_v59  ;;  %v9525_v42 = vmul.f32 1.442695, %v9477_v38  ;;  %v19388_v44 = vadd.f32 %v19282_v63, %v9392_v6 }
0x1859   : > { %v14348_v28 = vpop.eup %14347  ;;  %14365 = vrcp.f32 %v9568_v7  ;;  %v9480_v3 = vsub.f32 0.0, %v19382_v2  ;;  %v12636_v49 = vpop.f32.mrb[160].mxu0 }
0x185a   : > { %v14350_v32 = vpop.eup %14349  ;;  %v13010_v39 = vpack.c.bf16 %v19379_v25, %v19385_v23  ;;  %14367 = vrcp.f32 %v9567_v16  ;;  %v9570_v55 = vadd.f32 1.0, %v14348_v28  ;;  %v9479_v36 = vsub.f32 0.0, %v19388_v44  ;;  %v9402_v61 = vpop.f32.mrb[161].mxu0 }
0x185b   : > { %v14352_v54 = vpop.eup %14351  ;;  %v9569_v27 = vadd.f32 1.0, %v14350_v32  ;;  %14369 = vpow2.f32 %v9525_v42  ;;  %v9531_v22 = vmul.f32 1.442695, %v9480_v3  ;;  %v19395_v62 = vadd.f32 %v12636_v49, %v19282_v63 }
0x185c   : > { %v14354_v47 = vpop.eup %14353  ;;  %v9660_v8 = vmul.f32 %v14352_v54, %v19309_v10  ;;  %14371 = vrcp.f32 %v9570_v55  ;;  %v9529_v37 = vmul.f32 1.442695, %v9479_v36  ;;  %v19399_v4 = vadd.f32 %v19282_v63, %v9402_v61 }
0x185d   : > { %v14356_v58 = vpop.eup %14355  ;;  %v9659_v34 = vmul.f32 %v14354_v47, %v19312_v26  ;;  %14373 = vrcp.f32 %v9569_v27  ;;  %v9482_v50 = vsub.f32 0.0, %v19395_v62  ;;  %v12639_v60 = vpop.f32.mrb[162].mxu0 }
0x185e   : > { %v14358_v38 = vpop.eup %14357  ;;  %v19404_v6 = vmul.f32 %v9660_v8, %v20293_v41  ;;  %v9572_v59 = vadd.f32 1.0, %v14356_v58  ;;  %14375 = vpow2.f32 %v9531_v22  ;;  %v9481_v10 = vsub.f32 0.0, %v19399_v4  ;;  %v9412_v9 = vpop.f32.mrb[163].mxu0 }
0x185f   : > { %v14360_v7 = vpop.eup %14359  ;;  %v19408_v19 = vmul.f32 %v9659_v34, %v20296_v45  ;;  %v9571_v16 = vadd.f32 1.0, %v14358_v38  ;;  %14377 = vpow2.f32 %v9529_v37  ;;  %v9535_v26 = vmul.f32 1.442695, %v9482_v50 }
0x1860   : > { %v14362_v42 = vpop.eup %14361  ;;  %v9662_v28 = vmul.f32 %v14360_v7, %v19317_v56  ;;  %14379 = vrcp.f32 %v9572_v59  ;;  %v9533_v3 = vmul.f32 1.442695, %v9481_v10  ;;  %v19412_v41 = vadd.f32 %v12639_v60, %v19282_v63  ;;  %v20397_v7 = vld [vmem:[#allocation94_spill] sm:$0xff] }
0x1861   : > { %v14364_v49 = vpop.eup %14363  ;;  %v13014_v32 = vpack.c.bf16 %v19404_v6, %v19408_v19  ;;  %v9661_v55 = vmul.f32 %v14362_v42, %v19320_v11  ;;  %14381 = vrcp.f32 %v9571_v16  ;;  %v19418_v45 = vadd.f32 %v19282_v63, %v9412_v9  ;;  %v12642_v36 = vpop.f32.mrb[164].mxu0 }
0x1862   : > { %v19421_v61 = vmul.f32 %v9662_v28, %v20300_v31  ;;  %v9574_v56 = vadd.f32 1.0, %v14364_v49  ;;  %14383 = vpow2.f32 %v9535_v26  ;;  %v9484_v54 = vsub.f32 0.0, %v19412_v41  ;;  %v9422_v27 = vpop.f32.mrb[165].mxu0 }
0x1863   : > { %v14366_v22 = vpop.eup %14365  ;;  %v19425_v47 = vmul.f32 %v9661_v55, %v20303_v17  ;;  %14385 = vpow2.f32 %v9533_v3  ;;  %v9483_v11 = vsub.f32 0.0, %v19418_v45  ;;  %v19429_v8 = vadd.f32 %v12642_v36, %v19282_v63  ;;  %v20398_v3 = vld [vmem:[#allocation93_spill] sm:$0xff] }
0x1864   : > { %v14368_v37 = vpop.eup %14367  ;;  %v9664_v58 = vmul.f32 %v14366_v22, %v19325_v51  ;;  %14387 = vrcp.f32 %v9574_v56  ;;  %v9539_v31 = vmul.f32 1.442695, %v9484_v54  ;;  %v19433_v34 = vadd.f32 %v19282_v63, %v9422_v27 }
0x1865   : > { %v14370_v50 = vpop.eup %14369  ;;  %v13018_v60 = vpack.c.bf16 %v19421_v61, %v19425_v47  ;;  %v9663_v17 = vmul.f32 %v14368_v37, %v19328_v1  ;;  %v9537_v38 = vmul.f32 1.442695, %v9483_v11  ;;  %v9486_v59 = vsub.f32 0.0, %v19429_v8  ;;  %v12645_v10 = vpop.f32.mrb[166].mxu0 }
0x1866   : > { %v14372_v9 = vpop.eup %14371  ;;  %v19440_v16 = vmul.f32 %v9664_v58, %v20397_v7  ;;  %v9573_v51 = vadd.f32 1.0, %v14370_v50  ;;  %14389 = vpow2.f32 %v9539_v31  ;;  %v9485_v26 = vsub.f32 0.0, %v19433_v34  ;;  %v9432_v42 = vpop.f32.mrb[167].mxu0  ;;  %v20399_v50 = vld [vmem:[#allocation95_spill] sm:$0xff] }
0x1867   : > { %v14374_v28 = vpop.eup %14373  ;;  %v19444_v49 = vmul.f32 %v9663_v17, %v20398_v3  ;;  %v9666_v55 = vmul.f32 %v14372_v9, %v19333_v53  ;;  %14391 = vpow2.f32 %v9537_v38  ;;  %v9543_v1 = vmul.f32 1.442695, %v9486_v59 }
0x1868   : > { %v14376_v36 = vpop.eup %14375  ;;  %v9665_v56 = vmul.f32 %v14374_v28, %v19336_v5  ;;  %14393 = vrcp.f32 %v9573_v51  ;;  %v9541_v54 = vmul.f32 1.442695, %v9485_v26  ;;  %v19449_v27 = vadd.f32 %v12645_v10, %v19282_v63 }
0x1869   : > { %v14378_v22 = vpop.eup %14377  ;;  %v13022_v11 = vpack.c.bf16 %v19440_v16, %v19444_v49  ;;  %v19454_v37 = vmul.f32 %v9666_v55, %v20311_v48  ;;  %v9576_v58 = vadd.f32 1.0, %v14376_v36  ;;  %14395 = vpow2.f32 %v9543_v1  ;;  %v12648_v53 = vpop.f32.mrb[168].mxu0  ;;  %v20400_v1 = vld [vmem:[#allocation113_spill] sm:$0xff]  ;;  %v14670_v49 = vld [vmem:[#allocation2] sm:$0xff] }
0x186a   : > { %v14380_v31 = vpop.eup %14379  ;;  %v19457_v17 = vmul.f32 %v9665_v56, %v20399_v50  ;;  %v9575_v5 = vadd.f32 1.0, %v14378_v22  ;;  %14397 = vpow2.f32 %v9541_v54  ;;  %v9488_v38 = vsub.f32 0.0, %v19449_v27  ;;  %v9442_v59 = vpop.f32.mrb[169].mxu0 }
0x186b   : > { %v14382_v10 = vpop.eup %14381  ;;  %v9668_v9 = vmul.f32 %v14380_v31, %v19342_v40  ;;  %14399 = vrcp.f32 %v9576_v58  ;;  %v19462_v7 = vadd.f32 %v19282_v63, %v9432_v42  ;;  %v19465_v48 = vadd.f32 %v12648_v53, %v19282_v63  ;;  %v20401_v58 = vld [vmem:[#allocation114_spill] sm:$0xff] }
0x186c   : > { %v14384_v51 = vpop.eup %14383  ;;  %v9667_v28 = vmul.f32 %v14382_v10, %v19346_v46  ;;  %14401 = vrcp.f32 %v9575_v5  ;;  %v9547_v3 = vmul.f32 1.442695, %v9488_v38  ;;  %v19479_v46 = vadd.f32 %v19282_v63, %v9442_v59 }
0x186d   : > { %v14386_v55 = vpop.eup %14385  ;;  %v19471_v36 = vmul.f32 %v9668_v9, %v20400_v1  ;;  %v9578_v40 = vadd.f32 1.0, %v14384_v51  ;;  %v9487_v56 = vsub.f32 0.0, %v19462_v7  ;;  %v9490_v42 = vsub.f32 0.0, %v19465_v48  ;;  %v12651_v54 = vpop.f32.mrb[170].mxu0 }
0x186e   : > { %v14388_v22 = vpop.eup %14387  ;;  %v19476_v53 = vmul.f32 %v9667_v28, %v20401_v58  ;;  %v9577_v31 = vadd.f32 1.0, %v14386_v55  ;;  %14403 = vpow2.f32 %v9547_v3  ;;  %v9452_v50 = vpop.f32.mrb[171].mxu0  ;;  %v9489_v1 = vsub.f32 0.0, %v19479_v46 }
0x186f   : > { %v9670_v5 = vmul.f32 %v14388_v22, %v19358_v29  ;;  %14405 = vrcp.f32 %v9578_v40  ;;  %v9545_v38 = vmul.f32 1.442695, %v9487_v56  ;;  %v9551_v10 = vmul.f32 1.442695, %v9490_v42 }
0x1870   : > { %v14390_v9 = vpop.eup %14389  ;;  %14407 = vrcp.f32 %v9577_v31  ;;  %v19486_v28 = vadd.f32 %v12651_v54, %v19282_v63  ;;  %v19489_v59 = vadd.f32 %v19282_v63, %v9452_v50  ;;  %v9549_v56 = vmul.f32 1.442695, %v9489_v1 }
0x1871   : > { %v14392_v3 = vpop.eup %14391  ;;  %v9580_v55 = vadd.f32 1.0, %v14390_v9  ;;  %14409 = vpow2.f32 %v9545_v38  ;;  %v9702_v58 = vmul.f32 %v9670_v5, %v20323_v21  ;;  %v20411_v16 = vpack.c.bf16 %v19471_v36, %v19476_v53 }
0x1872   : > { %v14394_v29 = vpop.eup %14393  ;;  %v9579_v40 = vadd.f32 1.0, %v14392_v3  ;;  %14411 = vpow2.f32 %v9551_v10  ;;  %v9492_v42 = vsub.f32 0.0, %v19486_v28  ;;  %v9491_v54 = vsub.f32 0.0, %v19489_v59 }
0x1873   : > { %v14396_v22 = vpop.eup %14395  ;;  %v9669_v31 = vmul.f32 %v14394_v29, %v19371_v0  ;;  %14413 = vrcp.f32 %v9580_v55 }
0x1874   : > { %v14398_v51 = vpop.eup %14397  ;;  %14415 = vrcp.f32 %v9579_v40  ;;  %v9582_v38 = vadd.f32 1.0, %v14396_v22  ;;  %v9555_v9 = vmul.f32 1.442695, %v9492_v42  ;;  %v9553_v10 = vmul.f32 1.442695, %v9491_v54 }
0x1875   : > { %v14400_v63 = vpop.eup %14399  ;;  %v9701_v50 = vmul.f32 %v9669_v31, %v20154_v24  ;;  %v9581_v3 = vadd.f32 1.0, %v14398_v51  ;;  %14417 = vpow2.f32 %v9549_v56 }
0x1876   : > { %v14402_v1 = vpop.eup %14401  ;;  %v9672_v26 = vmul.f32 %v14400_v63, %v19382_v2  ;;  %14419 = vrcp.f32 %v9582_v38 }
0x1877   : > { %v9671_v21 = vmul.f32 %v14402_v1, %v19388_v44  ;;  %14421 = vrcp.f32 %v9581_v3  ;;  %v13000_v0 = vpack.c.bf16 %v9702_v58, %v9701_v50  ;;  %v20403_v3 = vld [vmem:[#allocation106_spill] sm:$0xff] }
0x1878   : > { %v14404_v5 = vpop.eup %14403  ;;  %v9704_v55 = vmul.f32 %v9672_v26, %v20155_v18  ;;  %14423 = vpow2.f32 %v9555_v9 }
0x1879   : > { %v14406_v29 = vpop.eup %14405  ;;  %v9703_v40 = vmul.f32 %v9671_v21, %v20156_v14  ;;  %v9584_v42 = vadd.f32 1.0, %v14404_v5  ;;  %14425 = vpow2.f32 %v9553_v10  ;;  %13001 = vmatprep.subr.bf16.mxu0 %v13000_v0 }
0x187a   : > { %v14408_v24 = vpop.eup %14407  ;;  %v9674_v51 = vmul.f32 %v14406_v29, %v19395_v62  ;;  %13003 = vmatpush3.bf16.msra.mxu0 %v13002_v33 }
0x187b   : > { %v14410_v2 = vpop.eup %14409  ;;  %v9673_v44 = vmul.f32 %v14408_v24, %v19399_v4  ;;  %14427 = vrcp.f32 %v9584_v42  ;;  %v13004_v56 = vpack.c.bf16 %v9704_v55, %v9703_v40  ;;  %v20406_v40 = vld [vmem:[#allocation109_spill] sm:$0xff]  ;;  %v20407_v24 = vld [vmem:[#allocation110_spill] sm:$0xff] }
0x187c   : > { %v14412_v18 = vpop.eup %14411  ;;  %v9706_v26 = vmul.f32 %v9674_v51, %v20158_v13  ;;  %v9583_v22 = vadd.f32 1.0, %v14410_v2 }
0x187d   : > { %v14414_v14 = vpop.eup %14413  ;;  %v9705_v58 = vmul.f32 %v9673_v44, %v20159_v20  ;;  %v9586_v31 = vadd.f32 1.0, %v14412_v18  ;;  %13005 = vmatprep.subr.bf16.mxu0 %v13004_v56  ;;  %v9798_v44 = vld [vmem:[#allocation16 + $0x40] sm:$0xff]  ;;  %v9799_v56 = vld [vmem:[#allocation16 + $0x48] sm:$0xff] }
0x187e   : > { %v14416_v54 = vpop.eup %14415  ;;  %v9676_v62 = vmul.f32 %v14414_v14, %v19412_v41  ;;  %14429 = vrcp.f32 %v9583_v22  ;;  %13007 = vmatpush3.bf16.msra.mxu0 %v13006_v15 }
0x187f   : > { %v14418_v35 = vpop.eup %14417  ;;  %v9675_v52 = vmul.f32 %v14416_v54, %v19418_v45  ;;  %14431 = vrcp.f32 %v9586_v31  ;;  %v13008_v33 = vpack.c.bf16 %v9706_v26, %v9705_v58  ;;  %v20410_v26 = vpack.c.bf16 %v19454_v37, %v19457_v17  ;;  %v9800_v37 = vld [vmem:[#allocation16 + $0x50] sm:$0xff]  ;;  %v9801_v17 = vld [vmem:[#allocation16 + $0x58] sm:$0xff]  ;;  %v11038_v58 = vld [vmem:[%s20177_s11 + $0x40] sm:$0xff] }
0x1880   : > { %v14420_v13 = vpop.eup %14419  ;;  %v9708_v4 = vmul.f32 %v9676_v62, %v20161_v12  ;;  %v9585_v38 = vadd.f32 1.0, %v14418_v35  ;;  %v13036_v14 = vpack.c.bf16 %v9801_v17, %v9800_v37  ;;  %v11039_v31 = vld [vmem:[%s20177_s11 + $0x48] sm:$0xff]  ;;  %v11040_v35 = vld [vmem:[%s20177_s11 + $0x50] sm:$0xff] }
0x1881   : > { %v14422_v20 = vpop.eup %14421  ;;  %v9707_v9 = vmul.f32 %v9675_v52, %v20162_v30  ;;  %v9678_v63 = vmul.f32 %v14420_v13, %v19429_v8  ;;  %13009 = vmatprep.subr.bf16.mxu0 %v13008_v33  ;;  %v13040_v36 = vpack.c.bf16 %v11039_v31, %v11038_v58  ;;  %v11041_v52 = vld [vmem:[%s20177_s11 + $0x58] sm:$0xff] }
0x1882   : > { %v14424_v41 = vpop.eup %14423  ;;  %v9677_v50 = vmul.f32 %v14422_v20, %v19433_v34  ;;  %14433 = vrcp.f32 %v9585_v38  ;;  %13011 = vmatpush3.bf16.msra.mxu0 %v13010_v39  ;;  %v20404_v34 = vld [vmem:[#allocation107_spill] sm:$0xff]  ;;  %v13044_v38 = vpack.c.bf16 %v11041_v52, %v11040_v35  ;;  %v20412_v20 = vld [vmem:[#allocation100_spill] sm:$0xff] }
0x1883   : > { %v14426_v57 = vpop.eup %14425  ;;  %v9710_v15 = vmul.f32 %v9678_v63, %v20402_v43  ;;  %v9588_v45 = vadd.f32 1.0, %v14424_v41  ;;  %v13012_v12 = vpack.c.bf16 %v9708_v4, %v9707_v9  ;;  %v20413_v9 = vld [vmem:[#allocation101_spill] sm:$0xff]  ;;  %v9983_v63 = vld [vmem:[#allocation17 + $0x40] sm:$0xff]  ;;  %v9984_v41 = vld [vmem:[#allocation17 + $0x48] sm:$0xff] }
0x1884   : > { %v9709_v10 = vmul.f32 %v9677_v50, %v20403_v3  ;;  %v9587_v1 = vadd.f32 1.0, %v14426_v57  ;;  %v13048_v50 = vpack.c.bf16 %v9984_v41, %v9983_v63  ;;  %v9985_v57 = vld [vmem:[#allocation17 + $0x50] sm:$0xff]  ;;  %v9986_v43 = vld [vmem:[#allocation17 + $0x58] sm:$0xff] }
0x1885   : > { %v14428_v30 = vpop.eup %14427  ;;  %14435 = vrcp.f32 %v9588_v45  ;;  %13013 = vmatprep.subr.bf16.mxu0 %v13012_v12  ;;  %v11047_v45 = vld [vmem:[%s20179_s18 + $0x2] ss:$0 sm:$0xff] }
0x1886   : > { %v9680_v8 = vmul.f32 %v14428_v30, %v19449_v27  ;;  %14437 = vrcp.f32 %v9587_v1  ;;  %13015 = vmatpush3.bf16.msra.mxu0 %v13014_v32  ;;  %v13016_v25 = vpack.c.bf16 %v9710_v15, %v9709_v10  ;;  %v20405_v27 = vld [vmem:[#allocation108_spill] sm:$0xff]  ;;  %13049 = vmatprep.subr.bf16.mxu1 %v13048_v50  ;;  %v13052_v15 = vpack.c.bf16 %v9986_v43, %v9985_v57 }
0x1887   : > { %13051 = vmatpush3.bf16.msra.mxu1 %v13048_v50 }
0x1888   : > { %v14430_v23 = vpop.eup %14429  ;;  %13017 = vmatprep.subr.bf16.mxu0 %v13016_v25  ;;  %v9712_v21 = vmul.f32 %v9680_v8, %v20404_v34  ;;  %13053 = vmatprep.subr.bf16.mxu1 %v13052_v15 }
0x1889   : > { %v14432_v39 = vpop.eup %14431  ;;  %v9679_v0 = vmul.f32 %v14430_v23, %v19462_v7 }
0x188a   : > { %v9682_v5 = vmul.f32 %v14432_v39, %v19465_v48  ;;  %13019 = vmatpush3.bf16.msra.mxu0 %v13018_v60  ;;  %v20408_v60 = vld [vmem:[#allocation111_spill] sm:$0xff] }
0x188b   : > { %v9711_v55 = vmul.f32 %v9679_v0, %v20405_v27  ;;  %13055 = vmatpush3.bf16.msra.mxu1 %v13052_v15 }
0x188c   : > { %v14434_v29 = vpop.eup %14433  ;;  %v9714_v6 = vmul.f32 %v9682_v5, %v20406_v40  ;;  %v11049_v40 = vld [vmem:[%s20181_s5 + $0x2] ss:$0 sm:$0xff] }
0x188d   : > { %v9681_v19 = vmul.f32 %v14434_v29, %v19479_v46  ;;  %v13020_v32 = vpack.c.bf16 %v9712_v21, %v9711_v55  ;;  %v20409_v46 = vld [vmem:[#allocation112_spill] sm:$0xff] }
0x188f   : > { %v14436_v42 = vpop.eup %14435  ;;  %v9713_v51 = vmul.f32 %v9681_v19, %v20407_v24  ;;  %13021 = vmatprep.subr.bf16.mxu0 %v13020_v32 }
0x1890   : > { %v14438_v2 = vpop.eup %14437  ;;  %v9684_v7 = vmul.f32 %v14436_v42, %v19486_v28  ;;  %13023 = vmatpush3.bf16.msra.mxu0 %v13022_v11  ;;  %v13032_v28 = vpack.c.bf16 %v9799_v56, %v9798_v44  ;;  %v14671_v11 = vld [vmem:[#allocation2 + $0x18] sm:$0xff] }
0x1891   : > { %v9683_v61 = vmul.f32 %v14438_v2, %v19489_v59  ;;  %v13024_v47 = vpack.c.bf16 %v9714_v6, %v9713_v51  ;;  %v14672_v59 = vld [vmem:[#allocation2 + $0x10] sm:$0xff] }
0x1892   : > { %v9716_v48 = vmul.f32 %v9684_v7, %v20408_v60 }
0x1893   : > { %v9715_v18 = vmul.f32 %v9683_v61, %v20409_v46  ;;  %13025 = vmatprep.subr.bf16.mxu0 %v13024_v47 }
0x1894   : > { %13027 = vmatpush3.bf16.msra.mxu0 %v20410_v26 }
0x1895   : > { %v13028_v22 = vpack.c.bf16 %v9716_v48, %v9715_v18 }
0x1897   : > { %13029 = vmatprep.subr.bf16.mxu0 %v13028_v22 }
0x1898   : > { %13031 = vmatpush3.bf16.msra.mxu0 %v20411_v16 }
0x1899   : > { %13033 = vmatprep.subr.bf16.mxu0 %v13032_v28 }
0x189b   : > { %9782 = vmatmul.mubr.f32.vlgmr.msra.gmra.mrb[172].mxu0 %v14670_v49 }
0x189c   : > { %9786 = vmatprep.mubr.f32.mxu0 %v14671_v11  ;;  %13035 = vmatpush3.bf16.msra.mxu0 %v13032_v28 }
0x189d   : > { %13037 = vmatprep.subr.bf16.mxu0 %v13036_v14 }
0x189f   : > { %9787 = vmatmul.mubr.f32.gmra.mrb[174].mxu0 %v14672_v59 }
0x18a0   : > { %13039 = vmatpush3.bf16.msra.mxu0 %v13036_v14 }
0x18a1   : > { %13041 = vmatprep.subr.bf16.mxu0 %v13040_v36 }
0x196e   : > { %v11780_v53 = vpop.f32.mrb[172].mxu0 }
0x196f   : > { %v11781_v54 = vpop.f32.mrb[173].mxu0 }
0x1970   : > { %v11782_v62 = vadd.f32 %v11781_v54, %v11780_v53 }
0x1972   : > { %v11783_v33 = vpop.f32.mrb[174].mxu0  ;;  %12660 = vmatprep.mubr.msk.f32.mxu0 %vm1902_vm1, %v11782_v62 }
0x1973   : > { %v11784_v13 = vpop.f32.mrb[175].mxu0 }
0x1974   : > { %v11785_v4 = vadd.f32 %v11784_v13, %v11783_v33 }
0x1976   : > { %12661 = vmatmul.mubr.msk.f32.vlgmr.msra.gmra.mrb[176].mxu0 %vm1902_vm1, %v11785_v4 }
0x1977   : > { %13043 = vmatpush3.bf16.msra.mxu0 %v13040_v36  ;;  %12671 = vmatprep.mubr.msk.f32.mxu0 %vm1902_vm1, %v20412_v20 }
0x1978   : > { %13045 = vmatprep.subr.bf16.mxu0 %v13044_v38 }
0x197b   : > { %13047 = vmatpush3.bf16.msra.mxu0 %v13044_v38 }
0x197e   : > { %12672 = vmatmul.mubr.msk.f32.vlgmr.msra.gmra.mrb[176].mxu0 %vm1902_vm1, %v20413_v9 }
0x1a51   : > { %v12673_v12 = vpop.f32.mrb[176].mxu0 }
0x1a52   : > { %v9967_v3 = vadd.f32 %v12673_v12, %v11047_v45  ;;  %v9949_v10 = vpop.f32.mrb[177].mxu0 }
0x1a53   : > { %v9966_v1 = vadd.f32 %v11047_v45, %v9949_v10 }
0x1a54   : > { %v9969_v30 = vsub.f32 0.0, %v9967_v3 }
0x1a55   : > { %v9968_v8 = vsub.f32 0.0, %v9966_v1 }
0x1a56   : > { %v9972_v25 = vmul.f32 1.442695, %v9969_v30 }
0x1a57   : > { %v9970_v23 = vmul.f32 1.442695, %v9968_v8 }
0x1a58   : > { %14439 = vpow2.f32 %v9972_v25 }
0x1a59   : > { %14441 = vpow2.f32 %v9970_v23 }
0x1a62   : > { %v14440_v39 = vpop.eup %14439 }
0x1a63   : > { %v14442_v34 = vpop.eup %14441  ;;  %v9975_v21 = vadd.f32 1.0, %v14440_v39 }
0x1a64   : > { %v9974_v0 = vadd.f32 1.0, %v14442_v34 }
0x1a65   : > { %14443 = vrcp.f32 %v9975_v21 }
0x1a66   : > { %14445 = vrcp.f32 %v9974_v0 }
0x1a6f   : > { %v14444_v5 = vpop.eup %14443 }
0x1a70   : > { %v14446_v27 = vpop.eup %14445  ;;  %v9981_v29 = vmul.f32 %v14444_v5, %v9967_v3 }
0x1a71   : > { %v9980_v55 = vmul.f32 %v14446_v27, %v9966_v1 }
0x1a73   : > { %12682 = vmatprep.mubr.msk.f32.mxu1 %vm1902_vm1, %v9980_v55 }
0x1a74   : > { %12683 = vmatmul.mubr.msk.f32.vlgmr.msra.gmra.mrb[188].mxu1 %vm1902_vm1, %v9981_v29 }
0x1b47   : > { %v12684_v6 = vpop.f32.mrb[188].mxu1 }
0x1b48   : > { %v10073_v19 = vadd.f32 %v12684_v6, %v11049_v40  ;;  %v10067_v32 = vpop.f32.mrb[189].mxu1 }
0x1b49   : > { %v10068_v42 = vadd.f32 %v11049_v40, %v10067_v32  ;;  %v10174_v32 = vld [vmem:[%s19910_s3] sm:$0xff] }
0x1b4a   : > { %v10079_v24 = vmul.f32 0.70710677, %v10073_v19  ;;  %v10077_v12 = vmul.f32 0.5, %v10073_v19 }
0x1b4b   : > { %v10078_v51 = vmul.f32 0.70710677, %v10068_v42  ;;  %v10076_v1 = vmul.f32 0.5, %v10068_v42  ;;  %v10175_v42 = vld [vmem:[%s19910_s3 + $0x8] sm:$0xff] }
0x1b4c   : > { %v10081_v2 = vand.u32 2147483647, %v10079_v24  ;;  %vm10121_vm0 = vcmp.lt.f32.partialorder %v10079_v24, 0.0  ;;  %v10176_v24 = vld [vmem:[%s19910_s3 + $0x10] sm:$0xff] }
0x1b4d   : > { %v10080_v7 = vand.u32 2147483647, %v10078_v51  ;;  %vm10120_vm14 = vcmp.lt.f32.partialorder %v10078_v51, 0.0  ;;  %v13056_v51 = vpack.c.bf16 %v10175_v42, %v10174_v32 }
0x1b4e   : > { %v10083_v61 = vmul.f32 0.3275911, %v10081_v2  ;;  %v10109_v44 = vmul.f32 %v10081_v2, %v10081_v2  ;;  %v10177_v2 = vld [vmem:[%s19910_s3 + $0x18] sm:$0xff]  ;;  %s1145_s3 = scalar_lea.vmem [#allocation19], %s10522_s7  ;;  %s14959_s7 = sshll.u32 %s15090_s0, 4  ;;  %s14960_s7 = int_to_ptr.vmem [resolvable:$false] %s14959_s7 }
0x1b4f   : > { %v10082_v47 = vmul.f32 0.3275911, %v10080_v7  ;;  %v10108_v56 = vmul.f32 %v10080_v7, %v10080_v7  ;;  %v13060_v7 = vpack.c.bf16 %v10177_v2, %v10176_v24  ;;  %13057 = vmatprep.subr.bf16.mxu0 %v13056_v51  ;;  %s10282_s5 = sshll.u32 %s1145_s3, 4  ;;  %s14961_s11 = scalar_lea.vmem %s14960_s7, 512  ;;  %s19577_s5 = int_to_ptr.vmem [resolvable:$true] %s10282_s5 }
0x1b50   : > { %v10085_v60 = vadd.f32 1.0, %v10083_v61  ;;  %v10111_v18 = vsub.f32 0.0, %v10109_v44  ;;  %13059 = vmatpush3.bf16.msra.mxu0 %v13056_v51  ;;  %s14955_s10 = scalar_lea.vmem %s19577_s5, 256  ;;  %p14962_p9 = scmp.lt.s32.totalorder %s19577_s5, %s14960_s7 }
0x1b51   : > { %v10084_v48 = vadd.f32 1.0, %v10082_v47  ;;  %v10110_v22 = vsub.f32 0.0, %v10108_v56  ;;  %13061 = vmatprep.subr.bf16.mxu0 %v13060_v7  ;;  %p14956_p13 = scmp.ne.s32.totalorder %s19577_s5, %s14955_s10  ;;  %p14963_p10 = scmp.lt.s32.totalorder %s14961_s11, %s14955_s10 }
0x1b52   : > { %14447 = vrcp.f32 %v10085_v60  ;;  %v10114_v11 = vmul.f32 1.442695, %v10111_v18 }
0x1b53   : > { %14449 = vrcp.f32 %v10084_v48  ;;  %v10112_v37 = vmul.f32 1.442695, %v10110_v22  ;;  %p14957_p0 = pnand %p14956_p13, %p20415_p6  ;;  %p14964_p12 = por %p14963_p10, %p14962_p9 }
0x1b54   : > { %14451 = vpow2.f32 %v10114_v11  ;;  %13063 = vmatpush3.bf16.msra.mxu0 %v13060_v7 }
0x1b55   : > { %14453 = vpow2.f32 %v10112_v37  ;;  %p14958_p5 = pneg %p14957_p0 }
0x1b57   : > { %p14965_p1 = pnand %p14964_p12, %p14958_p5 }
0x1b5c   : > { %v14448_v46 = vpop.eup %14447 }
0x1b5d   : > { %v14450_v26 = vpop.eup %14449  ;;  %v10091_v28 = vmul.f32 1.0614054, %v14448_v46 }
0x1b5e   : > { %v10090_v16 = vmul.f32 1.0614054, %v14450_v26  ;;  %v14452_v38 = vpop.eup %14451 }
0x1b5f   : > { %v10093_v49 = vadd.f32 -1.4531521, %v10091_v28  ;;  %v14454_v9 = vpop.eup %14453 }
0x1b60   : > { %v10092_v59 = vadd.f32 -1.4531521, %v10090_v16 }
0x1b61   : > { %v10095_v17 = vmul.f32 %v14448_v46, %v10093_v49 }
0x1b62   : > { %v10094_v14 = vmul.f32 %v14450_v26, %v10092_v59 }
0x1b63   : > { %v10097_v58 = vadd.f32 1.4214138, %v10095_v17 }
0x1b64   : > { %v10096_v31 = vadd.f32 1.4214138, %v10094_v14 }
0x1b65   : > { %v10099_v36 = vmul.f32 %v14448_v46, %v10097_v58 }
0x1b66   : > { %v10098_v53 = vmul.f32 %v14450_v26, %v10096_v31 }
0x1b67   : > { %v10101_v54 = vadd.f32 -0.28449672, %v10099_v36  ;;  %v14673_v36 = vld [vmem:[%s20388_s15] ss:$0 sm:$0xff] }
0x1b68   : > { %v10100_v62 = vadd.f32 -0.28449672, %v10098_v53 }
0x1b69   : > { %v10103_v35 = vmul.f32 %v14448_v46, %v10101_v54 }
0x1b6a   : > { %v10102_v52 = vmul.f32 %v14450_v26, %v10100_v62  ;;  %v14674_v62 = vld [vmem:[%s19909_s4] ss:$0 sm:$0xff]  ;;  %s19580_s4 = scalar_lea.hbm %s19908_s9, %s11063_s6 }
0x1b6b   : > { %v10105_v33 = vadd.f32 0.2548296, %v10103_v35 }
0x1b6c   : > { %v10104_v13 = vadd.f32 0.2548296, %v10102_v52 }
0x1b6d   : > { %v10107_v4 = vmul.f32 %v14448_v46, %v10105_v33  ;;  %v11052_v33 = vld [vmem:[%s15256_s20] ss:$0 sm:$0xff] }
0x1b6e   : > { %v10106_v20 = vmul.f32 %v14450_v26, %v10104_v13 }
0x1b6f   : > { %v10117_v63 = vmul.f32 %v14452_v38, %v10107_v4 }
0x1b70   : > { %v10116_v41 = vmul.f32 %v14454_v9, %v10106_v20 }
0x1b71   : > { %v10119_v50 = vsub.f32 1.0, %v10117_v63 }
0x1b72   : > { %v10118_v57 = vsub.f32 1.0, %v10116_v41 }
0x1b73   : > { %v10123_v43 = vsub.f32 0.0, %v10119_v50 }
0x1b74   : > { %v10122_v15 = vsub.f32 0.0, %v10118_v57 }
0x1b75   : > { %v10125_v45 = vsel %vm10121_vm0, %v10123_v43, %v10119_v50 }
0x1b76   : > { %v10127_v3 = vadd.f32 1.0, %v10125_v45  ;;  %v10124_v10 = vsel %vm10120_vm14, %v10122_v15, %v10118_v57 }
0x1b77   : > { %v10126_v30 = vadd.f32 1.0, %v10124_v10 }
0x1b78   : > { %v10129_v8 = vmul.f32 %v10127_v3, %v10077_v12 }
0x1b79   : > { %v10128_v25 = vmul.f32 %v10126_v30, %v10076_v1 }
0x1b7a   : > { %v10133_v23 = vsel %vm1902_vm1, %v10129_v8, 0.0 }
0x1b7b   : > { %10134 = vadd.xlane.f32.xlu1 %v10133_v23  ;;  %v10130_v39 = vsel %vm1902_vm1, %v10128_v25, 0.0 }
0x1b7c   : > { %10131 = vadd.xlane.f32.xlu0 %v10130_v39 }
0x1c08   : > { %v10135_v34 = vpop.xlane.xlu1 %10134 }
0x1c09   : > { %v10137_v21 = vmul.f32 0.03125, %v10135_v34  ;;  %v10132_v0 = vpop.xlane.xlu0 %10131 }
0x1c0a   : > { %v10136_v5 = vmul.f32 0.03125, %v10132_v0 }
0x1c0b   : > { %v10139_v27 = vsub.f32 %v10129_v8, %v10137_v21 }
0x1c0c   : > { %v10138_v55 = vsub.f32 %v10128_v25, %v10136_v5 }
0x1c0d   : > { %v10141_v29 = vmul.f32 %v10139_v27, %v10139_v27 }
0x1c0e   : > { %v10140_v40 = vmul.f32 %v10138_v55, %v10138_v55 }
0x1c0f   : > { %v10145_v6 = vsel %vm1902_vm1, %v10141_v29, 0.0 }
0x1c10   : > { %10146 = vadd.xlane.f32.xlu1 %v10145_v6  ;;  %v10142_v19 = vsel %vm1902_vm1, %v10140_v40, 0.0 }
0x1c11   : > { %10143 = vadd.xlane.f32.xlu0 %v10142_v19 }
0x1c9d   : > { %v10147_v61 = vpop.xlane.xlu1 %10146 }
0x1c9e   : > { %v10149_v47 = vmul.f32 0.03125, %v10147_v61  ;;  %v10144_v60 = vpop.xlane.xlu0 %10143 }
0x1c9f   : > { %v10148_v48 = vmul.f32 0.03125, %v10144_v60 }
0x1ca0   : > { %v10151_v44 = vadd.f32 1e-05, %v10149_v47 }
0x1ca1   : > { %v10150_v56 = vadd.f32 1e-05, %v10148_v48 }
0x1ca2   : > { %14455 = vrsqrt.f32 %v10151_v44  ;;  %vm10161_vm4 = vcmp.eq.f32.partialorder %v10151_v44, inf  ;;  %v10164_v22 = vand.u32 2147483648, %v10151_v44  ;;  %vm10163_vm5 = vcmp.eq.f32.partialorder %v10151_v44, 0.0 }
0x1ca3   : > { %14457 = vrsqrt.f32 %v10150_v56  ;;  %vm10154_vm10 = vcmp.eq.f32.partialorder %v10150_v56, inf  ;;  %v10157_v49 = vand.u32 2147483648, %v10150_v56  ;;  %vm10156_vm8 = vcmp.eq.f32.partialorder %v10150_v56, 0.0 }
0x1cac   : > { %v14456_v46 = vpop.eup %14455 }
0x1cad   : > { %v14458_v18 = vpop.eup %14457  ;;  %v10160_v26 = vmul.f32 %v14456_v46, %v10151_v44 }
0x1cae   : > { %v10153_v28 = vmul.f32 %v14458_v18, %v10150_v56 }
0x1caf   : > { %v10162_v16 = vsel %vm10161_vm4, %v10151_v44, %v10160_v26 }
0x1cb0   : > { %v10165_v11 = vsel %vm10163_vm5, %v10164_v22, %v10162_v16  ;;  %v10155_v59 = vsel %vm10154_vm10, %v10150_v56, %v10153_v28 }
0x1cb1   : > { %14459 = vrcp.f32 %v10165_v11  ;;  %v10158_v37 = vsel %vm10156_vm8, %v10157_v49, %v10155_v59 }
0x1cb2   : > { %14461 = vrcp.f32 %v10158_v37 }
0x1cbb   : > { %v14460_v17 = vpop.eup %14459 }
0x1cbc   : > { %v14462_v14 = vpop.eup %14461  ;;  %v10169_v58 = vmul.f32 %v14460_v17, %v10139_v27 }
0x1cbd   : > { %v10167_v31 = vmul.f32 %v14462_v14, %v10138_v55 }
0x1cbe   : > { %v10171_v53 = vmul.f32 %v14673_v36, %v10169_v58 }
0x1cbf   : > { %v10170_v54 = vmul.f32 %v14673_v36, %v10167_v31 }
0x1cc0   : > { %v10173_v52 = vadd.f32 %v14674_v62, %v10171_v53 }
0x1cc1   : > { %v10172_v35 = vadd.f32 %v14674_v62, %v10170_v54 }
0x1cc3   : > { %12693 = vmatprep.mubr.msk.f32.mxu0 %vm1902_vm1, %v10172_v35 }
0x1cc4   : > { %12694 = vmatmul.mubr.msk.f32.vlgmr.msra.gmra.mrb[178].mxu0 %vm1902_vm1, %v10173_v52 }
0x1d97   : > { %v12695_v13 = vpop.f32.mrb[178].mxu0 }
0x1d98   : > { %v10263_v4 = vadd.f32 %v12695_v13, %v11052_v33  ;;  %v10257_v38 = vpop.f32.mrb[179].mxu0 }
0x1d99   : > { %v10258_v20 = vadd.f32 %v11052_v33, %v10257_v38 }
0x1d9a   : > { %10267 = vst [vmem:[%s1145_s3 + $0x8] sm:$0xff] %v10263_v4 }
0x1d9b   : > { %10266 = vst [vmem:[%s1145_s3] sm:$0xff] %v10258_v20 }
0x1d9c   : > { %14968 = shalt.err (!%p14965_p1)
}
0x1d9d   : > { %s14969_s3 = scalar_lea.hbm %s19580_s4, 256  ;;  %s14973_s6 = scalar_lea.hbm %s19908_s9, 2048 }
0x1d9e   : > { %p14970_p2 = scmp.ne.s32.totalorder %s19580_s4, %s14969_s3  ;;  %p14974_p7 = scmp.lt.u32.totalorder %s19580_s4, %s19908_s9 }
0x1d9f   : > { %p14975_p8 = scmp.lt.u32.totalorder %s14973_s6, %s14969_s3  ;;  %p14977_p13 = scmp.lt.u32.totalorder %s14969_s3, %s19580_s4 }
0x1da0   : > { %p14971_p3 = pnand %p14970_p2, %p20415_p6 }
0x1da1   : > { %p14976_p11 = por %p14975_p8, %p14974_p7 }
0x1da2   : > { %p14972_p4 = pneg %p14971_p3 }
0x1da3   : > { %p14978_p0 = por %p14977_p13, %p14976_p11 }
0x1da5   : > { %p14979_p5 = pnand %p14978_p0, %p14972_p4 }
0x1da7   : > { %14982 = shalt.err (!%p14979_p5)
}
0x1da8   : > { %s15091_s10 = smov 128   ;;  %s15092_s11 = smov 8  }
0x1da9   : > { %13206 = dma.vmem_to_hbm [thread:$0]  (%p20415_p6), %s19577_s5, 256, %s19580_s4, %s19582_s8, %s15091_s10, %s15091_s10, %s15092_s11  }
0x1daa PF: > { %s20416_s28 = sld [smem:[#allocation50_spill]]  ;;  %s20417_s0 = sld [smem:[#allocation48_spill]] }
0x1dab   : > { %s20418_s7 = sld [smem:[#allocation54_spill]] }
0x1db0   : > { %p13263_p9 = scmp.ge.s32.totalorder %s20416_s28, 2  ;;  %s10297_s9 = sand.u32 1, %s20417_s0  }
0x1db1   : > { %p20419_p10 = scmp.ne.s32.totalorder %s20418_s7, 0  ;;  %s10298_s3 = scalar_lea.sflag [#allocation4], %s10297_s9 }
0x1db3   : > { %p13240_p12 = pnand %p13263_p9, %p20419_p10 }
0x1db5   : > { %15024 = dma.done.wait (!%p13240_p12), %s10298_s3, 256  }
0x1db6   : > { %15026 = vsyncadd (!%p13240_p12), %s10298_s3, 4294967040  ;;  %s20420_s7 = sld [smem:[#allocation51_spill]]  ;;  %s20421_s6 = sld [smem:[#allocation49_spill]] }
0x1db7   : > { %s20422_s2 = sld [smem:[#allocation52_spill]]  ;;  %s20423_s28 = smov %s15033_s1 }
0x1dbc   : > { %p81_p1 = scmp.ge.s32.totalorder %s20420_s7, 10   ;;  %s20424_s1 = smov %s20421_s6 }
0x1dbe   :  { %83 = sbr.rel (!%p81_p1) target bundleno = 69 (0x45), region = 287 }
0x1dc5   :  { %10303 = vsyncpa [#allocation3], 1 }
0x1dc6   :  { %10305 = vsyncpa [#allocation3 + $0x1], 1 }
0x1dc7   :  { %10306 = vsyncpa [#allocation6], 1 }
0x1dc8   :  { %10307 = vsyncpa [#allocation9], 1 }
0x1dc9   :  { %10308 = vsyncpa [#allocation12], 1 }
0x1dca   :  { %10309 = vsyncpa [#allocation15], 1 }
0x1dcb   :  { %10310 = vsyncpa [#allocation18], 1 }
0x1dcc   :  { %10311 = vsyncpa [#allocation4], 1 }
0x1dcd   :  { %10313 = vsyncpa [#allocation4 + $0x1], 1 }

</bundles_post_ra>
